<compile_context>
chip_gen: v5e
topology: v5e:2x2
jax: 0.10.0
libtpu: 0.0.40
codegen_flags: <defaults>
</compile_context>

<pallas_src>
import functools

import jax
import jax.numpy as jnp
from jax.experimental import pallas as pl
from jax.experimental.pallas import tpu as pltpu

_VMEM_LIMIT_BYTES = 48 * 1024 * 1024  # safe on v5e/v6e (128 MiB) and v7x (64 MiB)


def _round_up(x, m):
    return ((x + m - 1) // m) * m


def _w_spec(shape):
    # Full-array (non-tiled) BlockSpec for weights/biases; grid is (b, nt).
    return pl.BlockSpec(shape, lambda b, nt: (0,) * len(shape))


# ----------------------------------------------------------------------------
# Kernel 1: STN3d — convs + max-over-points + FC head, fully fused.
# ----------------------------------------------------------------------------
def _stn_kernel(x_ref, w1, b1, w2, b2, w3, b3,
                wf1, bf1, wf2, bf2, wf3, bf3,
                t_ref, gmax, *, n_valid, tn, masked):
    nt = pl.program_id(1)

    @pl.when(nt == 0)
    def _():
        gmax[...] = jnp.full_like(gmax, -jnp.inf)

    x = x_ref[0]                                                       # (tn, 3)
    h = jnp.dot(x, w1[...], preferred_element_type=jnp.float32) + b1[...]
    h = jnp.maximum(h, 0.0)
    h = jnp.dot(h, w2[...], preferred_element_type=jnp.float32) + b2[...]
    h = jnp.maximum(h, 0.0)
    h = jnp.dot(h, w3[...], preferred_element_type=jnp.float32) + b3[...]
    h = jnp.maximum(h, 0.0)                                            # (tn, 1024)
    if masked:  # ragged last tile: exclude padded points from the max
        row = nt * tn + jax.lax.broadcasted_iota(jnp.int32, (tn, 1), 0)
        h = jnp.where(row < n_valid, h, -jnp.inf)
    gmax[...] = jnp.maximum(gmax[...], jnp.max(h, axis=0, keepdims=True))

    @pl.when(nt == pl.num_programs(1) - 1)
    def _():
        g = gmax[...]                                                  # (1, 1024)
        f = jnp.maximum(jnp.dot(g, wf1[...], preferred_element_type=jnp.float32) + bf1[...], 0.0)
        f = jnp.maximum(jnp.dot(f, wf2[...], preferred_element_type=jnp.float32) + bf2[...], 0.0)
        t = jnp.dot(f, wf3[...], preferred_element_type=jnp.float32) + bf3[...]
        t_ref[0] = t.astype(t_ref.dtype)                               # (1, 9)


def stn_forward(xp, p, n_valid, tn):
    B, npad, _ = xp.shape
    ntiles = npad // tn
    masked = npad != n_valid
    names = ("stn_w1", "stn_b1", "stn_w2", "stn_b2", "stn_w3", "stn_b3",
             "stn_wf1", "stn_bf1", "stn_wf2", "stn_bf2", "stn_wf3", "stn_bf3")
    kern = functools.partial(_stn_kernel, n_valid=n_valid, tn=tn, masked=masked)
    return pl.pallas_call(
        kern,
        out_shape=jax.ShapeDtypeStruct((B, 1, 9), jnp.float32),
        grid_spec=pltpu.PrefetchScalarGridSpec(
            num_scalar_prefetch=0,
            grid=(B, ntiles),
            in_specs=[pl.BlockSpec((1, tn, 3), lambda b, nt: (b, nt, 0))]
                     + [_w_spec(p[n].shape) for n in names],
            out_specs=pl.BlockSpec((1, 1, 9), lambda b, nt: (b, 0, 0)),
            scratch_shapes=[pltpu.VMEM((1, 1024), jnp.float32)],
        ),
        compiler_params=pltpu.CompilerParams(
            dimension_semantics=("parallel", "arbitrary"),
            vmem_limit_bytes=_VMEM_LIMIT_BYTES),
    )(xp, *[p[n] for n in names])


# ----------------------------------------------------------------------------
# Kernel 2: PointNetfeat front — (transform folded) conv1/conv2/conv3 + max.
# ----------------------------------------------------------------------------
def _feat_kernel(x_ref, w1b_ref, b1, w2, b2, w3, b3,
                 pf_ref, g_ref, gmax, *, n_valid, tn, masked):
    nt = pl.program_id(1)

    @pl.when(nt == 0)
    def _():
        gmax[...] = jnp.full_like(gmax, -jnp.inf)

    x = x_ref[0]                                                       # (tn, 3)
    pf = jnp.dot(x, w1b_ref[0], preferred_element_type=jnp.float32) + b1[...]
    pf = jnp.maximum(pf, 0.0)                                          # (tn, 64)
    pf_ref[0] = pf.astype(pf_ref.dtype)
    h = jnp.maximum(jnp.dot(pf, w2[...], preferred_element_type=jnp.float32) + b2[...], 0.0)
    h = jnp.dot(h, w3[...], preferred_element_type=jnp.float32) + b3[...]  # bn3, no ReLU
    if masked:
        row = nt * tn + jax.lax.broadcasted_iota(jnp.int32, (tn, 1), 0)
        h = jnp.where(row < n_valid, h, -jnp.inf)
    gmax[...] = jnp.maximum(gmax[...], jnp.max(h, axis=0, keepdims=True))

    @pl.when(nt == pl.num_programs(1) - 1)
    def _():
        g_ref[0] = gmax[...]


def feat_forward(xp, w1b, p, n_valid, tn):
    B, npad, _ = xp.shape
    ntiles = npad // tn
    masked = npad != n_valid
    kern = functools.partial(_feat_kernel, n_valid=n_valid, tn=tn, masked=masked)
    return pl.pallas_call(
        kern,
        out_shape=(jax.ShapeDtypeStruct((B, npad, 64), jnp.float32),
                   jax.ShapeDtypeStruct((B, 1, 1024), jnp.float32)),
        grid_spec=pltpu.PrefetchScalarGridSpec(
            num_scalar_prefetch=0,
            grid=(B, ntiles),
            in_specs=[
                pl.BlockSpec((1, tn, 3), lambda b, nt: (b, nt, 0)),
                pl.BlockSpec((1, 3, 64), lambda b, nt: (b, 0, 0)),
                _w_spec(p["feat_b1"].shape),
                _w_spec(p["feat_w2"].shape), _w_spec(p["feat_b2"].shape),
                _w_spec(p["feat_w3"].shape), _w_spec(p["feat_b3"].shape),
            ],
            out_specs=[
                pl.BlockSpec((1, tn, 64), lambda b, nt: (b, nt, 0)),
                pl.BlockSpec((1, 1, 1024), lambda b, nt: (b, 0, 0)),
            ],
            scratch_shapes=[pltpu.VMEM((1, 1024), jnp.float32)],
        ),
        compiler_params=pltpu.CompilerParams(
            dimension_semantics=("parallel", "arbitrary"),
            vmem_limit_bytes=_VMEM_LIMIT_BYTES),
    )(xp, w1b, p["feat_b1"], p["feat_w2"], p["feat_b2"], p["feat_w3"], p["feat_b3"])


# ----------------------------------------------------------------------------
# Kernel 3: dense head — split-weight conv1, conv2, conv3, conv4, log_softmax.
# ----------------------------------------------------------------------------
def _head_kernel(pf_ref, g_ref, w1p, w1g, b1, w2, b2, w3, b3, w4, b4, o_ref):
    pf = pf_ref[0]                                                     # (tn, 64)
    g = g_ref[0]                                                       # (1, 1024)
    gproj = jnp.dot(g, w1g[...], preferred_element_type=jnp.float32)   # (1, 512)
    y = jnp.dot(pf, w1p[...], preferred_element_type=jnp.float32) + gproj + b1[...]
    y = jnp.maximum(y, 0.0)
    y = jnp.maximum(jnp.dot(y, w2[...], preferred_element_type=jnp.float32) + b2[...], 0.0)
    y = jnp.maximum(jnp.dot(y, w3[...], preferred_element_type=jnp.float32) + b3[...], 0.0)
    logits = jnp.dot(y, w4[...], preferred_element_type=jnp.float32) + b4[...]  # (tn, k)
    m = jnp.max(logits, axis=-1, keepdims=True)
    z = logits - m
    o_ref[0] = (z - jnp.log(jnp.sum(jnp.exp(z), axis=-1, keepdims=True))).astype(o_ref.dtype)


def head_forward(pf, g, p, tn):
    B, npad, _ = pf.shape
    ntiles = npad // tn
    k = p["head_w4"].shape[1]
    names = ("head_w1p", "head_w1g", "head_b1", "head_w2", "head_b2",
             "head_w3", "head_b3", "head_w4", "head_b4")
    return pl.pallas_call(
        _head_kernel,
        out_shape=jax.ShapeDtypeStruct((B, npad, k), jnp.float32),
        grid_spec=pltpu.PrefetchScalarGridSpec(
            num_scalar_prefetch=0,
            grid=(B, ntiles),
            in_specs=[
                pl.BlockSpec((1, tn, 64), lambda b, nt: (b, nt, 0)),
                pl.BlockSpec((1, 1, 1024), lambda b, nt: (b, 0, 0)),
            ] + [_w_spec(p[n].shape) for n in names],
            out_specs=pl.BlockSpec((1, tn, k), lambda b, nt: (b, nt, 0)),
        ),
        compiler_params=pltpu.CompilerParams(
            dimension_semantics=("parallel", "parallel"),
            vmem_limit_bytes=_VMEM_LIMIT_BYTES),
    )(pf, g, *[p[n] for n in names])


# ----------------------------------------------------------------------------
# Parameter construction (deterministic, synthetic) + BN folding (glue).
# ----------------------------------------------------------------------------
def init_params(key, k=2, eps=1e-5):
    keys = iter(jax.random.split(key, 128))

    def fold_bn(cin, cout):
        # Conv1d(kernel=1)/Linear (cout,cin)+bias followed by BatchNorm1d(cout),
        # folded in inference mode. Stored transposed: (cin, cout).
        w = 0.1 * jax.random.normal(next(keys), (cout, cin), jnp.float32)
        b = 0.1 * jax.random.normal(next(keys), (cout,), jnp.float32)
        gamma = 1.0 + 0.1 * jax.random.normal(next(keys), (cout,), jnp.float32)
        beta = 0.1 * jax.random.normal(next(keys), (cout,), jnp.float32)
        mean = 0.1 * jax.random.normal(next(keys), (cout,), jnp.float32)
        var = jax.random.uniform(next(keys), (cout,), jnp.float32, 0.5, 1.5)
        scale = gamma / jnp.sqrt(var + eps)
        return (w * scale[:, None]).T, ((b - mean) * scale + beta)[None, :]

    def plain(cin, cout):
        w = 0.1 * jax.random.normal(next(keys), (cout, cin), jnp.float32)
        b = 0.1 * jax.random.normal(next(keys), (cout,), jnp.float32)
        return w.T, b[None, :]

    p = {}
    # STN3d
    p["stn_w1"], p["stn_b1"] = fold_bn(3, 64)
    p["stn_w2"], p["stn_b2"] = fold_bn(64, 128)
    p["stn_w3"], p["stn_b3"] = fold_bn(128, 1024)
    p["stn_wf1"], p["stn_bf1"] = fold_bn(1024, 512)
    p["stn_wf2"], p["stn_bf2"] = fold_bn(512, 256)
    wf3, bf3 = plain(256, 9)
    p["stn_wf3"] = wf3
    p["stn_bf3"] = bf3 + jnp.eye(3, dtype=jnp.float32).reshape(1, 9)  # "+ iden" folded
    # PointNetfeat
    p["feat_w1"], p["feat_b1"] = fold_bn(3, 64)
    p["feat_w2"], p["feat_b2"] = fold_bn(64, 128)
    p["feat_w3"], p["feat_b3"] = fold_bn(128, 1024)
    # Dense head; conv1 (1088->512) split: rows 0..1023 = global, 1024.. = pointfeat
    w1, b1 = fold_bn(1088, 512)
    p["head_w1g"], p["head_w1p"], p["head_b1"] = w1[:1024], w1[1024:], b1
    p["head_w2"], p["head_b2"] = fold_bn(512, 256)
    p["head_w3"], p["head_b3"] = fold_bn(256, 128)
    p["head_w4"], p["head_b4"] = plain(128, k)
    return p


# ----------------------------------------------------------------------------
# Forward pass (PointNetDenseCls, feature_transform=False).
# ----------------------------------------------------------------------------
def pointnet_dense_cls(x, p):
    # TODO(synk): BatchNorm is folded in inference mode; PyTorch train()-mode
    # batch statistics are not reproduced.
    B, _, N = x.shape
    tn = min(512, _round_up(N, 8))            # points-per-tile (512 for large N)
    npad = _round_up(N, tn)
    xp = jnp.transpose(x, (0, 2, 1))          # (B, N, 3) channels-last
    if npad != N:
        xp = jnp.pad(xp, ((0, 0), (0, npad - N), (0, 0)))

    # --- STN3d: (B,3,3) input transform (identity already folded into bias) ---
    t9 = stn_forward(xp, p, N, tn)            # (B, 1, 9)
    trans = t9.reshape(B, 3, 3)

    # --- fold the per-batch 3x3 transform into feat conv1's weight (tiny) ---
    w1b = jnp.einsum("bij,jk->bik", trans, p["feat_w1"])   # (B, 3, 64)

    # --- PointNetfeat front: pointfeat + global max feature ---
    pointfeat, gfeat = feat_forward(xp, w1b, p, N, tn)     # (B,npad,64), (B,1,1024)

    # --- dense head (concat never materialized) + fused log_softmax ---
    logp = head_forward(pointfeat, gfeat, p, tn)           # (B, npad, k)
    if npad != N:
        logp = logp[:, :N, :]
    return logp, trans, None                                # trans_feat is None


# ----------------------------------------------------------------------------
if __name__ == "__main__":
    key = jax.random.PRNGKey(0)
    kp, kx = jax.random.split(key)

    B, N, K = 2, 20, 2                       # N=20 exercises pad/mask path (npad=24)
    params = init_params(kp, k=K)
    x = jax.random.normal(kx, (B, 3, N), jnp.float32)   # NCW like PyTorch Conv1d

    fwd = jax.jit(pointnet_dense_cls)
    out, trans, trans_feat = fwd(x, params)
    jax.block_until_ready((out, trans))

    assert out.shape == (B, N, K), out.shape
    assert trans.shape == (B, 3, 3), trans.shape
    assert trans_feat is None
    # log_softmax rows must exp-sum to ~1
    assert bool(jnp.allclose(jnp.sum(jnp.exp(out), axis=-1), 1.0, atol=1e-4))
    print("KERNEL_OK")
</pallas_src>

<mosaic_0001>
module attributes {stable_mosaic.version = 11 : i64} {
  func.func @_stn_kernel(%arg0: i32, %arg1: i32, %arg2: memref<1x24x3xf32, #tpu.memory_space<vmem>>, %arg3: memref<3x64xf32, #tpu.memory_space<vmem>>, %arg4: memref<1x64xf32, #tpu.memory_space<vmem>>, %arg5: memref<64x128xf32, #tpu.memory_space<vmem>>, %arg6: memref<1x128xf32, #tpu.memory_space<vmem>>, %arg7: memref<128x1024xf32, #tpu.memory_space<vmem>>, %arg8: memref<1x1024xf32, #tpu.memory_space<vmem>>, %arg9: memref<1024x512xf32, #tpu.memory_space<vmem>>, %arg10: memref<1x512xf32, #tpu.memory_space<vmem>>, %arg11: memref<512x256xf32, #tpu.memory_space<vmem>>, %arg12: memref<1x256xf32, #tpu.memory_space<vmem>>, %arg13: memref<256x9xf32, #tpu.memory_space<vmem>>, %arg14: memref<1x9xf32, #tpu.memory_space<vmem>>, %arg15: memref<1x1x9xf32, #tpu.memory_space<vmem>>, %arg16: memref<1x1024xf32, #tpu.memory_space<vmem>>) attributes {dimension_semantics = [#tpu.dimension_semantics<parallel>, #tpu.dimension_semantics<arbitrary>], iteration_bounds = array<i64: 2, 1>, scalar_prefetch = 0 : i64, scratch_operands = 1 : i64, tpu.core_type = #tpu.core_type<tc>, window_params = [{transform_indices = @transform_0, window_bounds = array<i64: 1, 24, 3>}, {pipeline_mode = #tpu.pipeline_mode<synchronous>, transform_indices = @transform_1, window_bounds = array<i64: 3, 64>}, {pipeline_mode = #tpu.pipeline_mode<synchronous>, transform_indices = @transform_2, window_bounds = array<i64: 1, 64>}, {pipeline_mode = #tpu.pipeline_mode<synchronous>, transform_indices = @transform_3, window_bounds = array<i64: 64, 128>}, {pipeline_mode = #tpu.pipeline_mode<synchronous>, transform_indices = @transform_4, window_bounds = array<i64: 1, 128>}, {pipeline_mode = #tpu.pipeline_mode<synchronous>, transform_indices = @transform_5, window_bounds = array<i64: 128, 1024>}, {pipeline_mode = #tpu.pipeline_mode<synchronous>, transform_indices = @transform_6, window_bounds = array<i64: 1, 1024>}, {pipeline_mode = #tpu.pipeline_mode<synchronous>, transform_indices = @transform_7, window_bounds = array<i64: 1024, 512>}, {pipeline_mode = #tpu.pipeline_mode<synchronous>, transform_indices = @transform_8, window_bounds = array<i64: 1, 512>}, {pipeline_mode = #tpu.pipeline_mode<synchronous>, transform_indices = @transform_9, window_bounds = array<i64: 512, 256>}, {pipeline_mode = #tpu.pipeline_mode<synchronous>, transform_indices = @transform_10, window_bounds = array<i64: 1, 256>}, {pipeline_mode = #tpu.pipeline_mode<synchronous>, transform_indices = @transform_11, window_bounds = array<i64: 256, 9>}, {pipeline_mode = #tpu.pipeline_mode<synchronous>, transform_indices = @transform_12, window_bounds = array<i64: 1, 9>}, {transform_indices = @transform_13, window_bounds = array<i64: 1, 1, 9>}]} {
    %c0_i32 = arith.constant 0 : i32
    %0 = arith.cmpi eq, %arg1, %c0_i32 : i32
    %1 = arith.extui %0 : i1 to i32
    %c0_i32_0 = arith.constant 0 : i32
    %2 = arith.cmpi ne, %1, %c0_i32_0 : i32
    scf.if %2 {
      %cst_28 = arith.constant 0xFF800000 : f32
      %44 = vector.broadcast %cst_28 : f32 to vector<1x1024xf32>
      %c0_29 = arith.constant 0 : index
      %c0_30 = arith.constant 0 : index
      %45 = vector.load %arg16[%c0_29, %c0_30] : memref<1x1024xf32, #tpu.memory_space<vmem>>, vector<1x1024xf32>
      tpu.vector_store %arg16[%c0_29, %c0_30], %44 {strides = array<i32>} : memref<1x1024xf32, #tpu.memory_space<vmem>>, vector<1x1024xf32>,
    } else {
    }
    %c0 = arith.constant 0 : index
    %c0_1 = arith.constant 0 : index
    %c0_2 = arith.constant 0 : index
    %3 = vector.load %arg2[%c0, %c0_1, %c0_2] : memref<1x24x3xf32, #tpu.memory_space<vmem>>, vector<1x24x3xf32>
    %4 = vector.shape_cast %3 : vector<1x24x3xf32> to vector<24x3xf32>
    %c0_3 = arith.constant 0 : index
    %c0_4 = arith.constant 0 : index
    %5 = vector.load %arg3[%c0_3, %c0_4] : memref<3x64xf32, #tpu.memory_space<vmem>>, vector<3x64xf32>
    %cst = arith.constant dense<0.000000e+00> : vector<24x64xf32>
    %6 = tpu.matmul %4, %5, %cst {dimension_numbers = #tpu.dot_dimension_numbers<[1], [0], [0], [1], [0, 0, 1, 1], [], []>} : vector<24x3xf32>, vector<3x64xf32>, vector<24x64xf32> -> vector<24x64xf32>
    %c0_5 = arith.constant 0 : index
    %c0_6 = arith.constant 0 : index
    %7 = vector.load %arg4[%c0_5, %c0_6] : memref<1x64xf32, #tpu.memory_space<vmem>>, vector<1x64xf32>
    %8 = vector.broadcast %7 : vector<1x64xf32> to vector<24x64xf32>
    %9 = arith.addf %6, %8 : vector<24x64xf32>
    %cst_7 = arith.constant 0.000000e+00 : f32
    %10 = vector.broadcast %cst_7 : f32 to vector<24x64xf32>
    %11 = arith.maximumf %9, %10 : vector<24x64xf32>
    %c0_8 = arith.constant 0 : index
    %c0_9 = arith.constant 0 : index
    %12 = vector.load %arg5[%c0_8, %c0_9] : memref<64x128xf32, #tpu.memory_space<vmem>>, vector<64x128xf32>
    %cst_10 = arith.constant dense<0.000000e+00> : vector<24x128xf32>
    %13 = tpu.matmul %11, %12, %cst_10 {dimension_numbers = #tpu.dot_dimension_numbers<[1], [0], [0], [1], [0, 0, 1, 1], [], []>} : vector<24x64xf32>, vector<64x128xf32>, vector<24x128xf32> -> vector<24x128xf32>
    %c0_11 = arith.constant 0 : index
    %c0_12 = arith.constant 0 : index
    %14 = vector.load %arg6[%c0_11, %c0_12] : memref<1x128xf32, #tpu.memory_space<vmem>>, vector<1x128xf32>
    %15 = vector.broadcast %14 : vector<1x128xf32> to vector<24x128xf32>
    %16 = arith.addf %13, %15 : vector<24x128xf32>
    %cst_13 = arith.constant 0.000000e+00 : f32
    %17 = vector.broadcast %cst_13 : f32 to vector<24x128xf32>
    %18 = arith.maximumf %16, %17 : vector<24x128xf32>
    %c0_14 = arith.constant 0 : index
    %c0_15 = arith.constant 0 : index
    %19 = vector.load %arg7[%c0_14, %c0_15] : memref<128x1024xf32, #tpu.memory_space<vmem>>, vector<128x1024xf32>
    %cst_16 = arith.constant dense<0.000000e+00> : vector<24x1024xf32>
    %20 = tpu.matmul %18, %19, %cst_16 {dimension_numbers = #tpu.dot_dimension_numbers<[1], [0], [0], [1], [0, 0, 1, 1], [], []>} : vector<24x128xf32>, vector<128x1024xf32>, vector<24x1024xf32> -> vector<24x1024xf32>
    %c0_17 = arith.constant 0 : index
    %c0_18 = arith.constant 0 : index
    %21 = vector.load %arg8[%c0_17, %c0_18] : memref<1x1024xf32, #tpu.memory_space<vmem>>, vector<1x1024xf32>
    %22 = vector.broadcast %21 : vector<1x1024xf32> to vector<24x1024xf32>
    %23 = arith.addf %20, %22 : vector<24x1024xf32>
    %cst_19 = arith.constant 0.000000e+00 : f32
    %24 = vector.broadcast %cst_19 : f32 to vector<24x1024xf32>
    %25 = arith.maximumf %23, %24 : vector<24x1024xf32>
    %c24_i32 = arith.constant 24 : i32
    %26 = arith.muli %arg1, %c24_i32 : i32
    %27 = tpu.iota {dimensions = array<i32: 0>} : vector<24x1xi32>
    %28 = vector.broadcast %26 : i32 to vector<24x1xi32>
    %29 = arith.addi %28, %27 : vector<24x1xi32>
    %c20_i32 = arith.constant 20 : i32
    %30 = vector.broadcast %c20_i32 : i32 to vector<24x1xi32>
    %31 = arith.cmpi slt, %29, %30 : vector<24x1xi32>
    %cst_20 = arith.constant 0xFF800000 : f32
    %32 = vector.shape_cast %31 : vector<24x1xi1> to vector<24x1xi1>
    %33 = vector.broadcast %32 : vector<24x1xi1> to vector<24x1024xi1>
    %34 = vector.broadcast %cst_20 : f32 to vector<24x1024xf32>
    %35 = arith.select %33, %25, %34 : vector<24x1024xi1>, vector<24x1024xf32>
    %c0_21 = arith.constant 0 : index
    %c0_22 = arith.constant 0 : index
    %36 = vector.load %arg16[%c0_21, %c0_22] : memref<1x1024xf32, #tpu.memory_space<vmem>>, vector<1x1024xf32>
    %cst_23 = arith.constant dense<0xFF800000> : vector<1024xf32>
    %37 = vector.multi_reduction <maximumf>, %35, %cst_23 [0] : vector<24x1024xf32> to vector<1024xf32>
    %38 = vector.shape_cast %37 : vector<1024xf32> to vector<1x1024xf32>
    %39 = arith.maximumf %36, %38 : vector<1x1024xf32>
    %c0_24 = arith.constant 0 : index
    %c0_25 = arith.constant 0 : index
    %40 = vector.load %arg16[%c0_24, %c0_25] : memref<1x1024xf32, #tpu.memory_space<vmem>>, vector<1x1024xf32>
    tpu.vector_store %arg16[%c0_24, %c0_25], %39 {strides = array<i32>} : memref<1x1024xf32, #tpu.memory_space<vmem>>, vector<1x1024xf32>,
    %c0_i32_26 = arith.constant 0 : i32
    %41 = arith.cmpi eq, %arg1, %c0_i32_26 : i32
    %42 = arith.extui %41 : i1 to i32
    %c0_i32_27 = arith.constant 0 : i32
    %43 = arith.cmpi ne, %42, %c0_i32_27 : i32
    scf.if %43 {
      %c0_28 = arith.constant 0 : index
      %c0_29 = arith.constant 0 : index
      %44 = vector.load %arg16[%c0_28, %c0_29] : memref<1x1024xf32, #tpu.memory_space<vmem>>, vector<1x1024xf32>
      %c0_30 = arith.constant 0 : index
      %c0_31 = arith.constant 0 : index
      %45 = vector.load %arg9[%c0_30, %c0_31] : memref<1024x512xf32, #tpu.memory_space<vmem>>, vector<1024x512xf32>
      %cst_32 = arith.constant dense<0.000000e+00> : vector<1x512xf32>
      %46 = tpu.matmul %44, %45, %cst_32 {dimension_numbers = #tpu.dot_dimension_numbers<[1], [0], [0], [1], [0, 0, 1, 1], [], []>} : vector<1x1024xf32>, vector<1024x512xf32>, vector<1x512xf32> -> vector<1x512xf32>
      %c0_33 = arith.constant 0 : index
      %c0_34 = arith.constant 0 : index
      %47 = vector.load %arg10[%c0_33, %c0_34] : memref<1x512xf32, #tpu.memory_space<vmem>>, vector<1x512xf32>
      %48 = arith.addf %46, %47 : vector<1x512xf32>
      %cst_35 = arith.constant 0.000000e+00 : f32
      %49 = vector.broadcast %cst_35 : f32 to vector<1x512xf32>
      %50 = arith.maximumf %48, %49 : vector<1x512xf32>
      %c0_36 = arith.constant 0 : index
      %c0_37 = arith.constant 0 : index
      %51 = vector.load %arg11[%c0_36, %c0_37] : memref<512x256xf32, #tpu.memory_space<vmem>>, vector<512x256xf32>
      %cst_38 = arith.constant dense<0.000000e+00> : vector<1x256xf32>
      %52 = tpu.matmul %50, %51, %cst_38 {dimension_numbers = #tpu.dot_dimension_numbers<[1], [0], [0], [1], [0, 0, 1, 1], [], []>} : vector<1x512xf32>, vector<512x256xf32>, vector<1x256xf32> -> vector<1x256xf32>
      %c0_39 = arith.constant 0 : index
      %c0_40 = arith.constant 0 : index
      %53 = vector.load %arg12[%c0_39, %c0_40] : memref<1x256xf32, #tpu.memory_space<vmem>>, vector<1x256xf32>
      %54 = arith.addf %52, %53 : vector<1x256xf32>
      %cst_41 = arith.constant 0.000000e+00 : f32
      %55 = vector.broadcast %cst_41 : f32 to vector<1x256xf32>
      %56 = arith.maximumf %54, %55 : vector<1x256xf32>
      %c0_42 = arith.constant 0 : index
      %c0_43 = arith.constant 0 : index
      %57 = vector.load %arg13[%c0_42, %c0_43] : memref<256x9xf32, #tpu.memory_space<vmem>>, vector<256x9xf32>
      %cst_44 = arith.constant dense<0.000000e+00> : vector<1x9xf32>
      %58 = tpu.matmul %56, %57, %cst_44 {dimension_numbers = #tpu.dot_dimension_numbers<[1], [0], [0], [1], [0, 0, 1, 1], [], []>} : vector<1x256xf32>, vector<256x9xf32>, vector<1x9xf32> -> vector<1x9xf32>
      %c0_45 = arith.constant 0 : index
      %c0_46 = arith.constant 0 : index
      %59 = vector.load %arg14[%c0_45, %c0_46] : memref<1x9xf32, #tpu.memory_space<vmem>>, vector<1x9xf32>
      %60 = arith.addf %58, %59 : vector<1x9xf32>
      %c0_47 = arith.constant 0 : index
      %c0_48 = arith.constant 0 : index
      %c0_49 = arith.constant 0 : index
      %61 = vector.load %arg15[%c0_47, %c0_48, %c0_49] : memref<1x1x9xf32, #tpu.memory_space<vmem>>, vector<1x1x9xf32>
      %62 = vector.shape_cast %61 : vector<1x1x9xf32> to vector<1x9xf32>
      %63 = vector.shape_cast %60 : vector<1x9xf32> to vector<1x1x9xf32>
      tpu.vector_store %arg15[%c0_47, %c0_48, %c0_49], %63 {strides = array<i32>} : memref<1x1x9xf32, #tpu.memory_space<vmem>>, vector<1x1x9xf32>,
    } else {
    }
    return
  }
  func.func @transform_0(%arg0: i32, %arg1: i32) -> (i32, i32, i32) {
    %c0_i32 = arith.constant 0 : i32
    %c0_i32_0 = arith.constant 0 : i32
    return %arg0, %arg1, %c0_i32 : i32, i32, i32
  }
  func.func @transform_1(%arg0: i32, %arg1: i32) -> (i32, i32) {
    %c0_i32 = arith.constant 0 : i32
    %c0_i32_0 = arith.constant 0 : i32
    %c0_i32_1 = arith.constant 0 : i32
    return %c0_i32, %c0_i32_0 : i32, i32
  }
  func.func @transform_2(%arg0: i32, %arg1: i32) -> (i32, i32) {
    %c0_i32 = arith.constant 0 : i32
    %c0_i32_0 = arith.constant 0 : i32
    %c0_i32_1 = arith.constant 0 : i32
    return %c0_i32, %c0_i32_0 : i32, i32
  }
  func.func @transform_3(%arg0: i32, %arg1: i32) -> (i32, i32) {
    %c0_i32 = arith.constant 0 : i32
    %c0_i32_0 = arith.constant 0 : i32
    %c0_i32_1 = arith.constant 0 : i32
    return %c0_i32, %c0_i32_0 : i32, i32
  }
  func.func @transform_4(%arg0: i32, %arg1: i32) -> (i32, i32) {
    %c0_i32 = arith.constant 0 : i32
    %c0_i32_0 = arith.constant 0 : i32
    %c0_i32_1 = arith.constant 0 : i32
    return %c0_i32, %c0_i32_0 : i32, i32
  }
  func.func @transform_5(%arg0: i32, %arg1: i32) -> (i32, i32) {
    %c0_i32 = arith.constant 0 : i32
    %c0_i32_0 = arith.constant 0 : i32
    %c0_i32_1 = arith.constant 0 : i32
    return %c0_i32, %c0_i32_0 : i32, i32
  }
  func.func @transform_6(%arg0: i32, %arg1: i32) -> (i32, i32) {
    %c0_i32 = arith.constant 0 : i32
    %c0_i32_0 = arith.constant 0 : i32
    %c0_i32_1 = arith.constant 0 : i32
    return %c0_i32, %c0_i32_0 : i32, i32
  }
  func.func @transform_7(%arg0: i32, %arg1: i32) -> (i32, i32) {
    %c0_i32 = arith.constant 0 : i32
    %c0_i32_0 = arith.constant 0 : i32
    %c0_i32_1 = arith.constant 0 : i32
    return %c0_i32, %c0_i32_0 : i32, i32
  }
  func.func @transform_8(%arg0: i32, %arg1: i32) -> (i32, i32) {
    %c0_i32 = arith.constant 0 : i32
    %c0_i32_0 = arith.constant 0 : i32
    %c0_i32_1 = arith.constant 0 : i32
    return %c0_i32, %c0_i32_0 : i32, i32
  }
  func.func @transform_9(%arg0: i32, %arg1: i32) -> (i32, i32) {
    %c0_i32 = arith.constant 0 : i32
    %c0_i32_0 = arith.constant 0 : i32
    %c0_i32_1 = arith.constant 0 : i32
    return %c0_i32, %c0_i32_0 : i32, i32
  }
  func.func @transform_10(%arg0: i32, %arg1: i32) -> (i32, i32) {
    %c0_i32 = arith.constant 0 : i32
    %c0_i32_0 = arith.constant 0 : i32
    %c0_i32_1 = arith.constant 0 : i32
    return %c0_i32, %c0_i32_0 : i32, i32
  }
  func.func @transform_11(%arg0: i32, %arg1: i32) -> (i32, i32) {
    %c0_i32 = arith.constant 0 : i32
    %c0_i32_0 = arith.constant 0 : i32
    %c0_i32_1 = arith.constant 0 : i32
    return %c0_i32, %c0_i32_0 : i32, i32
  }
  func.func @transform_12(%arg0: i32, %arg1: i32) -> (i32, i32) {
    %c0_i32 = arith.constant 0 : i32
    %c0_i32_0 = arith.constant 0 : i32
    %c0_i32_1 = arith.constant 0 : i32
    return %c0_i32, %c0_i32_0 : i32, i32
  }
  func.func @transform_13(%arg0: i32, %arg1: i32) -> (i32, i32, i32) {
    %c0_i32 = arith.constant 0 : i32
    %c0_i32_0 = arith.constant 0 : i32
    %c0_i32_1 = arith.constant 0 : i32
    return %arg0, %c0_i32, %c0_i32_0 : i32, i32, i32
  }
}

module attributes {stable_mosaic.version = 11 : i64} {
  func.func @_feat_kernel(%arg0: i32, %arg1: i32, %arg2: memref<1x24x3xf32, #tpu.memory_space<vmem>>, %arg3: memref<1x3x64xf32, #tpu.memory_space<vmem>>, %arg4: memref<1x64xf32, #tpu.memory_space<vmem>>, %arg5: memref<64x128xf32, #tpu.memory_space<vmem>>, %arg6: memref<1x128xf32, #tpu.memory_space<vmem>>, %arg7: memref<128x1024xf32, #tpu.memory_space<vmem>>, %arg8: memref<1x1024xf32, #tpu.memory_space<vmem>>, %arg9: memref<1x24x64xf32, #tpu.memory_space<vmem>>, %arg10: memref<1x1x1024xf32, #tpu.memory_space<vmem>>, %arg11: memref<1x1024xf32, #tpu.memory_space<vmem>>) attributes {dimension_semantics = [#tpu.dimension_semantics<parallel>, #tpu.dimension_semantics<arbitrary>], iteration_bounds = array<i64: 2, 1>, scalar_prefetch = 0 : i64, scratch_operands = 1 : i64, tpu.core_type = #tpu.core_type<tc>, window_params = [{transform_indices = @transform_0, window_bounds = array<i64: 1, 24, 3>}, {transform_indices = @transform_1, window_bounds = array<i64: 1, 3, 64>}, {pipeline_mode = #tpu.pipeline_mode<synchronous>, transform_indices = @transform_2, window_bounds = array<i64: 1, 64>}, {pipeline_mode = #tpu.pipeline_mode<synchronous>, transform_indices = @transform_3, window_bounds = array<i64: 64, 128>}, {pipeline_mode = #tpu.pipeline_mode<synchronous>, transform_indices = @transform_4, window_bounds = array<i64: 1, 128>}, {pipeline_mode = #tpu.pipeline_mode<synchronous>, transform_indices = @transform_5, window_bounds = array<i64: 128, 1024>}, {pipeline_mode = #tpu.pipeline_mode<synchronous>, transform_indices = @transform_6, window_bounds = array<i64: 1, 1024>}, {transform_indices = @transform_7, window_bounds = array<i64: 1, 24, 64>}, {transform_indices = @transform_8, window_bounds = array<i64: 1, 1, 1024>}]} {
    %c0_i32 = arith.constant 0 : i32
    %0 = arith.cmpi eq, %arg1, %c0_i32 : i32
    %1 = arith.extui %0 : i1 to i32
    %c0_i32_0 = arith.constant 0 : i32
    %2 = arith.cmpi ne, %1, %c0_i32_0 : i32
    scf.if %2 {
      %cst_31 = arith.constant 0xFF800000 : f32
      %46 = vector.broadcast %cst_31 : f32 to vector<1x1024xf32>
      %c0_32 = arith.constant 0 : index
      %c0_33 = arith.constant 0 : index
      %47 = vector.load %arg11[%c0_32, %c0_33] : memref<1x1024xf32, #tpu.memory_space<vmem>>, vector<1x1024xf32>
      tpu.vector_store %arg11[%c0_32, %c0_33], %46 {strides = array<i32>} : memref<1x1024xf32, #tpu.memory_space<vmem>>, vector<1x1024xf32>,
    } else {
    }
    %c0 = arith.constant 0 : index
    %c0_1 = arith.constant 0 : index
    %c0_2 = arith.constant 0 : index
    %3 = vector.load %arg2[%c0, %c0_1, %c0_2] : memref<1x24x3xf32, #tpu.memory_space<vmem>>, vector<1x24x3xf32>
    %4 = vector.shape_cast %3 : vector<1x24x3xf32> to vector<24x3xf32>
    %c0_3 = arith.constant 0 : index
    %c0_4 = arith.constant 0 : index
    %c0_5 = arith.constant 0 : index
    %5 = vector.load %arg3[%c0_3, %c0_4, %c0_5] : memref<1x3x64xf32, #tpu.memory_space<vmem>>, vector<1x3x64xf32>
    %6 = vector.shape_cast %5 : vector<1x3x64xf32> to vector<3x64xf32>
    %cst = arith.constant dense<0.000000e+00> : vector<24x64xf32>
    %7 = tpu.matmul %4, %6, %cst {dimension_numbers = #tpu.dot_dimension_numbers<[1], [0], [0], [1], [0, 0, 1, 1], [], []>} : vector<24x3xf32>, vector<3x64xf32>, vector<24x64xf32> -> vector<24x64xf32>
    %c0_6 = arith.constant 0 : index
    %c0_7 = arith.constant 0 : index
    %8 = vector.load %arg4[%c0_6, %c0_7] : memref<1x64xf32, #tpu.memory_space<vmem>>, vector<1x64xf32>
    %9 = vector.broadcast %8 : vector<1x64xf32> to vector<24x64xf32>
    %10 = arith.addf %7, %9 : vector<24x64xf32>
    %cst_8 = arith.constant 0.000000e+00 : f32
    %11 = vector.broadcast %cst_8 : f32 to vector<24x64xf32>
    %12 = arith.maximumf %10, %11 : vector<24x64xf32>
    %c0_9 = arith.constant 0 : index
    %c0_10 = arith.constant 0 : index
    %c0_11 = arith.constant 0 : index
    %13 = vector.load %arg9[%c0_9, %c0_10, %c0_11] : memref<1x24x64xf32, #tpu.memory_space<vmem>>, vector<1x24x64xf32>
    %14 = vector.shape_cast %13 : vector<1x24x64xf32> to vector<24x64xf32>
    %15 = vector.shape_cast %12 : vector<24x64xf32> to vector<1x24x64xf32>
    tpu.vector_store %arg9[%c0_9, %c0_10, %c0_11], %15 {strides = array<i32>} : memref<1x24x64xf32, #tpu.memory_space<vmem>>, vector<1x24x64xf32>,
    %c0_12 = arith.constant 0 : index
    %c0_13 = arith.constant 0 : index
    %16 = vector.load %arg5[%c0_12, %c0_13] : memref<64x128xf32, #tpu.memory_space<vmem>>, vector<64x128xf32>
    %cst_14 = arith.constant dense<0.000000e+00> : vector<24x128xf32>
    %17 = tpu.matmul %12, %16, %cst_14 {dimension_numbers = #tpu.dot_dimension_numbers<[1], [0], [0], [1], [0, 0, 1, 1], [], []>} : vector<24x64xf32>, vector<64x128xf32>, vector<24x128xf32> -> vector<24x128xf32>
    %c0_15 = arith.constant 0 : index
    %c0_16 = arith.constant 0 : index
    %18 = vector.load %arg6[%c0_15, %c0_16] : memref<1x128xf32, #tpu.memory_space<vmem>>, vector<1x128xf32>
    %19 = vector.broadcast %18 : vector<1x128xf32> to vector<24x128xf32>
    %20 = arith.addf %17, %19 : vector<24x128xf32>
    %cst_17 = arith.constant 0.000000e+00 : f32
    %21 = vector.broadcast %cst_17 : f32 to vector<24x128xf32>
    %22 = arith.maximumf %20, %21 : vector<24x128xf32>
    %c0_18 = arith.constant 0 : index
    %c0_19 = arith.constant 0 : index
    %23 = vector.load %arg7[%c0_18, %c0_19] : memref<128x1024xf32, #tpu.memory_space<vmem>>, vector<128x1024xf32>
    %cst_20 = arith.constant dense<0.000000e+00> : vector<24x1024xf32>
    %24 = tpu.matmul %22, %23, %cst_20 {dimension_numbers = #tpu.dot_dimension_numbers<[1], [0], [0], [1], [0, 0, 1, 1], [], []>} : vector<24x128xf32>, vector<128x1024xf32>, vector<24x1024xf32> -> vector<24x1024xf32>
    %c0_21 = arith.constant 0 : index
    %c0_22 = arith.constant 0 : index
    %25 = vector.load %arg8[%c0_21, %c0_22] : memref<1x1024xf32, #tpu.memory_space<vmem>>, vector<1x1024xf32>
    %26 = vector.broadcast %25 : vector<1x1024xf32> to vector<24x1024xf32>
    %27 = arith.addf %24, %26 : vector<24x1024xf32>
    %c24_i32 = arith.constant 24 : i32
    %28 = arith.muli %arg1, %c24_i32 : i32
    %29 = tpu.iota {dimensions = array<i32: 0>} : vector<24x1xi32>
    %30 = vector.broadcast %28 : i32 to vector<24x1xi32>
    %31 = arith.addi %30, %29 : vector<24x1xi32>
    %c20_i32 = arith.constant 20 : i32
    %32 = vector.broadcast %c20_i32 : i32 to vector<24x1xi32>
    %33 = arith.cmpi slt, %31, %32 : vector<24x1xi32>
    %cst_23 = arith.constant 0xFF800000 : f32
    %34 = vector.shape_cast %33 : vector<24x1xi1> to vector<24x1xi1>
    %35 = vector.broadcast %34 : vector<24x1xi1> to vector<24x1024xi1>
    %36 = vector.broadcast %cst_23 : f32 to vector<24x1024xf32>
    %37 = arith.select %35, %27, %36 : vector<24x1024xi1>, vector<24x1024xf32>
    %c0_24 = arith.constant 0 : index
    %c0_25 = arith.constant 0 : index
    %38 = vector.load %arg11[%c0_24, %c0_25] : memref<1x1024xf32, #tpu.memory_space<vmem>>, vector<1x1024xf32>
    %cst_26 = arith.constant dense<0xFF800000> : vector<1024xf32>
    %39 = vector.multi_reduction <maximumf>, %37, %cst_26 [0] : vector<24x1024xf32> to vector<1024xf32>
    %40 = vector.shape_cast %39 : vector<1024xf32> to vector<1x1024xf32>
    %41 = arith.maximumf %38, %40 : vector<1x1024xf32>
    %c0_27 = arith.constant 0 : index
    %c0_28 = arith.constant 0 : index
    %42 = vector.load %arg11[%c0_27, %c0_28] : memref<1x1024xf32, #tpu.memory_space<vmem>>, vector<1x1024xf32>
    tpu.vector_store %arg11[%c0_27, %c0_28], %41 {strides = array<i32>} : memref<1x1024xf32, #tpu.memory_space<vmem>>, vector<1x1024xf32>,
    %c0_i32_29 = arith.constant 0 : i32
    %43 = arith.cmpi eq, %arg1, %c0_i32_29 : i32
    %44 = arith.extui %43 : i1 to i32
    %c0_i32_30 = arith.constant 0 : i32
    %45 = arith.cmpi ne, %44, %c0_i32_30 : i32
    scf.if %45 {
      %c0_31 = arith.constant 0 : index
      %c0_32 = arith.constant 0 : index
      %46 = vector.load %arg11[%c0_31, %c0_32] : memref<1x1024xf32, #tpu.memory_space<vmem>>, vector<1x1024xf32>
      %c0_33 = arith.constant 0 : index
      %c0_34 = arith.constant 0 : index
      %c0_35 = arith.constant 0 : index
      %47 = vector.load %arg10[%c0_33, %c0_34, %c0_35] : memref<1x1x1024xf32, #tpu.memory_space<vmem>>, vector<1x1x1024xf32>
      %48 = vector.shape_cast %47 : vector<1x1x1024xf32> to vector<1x1024xf32>
      %49 = vector.shape_cast %46 : vector<1x1024xf32> to vector<1x1x1024xf32>
      tpu.vector_store %arg10[%c0_33, %c0_34, %c0_35], %49 {strides = array<i32>} : memref<1x1x1024xf32, #tpu.memory_space<vmem>>, vector<1x1x1024xf32>,
    } else {
    }
    return
  }
  func.func @transform_0(%arg0: i32, %arg1: i32) -> (i32, i32, i32) {
    %c0_i32 = arith.constant 0 : i32
    %c0_i32_0 = arith.constant 0 : i32
    return %arg0, %arg1, %c0_i32 : i32, i32, i32
  }
  func.func @transform_1(%arg0: i32, %arg1: i32) -> (i32, i32, i32) {
    %c0_i32 = arith.constant 0 : i32
    %c0_i32_0 = arith.constant 0 : i32
    %c0_i32_1 = arith.constant 0 : i32
    return %arg0, %c0_i32, %c0_i32_0 : i32, i32, i32
  }
  func.func @transform_2(%arg0: i32, %arg1: i32) -> (i32, i32) {
    %c0_i32 = arith.constant 0 : i32
    %c0_i32_0 = arith.constant 0 : i32
    %c0_i32_1 = arith.constant 0 : i32
    return %c0_i32, %c0_i32_0 : i32, i32
  }
  func.func @transform_3(%arg0: i32, %arg1: i32) -> (i32, i32) {
    %c0_i32 = arith.constant 0 : i32
    %c0_i32_0 = arith.constant 0 : i32
    %c0_i32_1 = arith.constant 0 : i32
    return %c0_i32, %c0_i32_0 : i32, i32
  }
  func.func @transform_4(%arg0: i32, %arg1: i32) -> (i32, i32) {
    %c0_i32 = arith.constant 0 : i32
    %c0_i32_0 = arith.constant 0 : i32
    %c0_i32_1 = arith.constant 0 : i32
    return %c0_i32, %c0_i32_0 : i32, i32
  }
  func.func @transform_5(%arg0: i32, %arg1: i32) -> (i32, i32) {
    %c0_i32 = arith.constant 0 : i32
    %c0_i32_0 = arith.constant 0 : i32
    %c0_i32_1 = arith.constant 0 : i32
    return %c0_i32, %c0_i32_0 : i32, i32
  }
  func.func @transform_6(%arg0: i32, %arg1: i32) -> (i32, i32) {
    %c0_i32 = arith.constant 0 : i32
    %c0_i32_0 = arith.constant 0 : i32
    %c0_i32_1 = arith.constant 0 : i32
    return %c0_i32, %c0_i32_0 : i32, i32
  }
  func.func @transform_7(%arg0: i32, %arg1: i32) -> (i32, i32, i32) {
    %c0_i32 = arith.constant 0 : i32
    %c0_i32_0 = arith.constant 0 : i32
    return %arg0, %arg1, %c0_i32 : i32, i32, i32
  }
  func.func @transform_8(%arg0: i32, %arg1: i32) -> (i32, i32, i32) {
    %c0_i32 = arith.constant 0 : i32
    %c0_i32_0 = arith.constant 0 : i32
    %c0_i32_1 = arith.constant 0 : i32
    return %arg0, %c0_i32, %c0_i32_0 : i32, i32, i32
  }
}

module attributes {stable_mosaic.version = 11 : i64} {
  func.func @_head_kernel(%arg0: i32, %arg1: i32, %arg2: memref<1x24x64xf32, #tpu.memory_space<vmem>>, %arg3: memref<1x1x1024xf32, #tpu.memory_space<vmem>>, %arg4: memref<64x512xf32, #tpu.memory_space<vmem>>, %arg5: memref<1024x512xf32, #tpu.memory_space<vmem>>, %arg6: memref<1x512xf32, #tpu.memory_space<vmem>>, %arg7: memref<512x256xf32, #tpu.memory_space<vmem>>, %arg8: memref<1x256xf32, #tpu.memory_space<vmem>>, %arg9: memref<256x128xf32, #tpu.memory_space<vmem>>, %arg10: memref<1x128xf32, #tpu.memory_space<vmem>>, %arg11: memref<128x2xf32, #tpu.memory_space<vmem>>, %arg12: memref<1x2xf32, #tpu.memory_space<vmem>>, %arg13: memref<1x24x2xf32, #tpu.memory_space<vmem>>) attributes {dimension_semantics = [#tpu.dimension_semantics<parallel>, #tpu.dimension_semantics<parallel>], iteration_bounds = array<i64: 2, 1>, scalar_prefetch = 0 : i64, scratch_operands = 0 : i64, tpu.core_type = #tpu.core_type<tc>, window_params = [{transform_indices = @transform_0, window_bounds = array<i64: 1, 24, 64>}, {transform_indices = @transform_1, window_bounds = array<i64: 1, 1, 1024>}, {pipeline_mode = #tpu.pipeline_mode<synchronous>, transform_indices = @transform_2, window_bounds = array<i64: 64, 512>}, {pipeline_mode = #tpu.pipeline_mode<synchronous>, transform_indices = @transform_3, window_bounds = array<i64: 1024, 512>}, {pipeline_mode = #tpu.pipeline_mode<synchronous>, transform_indices = @transform_4, window_bounds = array<i64: 1, 512>}, {pipeline_mode = #tpu.pipeline_mode<synchronous>, transform_indices = @transform_5, window_bounds = array<i64: 512, 256>}, {pipeline_mode = #tpu.pipeline_mode<synchronous>, transform_indices = @transform_6, window_bounds = array<i64: 1, 256>}, {pipeline_mode = #tpu.pipeline_mode<synchronous>, transform_indices = @transform_7, window_bounds = array<i64: 256, 128>}, {pipeline_mode = #tpu.pipeline_mode<synchronous>, transform_indices = @transform_8, window_bounds = array<i64: 1, 128>}, {pipeline_mode = #tpu.pipeline_mode<synchronous>, transform_indices = @transform_9, window_bounds = array<i64: 128, 2>}, {pipeline_mode = #tpu.pipeline_mode<synchronous>, transform_indices = @transform_10, window_bounds = array<i64: 1, 2>}, {transform_indices = @transform_11, window_bounds = array<i64: 1, 24, 2>}]} {
    %c0 = arith.constant 0 : index
    %c0_0 = arith.constant 0 : index
    %c0_1 = arith.constant 0 : index
    %0 = vector.load %arg2[%c0, %c0_0, %c0_1] : memref<1x24x64xf32, #tpu.memory_space<vmem>>, vector<1x24x64xf32>
    %1 = vector.shape_cast %0 : vector<1x24x64xf32> to vector<24x64xf32>
    %c0_2 = arith.constant 0 : index
    %c0_3 = arith.constant 0 : index
    %c0_4 = arith.constant 0 : index
    %2 = vector.load %arg3[%c0_2, %c0_3, %c0_4] : memref<1x1x1024xf32, #tpu.memory_space<vmem>>, vector<1x1x1024xf32>
    %3 = vector.shape_cast %2 : vector<1x1x1024xf32> to vector<1x1024xf32>
    %c0_5 = arith.constant 0 : index
    %c0_6 = arith.constant 0 : index
    %4 = vector.load %arg5[%c0_5, %c0_6] : memref<1024x512xf32, #tpu.memory_space<vmem>>, vector<1024x512xf32>
    %cst = arith.constant dense<0.000000e+00> : vector<1x512xf32>
    %5 = tpu.matmul %3, %4, %cst {dimension_numbers = #tpu.dot_dimension_numbers<[1], [0], [0], [1], [0, 0, 1, 1], [], []>} : vector<1x1024xf32>, vector<1024x512xf32>, vector<1x512xf32> -> vector<1x512xf32>
    %c0_7 = arith.constant 0 : index
    %c0_8 = arith.constant 0 : index
    %6 = vector.load %arg4[%c0_7, %c0_8] : memref<64x512xf32, #tpu.memory_space<vmem>>, vector<64x512xf32>
    %cst_9 = arith.constant dense<0.000000e+00> : vector<24x512xf32>
    %7 = tpu.matmul %1, %6, %cst_9 {dimension_numbers = #tpu.dot_dimension_numbers<[1], [0], [0], [1], [0, 0, 1, 1], [], []>} : vector<24x64xf32>, vector<64x512xf32>, vector<24x512xf32> -> vector<24x512xf32>
    %8 = vector.broadcast %5 : vector<1x512xf32> to vector<24x512xf32>
    %9 = arith.addf %7, %8 : vector<24x512xf32>
    %c0_10 = arith.constant 0 : index
    %c0_11 = arith.constant 0 : index
    %10 = vector.load %arg6[%c0_10, %c0_11] : memref<1x512xf32, #tpu.memory_space<vmem>>, vector<1x512xf32>
    %11 = vector.broadcast %10 : vector<1x512xf32> to vector<24x512xf32>
    %12 = arith.addf %9, %11 : vector<24x512xf32>
    %cst_12 = arith.constant 0.000000e+00 : f32
    %13 = vector.broadcast %cst_12 : f32 to vector<24x512xf32>
    %14 = arith.maximumf %12, %13 : vector<24x512xf32>
    %c0_13 = arith.constant 0 : index
    %c0_14 = arith.constant 0 : index
    %15 = vector.load %arg7[%c0_13, %c0_14] : memref<512x256xf32, #tpu.memory_space<vmem>>, vector<512x256xf32>
    %cst_15 = arith.constant dense<0.000000e+00> : vector<24x256xf32>
    %16 = tpu.matmul %14, %15, %cst_15 {dimension_numbers = #tpu.dot_dimension_numbers<[1], [0], [0], [1], [0, 0, 1, 1], [], []>} : vector<24x512xf32>, vector<512x256xf32>, vector<24x256xf32> -> vector<24x256xf32>
    %c0_16 = arith.constant 0 : index
    %c0_17 = arith.constant 0 : index
    %17 = vector.load %arg8[%c0_16, %c0_17] : memref<1x256xf32, #tpu.memory_space<vmem>>, vector<1x256xf32>
    %18 = vector.broadcast %17 : vector<1x256xf32> to vector<24x256xf32>
    %19 = arith.addf %16, %18 : vector<24x256xf32>
    %cst_18 = arith.constant 0.000000e+00 : f32
    %20 = vector.broadcast %cst_18 : f32 to vector<24x256xf32>
    %21 = arith.maximumf %19, %20 : vector<24x256xf32>
    %c0_19 = arith.constant 0 : index
    %c0_20 = arith.constant 0 : index
    %22 = vector.load %arg9[%c0_19, %c0_20] : memref<256x128xf32, #tpu.memory_space<vmem>>, vector<256x128xf32>
    %cst_21 = arith.constant dense<0.000000e+00> : vector<24x128xf32>
    %23 = tpu.matmul %21, %22, %cst_21 {dimension_numbers = #tpu.dot_dimension_numbers<[1], [0], [0], [1], [0, 0, 1, 1], [], []>} : vector<24x256xf32>, vector<256x128xf32>, vector<24x128xf32> -> vector<24x128xf32>
    %c0_22 = arith.constant 0 : index
    %c0_23 = arith.constant 0 : index
    %24 = vector.load %arg10[%c0_22, %c0_23] : memref<1x128xf32, #tpu.memory_space<vmem>>, vector<1x128xf32>
    %25 = vector.broadcast %24 : vector<1x128xf32> to vector<24x128xf32>
    %26 = arith.addf %23, %25 : vector<24x128xf32>
    %cst_24 = arith.constant 0.000000e+00 : f32
    %27 = vector.broadcast %cst_24 : f32 to vector<24x128xf32>
    %28 = arith.maximumf %26, %27 : vector<24x128xf32>
    %c0_25 = arith.constant 0 : index
    %c0_26 = arith.constant 0 : index
    %29 = vector.load %arg11[%c0_25, %c0_26] : memref<128x2xf32, #tpu.memory_space<vmem>>, vector<128x2xf32>
    %cst_27 = arith.constant dense<0.000000e+00> : vector<24x2xf32>
    %30 = tpu.matmul %28, %29, %cst_27 {dimension_numbers = #tpu.dot_dimension_numbers<[1], [0], [0], [1], [0, 0, 1, 1], [], []>} : vector<24x128xf32>, vector<128x2xf32>, vector<24x2xf32> -> vector<24x2xf32>
    %c0_28 = arith.constant 0 : index
    %c0_29 = arith.constant 0 : index
    %31 = vector.load %arg12[%c0_28, %c0_29] : memref<1x2xf32, #tpu.memory_space<vmem>>, vector<1x2xf32>
    %32 = vector.broadcast %31 : vector<1x2xf32> to vector<24x2xf32>
    %33 = arith.addf %30, %32 : vector<24x2xf32>
    %cst_30 = arith.constant dense<0xFF800000> : vector<24xf32>
    %34 = vector.multi_reduction <maximumf>, %33, %cst_30 [1] : vector<24x2xf32> to vector<24xf32>
    %35 = vector.shape_cast %34 : vector<24xf32> to vector<24x1xf32>
    %36 = vector.broadcast %35 : vector<24x1xf32> to vector<24x2xf32>
    %37 = arith.subf %33, %36 : vector<24x2xf32>
    %38 = math.exp %37 : vector<24x2xf32>
    %cst_31 = arith.constant dense<0.000000e+00> : vector<24xf32>
    %39 = vector.multi_reduction <add>, %38, %cst_31 [1] : vector<24x2xf32> to vector<24xf32>
    %40 = vector.shape_cast %39 : vector<24xf32> to vector<24x1xf32>
    %41 = math.log %40 : vector<24x1xf32>
    %42 = vector.broadcast %41 : vector<24x1xf32> to vector<24x2xf32>
    %43 = arith.subf %37, %42 : vector<24x2xf32>
    %c0_32 = arith.constant 0 : index
    %c0_33 = arith.constant 0 : index
    %c0_34 = arith.constant 0 : index
    %44 = vector.load %arg13[%c0_32, %c0_33, %c0_34] : memref<1x24x2xf32, #tpu.memory_space<vmem>>, vector<1x24x2xf32>
    %45 = vector.shape_cast %44 : vector<1x24x2xf32> to vector<24x2xf32>
    %46 = vector.shape_cast %43 : vector<24x2xf32> to vector<1x24x2xf32>
    tpu.vector_store %arg13[%c0_32, %c0_33, %c0_34], %46 {strides = array<i32>} : memref<1x24x2xf32, #tpu.memory_space<vmem>>, vector<1x24x2xf32>,
    return
  }
  func.func @transform_0(%arg0: i32, %arg1: i32) -> (i32, i32, i32) {
    %c0_i32 = arith.constant 0 : i32
    %c0_i32_0 = arith.constant 0 : i32
    return %arg0, %arg1, %c0_i32 : i32, i32, i32
  }
  func.func @transform_1(%arg0: i32, %arg1: i32) -> (i32, i32, i32) {
    %c0_i32 = arith.constant 0 : i32
    %c0_i32_0 = arith.constant 0 : i32
    %c0_i32_1 = arith.constant 0 : i32
    return %arg0, %c0_i32, %c0_i32_0 : i32, i32, i32
  }
  func.func @transform_2(%arg0: i32, %arg1: i32) -> (i32, i32) {
    %c0_i32 = arith.constant 0 : i32
    %c0_i32_0 = arith.constant 0 : i32
    %c0_i32_1 = arith.constant 0 : i32
    return %c0_i32, %c0_i32_0 : i32, i32
  }
  func.func @transform_3(%arg0: i32, %arg1: i32) -> (i32, i32) {
    %c0_i32 = arith.constant 0 : i32
    %c0_i32_0 = arith.constant 0 : i32
    %c0_i32_1 = arith.constant 0 : i32
    return %c0_i32, %c0_i32_0 : i32, i32
  }
  func.func @transform_4(%arg0: i32, %arg1: i32) -> (i32, i32) {
    %c0_i32 = arith.constant 0 : i32
    %c0_i32_0 = arith.constant 0 : i32
    %c0_i32_1 = arith.constant 0 : i32
    return %c0_i32, %c0_i32_0 : i32, i32
  }
  func.func @transform_5(%arg0: i32, %arg1: i32) -> (i32, i32) {
    %c0_i32 = arith.constant 0 : i32
    %c0_i32_0 = arith.constant 0 : i32
    %c0_i32_1 = arith.constant 0 : i32
    return %c0_i32, %c0_i32_0 : i32, i32
  }
  func.func @transform_6(%arg0: i32, %arg1: i32) -> (i32, i32) {
    %c0_i32 = arith.constant 0 : i32
    %c0_i32_0 = arith.constant 0 : i32
    %c0_i32_1 = arith.constant 0 : i32
    return %c0_i32, %c0_i32_0 : i32, i32
  }
  func.func @transform_7(%arg0: i32, %arg1: i32) -> (i32, i32) {
    %c0_i32 = arith.constant 0 : i32
    %c0_i32_0 = arith.constant 0 : i32
    %c0_i32_1 = arith.constant 0 : i32
    return %c0_i32, %c0_i32_0 : i32, i32
  }
  func.func @transform_8(%arg0: i32, %arg1: i32) -> (i32, i32) {
    %c0_i32 = arith.constant 0 : i32
    %c0_i32_0 = arith.constant 0 : i32
    %c0_i32_1 = arith.constant 0 : i32
    return %c0_i32, %c0_i32_0 : i32, i32
  }
  func.func @transform_9(%arg0: i32, %arg1: i32) -> (i32, i32) {
    %c0_i32 = arith.constant 0 : i32
    %c0_i32_0 = arith.constant 0 : i32
    %c0_i32_1 = arith.constant 0 : i32
    return %c0_i32, %c0_i32_0 : i32, i32
  }
  func.func @transform_10(%arg0: i32, %arg1: i32) -> (i32, i32) {
    %c0_i32 = arith.constant 0 : i32
    %c0_i32_0 = arith.constant 0 : i32
    %c0_i32_1 = arith.constant 0 : i32
    return %c0_i32, %c0_i32_0 : i32, i32
  }
  func.func @transform_11(%arg0: i32, %arg1: i32) -> (i32, i32, i32) {
    %c0_i32 = arith.constant 0 : i32
    %c0_i32_0 = arith.constant 0 : i32
    return %arg0, %arg1, %c0_i32 : i32, i32, i32
  }
}

</mosaic_0001>

<bundles_post_ra>
// kernel: pointnet_dense_cls.4
= control target key start
LH: loop header
LB: loop body
LE: loop exit
PB: predicated region body
PF: predicated region fallthrough
CT: control target
= control target key end

     0   :  { %s1734_s0 = inlined_call_operand.vmem [shape: f32[2,24,3], index: 0, kind: input, shape index: {}]   ;;  %s1735_s1 = inlined_call_operand.vmem [shape: f32[2,3,64], index: 1, kind: input, shape index: {}]   ;;  %s1736_s2 = inlined_call_operand.hbm [shape: f32[1,64], index: 2, kind: input, shape index: {}]   ;;  %s1737_s3 = inlined_call_operand.hbm [shape: f32[64,128], index: 3, kind: input, shape index: {}]   ;;  %s1738_s4 = inlined_call_operand.hbm [shape: f32[1,128], index: 4, kind: input, shape index: {}]   ;;  %s1739_s5 = inlined_call_operand.hbm [shape: f32[128,1024], index: 5, kind: input, shape index: {}]   ;;  %s1740_s6 = inlined_call_operand.hbm [shape: f32[1,1024], index: 6, kind: input, shape index: {}]   ;;  %s1741_s7 = inlined_call_operand.vmem [shape: f32[2,24,64], index: 7, kind: output, shape index: {0}]   ;;  %s1742_s8 = inlined_call_operand.vmem [shape: f32[2,1,1024], index: 8, kind: output, shape index: {1}]  }
   0x1   :  { %1743 = sst [smem:[#allocation14_spill]] %s1737_s3 }
   0x2   :  { %14 = vsyncpa [#allocation4], 0 }
   0x3   :  { %15 = vsyncpa [#allocation6], 0 }
   0x4   :  { %16 = vsyncpa [#allocation9], 0  ;;  %s1588_s27 = smov 0   ;;  %s1590_s28 = smov 0  }
   0x5   :  { %s1592_s29 = smov 0  }
   0x6 LB: > { %s1744_s3 = sld [smem:[#allocation14_spill]]  ;;  %s1238_s11 = sadd.s32 4294967295, %s1532_s29   ;;  %s1532_s29 = sphi %s1592_s29, %s22_s29   ;;  %s1528_s28 = sphi %s1590_s28, %s1749_s28   ;;  %s1524_s27 = sphi %s1588_s27, %s1748_s27  }
   0x7   : > { %p1240_p0 = scmp.ge.s32.totalorder %s1532_s29, 1  ;;  %p252_p1 = scmp.lt.s32.totalorder %s1532_s29, 3 }
   0x8   : > { %p1609_p2 = scmp.eq.s32.totalorder %s1238_s11, 0  ;;  %s1534_s14 = smov [#allocation5]  }
   0x9   : > { %p1613_p3 = pnand %p1240_p0, %p252_p1  ;;  %s277_s15 = sshll.u32 %s1534_s14, 4  ;;  %s278_s15 = int_to_ptr.vmem [resolvable:$true] %s277_s15 }
   0xa   : > { %s301_s18 = sshll.u32 %s1739_s5, 4  ;;  %s1535_s20 = smov [#allocation8]   ;;  %s302_s18 = int_to_ptr.hbm [resolvable:$true] %s301_s18 }
   0xb   : > { %p1287_p4 = pneg %p1613_p3  ;;  %s303_s21 = sshll.u32 %s1535_s20, 4  ;;  %s304_s21 = int_to_ptr.vmem [resolvable:$true] %s303_s21 }
   0xc   : > { %s275_s10 = sshll.u32 %s1744_s3, 4  ;;  %s1536_s22 = smov 128   ;;  %s276_s10 = int_to_ptr.hbm [resolvable:$true] %s275_s10 }
   0xd   : > { %p1624_p5 = pnand %p1609_p2, %p1287_p4  ;;  %s1537_s23 = smov 8  }
   0xe   : > { %s1538_s24 = smov 1024   ;;  %s1539_s25 = smov 64  }
   0xf   : > { %1293 = dma.hbm_to_vmem [thread:$0]  (!%p1624_p5), %s276_s10, 1024, %s278_s15, [#allocation6], %s1536_s22, %s1536_s22, %s1537_s23  }
  0x10   : > { %1299 = dma.hbm_to_vmem [thread:$0]  (!%p1624_p5), %s302_s18, 16384, %s304_s21, [#allocation9], %s1538_s24, %s1538_s24, %s1539_s25  }
  0x11   : > { %s264_s9 = sshll.u32 %s1736_s2, 4  ;;  %s34_s11 = sadd.s32 1, %s1528_s28  ;;  %s265_s9 = int_to_ptr.hbm [resolvable:$true] %s264_s9 }
  0x12   : > { %p36_p6 = scmp.ge.s32.totalorder %s34_s11, 2  ;;  %s1540_s14 = smov [#allocation3]  }
  0x13   : > { %s266_s16 = sshll.u32 %s1540_s14, 4  ;;  %s290_s3 = sshll.u32 %s1738_s4, 4  ;;  %s267_s16 = int_to_ptr.vmem [resolvable:$true] %s266_s16  ;;  %s291_s3 = int_to_ptr.hbm [resolvable:$true] %s290_s3 }
  0x14   : > { %s1751_s11 = smov (%p36_p6, %s34_s11), 0  ;;  %s316_s18 = sshll.u32 %s1740_s6, 4  ;;  %s317_s18 = int_to_ptr.hbm [resolvable:$true] %s316_s18 }
  0x15   : > { %1290 = dma.hbm_to_vmem [thread:$0]  (!%p1624_p5), %s265_s9, 16, %s267_s16, [#allocation4]  }
  0x16   : > { %s1541_s21 = smov [#allocation7]   ;;  %s1542_s23 = smov [#allocation10]  }
  0x17   : > { %s292_s22 = sshll.u32 %s1541_s21, 4  ;;  %s318_s24 = sshll.u32 %s1542_s23, 4  ;;  %s293_s22 = int_to_ptr.vmem [resolvable:$true] %s292_s22  ;;  %s319_s24 = int_to_ptr.vmem [resolvable:$true] %s318_s24 }
  0x18   : > { %1296 = dma.hbm_to_vmem [thread:$0]  (!%p1624_p5), %s291_s3, 16, %s293_s22, [#allocation6]  }
  0x19   : > { %1302 = dma.hbm_to_vmem [thread:$0]  (!%p1624_p5), %s317_s18, 128, %s319_s24, [#allocation9]  }
  0x1a   : > { %351 = sbr.rel (%p1613_p3) target bundleno = 498 (0x1f2), region = 48 }
  0x1f   : > { %1511 = dma.done.wait (%p1609_p2), [#allocation4], 16  }
  0x20   : > { %1513 = vsyncadd (%p1609_p2), [#allocation4], 4294967280 }
  0x21   : > { %1515 = dma.done.wait (%p1609_p2), [#allocation6], 1040  }
  0x22   : > { %1517 = vsyncadd (%p1609_p2), [#allocation6], 4294966256 }
  0x23   : > { %1519 = dma.done.wait (%p1609_p2), [#allocation9], 16512  }
  0x24   : > { %1521 = vsyncadd (%p1609_p2), [#allocation9], 4294950784  ;;  %p423_p7 = scmp.lt.s32.totalorder %s1524_s27, 1  ;;  %vm473_vm0 = vcmask 1042432   ;;  %vm463_vm1 = vcmask 23552   ;;  %v517_v1 = vld [vmem:[#allocation5 + $0x38] sm:$0xff] }
  0x25   : > { %v516_v2 = vld [vmem:[#allocation5 + $0x30] sm:$0xff]  ;;  %539 = vmatpush.msra.mxu1 %v517_v1  ;;  %v515_v4 = vld [vmem:[#allocation5 + $0x28] sm:$0xff]  ;;  %v514_v5 = vld [vmem:[#allocation5 + $0x20] sm:$0xff]  ;;  %vm506_vm2 = vcmask 523264   ;;  %vm1036_vm4 = vcmask 1040384   ;;  %vm1038_vm5 = vcmask 1042434  }
  0x26   : > { %s1753_s27 = smov (!%p423_p7, %s1524_s27), 1  ;;  %v513_v6 = vld [vmem:[#allocation5 + $0x18] sm:$0xff]  ;;  %v512_v9 = vld [vmem:[#allocation5 + $0x10] sm:$0xff]  ;;  %v511_v10 = vld [vmem:[#allocation5 + $0x8] sm:$0xff]  ;;  %vm1040_vm6 = vcmask 1041408   ;;  %vm1044_vm7 = vcmask 1046534  }
  0x27   : > { %s1254_s3 = sshll.u32 %s1753_s27, 2  ;;  %s1266_s26 = smul.u32 24, %s1753_s27  ;;  %540 = vmatpush.msra.mxu1 %v516_v2  ;;  %v510_v11 = vld [vmem:[#allocation5] sm:$0xff]  ;;  %v681_v13 = vld [vmem:[#allocation8 + $0x3c8] sm:$0xff]  ;;  %v682_v14 = vld [vmem:[#allocation8 + $0x3d0] sm:$0xff]  ;;  %vm1042_vm8 = vcmask 1044484  }
  0x28   : > { %s435_s25 = scalar_lea.vmem %s1735_s1, %s1254_s3  ;;  %v680_v12 = vld [vmem:[#allocation8 + $0x3c0] sm:$0xff]  ;;  %732 = vmatpush.msra.mxu3 %v681_v13  ;;  %v683_v15 = vld [vmem:[#allocation8 + $0x3d8] sm:$0xff]  ;;  %v673_v17 = vld [vmem:[#allocation8 + $0x388] sm:$0xff]  ;;  %s1256_s20 = sshll.u32 %s1753_s27, 3  ;;  %vm1046_vm9 = vcmask 1045508   ;;  %vm1048_vm10 = vcmask 1043456  }
  0x29   : > { %v458_v0 = vld [vmem:[%s435_s25] sm:$0x7]  ;;  %s430_s9 = scalar_lea.vmem %s1734_s0, %s1266_s26  ;;  %541 = vmatpush.msra.mxu1 %v515_v4  ;;  %706 = vmatpush.msra.mxu2 %v680_v12  ;;  %v672_v16 = vld [vmem:[#allocation8 + $0x380] sm:$0xff]  ;;  %v674_v18 = vld [vmem:[#allocation8 + $0x390] sm:$0xff]  ;;  %s1689_s17 = scalar_lea.vmem %s1741_s7, %s1266_s26 }
  0x2a   : > { %1257 = vmatpush.msk.msra.mxu0 %vm473_vm0, %v458_v0  ;;  %v455_v3 = vld [vmem:[%s430_s9] sm:$0xff]  ;;  %v456_v7 = vld [vmem:[%s430_s9 + $0x8] sm:$0xff]  ;;  %v457_v8 = vld [vmem:[%s430_s9 + $0x10] sm:$0xff]  ;;  %733 = vmatpush.msra.mxu3 %v673_v17  ;;  %s449_s18 = scalar_lea.vmem %s1742_s8, %s1256_s20 }
  0x2b   : > { %1258 = vmatmul.msk.f32.vlgmr.msra.gmra.mxu0 %vm463_vm1, %v455_v3  ;;  %542 = vmatpush.msra.mxu1 %v514_v5  ;;  %v675_v19 = vld [vmem:[#allocation8 + $0x398] sm:$0xff]  ;;  %v664_v20 = vld [vmem:[#allocation8 + $0x340] sm:$0xff]  ;;  %v665_v21 = vld [vmem:[#allocation8 + $0x348] sm:$0xff] }
  0x2c   : > { %758 = vmatpush.msrb.mxu0 %v682_v14  ;;  %707 = vmatpush.msra.mxu2 %v672_v16  ;;  %v666_v22 = vld [vmem:[#allocation8 + $0x350] sm:$0xff]  ;;  %v667_v23 = vld [vmem:[#allocation8 + $0x358] sm:$0xff]  ;;  %v656_v24 = vld [vmem:[#allocation8 + $0x300] sm:$0xff] }
  0x2d   : > { %543 = vmatpush.msra.mxu1 %v513_v6  ;;  %v657_v25 = vld [vmem:[#allocation8 + $0x308] sm:$0xff]  ;;  %734 = vmatpush.msra.mxu3 %v665_v21  ;;  %v658_v26 = vld [vmem:[#allocation8 + $0x310] sm:$0xff]  ;;  %v659_v27 = vld [vmem:[#allocation8 + $0x318] sm:$0xff] }
  0x2e   : > { %759 = vmatpush.msrb.mxu0 %v674_v18  ;;  %708 = vmatpush.msra.mxu2 %v664_v20  ;;  %v648_v28 = vld [vmem:[#allocation8 + $0x2c0] sm:$0xff]  ;;  %v649_v29 = vld [vmem:[#allocation8 + $0x2c8] sm:$0xff]  ;;  %v650_v30 = vld [vmem:[#allocation8 + $0x2d0] sm:$0xff] }
  0x2f   : > { %544 = vmatpush.msra.mxu1 %v512_v9  ;;  %735 = vmatpush.msra.mxu3 %v657_v25  ;;  %v651_v31 = vld [vmem:[#allocation8 + $0x2d8] sm:$0xff]  ;;  %v640_v33 = vld [vmem:[#allocation8 + $0x280] sm:$0xff]  ;;  %v641_v34 = vld [vmem:[#allocation8 + $0x288] sm:$0xff] }
  0x30   : > { %760 = vmatpush.msrb.mxu0 %v666_v22  ;;  %709 = vmatpush.msra.mxu2 %v656_v24  ;;  %v1681_v32 = vld [vmem:[#allocation3] ss:$0 sm:$0xff]  ;;  %v642_v35 = vld [vmem:[#allocation8 + $0x290] sm:$0xff]  ;;  %v632_v37 = vld [vmem:[#allocation8 + $0x240] sm:$0xff] }
  0x31   : > { %545 = vmatpush.msra.mxu1 %v511_v10  ;;  %736 = vmatpush.msra.mxu3 %v649_v29  ;;  %v643_v36 = vld [vmem:[#allocation8 + $0x298] sm:$0xff]  ;;  %v633_v38 = vld [vmem:[#allocation8 + $0x248] sm:$0xff]  ;;  %v634_v40 = vld [vmem:[#allocation8 + $0x250] sm:$0xff] }
  0x32   : > { %761 = vmatpush.msrb.mxu0 %v658_v26  ;;  %710 = vmatpush.msra.mxu2 %v648_v28  ;;  %v635_v41 = vld [vmem:[#allocation8 + $0x258] sm:$0xff]  ;;  %v624_v43 = vld [vmem:[#allocation8 + $0x200] sm:$0xff]  ;;  %v625_v44 = vld [vmem:[#allocation8 + $0x208] sm:$0xff] }
  0x33   : > { %1259 = vmatmul.msk.f32.gmra.mxu0 %vm463_vm1, %v456_v7  ;;  %546 = vmatpush.msra.mxu1 %v510_v11  ;;  %v626_v45 = vld [vmem:[#allocation8 + $0x210] sm:$0xff]  ;;  %v627_v47 = vld [vmem:[#allocation8 + $0x218] sm:$0xff]  ;;  %v616_v48 = vld [vmem:[#allocation8 + $0x1c0] sm:$0xff] }
  0x34   : > { %762 = vmatpush.msrb.mxu0 %v650_v30  ;;  %711 = vmatpush.msra.mxu2 %v640_v33  ;;  %v617_v49 = vld [vmem:[#allocation8 + $0x1c8] sm:$0xff]  ;;  %v618_v50 = vld [vmem:[#allocation8 + $0x1d0] sm:$0xff]  ;;  %v619_v51 = vld [vmem:[#allocation8 + $0x1d8] sm:$0xff] }
  0x35   : > { %784 = vmatpush.msrb.mxu1 %v683_v15  ;;  %737 = vmatpush.msra.mxu3 %v641_v34  ;;  %v608_v52 = vld [vmem:[#allocation8 + $0x180] sm:$0xff]  ;;  %v609_v53 = vld [vmem:[#allocation8 + $0x188] sm:$0xff]  ;;  %v610_v54 = vld [vmem:[#allocation8 + $0x190] sm:$0xff] }
  0x36   : > { %763 = vmatpush.msrb.mxu0 %v642_v35  ;;  %712 = vmatpush.msra.mxu2 %v632_v37  ;;  %v611_v55 = vld [vmem:[#allocation8 + $0x198] sm:$0xff]  ;;  %v600_v56 = vld [vmem:[#allocation8 + $0x140] sm:$0xff]  ;;  %v601_v58 = vld [vmem:[#allocation8 + $0x148] sm:$0xff] }
  0x37   : > { %785 = vmatpush.msrb.mxu1 %v675_v19  ;;  %738 = vmatpush.msra.mxu3 %v633_v38  ;;  %v602_v59 = vld [vmem:[#allocation8 + $0x150] sm:$0xff]  ;;  %v603_v61 = vld [vmem:[#allocation8 + $0x158] sm:$0xff]  ;;  %v592_v62 = vld [vmem:[#allocation8 + $0x100] sm:$0xff] }
  0x38   : > { %764 = vmatpush.msrb.mxu0 %v634_v40  ;;  %713 = vmatpush.msra.mxu2 %v624_v43  ;;  %v593_v63 = vld [vmem:[#allocation8 + $0x108] sm:$0xff]  ;;  %v594_v1 = vld [vmem:[#allocation8 + $0x110] sm:$0xff]  ;;  %v595_v2 = vld [vmem:[#allocation8 + $0x118] sm:$0xff] }
  0x39   : > { %786 = vmatpush.msrb.mxu1 %v667_v23  ;;  %739 = vmatpush.msra.mxu3 %v625_v44  ;;  %v584_v3 = vld [vmem:[#allocation8 + $0xc0] sm:$0xff]  ;;  %v585_v4 = vld [vmem:[#allocation8 + $0xc8] sm:$0xff]  ;;  %v586_v5 = vld [vmem:[#allocation8 + $0xd0] sm:$0xff] }
  0x3a   : > { %765 = vmatpush.msrb.mxu0 %v626_v45  ;;  %714 = vmatpush.msra.mxu2 %v616_v48  ;;  %v587_v6 = vld [vmem:[#allocation8 + $0xd8] sm:$0xff]  ;;  %v576_v7 = vld [vmem:[#allocation8 + $0x80] sm:$0xff]  ;;  %v578_v9 = vld [vmem:[#allocation8 + $0x90] sm:$0xff] }
  0x3b   : > { %1260 = vmatmul.msk.f32.gmra.mxu0 %vm463_vm1, %v457_v8  ;;  %787 = vmatpush.msrb.mxu1 %v659_v27  ;;  %v577_v8 = vld [vmem:[#allocation8 + $0x88] sm:$0xff]  ;;  %v579_v10 = vld [vmem:[#allocation8 + $0x98] sm:$0xff]  ;;  %v568_v12 = vld [vmem:[#allocation8 + $0x40] sm:$0xff] }
  0x3c   : > { %740 = vmatpush.msra.mxu3 %v617_v49  ;;  %766 = vmatpush.msrb.mxu0 %v618_v50  ;;  %v569_v13 = vld [vmem:[#allocation8 + $0x48] sm:$0xff]  ;;  %v570_v15 = vld [vmem:[#allocation8 + $0x50] sm:$0xff]  ;;  %v571_v16 = vld [vmem:[#allocation8 + $0x58] sm:$0xff] }
  0x3d   : > { %788 = vmatpush.msrb.mxu1 %v651_v31  ;;  %715 = vmatpush.msra.mxu2 %v608_v52  ;;  %v560_v17 = vld [vmem:[#allocation8] sm:$0xff]  ;;  %v561_v19 = vld [vmem:[#allocation8 + $0x8] sm:$0xff]  ;;  %v562_v20 = vld [vmem:[#allocation8 + $0x10] sm:$0xff] }
  0x3e   : > { %741 = vmatpush.msra.mxu3 %v609_v53  ;;  %767 = vmatpush.msrb.mxu0 %v610_v54  ;;  %v563_v21 = vld [vmem:[#allocation8 + $0x18] sm:$0xff]  ;;  %v684_v22 = vld [vmem:[#allocation8 + $0x3e0] sm:$0xff]  ;;  %v685_v23 = vld [vmem:[#allocation8 + $0x3e8] sm:$0xff] }
  0x3f   : > { %789 = vmatpush.msrb.mxu1 %v643_v36  ;;  %716 = vmatpush.msra.mxu2 %v600_v56  ;;  %v686_v24 = vld [vmem:[#allocation8 + $0x3f0] sm:$0xff]  ;;  %v687_v25 = vld [vmem:[#allocation8 + $0x3f8] sm:$0xff]  ;;  %v676_v26 = vld [vmem:[#allocation8 + $0x3a0] sm:$0xff] }
  0x40   : > { %742 = vmatpush.msra.mxu3 %v601_v58  ;;  %768 = vmatpush.msrb.mxu0 %v602_v59  ;;  %v677_v27 = vld [vmem:[#allocation8 + $0x3a8] sm:$0xff]  ;;  %v678_v28 = vld [vmem:[#allocation8 + $0x3b0] sm:$0xff]  ;;  %v679_v29 = vld [vmem:[#allocation8 + $0x3b8] sm:$0xff] }
  0x41   : > { %790 = vmatpush.msrb.mxu1 %v635_v41  ;;  %717 = vmatpush.msra.mxu2 %v592_v62  ;;  %v668_v30 = vld [vmem:[#allocation8 + $0x360] sm:$0xff]  ;;  %v669_v31 = vld [vmem:[#allocation8 + $0x368] sm:$0xff]  ;;  %v671_v33 = vld [vmem:[#allocation8 + $0x378] sm:$0xff] }
  0x42   : > { %743 = vmatpush.msra.mxu3 %v593_v63  ;;  %769 = vmatpush.msrb.mxu0 %v594_v1  ;;  %v660_v34 = vld [vmem:[#allocation8 + $0x320] sm:$0xff]  ;;  %v661_v35 = vld [vmem:[#allocation8 + $0x328] sm:$0xff]  ;;  %v662_v36 = vld [vmem:[#allocation8 + $0x330] sm:$0xff] }
  0x43   : > { %791 = vmatpush.msrb.mxu1 %v627_v47  ;;  %718 = vmatpush.msra.mxu2 %v584_v3  ;;  %v663_v37 = vld [vmem:[#allocation8 + $0x338] sm:$0xff]  ;;  %v652_v38 = vld [vmem:[#allocation8 + $0x2e0] sm:$0xff]  ;;  %v654_v40 = vld [vmem:[#allocation8 + $0x2f0] sm:$0xff] }
  0x44   : > { %744 = vmatpush.msra.mxu3 %v585_v4  ;;  %770 = vmatpush.msrb.mxu0 %v586_v5  ;;  %v655_v41 = vld [vmem:[#allocation8 + $0x2f8] sm:$0xff]  ;;  %v645_v43 = vld [vmem:[#allocation8 + $0x2a8] sm:$0xff]  ;;  %v646_v44 = vld [vmem:[#allocation8 + $0x2b0] sm:$0xff] }
  0x45   : > { %792 = vmatpush.msrb.mxu1 %v619_v51  ;;  %719 = vmatpush.msra.mxu2 %v576_v7  ;;  %v647_v45 = vld [vmem:[#allocation8 + $0x2b8] sm:$0xff]  ;;  %v637_v47 = vld [vmem:[#allocation8 + $0x268] sm:$0xff]  ;;  %v638_v48 = vld [vmem:[#allocation8 + $0x270] sm:$0xff] }
  0x46   : > { %745 = vmatpush.msra.mxu3 %v577_v8  ;;  %771 = vmatpush.msrb.mxu0 %v578_v9  ;;  %v639_v49 = vld [vmem:[#allocation8 + $0x278] sm:$0xff]  ;;  %v628_v50 = vld [vmem:[#allocation8 + $0x220] sm:$0xff]  ;;  %v629_v51 = vld [vmem:[#allocation8 + $0x228] sm:$0xff] }
  0x47   : > { %793 = vmatpush.msrb.mxu1 %v611_v55  ;;  %720 = vmatpush.msra.mxu2 %v568_v12  ;;  %v630_v52 = vld [vmem:[#allocation8 + $0x230] sm:$0xff]  ;;  %v631_v53 = vld [vmem:[#allocation8 + $0x238] sm:$0xff]  ;;  %v620_v54 = vld [vmem:[#allocation8 + $0x1e0] sm:$0xff] }
  0x48   : > { %746 = vmatpush.msra.mxu3 %v569_v13  ;;  %772 = vmatpush.msrb.mxu0 %v570_v15  ;;  %v621_v55 = vld [vmem:[#allocation8 + $0x1e8] sm:$0xff]  ;;  %v622_v56 = vld [vmem:[#allocation8 + $0x1f0] sm:$0xff]  ;;  %v612_v58 = vld [vmem:[#allocation8 + $0x1a0] sm:$0xff] }
  0x49   : > { %794 = vmatpush.msrb.mxu1 %v603_v61  ;;  %721 = vmatpush.msra.mxu2 %v560_v17  ;;  %v613_v59 = vld [vmem:[#allocation8 + $0x1a8] sm:$0xff]  ;;  %v615_v61 = vld [vmem:[#allocation8 + $0x1b8] sm:$0xff]  ;;  %v604_v62 = vld [vmem:[#allocation8 + $0x160] sm:$0xff] }
  0x4a   : > { %747 = vmatpush.msra.mxu3 %v561_v19  ;;  %773 = vmatpush.msrb.mxu0 %v562_v20  ;;  %v605_v63 = vld [vmem:[#allocation8 + $0x168] sm:$0xff]  ;;  %v607_v1 = vld [vmem:[#allocation8 + $0x178] sm:$0xff]  ;;  %v598_v4 = vld [vmem:[#allocation8 + $0x130] sm:$0xff] }
  0x4b   : > { %795 = vmatpush.msrb.mxu1 %v595_v2  ;;  %810 = vmatpush.msrb.mxu2 %v684_v22  ;;  %v596_v2 = vld [vmem:[#allocation8 + $0x120] sm:$0xff]  ;;  %v597_v3 = vld [vmem:[#allocation8 + $0x128] sm:$0xff]  ;;  %v599_v5 = vld [vmem:[#allocation8 + $0x138] sm:$0xff] }
  0x4c   : > { %836 = vmatpush.msrb.mxu3 %v685_v23  ;;  %862 = vmatpush.msra.mxu0 %v686_v24  ;;  %v589_v7 = vld [vmem:[#allocation8 + $0xe8] sm:$0xff]  ;;  %v590_v8 = vld [vmem:[#allocation8 + $0xf0] sm:$0xff]  ;;  %v591_v9 = vld [vmem:[#allocation8 + $0xf8] sm:$0xff] }
  0x4d   : > { %796 = vmatpush.msrb.mxu1 %v587_v6  ;;  %811 = vmatpush.msrb.mxu2 %v676_v26  ;;  %v588_v6 = vld [vmem:[#allocation8 + $0xe0] sm:$0xff]  ;;  %v582_v12 = vld [vmem:[#allocation8 + $0xb0] sm:$0xff]  ;;  %v583_v13 = vld [vmem:[#allocation8 + $0xb8] sm:$0xff] }
  0x4e   : > { %837 = vmatpush.msrb.mxu3 %v677_v27  ;;  %863 = vmatpush.msra.mxu0 %v678_v28  ;;  %v573_v15 = vld [vmem:[#allocation8 + $0x68] sm:$0xff]  ;;  %v575_v17 = vld [vmem:[#allocation8 + $0x78] sm:$0xff]  ;;  %v566_v20 = vld [vmem:[#allocation8 + $0x30] sm:$0xff] }
  0x4f   : > { %797 = vmatpush.msrb.mxu1 %v579_v10  ;;  %812 = vmatpush.msrb.mxu2 %v668_v30  ;;  %v580_v10 = vld [vmem:[#allocation8 + $0xa0] sm:$0xff]  ;;  %v565_v19 = vld [vmem:[#allocation8 + $0x28] sm:$0xff]  ;;  %v1347_v22 = vld [vmem:[#allocation7] ss:$0 sm:$0xff] }
  0x50   : > { %838 = vmatpush.msrb.mxu3 %v669_v31 }
  0x51   : > { %798 = vmatpush.msrb.mxu1 %v571_v16  ;;  %813 = vmatpush.msrb.mxu2 %v660_v34  ;;  %v574_v16 = vld [vmem:[#allocation8 + $0x70] sm:$0xff] }
  0x52   : > { %839 = vmatpush.msrb.mxu3 %v661_v35 }
  0x53   : > { %799 = vmatpush.msrb.mxu1 %v563_v21  ;;  %814 = vmatpush.msrb.mxu2 %v652_v38  ;;  %v567_v21 = vld [vmem:[#allocation8 + $0x38] sm:$0xff]  ;;  %v915_v38 = vlaneseq }
  0xa8   : > { %v494_v39 = vpop.f32.mrf.mxu0 }
  0xa9   : > { %v495_v42 = vadd.f32 %v1681_v32, %v494_v39  ;;  %v653_v39 = vld [vmem:[#allocation8 + $0x2e8] sm:$0xff] }
  0xaa   : > { %840 = vmatpush.msrb.mxu3 %v653_v39 }
  0xab   : > { %v503_v46 = vmax.f32 %v495_v42, 0.0  ;;  %v644_v42 = vld [vmem:[#allocation8 + $0x2a0] sm:$0xff] }
  0xac   : > { %815 = vmatpush.msrb.mxu2 %v644_v42  ;;  %841 = vmatpush.msrb.mxu3 %v645_v43 }
  0xad   : > { %507 = vst.msk [vmem:[%s1689_s17] sm:$0xff] %vm506_vm2, %v503_v46  ;;  %1261 = vmatmul.msk.f32.vlgmr.msra.gmra.mxu1 %vm506_vm2, %v503_v46  ;;  %v636_v46 = vld [vmem:[#allocation8 + $0x260] sm:$0xff] }
  0xae   : > { %888 = vmatpush.msra.mxu1 %v687_v25  ;;  %816 = vmatpush.msrb.mxu2 %v636_v46 }
  0xaf   : > { %842 = vmatpush.msrb.mxu3 %v637_v47 }
  0xb0   : > { %v497_v57 = vpop.f32.mrf.mxu0  ;;  %889 = vmatpush.msra.mxu1 %v679_v29  ;;  %817 = vmatpush.msrb.mxu2 %v628_v50 }
  0xb1   : > { %v498_v60 = vadd.f32 %v1681_v32, %v497_v57  ;;  %843 = vmatpush.msrb.mxu3 %v629_v51  ;;  %v623_v57 = vld [vmem:[#allocation8 + $0x1f8] sm:$0xff] }
  0xb2   : > { %890 = vmatpush.msra.mxu1 %v671_v33  ;;  %818 = vmatpush.msrb.mxu2 %v620_v54 }
  0xb3   : > { %v504_v0 = vmax.f32 %v498_v60, 0.0  ;;  %844 = vmatpush.msrb.mxu3 %v621_v55  ;;  %v614_v60 = vld [vmem:[#allocation8 + $0x1b0] sm:$0xff] }
  0xb4   : > { %891 = vmatpush.msra.mxu1 %v663_v37  ;;  %819 = vmatpush.msrb.mxu2 %v612_v58 }
  0xb5   : > { %508 = vst.msk [vmem:[%s1689_s17 + $0x8] sm:$0xff] %vm506_vm2, %v504_v0  ;;  %1262 = vmatmul.msk.f32.gmra.mxu1 %vm506_vm2, %v504_v0  ;;  %845 = vmatpush.msrb.mxu3 %v613_v59  ;;  %v606_v0 = vld [vmem:[#allocation8 + $0x170] sm:$0xff] }
  0xb6   : > { %892 = vmatpush.msra.mxu1 %v655_v41  ;;  %820 = vmatpush.msrb.mxu2 %v604_v62  ;;  %v916_v41 = vshrl.u32 %v915_v38, 7 }
  0xb7   : > { %846 = vmatpush.msrb.mxu3 %v605_v63 }
  0xb8   : > { %v500_v11 = vpop.f32.mrf.mxu0  ;;  %893 = vmatpush.msra.mxu1 %v647_v45  ;;  %821 = vmatpush.msrb.mxu2 %v596_v2  ;;  %v1702_v45 = vadd.s32 16, %v916_v41 }
  0xb9   : > { %v501_v14 = vadd.f32 %v1681_v32, %v500_v11  ;;  %v670_v32 = vld [vmem:[#allocation8 + $0x370] sm:$0xff]  ;;  %847 = vmatpush.msrb.mxu3 %v597_v3  ;;  %v581_v11 = vld [vmem:[#allocation8 + $0xa8] sm:$0xff] }
  0xba   : > { %864 = vmatpush.msra.mxu0 %v670_v32  ;;  %894 = vmatpush.msra.mxu1 %v639_v49  ;;  %vm925_vm3 = vcmp.lt.s32.totalorder %v1702_v45, 20 }
  0xbb   : > { %v505_v18 = vmax.f32 %v501_v14, 0.0  ;;  %822 = vmatpush.msrb.mxu2 %v588_v6  ;;  %848 = vmatpush.msrb.mxu3 %v589_v7  ;;  %v572_v14 = vld [vmem:[#allocation8 + $0x60] sm:$0xff] }
  0xbc   : > { %865 = vmatpush.msra.mxu0 %v662_v36  ;;  %895 = vmatpush.msra.mxu1 %v631_v53 }
  0xbd   : > { %509 = vst.msk [vmem:[%s1689_s17 + $0x10] sm:$0xff] %vm506_vm2, %v505_v18  ;;  %1263 = vmatmul.msk.f32.gmra.mxu1 %vm506_vm2, %v505_v18  ;;  %823 = vmatpush.msrb.mxu2 %v580_v10  ;;  %v564_v18 = vld [vmem:[#allocation8 + $0x20] sm:$0xff] }
  0xbe   : > { %866 = vmatpush.msra.mxu0 %v654_v40  ;;  %896 = vmatpush.msra.mxu1 %v623_v57 }
  0xbf   : > { %849 = vmatpush.msrb.mxu3 %v581_v11  ;;  %824 = vmatpush.msrb.mxu2 %v572_v14 }
  0xc0   : > { %867 = vmatpush.msra.mxu0 %v646_v44  ;;  %897 = vmatpush.msra.mxu1 %v615_v61  ;;  %v688_v44 = vld [vmem:[#allocation10] sm:$0xff] }
  0xc1   : > { %850 = vmatpush.msrb.mxu3 %v573_v15  ;;  %825 = vmatpush.msrb.mxu2 %v564_v18  ;;  %v692_v46 = vperm.slane %v688_v44, 2  ;;  %v693_v47 = vperm.slane %v688_v44, 3  ;;  %v690_v61 = vperm.slane %v688_v44, 0 }
  0xc2   : > { %868 = vmatpush.msra.mxu0 %v638_v48  ;;  %898 = vmatpush.msra.mxu1 %v607_v1  ;;  %v691_v48 = vperm.slane %v688_v44, 1 }
  0xc3   : > { %851 = vmatpush.msrb.mxu3 %v565_v19 }
  0xc4   : > { %869 = vmatpush.msra.mxu0 %v630_v52  ;;  %899 = vmatpush.msra.mxu1 %v599_v5 }
  0xc6   : > { %870 = vmatpush.msra.mxu0 %v622_v56  ;;  %900 = vmatpush.msra.mxu1 %v591_v9 }
  0xc8   : > { %871 = vmatpush.msra.mxu0 %v614_v60  ;;  %901 = vmatpush.msra.mxu1 %v583_v13 }
  0xca   : > { %872 = vmatpush.msra.mxu0 %v606_v0  ;;  %902 = vmatpush.msra.mxu1 %v575_v17 }
  0xcc   : > { %873 = vmatpush.msra.mxu0 %v598_v4  ;;  %903 = vmatpush.msra.mxu1 %v567_v21  ;;  %v696_v21 = vperm.slane %v688_v44, 6 }
  0xce   : > { %874 = vmatpush.msra.mxu0 %v590_v8 }
  0xd0   : > { %875 = vmatpush.msra.mxu0 %v582_v12 }
  0xd2   : > { %876 = vmatpush.msra.mxu0 %v574_v16 }
  0xd4   : > { %877 = vmatpush.msra.mxu0 %v566_v20 }
 0x12a   : > { %v548_v23 = vpop.f32.mrf.mxu1 }
 0x12b   : > { %v549_v24 = vadd.f32 %v1347_v22, %v548_v23 }
 0x12d   : > { %v557_v25 = vmax.f32 %v549_v24, 0.0 }
 0x12f   : > { %722 = vmatmul.f32.vlgmr.msra.gmra.mxu2 %v557_v25  ;;  %748 = vmatmul.f32.vlgmr.msra.gmra.mxu3 %v557_v25 }
 0x130   : > { %774 = vmatmul.f32.vlgmr.msrb.gmra.mxu0 %v557_v25  ;;  %800 = vmatmul.f32.vlgmr.msrb.gmra.mxu1 %v557_v25 }
 0x132   : > { %v551_v26 = vpop.f32.mrf.mxu1 }
 0x133   : > { %v552_v27 = vadd.f32 %v1347_v22, %v551_v26 }
 0x135   : > { %v558_v28 = vmax.f32 %v552_v27, 0.0 }
 0x137   : > { %725 = vmatmul.f32.gmra.mxu2 %v558_v28  ;;  %751 = vmatmul.f32.gmra.mxu3 %v558_v28 }
 0x138   : > { %777 = vmatmul.f32.gmra.mxu0 %v558_v28  ;;  %803 = vmatmul.f32.gmra.mxu1 %v558_v28 }
 0x13a   : > { %v554_v29 = vpop.f32.mrf.mxu1 }
 0x13b   : > { %v555_v30 = vadd.f32 %v1347_v22, %v554_v29  ;;  %v697_v22 = vperm.slane %v688_v44, 7 }
 0x13d   : > { %v559_v31 = vmax.f32 %v555_v30, 0.0 }
 0x13f   : > { %728 = vmatmul.f32.gmra.mxu2 %v559_v31  ;;  %754 = vmatmul.f32.gmra.mxu3 %v559_v31 }
 0x140   : > { %780 = vmatmul.f32.gmra.mxu0 %v559_v31  ;;  %806 = vmatmul.f32.gmra.mxu1 %v559_v31 }
 0x147   : > { %826 = vmatmul.f32.vlgmr.msrb.gmra.mxu2 %v557_v25  ;;  %852 = vmatmul.f32.vlgmr.msrb.gmra.mxu3 %v557_v25 }
 0x148   : > { %878 = vmatmul.f32.vlgmr.msra.gmra.mxu0 %v557_v25  ;;  %904 = vmatmul.f32.vlgmr.msra.gmra.mxu1 %v557_v25 }
 0x14f   : > { %829 = vmatmul.f32.gmra.mxu2 %v558_v28  ;;  %855 = vmatmul.f32.gmra.mxu3 %v558_v28 }
 0x150   : > { %881 = vmatmul.f32.gmra.mxu0 %v558_v28  ;;  %907 = vmatmul.f32.gmra.mxu1 %v558_v28 }
 0x157   : > { %832 = vmatmul.f32.gmra.mxu2 %v559_v31  ;;  %858 = vmatmul.f32.gmra.mxu3 %v559_v31 }
 0x158   : > { %884 = vmatmul.f32.gmra.mxu0 %v559_v31  ;;  %910 = vmatmul.f32.gmra.mxu1 %v559_v31 }
 0x1ad   : > { %v775_v32 = vpop.f32.mrf.mxu0  ;;  %v801_v33 = vpop.f32.mrf.mxu1 }
 0x1ae   : > { %v776_v59 = vadd.f32 %v775_v32, %v692_v46  ;;  %v802_v60 = vadd.f32 %v801_v33, %v693_v47  ;;  %v694_v33 = vperm.slane %v688_v44, 4 }
 0x1b2   : > { %v723_v34 = vpop.f32.mrf.mxu2  ;;  %v749_v35 = vpop.f32.mrf.mxu3 }
 0x1b3   : > { %v750_v62 = vadd.f32 %v749_v35, %v691_v48  ;;  %v724_v11 = vadd.f32 %v723_v34, %v690_v61  ;;  %v695_v34 = vperm.slane %v688_v44, 5 }
 0x1b5   : > { %v778_v36 = vpop.f32.mrf.mxu0  ;;  %v804_v37 = vpop.f32.mrf.mxu1 }
 0x1b6   : > { %v779_v53 = vadd.f32 %v778_v36, %v692_v46  ;;  %v805_v54 = vadd.f32 %v804_v37, %v693_v47 }
 0x1b8   : > { %v973_v1 = vmax.f32 %v776_v59, %v779_v53  ;;  %v981_v2 = vmax.f32 %v802_v60, %v805_v54 }
 0x1ba   : > { %v726_v39 = vpop.f32.mrf.mxu2  ;;  %v752_v40 = vpop.f32.mrf.mxu3 }
 0x1bb   : > { %v753_v56 = vadd.f32 %v752_v40, %v691_v48  ;;  %v727_v5 = vadd.f32 %v726_v39, %v690_v61 }
 0x1bd   : > { %v781_v42 = vpop.f32.mrf.mxu0  ;;  %v807_v43 = vpop.f32.mrf.mxu1  ;;  %v965_v6 = vmax.f32 %v750_v62, %v753_v56  ;;  %v957_v14 = vmax.f32 %v724_v11, %v727_v5 }
 0x1be   : > { %v782_v51 = vadd.f32 %v781_v42, %v692_v46  ;;  %v808_v52 = vadd.f32 %v807_v43, %v693_v47 }
 0x1c0   : > { %v950_v63 = vsel %vm925_vm3, %v782_v51, -inf  ;;  %v951_v0 = vsel %vm925_vm3, %v808_v52, -inf }
 0x1c1   : > { %v974_v7 = vmax.f32 %v973_v1, %v950_v63  ;;  %v982_v8 = vmax.f32 %v981_v2, %v951_v0 }
 0x1c2   : > { %v729_v49 = vpop.f32.mrf.mxu2  ;;  %v755_v50 = vpop.f32.mrf.mxu3 }
 0x1c3   : > { %v756_v55 = vadd.f32 %v755_v50, %v691_v48  ;;  %v730_v3 = vadd.f32 %v729_v49, %v690_v61  ;;  %v975_v17 = vrot.slane %v974_v7, 4  ;;  %v983_v18 = vrot.slane %v982_v8, 4 }
 0x1c5   : > { %v879_v57 = vpop.f32.mrf.mxu0  ;;  %v905_v58 = vpop.f32.mrf.mxu1  ;;  %v949_v4 = vsel %vm925_vm3, %v756_v55, -inf  ;;  %v948_v13 = vsel %vm925_vm3, %v730_v3, -inf  ;;  %v976_v23 = vmax.f32 %v974_v7, %v975_v17  ;;  %v984_v24 = vmax.f32 %v982_v8, %v983_v18 }
 0x1c6   : > { %v966_v12 = vmax.f32 %v965_v6, %v949_v4  ;;  %v958_v19 = vmax.f32 %v957_v14, %v948_v13  ;;  %v880_v31 = vadd.f32 %v879_v57, %v696_v21  ;;  %v906_v32 = vadd.f32 %v905_v58, %v697_v22 }
 0x1c7   : > { %v977_v37 = vrot.slane %v976_v23, 2  ;;  %v985_v38 = vrot.slane %v984_v24, 2 }
 0x1c8   : > { %v967_v20 = vrot.slane %v966_v12, 4  ;;  %v959_v27 = vrot.slane %v958_v19, 4 }
 0x1c9   : > { %v978_v52 = vmax.f32 %v976_v23, %v977_v37  ;;  %v986_v53 = vmax.f32 %v984_v24, %v985_v38 }
 0x1ca   : > { %v827_v9 = vpop.f32.mrf.mxu2  ;;  %v853_v10 = vpop.f32.mrf.mxu3  ;;  %v968_v28 = vmax.f32 %v966_v12, %v967_v20  ;;  %v960_v41 = vmax.f32 %v958_v19, %v959_v27 }
 0x1cb   : > { %v828_v54 = vadd.f32 %v827_v9, %v694_v33  ;;  %v854_v55 = vadd.f32 %v853_v10, %v695_v34  ;;  %v979_v10 = vrot.slane %v978_v52, 1  ;;  %v987_v14 = vrot.slane %v986_v53, 1 }
 0x1cc   : > { %v969_v42 = vrot.slane %v968_v28, 2  ;;  %v961_v62 = vrot.slane %v960_v41, 2 }
 0x1cd   : > { %v882_v15 = vpop.f32.mrf.mxu0  ;;  %v908_v16 = vpop.f32.mrf.mxu1  ;;  %v980_v24 = vmax.f32 %v978_v52, %v979_v10 }
 0x1ce   : > { %v883_v29 = vadd.f32 %v882_v15, %v696_v21  ;;  %v909_v30 = vadd.f32 %v908_v16, %v697_v22  ;;  %v970_v63 = vmax.f32 %v968_v28, %v969_v42  ;;  %v962_v15 = vmax.f32 %v960_v41, %v961_v62 }
 0x1d0   : > { %v1005_v43 = vmax.f32 %v880_v31, %v883_v29  ;;  %v1013_v46 = vmax.f32 %v906_v32, %v909_v30  ;;  %v971_v11 = vrot.slane %v970_v63, 1 }
 0x1d2   : > { %v830_v25 = vpop.f32.mrf.mxu2  ;;  %v856_v26 = vpop.f32.mrf.mxu3 }
 0x1d3   : > { %v831_v47 = vadd.f32 %v830_v25, %v694_v33  ;;  %v857_v48 = vadd.f32 %v856_v26, %v695_v34  ;;  %v988_v25 = vmax.f32 %v986_v53, %v987_v14  ;;  %v963_v26 = vrot.slane %v962_v15, 1 }
 0x1d5   : > { %v885_v35 = vpop.f32.mrf.mxu0  ;;  %v911_v36 = vpop.f32.mrf.mxu1  ;;  %v989_v0 = vmax.f32 %v828_v54, %v831_v47  ;;  %v997_v1 = vmax.f32 %v854_v55, %v857_v48 }
 0x1d6   : > { %v886_v39 = vadd.f32 %v885_v35, %v696_v21  ;;  %v912_v40 = vadd.f32 %v911_v36, %v697_v22  ;;  %v972_v22 = vmax.f32 %v970_v63, %v971_v11  ;;  %v1031_v35 = vrot.slane %v988_v25, 5 }
 0x1d7   : > { %v964_v36 = vmax.f32 %v962_v15, %v963_v26 }
 0x1d8   : > { %v954_v49 = vsel %vm925_vm3, %v886_v39, -inf  ;;  %v955_v50 = vsel %vm925_vm3, %v912_v40, -inf  ;;  %v1029_v31 = vrot.slane %v972_v22, 7 }
 0x1d9   : > { %v1006_v51 = vmax.f32 %v1005_v43, %v954_v49  ;;  %v1014_v44 = vmax.f32 %v1013_v46, %v955_v50 }
 0x1da   : > { %v833_v56 = vpop.f32.mrf.mxu2  ;;  %v859_v57 = vpop.f32.mrf.mxu3  ;;  %v1037_v41 = vsel %vm1036_vm4, %v964_v36, %v1029_v31 }
 0x1db   : > { %v1007_v58 = vrot.slane %v1006_v51, 4  ;;  %v1015_v59 = vrot.slane %v1014_v44, 4  ;;  %v834_v60 = vadd.f32 %v833_v56, %v694_v33  ;;  %v860_v61 = vadd.f32 %v859_v57, %v695_v34 }
 0x1dc   : > { %v1030_v34 = vrot.slane %v980_v24, 6 }
 0x1dd   : > { %v1008_v2 = vmax.f32 %v1006_v51, %v1007_v58  ;;  %v1016_v3 = vmax.f32 %v1014_v44, %v1015_v59  ;;  %v952_v4 = vsel %vm925_vm3, %v834_v60, -inf  ;;  %v953_v5 = vsel %vm925_vm3, %v860_v61, -inf }
 0x1de   : > { %v990_v6 = vmax.f32 %v989_v0, %v952_v4  ;;  %v998_v7 = vmax.f32 %v997_v1, %v953_v5  ;;  %v1039_v46 = vsel %vm1038_vm5, %v1030_v34, %v1031_v35 }
 0x1df   : > { %v1009_v8 = vrot.slane %v1008_v2, 2  ;;  %v1017_v9 = vrot.slane %v1016_v3, 2  ;;  %v1041_v49 = vsel %vm1040_vm6, %v1037_v41, %v1039_v46 }
 0x1e0   : > { %v991_v12 = vrot.slane %v990_v6, 4  ;;  %v999_v13 = vrot.slane %v998_v7, 4 }
 0x1e1   : > { %v1010_v16 = vmax.f32 %v1008_v2, %v1009_v8  ;;  %v1018_v17 = vmax.f32 %v1016_v3, %v1017_v9 }
 0x1e2   : > { %v992_v18 = vmax.f32 %v990_v6, %v991_v12  ;;  %v1000_v19 = vmax.f32 %v998_v7, %v999_v13 }
 0x1e3   : > { %v1011_v20 = vrot.slane %v1010_v16, 1  ;;  %v1019_v21 = vrot.slane %v1018_v17, 1 }
 0x1e4   : > { %v993_v23 = vrot.slane %v992_v18, 2  ;;  %v1001_v45 = vrot.slane %v1000_v19, 2 }
 0x1e5   : > { %v1012_v27 = vmax.f32 %v1010_v16, %v1011_v20  ;;  %v1020_v28 = vmax.f32 %v1018_v17, %v1019_v21 }
 0x1e6   : > { %v994_v29 = vmax.f32 %v992_v18, %v993_v23  ;;  %v1002_v30 = vmax.f32 %v1000_v19, %v1001_v45 }
 0x1e7   : > { %v1034_v37 = vrot.slane %v1012_v27, 2  ;;  %v1035_v38 = vrot.slane %v1020_v28, 1 }
 0x1e8   : > { %v995_v32 = vrot.slane %v994_v29, 1  ;;  %v1003_v33 = vrot.slane %v1002_v30, 1 }
 0x1e9   : > { %v1045_v47 = vsel %vm1044_vm7, %v1034_v37, %v1035_v38 }
 0x1ea   : > { %v996_v39 = vmax.f32 %v994_v29, %v995_v32  ;;  %v1004_v40 = vmax.f32 %v1002_v30, %v1003_v33 }
 0x1ec   : > { %v1032_v42 = vrot.slane %v996_v39, 4  ;;  %v1033_v43 = vrot.slane %v1004_v40, 3 }
 0x1ee   : > { %v1043_v48 = vsel %vm1042_vm8, %v1032_v42, %v1033_v43 }
 0x1ef   : > { %v1047_v50 = vsel %vm1046_vm9, %v1043_v48, %v1045_v47 }
 0x1f0   : > { %v1049_v51 = vsel %vm1048_vm10, %v1041_v49, %v1047_v50 }
 0x1f1   : > { %1057 = vst [vmem:[%s449_s18] sm:$0xff] %v1049_v51 }
 0x1f2 PF: > { %s22_s29 = sadd.s32 1, %s1532_s29   ;;  %s1748_s27 = smov %s1528_s28 }
 0x1f3   : > { %p19_p8 = scmp.ge.s32.totalorder %s22_s29, 4   ;;  %s1749_s28 = smov %s1751_s11 }
 0x1f5   :  { %21 = sbr.rel (!%p19_p8) target bundleno = 6 (0x6), region = 122 }
 0x1fa   :  { %1102 = vsyncpa [#allocation4], 1 }
 0x1fb   :  { %1104 = vsyncpa [#allocation4 + $0x1], 1 }
 0x1fc   :  { %1105 = vsyncpa [#allocation6], 1 }
 0x1fd   :  { %1106 = vsyncpa [#allocation9], 1 }

// kernel: pointnet_dense_cls.5
= control target key start
LH: loop header
LB: loop body
LE: loop exit
PB: predicated region body
PF: predicated region fallthrough
CT: control target
= control target key end

     0   :  { %s3537_s0 = inlined_call_operand.vmem [shape: f32[2,24,64], index: 0, kind: input, shape index: {}]   ;;  %s3538_s1 = inlined_call_operand.vmem [shape: f32[2,1,1024], index: 1, kind: input, shape index: {}]   ;;  %s3539_s2 = inlined_call_operand.hbm [shape: f32[64,512], index: 2, kind: input, shape index: {}]   ;;  %s3540_s3 = inlined_call_operand.hbm [shape: f32[1024,512], index: 3, kind: input, shape index: {}]   ;;  %s3541_s4 = inlined_call_operand.hbm [shape: f32[1,512], index: 4, kind: input, shape index: {}]   ;;  %s3542_s5 = inlined_call_operand.hbm [shape: f32[512,256], index: 5, kind: input, shape index: {}]   ;;  %s3543_s6 = inlined_call_operand.hbm [shape: f32[1,256], index: 6, kind: input, shape index: {}]   ;;  %s3544_s7 = inlined_call_operand.hbm [shape: f32[256,128], index: 7, kind: input, shape index: {}]   ;;  %s3545_s8 = inlined_call_operand.hbm [shape: f32[1,128], index: 8, kind: input, shape index: {}]   ;;  %s3546_s9 = inlined_call_operand.vmem [shape: f32[128,2], index: 9, kind: input, shape index: {}]   ;;  %s3547_s10 = inlined_call_operand.hbm [shape: f32[1,2], index: 10, kind: input, shape index: {}]   ;;  %s3548_s11 = inlined_call_operand.vmem [shape: f32[2,24,2], index: 11, kind: output, shape index: {}]  }
   0x1   :  { %3550 = sst [smem:[#allocation21_spill]] %s3540_s3 }
   0x2   :  { %3551 = sst [smem:[#allocation22_spill]] %s3542_s5 }
   0x3   :  { %3552 = sst [smem:[#allocation23_spill]] %s3548_s11 }
   0x4   :  { %16 = vsyncpa [#allocation3], 0 }
   0x5   :  { %17 = vsyncpa [#allocation5], 0 }
   0x6   :  { %18 = vsyncpa [#allocation8], 0 }
   0x7   :  { %19 = vsyncpa [#allocation11], 0 }
   0x8   :  { %20 = vsyncpa [#allocation14], 0  ;;  %s3150_s17 = smov 0   ;;  %s3152_s18 = smov 0  }
   0x9   :  { %s3154_s19 = smov 0  }
   0xa LB: > { %3553 = sst [smem:[#allocation20_spill]] %s3074_s19  ;;  %s2628_s20 = sadd.s32 4294967295, %s3074_s19   ;;  %s3074_s19 = sphi %s3154_s19, %s3563_s19   ;;  %s3070_s18 = sphi %s3152_s18, %s3562_s18   ;;  %s3066_s17 = sphi %s3150_s17, %s3561_s17  }
   0xb   : > { %p2630_p0 = scmp.ge.s32.totalorder %s3074_s19, 1  ;;  %p314_p1 = scmp.lt.s32.totalorder %s3074_s19, 3 }
   0xc   : > { %p3168_p2 = scmp.eq.s32.totalorder %s2628_s20, 0  ;;  %s3555_s3 = sld [smem:[#allocation21_spill]] }
   0xd   : > { %p3175_p3 = pnand %p2630_p0, %p314_p1  ;;  %s3557_s5 = sld [smem:[#allocation22_spill]] }
   0xe   : > { %s3076_s29 = smov [#allocation4]   ;;  %s3077_s13 = smov [#allocation7]  }
   0xf   : > { %p2699_p4 = pneg %p3175_p3  ;;  %s341_s30 = sshll.u32 %s3076_s29, 4  ;;  %s342_s30 = int_to_ptr.vmem [resolvable:$true] %s341_s30 }
  0x10   : > { %s367_s14 = sshll.u32 %s3077_s13, 4  ;;  %s3078_s15 = smov 512   ;;  %s368_s14 = int_to_ptr.vmem [resolvable:$true] %s367_s14 }
  0x11   : > { %p3186_p5 = pnand %p3168_p2, %p2699_p4  ;;  %s3079_s16 = smov 32  }
  0x12   : > { %s339_s24 = sshll.u32 %s3555_s3, 4  ;;  %s391_s23 = sshll.u32 %s3544_s7, 4  ;;  %s340_s24 = int_to_ptr.hbm [resolvable:$true] %s339_s24  ;;  %s392_s23 = int_to_ptr.hbm [resolvable:$true] %s391_s23 }
  0x13   : > { %s365_s28 = sshll.u32 %s3557_s5, 4  ;;  %s3080_s26 = smov 256   ;;  %s366_s28 = int_to_ptr.hbm [resolvable:$true] %s365_s28 }
  0x14   : > { %2705 = dma.hbm_to_vmem [thread:$0]  (!%p3186_p5), %s340_s24, 65536, %s342_s30, [#allocation5], %s3078_s15, %s3078_s15, %s3079_s16  }
  0x15   : > { %s3081_s27 = smov 16   ;;  %s3082_s29 = smov [#allocation10]  }
  0x16   : > { %2711 = dma.hbm_to_vmem [thread:$0]  (!%p3186_p5), %s366_s28, 16384, %s368_s14, [#allocation8], %s3080_s26, %s3080_s26, %s3081_s27  }
  0x17   : > { %s393_s3 = sshll.u32 %s3082_s29, 4  ;;  %s3083_s13 = smov 128   ;;  %s394_s3 = int_to_ptr.vmem [resolvable:$true] %s393_s3 }
  0x18   : > { %s3084_s5 = smov 8   ;;  %s38_s19 = sadd.s32 1, %s3070_s18 }
  0x19   : > { %2717 = dma.hbm_to_vmem [thread:$0]  (!%p3186_p5), %s392_s23, 4096, %s394_s3, [#allocation11], %s3083_s13, %s3083_s13, %s3084_s5  }
  0x1a   : > { %s325_s30 = sshll.u32 %s3539_s2, 4  ;;  %p40_p6 = scmp.ge.s32.totalorder %s38_s19, 2  ;;  %s326_s30 = int_to_ptr.hbm [resolvable:$true] %s325_s30 }
  0x1b   : > { %s354_s28 = sshll.u32 %s3541_s4, 4  ;;  %s3085_s14 = smov [#allocation2]   ;;  %s355_s28 = int_to_ptr.hbm [resolvable:$true] %s354_s28 }
  0x1c   : > { %s3565_s19 = smov (%p40_p6, %s38_s19), 0  ;;  %s327_s26 = sshll.u32 %s3085_s14, 4  ;;  %s328_s26 = int_to_ptr.vmem [resolvable:$true] %s327_s26 }
  0x1d   : > { %2702 = dma.hbm_to_vmem [thread:$0]  (!%p3186_p5), %s326_s30, 4096, %s328_s26, [#allocation3], %s3078_s15, %s3078_s15, %s3079_s16  }
  0x1e   : > { %s3086_s3 = smov [#allocation6]   ;;  %s380_s27 = sshll.u32 %s3543_s6, 4  ;;  %s381_s27 = int_to_ptr.hbm [resolvable:$true] %s380_s27 }
  0x1f   : > { %s356_s5 = sshll.u32 %s3086_s3, 4  ;;  %s406_s24 = sshll.u32 %s3545_s8, 4  ;;  %s357_s5 = int_to_ptr.vmem [resolvable:$true] %s356_s5  ;;  %s407_s24 = int_to_ptr.hbm [resolvable:$true] %s406_s24 }
  0x20   : > { %2708 = dma.hbm_to_vmem [thread:$0]  (!%p3186_p5), %s355_s28, 64, %s357_s5, [#allocation5]  }
  0x21   : > { %s3087_s20 = smov [#allocation9]   ;;  %s3088_s15 = smov [#allocation12]  }
  0x22   : > { %s382_s22 = sshll.u32 %s3087_s20, 4  ;;  %s408_s16 = sshll.u32 %s3088_s15, 4  ;;  %s383_s22 = int_to_ptr.vmem [resolvable:$true] %s382_s22  ;;  %s409_s16 = int_to_ptr.vmem [resolvable:$true] %s408_s16 }
  0x23   : > { %2714 = dma.hbm_to_vmem [thread:$0]  (!%p3186_p5), %s381_s27, 32, %s383_s22, [#allocation8]  }
  0x24   : > { %s421_s26 = sshll.u32 %s3547_s10, 4  ;;  %s3089_s28 = smov [#allocation13]   ;;  %s422_s26 = int_to_ptr.hbm [resolvable:$true] %s421_s26 }
  0x25   : > { %2720 = dma.hbm_to_vmem [thread:$0]  (!%p3186_p5), %s407_s24, 16, %s409_s16, [#allocation11]  }
  0x26   : > { %s423_s3 = sshll.u32 %s3089_s28, 4  ;;  %456 = sbr.rel (%p3175_p3) target bundleno = 1289 (0x509), region = 64  ;;  %s424_s3 = int_to_ptr.vmem [resolvable:$true] %s423_s3 }
  0x27   : > { %2723 = dma.hbm_to_vmem [thread:$0]  (!%p3186_p5), %s422_s26, 16, %s424_s3, [#allocation14]  }
  0x2b   : > { %3045 = dma.done.wait (%p3168_p2), [#allocation3], 4096  }
  0x2c   : > { %3047 = vsyncadd (%p3168_p2), [#allocation3], 4294963200 }
  0x2d   : > { %3049 = dma.done.wait (%p3168_p2), [#allocation5], 65600  }
  0x2e   : > { %3051 = vsyncadd (%p3168_p2), [#allocation5], 4294901696 }
  0x2f   : > { %3053 = dma.done.wait (%p3168_p2), [#allocation8], 16416  }
  0x30   : > { %3055 = vsyncadd (%p3168_p2), [#allocation8], 4294950880 }
  0x31   : > { %3057 = dma.done.wait (%p3168_p2), [#allocation11], 4112  }
  0x32   : > { %3059 = vsyncadd (%p3168_p2), [#allocation11], 4294963184 }
  0x33   : > { %3061 = dma.done.wait (%p3168_p2), [#allocation14], 16  }
  0x34   : > { %3063 = vsyncadd (%p3168_p2), [#allocation14], 4294967280  ;;  %v696_v0 = vld [vmem:[#allocation4 + $0x3e0] sm:$0xff]  ;;  %p545_p7 = scmp.lt.s32.totalorder %s3066_s17, 1  ;;  %vm1777_vm0 = vcmask 523264   ;;  %vm2410_vm1 = vcmask 15360  }
  0x35   : > { %v760_v1 = vld [vmem:[#allocation4 + $0x5e0] sm:$0xff]  ;;  %1121 = vmatpush.msra.mxu1 %v696_v0  ;;  %s3559_s27 = sld [smem:[#allocation23_spill]] }
  0x36   : > { %v824_v2 = vld [vmem:[#allocation4 + $0x7e0] sm:$0xff]  ;;  %1141 = vmatpush.msra.mxu2 %v760_v1  ;;  %s3567_s17 = smov (!%p545_p7, %s3066_s17), 1 }
  0x37   : > { %v692_v3 = vld [vmem:[#allocation4 + $0x3c0] sm:$0xff]  ;;  %1161 = vmatpush.msra.mxu3 %v824_v2  ;;  %s2650_s21 = sshll.u32 %s3567_s17, 3  ;;  %s2666_s11 = smul.u32 24, %s3567_s17 }
  0x38   : > { %v756_v4 = vld [vmem:[#allocation4 + $0x5c0] sm:$0xff]  ;;  %1122 = vmatpush.msra.mxu1 %v692_v3  ;;  %s557_s5 = scalar_lea.vmem %s3538_s1, %s2650_s21 }
  0x39   : > { %v820_v5 = vld [vmem:[#allocation4 + $0x7c0] sm:$0xff]  ;;  %1142 = vmatpush.msra.mxu2 %v756_v4  ;;  %s3323_s29 = scalar_lea.vmem %s3537_s0, %s2666_s11 }
  0x3a   : > { %v688_v6 = vld [vmem:[#allocation4 + $0x3a0] sm:$0xff]  ;;  %1162 = vmatpush.msra.mxu3 %v820_v5 }
  0x3b   : > { %v752_v7 = vld [vmem:[#allocation4 + $0x5a0] sm:$0xff]  ;;  %1123 = vmatpush.msra.mxu1 %v688_v6 }
  0x3c   : > { %v816_v8 = vld [vmem:[#allocation4 + $0x7a0] sm:$0xff]  ;;  %1143 = vmatpush.msra.mxu2 %v752_v7 }
  0x3d   : > { %v684_v9 = vld [vmem:[#allocation4 + $0x380] sm:$0xff]  ;;  %1163 = vmatpush.msra.mxu3 %v816_v8 }
  0x3e   : > { %v748_v10 = vld [vmem:[#allocation4 + $0x580] sm:$0xff]  ;;  %1124 = vmatpush.msra.mxu1 %v684_v9 }
  0x3f   : > { %v632_v11 = vld [vmem:[#allocation4 + $0x1e0] sm:$0xff]  ;;  %1144 = vmatpush.msra.mxu2 %v748_v10 }
  0x40   : > { %v812_v12 = vld [vmem:[#allocation4 + $0x780] sm:$0xff]  ;;  %1101 = vmatpush.msra.mxu0 %v632_v11 }
  0x41   : > { %v628_v13 = vld [vmem:[#allocation4 + $0x1c0] sm:$0xff]  ;;  %1164 = vmatpush.msra.mxu3 %v812_v12 }
  0x42   : > { %v680_v14 = vld [vmem:[#allocation4 + $0x360] sm:$0xff]  ;;  %1102 = vmatpush.msra.mxu0 %v628_v13 }
  0x43   : > { %v744_v15 = vld [vmem:[#allocation4 + $0x560] sm:$0xff]  ;;  %1125 = vmatpush.msra.mxu1 %v680_v14 }
  0x44   : > { %v808_v16 = vld [vmem:[#allocation4 + $0x760] sm:$0xff]  ;;  %1145 = vmatpush.msra.mxu2 %v744_v15 }
  0x45   : > { %v624_v17 = vld [vmem:[#allocation4 + $0x1a0] sm:$0xff]  ;;  %1165 = vmatpush.msra.mxu3 %v808_v16 }
  0x46   : > { %v676_v18 = vld [vmem:[#allocation4 + $0x340] sm:$0xff]  ;;  %1103 = vmatpush.msra.mxu0 %v624_v17 }
  0x47   : > { %v740_v19 = vld [vmem:[#allocation4 + $0x540] sm:$0xff]  ;;  %1126 = vmatpush.msra.mxu1 %v676_v18 }
  0x48   : > { %v804_v20 = vld [vmem:[#allocation4 + $0x740] sm:$0xff]  ;;  %1146 = vmatpush.msra.mxu2 %v740_v19 }
  0x49   : > { %v620_v21 = vld [vmem:[#allocation4 + $0x180] sm:$0xff]  ;;  %1166 = vmatpush.msra.mxu3 %v804_v20 }
  0x4a   : > { %v672_v22 = vld [vmem:[#allocation4 + $0x320] sm:$0xff]  ;;  %1104 = vmatpush.msra.mxu0 %v620_v21 }
  0x4b   : > { %v736_v23 = vld [vmem:[#allocation4 + $0x520] sm:$0xff]  ;;  %1127 = vmatpush.msra.mxu1 %v672_v22 }
  0x4c   : > { %v800_v24 = vld [vmem:[#allocation4 + $0x720] sm:$0xff]  ;;  %1147 = vmatpush.msra.mxu2 %v736_v23 }
  0x4d   : > { %v616_v25 = vld [vmem:[#allocation4 + $0x160] sm:$0xff]  ;;  %1167 = vmatpush.msra.mxu3 %v800_v24 }
  0x4e   : > { %v668_v26 = vld [vmem:[#allocation4 + $0x300] sm:$0xff]  ;;  %1105 = vmatpush.msra.mxu0 %v616_v25 }
  0x4f   : > { %v732_v27 = vld [vmem:[#allocation4 + $0x500] sm:$0xff]  ;;  %1128 = vmatpush.msra.mxu1 %v668_v26 }
  0x50   : > { %v796_v28 = vld [vmem:[#allocation4 + $0x700] sm:$0xff]  ;;  %1148 = vmatpush.msra.mxu2 %v732_v27 }
  0x51   : > { %v612_v29 = vld [vmem:[#allocation4 + $0x140] sm:$0xff]  ;;  %1168 = vmatpush.msra.mxu3 %v796_v28 }
  0x52   : > { %v664_v30 = vld [vmem:[#allocation4 + $0x2e0] sm:$0xff]  ;;  %1106 = vmatpush.msra.mxu0 %v612_v29 }
  0x53   : > { %v728_v31 = vld [vmem:[#allocation4 + $0x4e0] sm:$0xff]  ;;  %1129 = vmatpush.msra.mxu1 %v664_v30 }
  0x54   : > { %v792_v32 = vld [vmem:[#allocation4 + $0x6e0] sm:$0xff]  ;;  %1149 = vmatpush.msra.mxu2 %v728_v31 }
  0x55   : > { %v608_v33 = vld [vmem:[#allocation4 + $0x120] sm:$0xff]  ;;  %1169 = vmatpush.msra.mxu3 %v792_v32 }
  0x56   : > { %v660_v34 = vld [vmem:[#allocation4 + $0x2c0] sm:$0xff]  ;;  %1107 = vmatpush.msra.mxu0 %v608_v33 }
  0x57   : > { %v724_v35 = vld [vmem:[#allocation4 + $0x4c0] sm:$0xff]  ;;  %1130 = vmatpush.msra.mxu1 %v660_v34 }
  0x58   : > { %v788_v36 = vld [vmem:[#allocation4 + $0x6c0] sm:$0xff]  ;;  %1150 = vmatpush.msra.mxu2 %v724_v35 }
  0x59   : > { %v604_v37 = vld [vmem:[#allocation4 + $0x100] sm:$0xff]  ;;  %1170 = vmatpush.msra.mxu3 %v788_v36 }
  0x5a   : > { %v656_v38 = vld [vmem:[#allocation4 + $0x2a0] sm:$0xff]  ;;  %1108 = vmatpush.msra.mxu0 %v604_v37 }
  0x5b   : > { %v720_v39 = vld [vmem:[#allocation4 + $0x4a0] sm:$0xff]  ;;  %1131 = vmatpush.msra.mxu1 %v656_v38 }
  0x5c   : > { %v784_v40 = vld [vmem:[#allocation4 + $0x6a0] sm:$0xff]  ;;  %1151 = vmatpush.msra.mxu2 %v720_v39 }
  0x5d   : > { %v600_v41 = vld [vmem:[#allocation4 + $0xe0] sm:$0xff]  ;;  %1171 = vmatpush.msra.mxu3 %v784_v40 }
  0x5e   : > { %v652_v42 = vld [vmem:[#allocation4 + $0x280] sm:$0xff]  ;;  %1109 = vmatpush.msra.mxu0 %v600_v41 }
  0x5f   : > { %v716_v43 = vld [vmem:[#allocation4 + $0x480] sm:$0xff]  ;;  %1132 = vmatpush.msra.mxu1 %v652_v42 }
  0x60   : > { %v780_v44 = vld [vmem:[#allocation4 + $0x680] sm:$0xff]  ;;  %1152 = vmatpush.msra.mxu2 %v716_v43 }
  0x61   : > { %v596_v45 = vld [vmem:[#allocation4 + $0xc0] sm:$0xff]  ;;  %1172 = vmatpush.msra.mxu3 %v780_v44 }
  0x62   : > { %v648_v46 = vld [vmem:[#allocation4 + $0x260] sm:$0xff]  ;;  %1110 = vmatpush.msra.mxu0 %v596_v45 }
  0x63   : > { %v712_v47 = vld [vmem:[#allocation4 + $0x460] sm:$0xff]  ;;  %1133 = vmatpush.msra.mxu1 %v648_v46 }
  0x64   : > { %v776_v48 = vld [vmem:[#allocation4 + $0x660] sm:$0xff]  ;;  %1153 = vmatpush.msra.mxu2 %v712_v47 }
  0x65   : > { %v592_v49 = vld [vmem:[#allocation4 + $0xa0] sm:$0xff]  ;;  %1173 = vmatpush.msra.mxu3 %v776_v48 }
  0x66   : > { %v644_v50 = vld [vmem:[#allocation4 + $0x240] sm:$0xff]  ;;  %1111 = vmatpush.msra.mxu0 %v592_v49 }
  0x67   : > { %v708_v51 = vld [vmem:[#allocation4 + $0x440] sm:$0xff]  ;;  %1134 = vmatpush.msra.mxu1 %v644_v50 }
  0x68   : > { %v772_v52 = vld [vmem:[#allocation4 + $0x640] sm:$0xff]  ;;  %1154 = vmatpush.msra.mxu2 %v708_v51 }
  0x69   : > { %v588_v53 = vld [vmem:[#allocation4 + $0x80] sm:$0xff]  ;;  %1174 = vmatpush.msra.mxu3 %v772_v52 }
  0x6a   : > { %v640_v54 = vld [vmem:[#allocation4 + $0x220] sm:$0xff]  ;;  %1112 = vmatpush.msra.mxu0 %v588_v53 }
  0x6b   : > { %v704_v55 = vld [vmem:[#allocation4 + $0x420] sm:$0xff]  ;;  %1135 = vmatpush.msra.mxu1 %v640_v54 }
  0x6c   : > { %v768_v56 = vld [vmem:[#allocation4 + $0x620] sm:$0xff]  ;;  %1155 = vmatpush.msra.mxu2 %v704_v55 }
  0x6d   : > { %v584_v57 = vld [vmem:[#allocation4 + $0x60] sm:$0xff]  ;;  %1175 = vmatpush.msra.mxu3 %v768_v56 }
  0x6e   : > { %v636_v58 = vld [vmem:[#allocation4 + $0x200] sm:$0xff]  ;;  %1113 = vmatpush.msra.mxu0 %v584_v57 }
  0x6f   : > { %v700_v59 = vld [vmem:[#allocation4 + $0x400] sm:$0xff]  ;;  %1136 = vmatpush.msra.mxu1 %v636_v58 }
  0x70   : > { %v764_v60 = vld [vmem:[#allocation4 + $0x600] sm:$0xff]  ;;  %1156 = vmatpush.msra.mxu2 %v700_v59 }
  0x71   : > { %v952_v61 = vld [vmem:[#allocation4 + $0xbe0] sm:$0xff]  ;;  %1176 = vmatpush.msra.mxu3 %v764_v60 }
  0x72   : > { %v1016_v62 = vld [vmem:[#allocation4 + $0xde0] sm:$0xff]  ;;  %1201 = vmatpush.msrb.mxu1 %v952_v61 }
  0x73   : > { %v1080_v63 = vld [vmem:[#allocation4 + $0xfe0] sm:$0xff]  ;;  %1221 = vmatpush.msrb.mxu2 %v1016_v62 }
  0x74   : > { %v580_v0 = vld [vmem:[#allocation4 + $0x40] sm:$0xff]  ;;  %1241 = vmatpush.msrb.mxu3 %v1080_v63 }
  0x75   : > { %v948_v1 = vld [vmem:[#allocation4 + $0xbc0] sm:$0xff]  ;;  %1114 = vmatpush.msra.mxu0 %v580_v0 }
  0x76   : > { %v1012_v2 = vld [vmem:[#allocation4 + $0xdc0] sm:$0xff]  ;;  %1202 = vmatpush.msrb.mxu1 %v948_v1 }
  0x77   : > { %v1076_v3 = vld [vmem:[#allocation4 + $0xfc0] sm:$0xff]  ;;  %1222 = vmatpush.msrb.mxu2 %v1012_v2  ;;  %v697_v2 = vld [vmem:[#allocation4 + $0x3e8] sm:$0xff] }
  0x78   : > { %v576_v4 = vld [vmem:[#allocation4 + $0x20] sm:$0xff]  ;;  %1242 = vmatpush.msrb.mxu3 %v1076_v3  ;;  %v761_v3 = vld [vmem:[#allocation4 + $0x5e8] sm:$0xff] }
  0x79   : > { %v944_v5 = vld [vmem:[#allocation4 + $0xba0] sm:$0xff]  ;;  %1115 = vmatpush.msra.mxu0 %v576_v4  ;;  %v825_v4 = vld [vmem:[#allocation4 + $0x7e8] sm:$0xff] }
  0x7a   : > { %v1008_v6 = vld [vmem:[#allocation4 + $0xda0] sm:$0xff]  ;;  %1203 = vmatpush.msrb.mxu1 %v944_v5 }
  0x7b   : > { %v1072_v7 = vld [vmem:[#allocation4 + $0xfa0] sm:$0xff]  ;;  %1223 = vmatpush.msrb.mxu2 %v1008_v6  ;;  %v693_v6 = vld [vmem:[#allocation4 + $0x3c8] sm:$0xff] }
  0x7c   : > { %v572_v8 = vld [vmem:[#allocation4] sm:$0xff]  ;;  %1243 = vmatpush.msrb.mxu3 %v1072_v7  ;;  %v757_v7 = vld [vmem:[#allocation4 + $0x5c8] sm:$0xff] }
  0x7d   : > { %v940_v9 = vld [vmem:[#allocation4 + $0xb80] sm:$0xff]  ;;  %1116 = vmatpush.msra.mxu0 %v572_v8  ;;  %v821_v8 = vld [vmem:[#allocation4 + $0x7c8] sm:$0xff] }
  0x7e   : > { %v1004_v10 = vld [vmem:[#allocation4 + $0xd80] sm:$0xff]  ;;  %1204 = vmatpush.msrb.mxu1 %v940_v9 }
  0x7f   : > { %v1068_v11 = vld [vmem:[#allocation4 + $0xf80] sm:$0xff]  ;;  %1224 = vmatpush.msrb.mxu2 %v1004_v10  ;;  %v689_v10 = vld [vmem:[#allocation4 + $0x3a8] sm:$0xff] }
  0x80   : > { %v888_v12 = vld [vmem:[#allocation4 + $0x9e0] sm:$0xff]  ;;  %1244 = vmatpush.msrb.mxu3 %v1068_v11  ;;  %v753_v11 = vld [vmem:[#allocation4 + $0x5a8] sm:$0xff] }
  0x81   : > { %v936_v13 = vld [vmem:[#allocation4 + $0xb60] sm:$0xff]  ;;  %1181 = vmatpush.msrb.mxu0 %v888_v12  ;;  %v817_v12 = vld [vmem:[#allocation4 + $0x7a8] sm:$0xff] }
  0x82   : > { %v1000_v14 = vld [vmem:[#allocation4 + $0xd60] sm:$0xff]  ;;  %1205 = vmatpush.msrb.mxu1 %v936_v13 }
  0x83   : > { %v1064_v15 = vld [vmem:[#allocation4 + $0xf60] sm:$0xff]  ;;  %1225 = vmatpush.msrb.mxu2 %v1000_v14 }
  0x84   : > { %v884_v16 = vld [vmem:[#allocation4 + $0x9c0] sm:$0xff]  ;;  %1245 = vmatpush.msrb.mxu3 %v1064_v15  ;;  %v685_v15 = vld [vmem:[#allocation4 + $0x388] sm:$0xff] }
  0x85   : > { %v932_v17 = vld [vmem:[#allocation4 + $0xb40] sm:$0xff]  ;;  %1182 = vmatpush.msrb.mxu0 %v884_v16  ;;  %v749_v16 = vld [vmem:[#allocation4 + $0x588] sm:$0xff] }
  0x86   : > { %v996_v18 = vld [vmem:[#allocation4 + $0xd40] sm:$0xff]  ;;  %1206 = vmatpush.msrb.mxu1 %v932_v17  ;;  %v813_v17 = vld [vmem:[#allocation4 + $0x788] sm:$0xff] }
  0x87   : > { %v1060_v19 = vld [vmem:[#allocation4 + $0xf40] sm:$0xff]  ;;  %1226 = vmatpush.msrb.mxu2 %v996_v18  ;;  %v633_v18 = vld [vmem:[#allocation4 + $0x1e8] sm:$0xff] }
  0x88   : > { %v880_v20 = vld [vmem:[#allocation4 + $0x9a0] sm:$0xff]  ;;  %1246 = vmatpush.msrb.mxu3 %v1060_v19 }
  0x89   : > { %v928_v21 = vld [vmem:[#allocation4 + $0xb20] sm:$0xff]  ;;  %1183 = vmatpush.msrb.mxu0 %v880_v20 }
  0x8a   : > { %v992_v22 = vld [vmem:[#allocation4 + $0xd20] sm:$0xff]  ;;  %1207 = vmatpush.msrb.mxu1 %v928_v21  ;;  %v681_v21 = vld [vmem:[#allocation4 + $0x368] sm:$0xff] }
  0x8b   : > { %v1056_v23 = vld [vmem:[#allocation4 + $0xf20] sm:$0xff]  ;;  %1227 = vmatpush.msrb.mxu2 %v992_v22  ;;  %v745_v22 = vld [vmem:[#allocation4 + $0x568] sm:$0xff] }
  0x8c   : > { %v876_v24 = vld [vmem:[#allocation4 + $0x980] sm:$0xff]  ;;  %1247 = vmatpush.msrb.mxu3 %v1056_v23  ;;  %v809_v23 = vld [vmem:[#allocation4 + $0x768] sm:$0xff] }
  0x8d   : > { %v924_v25 = vld [vmem:[#allocation4 + $0xb00] sm:$0xff]  ;;  %1184 = vmatpush.msrb.mxu0 %v876_v24  ;;  %v629_v24 = vld [vmem:[#allocation4 + $0x1c8] sm:$0xff] }
  0x8e   : > { %v988_v26 = vld [vmem:[#allocation4 + $0xd00] sm:$0xff]  ;;  %1208 = vmatpush.msrb.mxu1 %v924_v25 }
  0x8f   : > { %v1052_v27 = vld [vmem:[#allocation4 + $0xf00] sm:$0xff]  ;;  %1228 = vmatpush.msrb.mxu2 %v988_v26  ;;  %v741_v26 = vld [vmem:[#allocation4 + $0x548] sm:$0xff] }
  0x90   : > { %v872_v28 = vld [vmem:[#allocation4 + $0x960] sm:$0xff]  ;;  %1248 = vmatpush.msrb.mxu3 %v1052_v27  ;;  %v677_v27 = vld [vmem:[#allocation4 + $0x348] sm:$0xff] }
  0x91   : > { %v920_v29 = vld [vmem:[#allocation4 + $0xae0] sm:$0xff]  ;;  %1185 = vmatpush.msrb.mxu0 %v872_v28  ;;  %v805_v28 = vld [vmem:[#allocation4 + $0x748] sm:$0xff] }
  0x92   : > { %v984_v30 = vld [vmem:[#allocation4 + $0xce0] sm:$0xff]  ;;  %1209 = vmatpush.msrb.mxu1 %v920_v29  ;;  %v625_v29 = vld [vmem:[#allocation4 + $0x1a8] sm:$0xff] }
  0x93   : > { %v1048_v31 = vld [vmem:[#allocation4 + $0xee0] sm:$0xff]  ;;  %1229 = vmatpush.msrb.mxu2 %v984_v30  ;;  %v737_v30 = vld [vmem:[#allocation4 + $0x528] sm:$0xff] }
  0x94   : > { %v868_v32 = vld [vmem:[#allocation4 + $0x940] sm:$0xff]  ;;  %1249 = vmatpush.msrb.mxu3 %v1048_v31  ;;  %v673_v31 = vld [vmem:[#allocation4 + $0x328] sm:$0xff] }
  0x95   : > { %v916_v33 = vld [vmem:[#allocation4 + $0xac0] sm:$0xff]  ;;  %1186 = vmatpush.msrb.mxu0 %v868_v32  ;;  %v801_v32 = vld [vmem:[#allocation4 + $0x728] sm:$0xff] }
  0x96   : > { %v980_v34 = vld [vmem:[#allocation4 + $0xcc0] sm:$0xff]  ;;  %1210 = vmatpush.msrb.mxu1 %v916_v33  ;;  %v621_v33 = vld [vmem:[#allocation4 + $0x188] sm:$0xff] }
  0x97   : > { %v1044_v35 = vld [vmem:[#allocation4 + $0xec0] sm:$0xff]  ;;  %1230 = vmatpush.msrb.mxu2 %v980_v34  ;;  %v733_v34 = vld [vmem:[#allocation4 + $0x508] sm:$0xff] }
  0x98   : > { %v864_v36 = vld [vmem:[#allocation4 + $0x920] sm:$0xff]  ;;  %1250 = vmatpush.msrb.mxu3 %v1044_v35  ;;  %v669_v35 = vld [vmem:[#allocation4 + $0x308] sm:$0xff] }
  0x99   : > { %v912_v37 = vld [vmem:[#allocation4 + $0xaa0] sm:$0xff]  ;;  %1187 = vmatpush.msrb.mxu0 %v864_v36  ;;  %v797_v36 = vld [vmem:[#allocation4 + $0x708] sm:$0xff] }
  0x9a   : > { %v976_v38 = vld [vmem:[#allocation4 + $0xca0] sm:$0xff]  ;;  %1211 = vmatpush.msrb.mxu1 %v912_v37  ;;  %v617_v37 = vld [vmem:[#allocation4 + $0x168] sm:$0xff] }
  0x9b   : > { %v1040_v39 = vld [vmem:[#allocation4 + $0xea0] sm:$0xff]  ;;  %1231 = vmatpush.msrb.mxu2 %v976_v38  ;;  %v729_v38 = vld [vmem:[#allocation4 + $0x4e8] sm:$0xff] }
  0x9c   : > { %v860_v40 = vld [vmem:[#allocation4 + $0x900] sm:$0xff]  ;;  %1251 = vmatpush.msrb.mxu3 %v1040_v39  ;;  %v665_v39 = vld [vmem:[#allocation4 + $0x2e8] sm:$0xff] }
  0x9d   : > { %v908_v41 = vld [vmem:[#allocation4 + $0xa80] sm:$0xff]  ;;  %1188 = vmatpush.msrb.mxu0 %v860_v40  ;;  %v793_v40 = vld [vmem:[#allocation4 + $0x6e8] sm:$0xff] }
  0x9e   : > { %v972_v42 = vld [vmem:[#allocation4 + $0xc80] sm:$0xff]  ;;  %1212 = vmatpush.msrb.mxu1 %v908_v41  ;;  %v613_v41 = vld [vmem:[#allocation4 + $0x148] sm:$0xff] }
  0x9f   : > { %v1036_v43 = vld [vmem:[#allocation4 + $0xe80] sm:$0xff]  ;;  %1232 = vmatpush.msrb.mxu2 %v972_v42  ;;  %v725_v42 = vld [vmem:[#allocation4 + $0x4c8] sm:$0xff] }
  0xa0   : > { %v856_v44 = vld [vmem:[#allocation4 + $0x8e0] sm:$0xff]  ;;  %1252 = vmatpush.msrb.mxu3 %v1036_v43  ;;  %v661_v43 = vld [vmem:[#allocation4 + $0x2c8] sm:$0xff] }
  0xa1   : > { %v904_v45 = vld [vmem:[#allocation4 + $0xa60] sm:$0xff]  ;;  %1189 = vmatpush.msrb.mxu0 %v856_v44  ;;  %v789_v44 = vld [vmem:[#allocation4 + $0x6c8] sm:$0xff] }
  0xa2   : > { %v968_v46 = vld [vmem:[#allocation4 + $0xc60] sm:$0xff]  ;;  %1213 = vmatpush.msrb.mxu1 %v904_v45  ;;  %v609_v45 = vld [vmem:[#allocation4 + $0x128] sm:$0xff] }
  0xa3   : > { %v1032_v47 = vld [vmem:[#allocation4 + $0xe60] sm:$0xff]  ;;  %1233 = vmatpush.msrb.mxu2 %v968_v46  ;;  %v721_v46 = vld [vmem:[#allocation4 + $0x4a8] sm:$0xff] }
  0xa4   : > { %v852_v48 = vld [vmem:[#allocation4 + $0x8c0] sm:$0xff]  ;;  %1253 = vmatpush.msrb.mxu3 %v1032_v47  ;;  %v657_v47 = vld [vmem:[#allocation4 + $0x2a8] sm:$0xff] }
  0xa5   : > { %v900_v49 = vld [vmem:[#allocation4 + $0xa40] sm:$0xff]  ;;  %1190 = vmatpush.msrb.mxu0 %v852_v48  ;;  %v785_v48 = vld [vmem:[#allocation4 + $0x6a8] sm:$0xff] }
  0xa6   : > { %v3259_v50 = vld [vmem:[%s557_s5] sm:$0xff]  ;;  %1214 = vmatpush.msrb.mxu1 %v900_v49  ;;  %v605_v49 = vld [vmem:[#allocation4 + $0x108] sm:$0xff] }
  0xa7   : > { %v964_v51 = vld [vmem:[#allocation4 + $0xc40] sm:$0xff]  ;;  %v3262_v57 = vperm.slane %v3259_v50, 2  ;;  %v3265_v61 = vperm.slane %v3259_v50, 0  ;;  %v3268_v63 = vperm.slane %v3259_v50, 1  ;;  %v3271_v0 = vperm.slane %v3259_v50, 3 }
  0xa8   : > { %v1028_v52 = vld [vmem:[#allocation4 + $0xe40] sm:$0xff]  ;;  %1234 = vmatpush.msrb.mxu2 %v964_v51  ;;  %v3278_v13 = vperm.slane %v3259_v50, 6  ;;  %v3281_v19 = vperm.slane %v3259_v50, 4  ;;  %v3284_v20 = vperm.slane %v3259_v50, 7  ;;  %v3288_v25 = vperm.slane %v3259_v50, 5  ;;  %v717_v50 = vld [vmem:[#allocation4 + $0x488] sm:$0xff] }
  0xa9   : > { %v848_v53 = vld [vmem:[#allocation4 + $0x8a0] sm:$0xff]  ;;  %1254 = vmatpush.msrb.mxu3 %v1028_v52  ;;  %1157 = vmatmul.f32.vlgmr.msra.gmra.mxu2 %v3262_v57  ;;  %v653_v51 = vld [vmem:[#allocation4 + $0x288] sm:$0xff] }
  0xaa   : > { %v896_v54 = vld [vmem:[#allocation4 + $0xa20] sm:$0xff]  ;;  %1191 = vmatpush.msrb.mxu0 %v848_v53  ;;  %1137 = vmatmul.f32.vlgmr.msra.gmra.mxu1 %v3268_v63  ;;  %v781_v52 = vld [vmem:[#allocation4 + $0x688] sm:$0xff] }
  0xab   : > { %v960_v55 = vld [vmem:[#allocation4 + $0xc20] sm:$0xff]  ;;  %1215 = vmatpush.msrb.mxu1 %v896_v54  ;;  %1117 = vmatmul.f32.vlgmr.msra.gmra.mxu0 %v3265_v61  ;;  %v601_v53 = vld [vmem:[#allocation4 + $0xe8] sm:$0xff] }
  0xac   : > { %v1024_v56 = vld [vmem:[#allocation4 + $0xe20] sm:$0xff]  ;;  %1235 = vmatpush.msrb.mxu2 %v960_v55  ;;  %1177 = vmatmul.f32.vlgmr.msra.gmra.mxu3 %v3271_v0  ;;  %v713_v54 = vld [vmem:[#allocation4 + $0x468] sm:$0xff] }
  0xad   : > { %v844_v58 = vld [vmem:[#allocation4 + $0x880] sm:$0xff]  ;;  %1255 = vmatpush.msrb.mxu3 %v1024_v56  ;;  %v649_v55 = vld [vmem:[#allocation4 + $0x268] sm:$0xff] }
  0xae   : > { %v892_v59 = vld [vmem:[#allocation4 + $0xa00] sm:$0xff]  ;;  %1192 = vmatpush.msrb.mxu0 %v844_v58  ;;  %v777_v56 = vld [vmem:[#allocation4 + $0x668] sm:$0xff] }
  0xaf   : > { %v956_v60 = vld [vmem:[#allocation4 + $0xc00] sm:$0xff]  ;;  %1216 = vmatpush.msrb.mxu1 %v892_v59  ;;  %v597_v58 = vld [vmem:[#allocation4 + $0xc8] sm:$0xff] }
  0xb0   : > { %v1020_v62 = vld [vmem:[#allocation4 + $0xe00] sm:$0xff]  ;;  %1236 = vmatpush.msrb.mxu2 %v956_v60  ;;  %v709_v59 = vld [vmem:[#allocation4 + $0x448] sm:$0xff] }
  0xb1   : > { %v840_v1 = vld [vmem:[#allocation4 + $0x860] sm:$0xff]  ;;  %1256 = vmatpush.msrb.mxu3 %v1020_v62  ;;  %1281 = vmatpush.msra.mxu1 %v697_v2  ;;  %v645_v60 = vld [vmem:[#allocation4 + $0x248] sm:$0xff] }
  0xb2   : > { %v836_v5 = vld [vmem:[#allocation4 + $0x840] sm:$0xff]  ;;  %1193 = vmatpush.msrb.mxu0 %v840_v1  ;;  %1301 = vmatpush.msra.mxu2 %v761_v3  ;;  %v773_v62 = vld [vmem:[#allocation4 + $0x648] sm:$0xff] }
  0xb3   : > { %1321 = vmatpush.msra.mxu3 %v825_v4  ;;  %v832_v9 = vld [vmem:[#allocation4 + $0x820] sm:$0xff]  ;;  %1282 = vmatpush.msra.mxu1 %v693_v6  ;;  %v593_v1 = vld [vmem:[#allocation4 + $0xa8] sm:$0xff] }
  0xb4   : > { %1194 = vmatpush.msrb.mxu0 %v836_v5  ;;  %1302 = vmatpush.msra.mxu2 %v757_v7  ;;  %v828_v14 = vld [vmem:[#allocation4 + $0x800] sm:$0xff]  ;;  %v705_v2 = vld [vmem:[#allocation4 + $0x428] sm:$0xff] }
  0xb5   : > { %1322 = vmatpush.msra.mxu3 %v821_v8  ;;  %1283 = vmatpush.msra.mxu1 %v689_v10  ;;  %v641_v3 = vld [vmem:[#allocation4 + $0x228] sm:$0xff] }
  0xb6   : > { %1195 = vmatpush.msrb.mxu0 %v832_v9  ;;  %1303 = vmatpush.msra.mxu2 %v753_v11  ;;  %v769_v4 = vld [vmem:[#allocation4 + $0x628] sm:$0xff] }
  0xb7   : > { %1323 = vmatpush.msra.mxu3 %v817_v12  ;;  %1237 = vmatmul.f32.vlgmr.msrb.gmra.mxu2 %v3278_v13  ;;  %v589_v5 = vld [vmem:[#allocation4 + $0x88] sm:$0xff] }
  0xb8   : > { %1196 = vmatpush.msrb.mxu0 %v828_v14  ;;  %1284 = vmatpush.msra.mxu1 %v685_v15  ;;  %v701_v6 = vld [vmem:[#allocation4 + $0x408] sm:$0xff] }
  0xb9   : > { %1304 = vmatpush.msra.mxu2 %v749_v16  ;;  %1324 = vmatpush.msra.mxu3 %v813_v17  ;;  %v637_v7 = vld [vmem:[#allocation4 + $0x208] sm:$0xff] }
  0xba   : > { %1261 = vmatpush.msra.mxu0 %v633_v18  ;;  %1257 = vmatmul.f32.vlgmr.msrb.gmra.mxu3 %v3284_v20  ;;  %v765_v8 = vld [vmem:[#allocation4 + $0x608] sm:$0xff] }
  0xbb   : > { %1197 = vmatmul.f32.vlgmr.msrb.gmra.mxu0 %v3281_v19  ;;  %1285 = vmatpush.msra.mxu1 %v681_v21  ;;  %v585_v9 = vld [vmem:[#allocation4 + $0x68] sm:$0xff] }
  0xbc   : > { %1305 = vmatpush.msra.mxu2 %v745_v22  ;;  %1325 = vmatpush.msra.mxu3 %v809_v23  ;;  %v953_v10 = vld [vmem:[#allocation4 + $0xbe8] sm:$0xff] }
  0xbd   : > { %1262 = vmatpush.msra.mxu0 %v629_v24  ;;  %1217 = vmatmul.f32.vlgmr.msrb.gmra.mxu1 %v3288_v25  ;;  %v1017_v11 = vld [vmem:[#allocation4 + $0xde8] sm:$0xff] }
  0xbe   : > { %1306 = vmatpush.msra.mxu2 %v741_v26  ;;  %1286 = vmatpush.msra.mxu1 %v677_v27  ;;  %v1081_v12 = vld [vmem:[#allocation4 + $0xfe8] sm:$0xff] }
  0xbf   : > { %1326 = vmatpush.msra.mxu3 %v805_v28  ;;  %1263 = vmatpush.msra.mxu0 %v625_v29  ;;  %v581_v14 = vld [vmem:[#allocation4 + $0x48] sm:$0xff] }
  0xc0   : > { %1307 = vmatpush.msra.mxu2 %v737_v30  ;;  %1287 = vmatpush.msra.mxu1 %v673_v31  ;;  %v949_v15 = vld [vmem:[#allocation4 + $0xbc8] sm:$0xff] }
  0xc1   : > { %1327 = vmatpush.msra.mxu3 %v801_v32  ;;  %1264 = vmatpush.msra.mxu0 %v621_v33  ;;  %v1013_v16 = vld [vmem:[#allocation4 + $0xdc8] sm:$0xff] }
  0xc2   : > { %1308 = vmatpush.msra.mxu2 %v733_v34  ;;  %1288 = vmatpush.msra.mxu1 %v669_v35  ;;  %v1077_v17 = vld [vmem:[#allocation4 + $0xfc8] sm:$0xff] }
  0xc3   : > { %1328 = vmatpush.msra.mxu3 %v797_v36  ;;  %1265 = vmatpush.msra.mxu0 %v617_v37  ;;  %v577_v18 = vld [vmem:[#allocation4 + $0x28] sm:$0xff] }
  0xc4   : > { %1309 = vmatpush.msra.mxu2 %v729_v38  ;;  %1289 = vmatpush.msra.mxu1 %v665_v39  ;;  %v945_v21 = vld [vmem:[#allocation4 + $0xba8] sm:$0xff] }
  0xc5   : > { %1329 = vmatpush.msra.mxu3 %v793_v40  ;;  %1266 = vmatpush.msra.mxu0 %v613_v41  ;;  %v1009_v22 = vld [vmem:[#allocation4 + $0xda8] sm:$0xff] }
  0xc6   : > { %1310 = vmatpush.msra.mxu2 %v725_v42  ;;  %1290 = vmatpush.msra.mxu1 %v661_v43  ;;  %v1073_v23 = vld [vmem:[#allocation4 + $0xfa8] sm:$0xff] }
  0xc7   : > { %1330 = vmatpush.msra.mxu3 %v789_v44  ;;  %1267 = vmatpush.msra.mxu0 %v609_v45  ;;  %v573_v24 = vld [vmem:[#allocation4 + $0x8] sm:$0xff] }
  0xc8   : > { %1311 = vmatpush.msra.mxu2 %v721_v46  ;;  %1291 = vmatpush.msra.mxu1 %v657_v47  ;;  %v941_v26 = vld [vmem:[#allocation4 + $0xb88] sm:$0xff] }
  0xc9   : > { %1331 = vmatpush.msra.mxu3 %v785_v48  ;;  %1268 = vmatpush.msra.mxu0 %v605_v49  ;;  %v1005_v27 = vld [vmem:[#allocation4 + $0xd88] sm:$0xff] }
  0xca   : > { %1312 = vmatpush.msra.mxu2 %v717_v50  ;;  %1292 = vmatpush.msra.mxu1 %v653_v51  ;;  %v1069_v28 = vld [vmem:[#allocation4 + $0xf88] sm:$0xff] }
  0xcb   : > { %1332 = vmatpush.msra.mxu3 %v781_v52  ;;  %1269 = vmatpush.msra.mxu0 %v601_v53  ;;  %v889_v29 = vld [vmem:[#allocation4 + $0x9e8] sm:$0xff] }
  0xcc   : > { %1313 = vmatpush.msra.mxu2 %v713_v54  ;;  %1293 = vmatpush.msra.mxu1 %v649_v55  ;;  %v937_v30 = vld [vmem:[#allocation4 + $0xb68] sm:$0xff] }
  0xcd   : > { %1333 = vmatpush.msra.mxu3 %v777_v56  ;;  %1270 = vmatpush.msra.mxu0 %v597_v58  ;;  %v1001_v31 = vld [vmem:[#allocation4 + $0xd68] sm:$0xff] }
  0xce   : > { %1314 = vmatpush.msra.mxu2 %v709_v59  ;;  %1294 = vmatpush.msra.mxu1 %v645_v60  ;;  %v1065_v32 = vld [vmem:[#allocation4 + $0xf68] sm:$0xff] }
  0xcf   : > { %1334 = vmatpush.msra.mxu3 %v773_v62  ;;  %1271 = vmatpush.msra.mxu0 %v593_v1  ;;  %v885_v33 = vld [vmem:[#allocation4 + $0x9c8] sm:$0xff] }
  0xd0   : > { %1315 = vmatpush.msra.mxu2 %v705_v2  ;;  %1295 = vmatpush.msra.mxu1 %v641_v3  ;;  %v933_v34 = vld [vmem:[#allocation4 + $0xb48] sm:$0xff] }
  0xd1   : > { %1335 = vmatpush.msra.mxu3 %v769_v4  ;;  %1272 = vmatpush.msra.mxu0 %v589_v5  ;;  %v997_v35 = vld [vmem:[#allocation4 + $0xd48] sm:$0xff] }
  0xd2   : > { %1316 = vmatpush.msra.mxu2 %v701_v6  ;;  %1296 = vmatpush.msra.mxu1 %v637_v7  ;;  %v1061_v36 = vld [vmem:[#allocation4 + $0xf48] sm:$0xff] }
  0xd3   : > { %1336 = vmatpush.msra.mxu3 %v765_v8  ;;  %1273 = vmatpush.msra.mxu0 %v585_v9  ;;  %v881_v37 = vld [vmem:[#allocation4 + $0x9a8] sm:$0xff] }
  0xd4   : > { %1361 = vmatpush.msrb.mxu1 %v953_v10  ;;  %1381 = vmatpush.msrb.mxu2 %v1017_v11  ;;  %v929_v38 = vld [vmem:[#allocation4 + $0xb28] sm:$0xff] }
  0xd5   : > { %1401 = vmatpush.msrb.mxu3 %v1081_v12  ;;  %1274 = vmatpush.msra.mxu0 %v581_v14  ;;  %v993_v39 = vld [vmem:[#allocation4 + $0xd28] sm:$0xff] }
  0xd6   : > { %1362 = vmatpush.msrb.mxu1 %v949_v15  ;;  %1382 = vmatpush.msrb.mxu2 %v1013_v16  ;;  %v1057_v40 = vld [vmem:[#allocation4 + $0xf28] sm:$0xff] }
  0xd7   : > { %1402 = vmatpush.msrb.mxu3 %v1077_v17  ;;  %1275 = vmatpush.msra.mxu0 %v577_v18  ;;  %v877_v41 = vld [vmem:[#allocation4 + $0x988] sm:$0xff] }
  0xd8   : > { %1363 = vmatpush.msrb.mxu1 %v945_v21  ;;  %1383 = vmatpush.msrb.mxu2 %v1009_v22  ;;  %v925_v42 = vld [vmem:[#allocation4 + $0xb08] sm:$0xff]  ;;  %v698_v21 = vld [vmem:[#allocation4 + $0x3f0] sm:$0xff] }
  0xd9   : > { %1403 = vmatpush.msrb.mxu3 %v1073_v23  ;;  %1276 = vmatpush.msra.mxu0 %v573_v24  ;;  %v989_v43 = vld [vmem:[#allocation4 + $0xd08] sm:$0xff]  ;;  %v762_v22 = vld [vmem:[#allocation4 + $0x5f0] sm:$0xff] }
  0xda   : > { %1364 = vmatpush.msrb.mxu1 %v941_v26  ;;  %1384 = vmatpush.msrb.mxu2 %v1005_v27  ;;  %v1053_v44 = vld [vmem:[#allocation4 + $0xf08] sm:$0xff]  ;;  %v826_v23 = vld [vmem:[#allocation4 + $0x7f0] sm:$0xff] }
  0xdb   : > { %1404 = vmatpush.msrb.mxu3 %v1069_v28  ;;  %1341 = vmatpush.msrb.mxu0 %v889_v29  ;;  %v873_v45 = vld [vmem:[#allocation4 + $0x968] sm:$0xff]  ;;  %v694_v26 = vld [vmem:[#allocation4 + $0x3d0] sm:$0xff] }
  0xdc   : > { %1365 = vmatpush.msrb.mxu1 %v937_v30  ;;  %1385 = vmatpush.msrb.mxu2 %v1001_v31  ;;  %v921_v46 = vld [vmem:[#allocation4 + $0xae8] sm:$0xff]  ;;  %v758_v27 = vld [vmem:[#allocation4 + $0x5d0] sm:$0xff] }
  0xdd   : > { %1405 = vmatpush.msrb.mxu3 %v1065_v32  ;;  %1342 = vmatpush.msrb.mxu0 %v885_v33  ;;  %v985_v47 = vld [vmem:[#allocation4 + $0xce8] sm:$0xff]  ;;  %v822_v28 = vld [vmem:[#allocation4 + $0x7d0] sm:$0xff] }
  0xde   : > { %1366 = vmatpush.msrb.mxu1 %v933_v34  ;;  %1386 = vmatpush.msrb.mxu2 %v997_v35  ;;  %v1049_v48 = vld [vmem:[#allocation4 + $0xee8] sm:$0xff]  ;;  %v690_v30 = vld [vmem:[#allocation4 + $0x3b0] sm:$0xff] }
  0xdf   : > { %1406 = vmatpush.msrb.mxu3 %v1061_v36  ;;  %1343 = vmatpush.msrb.mxu0 %v881_v37  ;;  %v869_v49 = vld [vmem:[#allocation4 + $0x948] sm:$0xff]  ;;  %v754_v31 = vld [vmem:[#allocation4 + $0x5b0] sm:$0xff] }
  0xe0   : > { %1367 = vmatpush.msrb.mxu1 %v929_v38  ;;  %1387 = vmatpush.msrb.mxu2 %v993_v39  ;;  %v917_v50 = vld [vmem:[#allocation4 + $0xac8] sm:$0xff]  ;;  %v818_v32 = vld [vmem:[#allocation4 + $0x7b0] sm:$0xff] }
  0xe1   : > { %1407 = vmatpush.msrb.mxu3 %v1057_v40  ;;  %1344 = vmatpush.msrb.mxu0 %v877_v41  ;;  %v981_v51 = vld [vmem:[#allocation4 + $0xcc8] sm:$0xff]  ;;  %v686_v34 = vld [vmem:[#allocation4 + $0x390] sm:$0xff] }
  0xe2   : > { %1368 = vmatpush.msrb.mxu1 %v925_v42  ;;  %1388 = vmatpush.msrb.mxu2 %v989_v43  ;;  %v1045_v52 = vld [vmem:[#allocation4 + $0xec8] sm:$0xff]  ;;  %v750_v35 = vld [vmem:[#allocation4 + $0x590] sm:$0xff] }
  0xe3   : > { %1408 = vmatpush.msrb.mxu3 %v1053_v44  ;;  %1345 = vmatpush.msrb.mxu0 %v873_v45  ;;  %v865_v53 = vld [vmem:[#allocation4 + $0x928] sm:$0xff]  ;;  %v814_v36 = vld [vmem:[#allocation4 + $0x790] sm:$0xff] }
  0xe4   : > { %1369 = vmatpush.msrb.mxu1 %v921_v46  ;;  %1389 = vmatpush.msrb.mxu2 %v985_v47  ;;  %v913_v54 = vld [vmem:[#allocation4 + $0xaa8] sm:$0xff]  ;;  %v634_v37 = vld [vmem:[#allocation4 + $0x1f0] sm:$0xff] }
  0xe5   : > { %1409 = vmatpush.msrb.mxu3 %v1049_v48  ;;  %1346 = vmatpush.msrb.mxu0 %v869_v49  ;;  %v977_v55 = vld [vmem:[#allocation4 + $0xca8] sm:$0xff]  ;;  %v682_v38 = vld [vmem:[#allocation4 + $0x370] sm:$0xff] }
  0xe6   : > { %1370 = vmatpush.msrb.mxu1 %v917_v50  ;;  %v1041_v56 = vld [vmem:[#allocation4 + $0xea8] sm:$0xff]  ;;  %1390 = vmatpush.msrb.mxu2 %v981_v51  ;;  %v746_v39 = vld [vmem:[#allocation4 + $0x570] sm:$0xff] }
  0xe7   : > { %1410 = vmatpush.msrb.mxu3 %v1045_v52  ;;  %v861_v58 = vld [vmem:[#allocation4 + $0x908] sm:$0xff]  ;;  %1347 = vmatpush.msrb.mxu0 %v865_v53  ;;  %v810_v40 = vld [vmem:[#allocation4 + $0x770] sm:$0xff] }
  0xe8   : > { %v909_v59 = vld [vmem:[#allocation4 + $0xa88] sm:$0xff]  ;;  %1371 = vmatpush.msrb.mxu1 %v913_v54  ;;  %1391 = vmatpush.msrb.mxu2 %v977_v55  ;;  %v630_v41 = vld [vmem:[#allocation4 + $0x1d0] sm:$0xff] }
  0xe9   : > { %v973_v60 = vld [vmem:[#allocation4 + $0xc88] sm:$0xff]  ;;  %1411 = vmatpush.msrb.mxu3 %v1041_v56  ;;  %1348 = vmatpush.msrb.mxu0 %v861_v58  ;;  %v742_v42 = vld [vmem:[#allocation4 + $0x550] sm:$0xff] }
  0xea   : > { %v1037_v62 = vld [vmem:[#allocation4 + $0xe88] sm:$0xff]  ;;  %1372 = vmatpush.msrb.mxu1 %v909_v59  ;;  %1392 = vmatpush.msrb.mxu2 %v973_v60  ;;  %v678_v43 = vld [vmem:[#allocation4 + $0x350] sm:$0xff] }
  0xeb   : > { %v857_v1 = vld [vmem:[#allocation4 + $0x8e8] sm:$0xff]  ;;  %1412 = vmatpush.msrb.mxu3 %v1037_v62  ;;  %1317 = vmatmul.f32.vlgmr.msra.gmra.mxu2 %v3262_v57  ;;  %v806_v44 = vld [vmem:[#allocation4 + $0x750] sm:$0xff] }
  0xec   : > { %v905_v2 = vld [vmem:[#allocation4 + $0xa68] sm:$0xff]  ;;  %1349 = vmatpush.msrb.mxu0 %v857_v1  ;;  %1297 = vmatmul.f32.vlgmr.msra.gmra.mxu1 %v3268_v63  ;;  %v626_v45 = vld [vmem:[#allocation4 + $0x1b0] sm:$0xff] }
  0xed   : > { %v969_v3 = vld [vmem:[#allocation4 + $0xc68] sm:$0xff]  ;;  %1373 = vmatpush.msrb.mxu1 %v905_v2  ;;  %1277 = vmatmul.f32.vlgmr.msra.gmra.mxu0 %v3265_v61  ;;  %v738_v46 = vld [vmem:[#allocation4 + $0x530] sm:$0xff] }
  0xee   : > { %v1033_v4 = vld [vmem:[#allocation4 + $0xe68] sm:$0xff]  ;;  %1393 = vmatpush.msrb.mxu2 %v969_v3  ;;  %1337 = vmatmul.f32.vlgmr.msra.gmra.mxu3 %v3271_v0  ;;  %v674_v47 = vld [vmem:[#allocation4 + $0x330] sm:$0xff] }
  0xef   : > { %v853_v5 = vld [vmem:[#allocation4 + $0x8c8] sm:$0xff]  ;;  %1413 = vmatpush.msrb.mxu3 %v1033_v4  ;;  %v802_v48 = vld [vmem:[#allocation4 + $0x730] sm:$0xff] }
  0xf0   : > { %v901_v6 = vld [vmem:[#allocation4 + $0xa48] sm:$0xff]  ;;  %1350 = vmatpush.msrb.mxu0 %v853_v5  ;;  %v622_v49 = vld [vmem:[#allocation4 + $0x190] sm:$0xff] }
  0xf1   : > { %v965_v7 = vld [vmem:[#allocation4 + $0xc48] sm:$0xff]  ;;  %1374 = vmatpush.msrb.mxu1 %v901_v6  ;;  %v734_v50 = vld [vmem:[#allocation4 + $0x510] sm:$0xff] }
  0xf2   : > { %v1029_v8 = vld [vmem:[#allocation4 + $0xe48] sm:$0xff]  ;;  %1394 = vmatpush.msrb.mxu2 %v965_v7  ;;  %v670_v51 = vld [vmem:[#allocation4 + $0x310] sm:$0xff] }
  0xf3   : > { %v849_v9 = vld [vmem:[#allocation4 + $0x8a8] sm:$0xff]  ;;  %1414 = vmatpush.msrb.mxu3 %v1029_v8  ;;  %v798_v52 = vld [vmem:[#allocation4 + $0x710] sm:$0xff] }
  0xf4   : > { %v897_v10 = vld [vmem:[#allocation4 + $0xa28] sm:$0xff]  ;;  %1351 = vmatpush.msrb.mxu0 %v849_v9  ;;  %v618_v53 = vld [vmem:[#allocation4 + $0x170] sm:$0xff] }
  0xf5   : > { %v961_v11 = vld [vmem:[#allocation4 + $0xc28] sm:$0xff]  ;;  %1375 = vmatpush.msrb.mxu1 %v897_v10  ;;  %v730_v54 = vld [vmem:[#allocation4 + $0x4f0] sm:$0xff] }
  0xf6   : > { %v1025_v12 = vld [vmem:[#allocation4 + $0xe28] sm:$0xff]  ;;  %1395 = vmatpush.msrb.mxu2 %v961_v11  ;;  %v666_v55 = vld [vmem:[#allocation4 + $0x2f0] sm:$0xff] }
  0xf7   : > { %v845_v14 = vld [vmem:[#allocation4 + $0x888] sm:$0xff]  ;;  %1415 = vmatpush.msrb.mxu3 %v1025_v12  ;;  %v794_v56 = vld [vmem:[#allocation4 + $0x6f0] sm:$0xff] }
  0xf8   : > { %v893_v15 = vld [vmem:[#allocation4 + $0xa08] sm:$0xff]  ;;  %1352 = vmatpush.msrb.mxu0 %v845_v14  ;;  %v614_v58 = vld [vmem:[#allocation4 + $0x150] sm:$0xff] }
  0xf9   : > { %v957_v16 = vld [vmem:[#allocation4 + $0xc08] sm:$0xff]  ;;  %1376 = vmatpush.msrb.mxu1 %v893_v15  ;;  %v726_v59 = vld [vmem:[#allocation4 + $0x4d0] sm:$0xff] }
  0xfa   : > { %v1021_v17 = vld [vmem:[#allocation4 + $0xe08] sm:$0xff]  ;;  %1396 = vmatpush.msrb.mxu2 %v957_v16  ;;  %1377 = vmatmul.f32.vlgmr.msrb.gmra.mxu1 %v3288_v25  ;;  %v662_v60 = vld [vmem:[#allocation4 + $0x2d0] sm:$0xff] }
  0xfb   : > { %v841_v18 = vld [vmem:[#allocation4 + $0x868] sm:$0xff]  ;;  %1416 = vmatpush.msrb.mxu3 %v1021_v17  ;;  %1441 = vmatpush.msra.mxu1 %v698_v21  ;;  %v790_v62 = vld [vmem:[#allocation4 + $0x6d0] sm:$0xff] }
  0xfc   : > { %v837_v24 = vld [vmem:[#allocation4 + $0x848] sm:$0xff]  ;;  %1353 = vmatpush.msrb.mxu0 %v841_v18  ;;  %1461 = vmatpush.msra.mxu2 %v762_v22  ;;  %v610_v1 = vld [vmem:[#allocation4 + $0x130] sm:$0xff] }
  0xfd   : > { %1481 = vmatpush.msra.mxu3 %v826_v23  ;;  %v833_v29 = vld [vmem:[#allocation4 + $0x828] sm:$0xff]  ;;  %1442 = vmatpush.msra.mxu1 %v694_v26  ;;  %v722_v2 = vld [vmem:[#allocation4 + $0x4b0] sm:$0xff] }
  0xfe   : > { %1354 = vmatpush.msrb.mxu0 %v837_v24  ;;  %1462 = vmatpush.msra.mxu2 %v758_v27  ;;  %v829_v33 = vld [vmem:[#allocation4 + $0x808] sm:$0xff]  ;;  %v658_v3 = vld [vmem:[#allocation4 + $0x2b0] sm:$0xff] }
  0xff   : > { %1482 = vmatpush.msra.mxu3 %v822_v28  ;;  %1443 = vmatpush.msra.mxu1 %v690_v30  ;;  %v786_v4 = vld [vmem:[#allocation4 + $0x6b0] sm:$0xff] }
 0x100   : > { %1355 = vmatpush.msrb.mxu0 %v833_v29  ;;  %1463 = vmatpush.msra.mxu2 %v754_v31  ;;  %v606_v5 = vld [vmem:[#allocation4 + $0x110] sm:$0xff] }
 0x101   : > { %1483 = vmatpush.msra.mxu3 %v818_v32  ;;  %1397 = vmatmul.f32.vlgmr.msrb.gmra.mxu2 %v3278_v13  ;;  %v718_v6 = vld [vmem:[#allocation4 + $0x490] sm:$0xff] }
 0x102   : > { %1356 = vmatpush.msrb.mxu0 %v829_v33  ;;  %1444 = vmatpush.msra.mxu1 %v686_v34  ;;  %v654_v7 = vld [vmem:[#allocation4 + $0x290] sm:$0xff] }
 0x103   : > { %1464 = vmatpush.msra.mxu2 %v750_v35  ;;  %1484 = vmatpush.msra.mxu3 %v814_v36  ;;  %v782_v8 = vld [vmem:[#allocation4 + $0x690] sm:$0xff] }
 0x104   : > { %1421 = vmatpush.msra.mxu0 %v634_v37  ;;  %1417 = vmatmul.f32.vlgmr.msrb.gmra.mxu3 %v3284_v20  ;;  %v602_v9 = vld [vmem:[#allocation4 + $0xf0] sm:$0xff] }
 0x105   : > { %1357 = vmatmul.f32.vlgmr.msrb.gmra.mxu0 %v3281_v19  ;;  %1445 = vmatpush.msra.mxu1 %v682_v38  ;;  %v714_v10 = vld [vmem:[#allocation4 + $0x470] sm:$0xff] }
 0x106   : > { %1465 = vmatpush.msra.mxu2 %v746_v39  ;;  %1485 = vmatpush.msra.mxu3 %v810_v40  ;;  %v650_v11 = vld [vmem:[#allocation4 + $0x270] sm:$0xff] }
 0x107   : > { %1422 = vmatpush.msra.mxu0 %v630_v41  ;;  %1446 = vmatpush.msra.mxu1 %v678_v43  ;;  %v778_v12 = vld [vmem:[#allocation4 + $0x670] sm:$0xff] }
 0x108   : > { %1466 = vmatpush.msra.mxu2 %v742_v42  ;;  %1486 = vmatpush.msra.mxu3 %v806_v44  ;;  %v598_v14 = vld [vmem:[#allocation4 + $0xd0] sm:$0xff] }
 0x109   : > { %1423 = vmatpush.msra.mxu0 %v626_v45  ;;  %1447 = vmatpush.msra.mxu1 %v674_v47  ;;  %v710_v15 = vld [vmem:[#allocation4 + $0x450] sm:$0xff] }
 0x10a   : > { %1467 = vmatpush.msra.mxu2 %v738_v46  ;;  %1487 = vmatpush.msra.mxu3 %v802_v48  ;;  %v646_v16 = vld [vmem:[#allocation4 + $0x250] sm:$0xff] }
 0x10b   : > { %1424 = vmatpush.msra.mxu0 %v622_v49  ;;  %1448 = vmatpush.msra.mxu1 %v670_v51  ;;  %v774_v17 = vld [vmem:[#allocation4 + $0x650] sm:$0xff] }
 0x10c   : > { %1468 = vmatpush.msra.mxu2 %v734_v50  ;;  %1488 = vmatpush.msra.mxu3 %v798_v52  ;;  %v594_v18 = vld [vmem:[#allocation4 + $0xb0] sm:$0xff] }
 0x10d   : > { %1425 = vmatpush.msra.mxu0 %v618_v53  ;;  %1449 = vmatpush.msra.mxu1 %v666_v55  ;;  %v706_v21 = vld [vmem:[#allocation4 + $0x430] sm:$0xff] }
 0x10e   : > { %1469 = vmatpush.msra.mxu2 %v730_v54  ;;  %1489 = vmatpush.msra.mxu3 %v794_v56  ;;  %v642_v22 = vld [vmem:[#allocation4 + $0x230] sm:$0xff] }
 0x10f   : > { %1426 = vmatpush.msra.mxu0 %v614_v58  ;;  %1450 = vmatpush.msra.mxu1 %v662_v60  ;;  %v770_v23 = vld [vmem:[#allocation4 + $0x630] sm:$0xff] }
 0x110   : > { %1470 = vmatpush.msra.mxu2 %v726_v59  ;;  %1490 = vmatpush.msra.mxu3 %v790_v62  ;;  %v590_v24 = vld [vmem:[#allocation4 + $0x90] sm:$0xff] }
 0x111   : > { %1427 = vmatpush.msra.mxu0 %v610_v1  ;;  %1451 = vmatpush.msra.mxu1 %v658_v3  ;;  %v702_v26 = vld [vmem:[#allocation4 + $0x410] sm:$0xff] }
 0x112   : > { %1471 = vmatpush.msra.mxu2 %v722_v2  ;;  %1491 = vmatpush.msra.mxu3 %v786_v4  ;;  %v638_v27 = vld [vmem:[#allocation4 + $0x210] sm:$0xff] }
 0x113   : > { %1428 = vmatpush.msra.mxu0 %v606_v5  ;;  %1452 = vmatpush.msra.mxu1 %v654_v7  ;;  %v766_v28 = vld [vmem:[#allocation4 + $0x610] sm:$0xff] }
 0x114   : > { %1472 = vmatpush.msra.mxu2 %v718_v6  ;;  %1492 = vmatpush.msra.mxu3 %v782_v8  ;;  %v586_v29 = vld [vmem:[#allocation4 + $0x70] sm:$0xff] }
 0x115   : > { %1429 = vmatpush.msra.mxu0 %v602_v9  ;;  %1453 = vmatpush.msra.mxu1 %v650_v11  ;;  %v954_v30 = vld [vmem:[#allocation4 + $0xbf0] sm:$0xff] }
 0x116   : > { %1473 = vmatpush.msra.mxu2 %v714_v10  ;;  %1493 = vmatpush.msra.mxu3 %v778_v12  ;;  %v1018_v31 = vld [vmem:[#allocation4 + $0xdf0] sm:$0xff] }
 0x117   : > { %1430 = vmatpush.msra.mxu0 %v598_v14  ;;  %1454 = vmatpush.msra.mxu1 %v646_v16  ;;  %v1082_v32 = vld [vmem:[#allocation4 + $0xff0] sm:$0xff] }
 0x118   : > { %1474 = vmatpush.msra.mxu2 %v710_v15  ;;  %1494 = vmatpush.msra.mxu3 %v774_v17  ;;  %v582_v33 = vld [vmem:[#allocation4 + $0x50] sm:$0xff] }
 0x119   : > { %1431 = vmatpush.msra.mxu0 %v594_v18  ;;  %1455 = vmatpush.msra.mxu1 %v642_v22  ;;  %v950_v34 = vld [vmem:[#allocation4 + $0xbd0] sm:$0xff] }
 0x11a   : > { %1475 = vmatpush.msra.mxu2 %v706_v21  ;;  %1495 = vmatpush.msra.mxu3 %v770_v23  ;;  %v1014_v35 = vld [vmem:[#allocation4 + $0xdd0] sm:$0xff] }
 0x11b   : > { %1432 = vmatpush.msra.mxu0 %v590_v24  ;;  %1456 = vmatpush.msra.mxu1 %v638_v27  ;;  %v1078_v36 = vld [vmem:[#allocation4 + $0xfd0] sm:$0xff] }
 0x11c   : > { %1476 = vmatpush.msra.mxu2 %v702_v26  ;;  %1496 = vmatpush.msra.mxu3 %v766_v28  ;;  %v578_v37 = vld [vmem:[#allocation4 + $0x30] sm:$0xff] }
 0x11d   : > { %1433 = vmatpush.msra.mxu0 %v586_v29  ;;  %1521 = vmatpush.msrb.mxu1 %v954_v30  ;;  %v946_v38 = vld [vmem:[#allocation4 + $0xbb0] sm:$0xff] }
 0x11e   : > { %1541 = vmatpush.msrb.mxu2 %v1018_v31  ;;  %1561 = vmatpush.msrb.mxu3 %v1082_v32  ;;  %v1010_v39 = vld [vmem:[#allocation4 + $0xdb0] sm:$0xff] }
 0x11f   : > { %1434 = vmatpush.msra.mxu0 %v582_v33  ;;  %1522 = vmatpush.msrb.mxu1 %v950_v34  ;;  %v1074_v40 = vld [vmem:[#allocation4 + $0xfb0] sm:$0xff] }
 0x120   : > { %1542 = vmatpush.msrb.mxu2 %v1014_v35  ;;  %1562 = vmatpush.msrb.mxu3 %v1078_v36  ;;  %v574_v41 = vld [vmem:[#allocation4 + $0x10] sm:$0xff] }
 0x121   : > { %v942_v42 = vld [vmem:[#allocation4 + $0xb90] sm:$0xff]  ;;  %1435 = vmatpush.msra.mxu0 %v578_v37  ;;  %1523 = vmatpush.msrb.mxu1 %v946_v38  ;;  %v699_v38 = vld [vmem:[#allocation4 + $0x3f8] sm:$0xff] }
 0x122   : > { %v1006_v43 = vld [vmem:[#allocation4 + $0xd90] sm:$0xff]  ;;  %1543 = vmatpush.msrb.mxu2 %v1010_v39  ;;  %1563 = vmatpush.msrb.mxu3 %v1074_v40  ;;  %v763_v39 = vld [vmem:[#allocation4 + $0x5f8] sm:$0xff] }
 0x123   : > { %v1070_v44 = vld [vmem:[#allocation4 + $0xf90] sm:$0xff]  ;;  %1436 = vmatpush.msra.mxu0 %v574_v41  ;;  %1524 = vmatpush.msrb.mxu1 %v942_v42  ;;  %v827_v40 = vld [vmem:[#allocation4 + $0x7f8] sm:$0xff] }
 0x124   : > { %v890_v45 = vld [vmem:[#allocation4 + $0x9f0] sm:$0xff]  ;;  %1544 = vmatpush.msrb.mxu2 %v1006_v43  ;;  %1564 = vmatpush.msrb.mxu3 %v1070_v44  ;;  %v695_v42 = vld [vmem:[#allocation4 + $0x3d8] sm:$0xff] }
 0x125   : > { %v938_v46 = vld [vmem:[#allocation4 + $0xb70] sm:$0xff]  ;;  %1501 = vmatpush.msrb.mxu0 %v890_v45  ;;  %1477 = vmatmul.f32.vlgmr.msra.gmra.mxu2 %v3262_v57  ;;  %v759_v43 = vld [vmem:[#allocation4 + $0x5d8] sm:$0xff] }
 0x126   : > { %v1002_v47 = vld [vmem:[#allocation4 + $0xd70] sm:$0xff]  ;;  %1525 = vmatpush.msrb.mxu1 %v938_v46  ;;  %1437 = vmatmul.f32.vlgmr.msra.gmra.mxu0 %v3265_v61  ;;  %v823_v44 = vld [vmem:[#allocation4 + $0x7d8] sm:$0xff] }
 0x127   : > { %v1066_v48 = vld [vmem:[#allocation4 + $0xf70] sm:$0xff]  ;;  %1545 = vmatpush.msrb.mxu2 %v1002_v47  ;;  %1457 = vmatmul.f32.vlgmr.msra.gmra.mxu1 %v3268_v63  ;;  %v691_v46 = vld [vmem:[#allocation4 + $0x3b8] sm:$0xff] }
 0x128   : > { %v886_v49 = vld [vmem:[#allocation4 + $0x9d0] sm:$0xff]  ;;  %1565 = vmatpush.msrb.mxu3 %v1066_v48  ;;  %v755_v47 = vld [vmem:[#allocation4 + $0x5b8] sm:$0xff] }
 0x129   : > { %v934_v50 = vld [vmem:[#allocation4 + $0xb50] sm:$0xff]  ;;  %1502 = vmatpush.msrb.mxu0 %v886_v49  ;;  %1497 = vmatmul.f32.vlgmr.msra.gmra.mxu3 %v3271_v0  ;;  %v819_v48 = vld [vmem:[#allocation4 + $0x7b8] sm:$0xff] }
 0x12a   : > { %v998_v51 = vld [vmem:[#allocation4 + $0xd50] sm:$0xff]  ;;  %1526 = vmatpush.msrb.mxu1 %v934_v50  ;;  %v687_v50 = vld [vmem:[#allocation4 + $0x398] sm:$0xff] }
 0x12b   : > { %v1062_v52 = vld [vmem:[#allocation4 + $0xf50] sm:$0xff]  ;;  %1546 = vmatpush.msrb.mxu2 %v998_v51  ;;  %v751_v51 = vld [vmem:[#allocation4 + $0x598] sm:$0xff] }
 0x12c   : > { %v882_v53 = vld [vmem:[#allocation4 + $0x9b0] sm:$0xff]  ;;  %1566 = vmatpush.msrb.mxu3 %v1062_v52  ;;  %v815_v52 = vld [vmem:[#allocation4 + $0x798] sm:$0xff] }
 0x12d   : > { %v930_v54 = vld [vmem:[#allocation4 + $0xb30] sm:$0xff]  ;;  %1503 = vmatpush.msrb.mxu0 %v882_v53  ;;  %v635_v53 = vld [vmem:[#allocation4 + $0x1f8] sm:$0xff] }
 0x12e   : > { %v994_v55 = vld [vmem:[#allocation4 + $0xd30] sm:$0xff]  ;;  %1527 = vmatpush.msrb.mxu1 %v930_v54  ;;  %v683_v54 = vld [vmem:[#allocation4 + $0x378] sm:$0xff] }
 0x12f   : > { %v1058_v56 = vld [vmem:[#allocation4 + $0xf30] sm:$0xff]  ;;  %1547 = vmatpush.msrb.mxu2 %v994_v55  ;;  %v747_v55 = vld [vmem:[#allocation4 + $0x578] sm:$0xff] }
 0x130   : > { %v878_v58 = vld [vmem:[#allocation4 + $0x990] sm:$0xff]  ;;  %1567 = vmatpush.msrb.mxu3 %v1058_v56  ;;  %v811_v56 = vld [vmem:[#allocation4 + $0x778] sm:$0xff] }
 0x131   : > { %v926_v59 = vld [vmem:[#allocation4 + $0xb10] sm:$0xff]  ;;  %1504 = vmatpush.msrb.mxu0 %v878_v58  ;;  %v631_v58 = vld [vmem:[#allocation4 + $0x1d8] sm:$0xff] }
 0x132   : > { %v990_v60 = vld [vmem:[#allocation4 + $0xd10] sm:$0xff]  ;;  %1528 = vmatpush.msrb.mxu1 %v926_v59  ;;  %v743_v59 = vld [vmem:[#allocation4 + $0x558] sm:$0xff] }
 0x133   : > { %v1054_v62 = vld [vmem:[#allocation4 + $0xf10] sm:$0xff]  ;;  %1548 = vmatpush.msrb.mxu2 %v990_v60  ;;  %v679_v60 = vld [vmem:[#allocation4 + $0x358] sm:$0xff] }
 0x134   : > { %v874_v1 = vld [vmem:[#allocation4 + $0x970] sm:$0xff]  ;;  %1568 = vmatpush.msrb.mxu3 %v1054_v62  ;;  %v807_v62 = vld [vmem:[#allocation4 + $0x758] sm:$0xff] }
 0x135   : > { %v922_v2 = vld [vmem:[#allocation4 + $0xaf0] sm:$0xff]  ;;  %1505 = vmatpush.msrb.mxu0 %v874_v1  ;;  %v627_v1 = vld [vmem:[#allocation4 + $0x1b8] sm:$0xff] }
 0x136   : > { %v986_v3 = vld [vmem:[#allocation4 + $0xcf0] sm:$0xff]  ;;  %1529 = vmatpush.msrb.mxu1 %v922_v2  ;;  %v739_v2 = vld [vmem:[#allocation4 + $0x538] sm:$0xff] }
 0x137   : > { %v1050_v4 = vld [vmem:[#allocation4 + $0xef0] sm:$0xff]  ;;  %1549 = vmatpush.msrb.mxu2 %v986_v3  ;;  %v675_v3 = vld [vmem:[#allocation4 + $0x338] sm:$0xff] }
 0x138   : > { %v870_v5 = vld [vmem:[#allocation4 + $0x950] sm:$0xff]  ;;  %1569 = vmatpush.msrb.mxu3 %v1050_v4  ;;  %v803_v4 = vld [vmem:[#allocation4 + $0x738] sm:$0xff] }
 0x139   : > { %v918_v6 = vld [vmem:[#allocation4 + $0xad0] sm:$0xff]  ;;  %1506 = vmatpush.msrb.mxu0 %v870_v5  ;;  %v623_v5 = vld [vmem:[#allocation4 + $0x198] sm:$0xff] }
 0x13a   : > { %v982_v7 = vld [vmem:[#allocation4 + $0xcd0] sm:$0xff]  ;;  %1530 = vmatpush.msrb.mxu1 %v918_v6  ;;  %v735_v6 = vld [vmem:[#allocation4 + $0x518] sm:$0xff] }
 0x13b   : > { %v1046_v8 = vld [vmem:[#allocation4 + $0xed0] sm:$0xff]  ;;  %1550 = vmatpush.msrb.mxu2 %v982_v7  ;;  %v671_v7 = vld [vmem:[#allocation4 + $0x318] sm:$0xff] }
 0x13c   : > { %v866_v9 = vld [vmem:[#allocation4 + $0x930] sm:$0xff]  ;;  %1570 = vmatpush.msrb.mxu3 %v1046_v8  ;;  %v799_v8 = vld [vmem:[#allocation4 + $0x718] sm:$0xff] }
 0x13d   : > { %v914_v10 = vld [vmem:[#allocation4 + $0xab0] sm:$0xff]  ;;  %1507 = vmatpush.msrb.mxu0 %v866_v9  ;;  %v619_v9 = vld [vmem:[#allocation4 + $0x178] sm:$0xff] }
 0x13e   : > { %v978_v11 = vld [vmem:[#allocation4 + $0xcb0] sm:$0xff]  ;;  %1531 = vmatpush.msrb.mxu1 %v914_v10  ;;  %v731_v10 = vld [vmem:[#allocation4 + $0x4f8] sm:$0xff] }
 0x13f   : > { %v1042_v12 = vld [vmem:[#allocation4 + $0xeb0] sm:$0xff]  ;;  %1551 = vmatpush.msrb.mxu2 %v978_v11  ;;  %v667_v11 = vld [vmem:[#allocation4 + $0x2f8] sm:$0xff] }
 0x140   : > { %v862_v14 = vld [vmem:[#allocation4 + $0x910] sm:$0xff]  ;;  %1571 = vmatpush.msrb.mxu3 %v1042_v12  ;;  %v795_v12 = vld [vmem:[#allocation4 + $0x6f8] sm:$0xff] }
 0x141   : > { %v910_v15 = vld [vmem:[#allocation4 + $0xa90] sm:$0xff]  ;;  %1508 = vmatpush.msrb.mxu0 %v862_v14  ;;  %v615_v14 = vld [vmem:[#allocation4 + $0x158] sm:$0xff] }
 0x142   : > { %v974_v16 = vld [vmem:[#allocation4 + $0xc90] sm:$0xff]  ;;  %1532 = vmatpush.msrb.mxu1 %v910_v15  ;;  %v727_v15 = vld [vmem:[#allocation4 + $0x4d8] sm:$0xff] }
 0x143   : > { %v1038_v17 = vld [vmem:[#allocation4 + $0xe90] sm:$0xff]  ;;  %1552 = vmatpush.msrb.mxu2 %v974_v16  ;;  %v663_v16 = vld [vmem:[#allocation4 + $0x2d8] sm:$0xff] }
 0x144   : > { %v858_v18 = vld [vmem:[#allocation4 + $0x8f0] sm:$0xff]  ;;  %1572 = vmatpush.msrb.mxu3 %v1038_v17  ;;  %v791_v17 = vld [vmem:[#allocation4 + $0x6d8] sm:$0xff] }
 0x145   : > { %v906_v21 = vld [vmem:[#allocation4 + $0xa70] sm:$0xff]  ;;  %1509 = vmatpush.msrb.mxu0 %v858_v18  ;;  %v611_v18 = vld [vmem:[#allocation4 + $0x138] sm:$0xff] }
 0x146   : > { %v970_v22 = vld [vmem:[#allocation4 + $0xc70] sm:$0xff]  ;;  %1533 = vmatpush.msrb.mxu1 %v906_v21  ;;  %v723_v21 = vld [vmem:[#allocation4 + $0x4b8] sm:$0xff] }
 0x147   : > { %v1034_v23 = vld [vmem:[#allocation4 + $0xe70] sm:$0xff]  ;;  %1553 = vmatpush.msrb.mxu2 %v970_v22  ;;  %v659_v22 = vld [vmem:[#allocation4 + $0x2b8] sm:$0xff] }
 0x148   : > { %v854_v24 = vld [vmem:[#allocation4 + $0x8d0] sm:$0xff]  ;;  %1573 = vmatpush.msrb.mxu3 %v1034_v23  ;;  %v787_v23 = vld [vmem:[#allocation4 + $0x6b8] sm:$0xff] }
 0x149   : > { %v902_v26 = vld [vmem:[#allocation4 + $0xa50] sm:$0xff]  ;;  %1510 = vmatpush.msrb.mxu0 %v854_v24  ;;  %v607_v24 = vld [vmem:[#allocation4 + $0x118] sm:$0xff] }
 0x14a   : > { %v966_v27 = vld [vmem:[#allocation4 + $0xc50] sm:$0xff]  ;;  %1534 = vmatpush.msrb.mxu1 %v902_v26  ;;  %v719_v26 = vld [vmem:[#allocation4 + $0x498] sm:$0xff] }
 0x14b   : > { %v1030_v28 = vld [vmem:[#allocation4 + $0xe50] sm:$0xff]  ;;  %1554 = vmatpush.msrb.mxu2 %v966_v27  ;;  %v655_v27 = vld [vmem:[#allocation4 + $0x298] sm:$0xff] }
 0x14c   : > { %v850_v29 = vld [vmem:[#allocation4 + $0x8b0] sm:$0xff]  ;;  %1574 = vmatpush.msrb.mxu3 %v1030_v28  ;;  %v783_v28 = vld [vmem:[#allocation4 + $0x698] sm:$0xff] }
 0x14d   : > { %v898_v30 = vld [vmem:[#allocation4 + $0xa30] sm:$0xff]  ;;  %1511 = vmatpush.msrb.mxu0 %v850_v29  ;;  %v603_v29 = vld [vmem:[#allocation4 + $0xf8] sm:$0xff] }
 0x14e   : > { %v962_v31 = vld [vmem:[#allocation4 + $0xc30] sm:$0xff]  ;;  %1535 = vmatpush.msrb.mxu1 %v898_v30  ;;  %v715_v30 = vld [vmem:[#allocation4 + $0x478] sm:$0xff] }
 0x14f   : > { %v1026_v32 = vld [vmem:[#allocation4 + $0xe30] sm:$0xff]  ;;  %1555 = vmatpush.msrb.mxu2 %v962_v31  ;;  %v651_v31 = vld [vmem:[#allocation4 + $0x278] sm:$0xff] }
 0x150   : > { %v846_v33 = vld [vmem:[#allocation4 + $0x890] sm:$0xff]  ;;  %1575 = vmatpush.msrb.mxu3 %v1026_v32  ;;  %v779_v32 = vld [vmem:[#allocation4 + $0x678] sm:$0xff] }
 0x151   : > { %v894_v34 = vld [vmem:[#allocation4 + $0xa10] sm:$0xff]  ;;  %1512 = vmatpush.msrb.mxu0 %v846_v33  ;;  %v599_v33 = vld [vmem:[#allocation4 + $0xd8] sm:$0xff] }
 0x152   : > { %v958_v35 = vld [vmem:[#allocation4 + $0xc10] sm:$0xff]  ;;  %1536 = vmatpush.msrb.mxu1 %v894_v34  ;;  %v711_v34 = vld [vmem:[#allocation4 + $0x458] sm:$0xff] }
 0x153   : > { %v1022_v36 = vld [vmem:[#allocation4 + $0xe10] sm:$0xff]  ;;  %1556 = vmatpush.msrb.mxu2 %v958_v35  ;;  %1537 = vmatmul.f32.vlgmr.msrb.gmra.mxu1 %v3288_v25  ;;  %v647_v35 = vld [vmem:[#allocation4 + $0x258] sm:$0xff] }
 0x154   : > { %v842_v37 = vld [vmem:[#allocation4 + $0x870] sm:$0xff]  ;;  %1576 = vmatpush.msrb.mxu3 %v1022_v36  ;;  %1601 = vmatpush.msra.mxu1 %v699_v38  ;;  %v775_v36 = vld [vmem:[#allocation4 + $0x658] sm:$0xff] }
 0x155   : > { %v838_v41 = vld [vmem:[#allocation4 + $0x850] sm:$0xff]  ;;  %1513 = vmatpush.msrb.mxu0 %v842_v37  ;;  %1621 = vmatpush.msra.mxu2 %v763_v39  ;;  %v595_v37 = vld [vmem:[#allocation4 + $0xb8] sm:$0xff] }
 0x156   : > { %1641 = vmatpush.msra.mxu3 %v827_v40  ;;  %v834_v45 = vld [vmem:[#allocation4 + $0x830] sm:$0xff]  ;;  %1602 = vmatpush.msra.mxu1 %v695_v42  ;;  %v707_v38 = vld [vmem:[#allocation4 + $0x438] sm:$0xff] }
 0x157   : > { %1514 = vmatpush.msrb.mxu0 %v838_v41  ;;  %1622 = vmatpush.msra.mxu2 %v759_v43  ;;  %v830_v49 = vld [vmem:[#allocation4 + $0x810] sm:$0xff]  ;;  %v643_v39 = vld [vmem:[#allocation4 + $0x238] sm:$0xff] }
 0x158   : > { %1642 = vmatpush.msra.mxu3 %v823_v44  ;;  %1603 = vmatpush.msra.mxu1 %v691_v46  ;;  %v771_v40 = vld [vmem:[#allocation4 + $0x638] sm:$0xff] }
 0x159   : > { %1515 = vmatpush.msrb.mxu0 %v834_v45  ;;  %1623 = vmatpush.msra.mxu2 %v755_v47  ;;  %v591_v41 = vld [vmem:[#allocation4 + $0x98] sm:$0xff] }
 0x15a   : > { %1643 = vmatpush.msra.mxu3 %v819_v48  ;;  %1557 = vmatmul.f32.vlgmr.msrb.gmra.mxu2 %v3278_v13  ;;  %v703_v42 = vld [vmem:[#allocation4 + $0x418] sm:$0xff] }
 0x15b   : > { %1516 = vmatpush.msrb.mxu0 %v830_v49  ;;  %1604 = vmatpush.msra.mxu1 %v687_v50  ;;  %v639_v43 = vld [vmem:[#allocation4 + $0x218] sm:$0xff] }
 0x15c   : > { %1624 = vmatpush.msra.mxu2 %v751_v51  ;;  %1644 = vmatpush.msra.mxu3 %v815_v52  ;;  %v767_v44 = vld [vmem:[#allocation4 + $0x618] sm:$0xff] }
 0x15d   : > { %1581 = vmatpush.msra.mxu0 %v635_v53  ;;  %1577 = vmatmul.f32.vlgmr.msrb.gmra.mxu3 %v3284_v20  ;;  %v587_v45 = vld [vmem:[#allocation4 + $0x78] sm:$0xff] }
 0x15e   : > { %1517 = vmatmul.f32.vlgmr.msrb.gmra.mxu0 %v3281_v19  ;;  %1605 = vmatpush.msra.mxu1 %v683_v54  ;;  %v955_v46 = vld [vmem:[#allocation4 + $0xbf8] sm:$0xff] }
 0x15f   : > { %1625 = vmatpush.msra.mxu2 %v747_v55  ;;  %1645 = vmatpush.msra.mxu3 %v811_v56  ;;  %v1019_v47 = vld [vmem:[#allocation4 + $0xdf8] sm:$0xff] }
 0x160   : > { %1582 = vmatpush.msra.mxu0 %v631_v58  ;;  %1606 = vmatpush.msra.mxu1 %v679_v60  ;;  %v1083_v48 = vld [vmem:[#allocation4 + $0xff8] sm:$0xff] }
 0x161   : > { %1626 = vmatpush.msra.mxu2 %v743_v59  ;;  %1646 = vmatpush.msra.mxu3 %v807_v62  ;;  %v583_v49 = vld [vmem:[#allocation4 + $0x58] sm:$0xff] }
 0x162   : > { %1583 = vmatpush.msra.mxu0 %v627_v1  ;;  %1607 = vmatpush.msra.mxu1 %v675_v3  ;;  %v951_v50 = vld [vmem:[#allocation4 + $0xbd8] sm:$0xff] }
 0x163   : > { %1627 = vmatpush.msra.mxu2 %v739_v2  ;;  %1647 = vmatpush.msra.mxu3 %v803_v4  ;;  %v1015_v51 = vld [vmem:[#allocation4 + $0xdd8] sm:$0xff] }
 0x164   : > { %1584 = vmatpush.msra.mxu0 %v623_v5  ;;  %1608 = vmatpush.msra.mxu1 %v671_v7  ;;  %v1079_v52 = vld [vmem:[#allocation4 + $0xfd8] sm:$0xff] }
 0x165   : > { %1628 = vmatpush.msra.mxu2 %v735_v6  ;;  %1648 = vmatpush.msra.mxu3 %v799_v8  ;;  %v579_v53 = vld [vmem:[#allocation4 + $0x38] sm:$0xff] }
 0x166   : > { %1585 = vmatpush.msra.mxu0 %v619_v9  ;;  %1609 = vmatpush.msra.mxu1 %v667_v11  ;;  %v947_v54 = vld [vmem:[#allocation4 + $0xbb8] sm:$0xff] }
 0x167   : > { %1629 = vmatpush.msra.mxu2 %v731_v10  ;;  %1649 = vmatpush.msra.mxu3 %v795_v12  ;;  %v1011_v55 = vld [vmem:[#allocation4 + $0xdb8] sm:$0xff] }
 0x168   : > { %1586 = vmatpush.msra.mxu0 %v615_v14  ;;  %1610 = vmatpush.msra.mxu1 %v663_v16  ;;  %v1075_v56 = vld [vmem:[#allocation4 + $0xfb8] sm:$0xff] }
 0x169   : > { %1630 = vmatpush.msra.mxu2 %v727_v15  ;;  %1650 = vmatpush.msra.mxu3 %v791_v17  ;;  %v575_v58 = vld [vmem:[#allocation4 + $0x18] sm:$0xff] }
 0x16a   : > { %1587 = vmatpush.msra.mxu0 %v611_v18  ;;  %1611 = vmatpush.msra.mxu1 %v659_v22  ;;  %v943_v59 = vld [vmem:[#allocation4 + $0xb98] sm:$0xff] }
 0x16b   : > { %1631 = vmatpush.msra.mxu2 %v723_v21  ;;  %1651 = vmatpush.msra.mxu3 %v787_v23  ;;  %v1007_v60 = vld [vmem:[#allocation4 + $0xd98] sm:$0xff] }
 0x16c   : > { %1588 = vmatpush.msra.mxu0 %v607_v24  ;;  %1612 = vmatpush.msra.mxu1 %v655_v27  ;;  %v1071_v62 = vld [vmem:[#allocation4 + $0xf98] sm:$0xff] }
 0x16d   : > { %1632 = vmatpush.msra.mxu2 %v719_v26  ;;  %1652 = vmatpush.msra.mxu3 %v783_v28  ;;  %v891_v1 = vld [vmem:[#allocation4 + $0x9f8] sm:$0xff] }
 0x16e   : > { %1589 = vmatpush.msra.mxu0 %v603_v29  ;;  %1613 = vmatpush.msra.mxu1 %v651_v31  ;;  %v939_v2 = vld [vmem:[#allocation4 + $0xb78] sm:$0xff] }
 0x16f   : > { %1633 = vmatpush.msra.mxu2 %v715_v30  ;;  %1653 = vmatpush.msra.mxu3 %v779_v32  ;;  %v1003_v3 = vld [vmem:[#allocation4 + $0xd78] sm:$0xff] }
 0x170   : > { %1590 = vmatpush.msra.mxu0 %v599_v33  ;;  %1614 = vmatpush.msra.mxu1 %v647_v35  ;;  %v1067_v4 = vld [vmem:[#allocation4 + $0xf78] sm:$0xff] }
 0x171   : > { %1634 = vmatpush.msra.mxu2 %v711_v34  ;;  %1654 = vmatpush.msra.mxu3 %v775_v36  ;;  %v887_v5 = vld [vmem:[#allocation4 + $0x9d8] sm:$0xff] }
 0x172   : > { %1591 = vmatpush.msra.mxu0 %v595_v37  ;;  %1615 = vmatpush.msra.mxu1 %v643_v39  ;;  %v935_v6 = vld [vmem:[#allocation4 + $0xb58] sm:$0xff] }
 0x173   : > { %1635 = vmatpush.msra.mxu2 %v707_v38  ;;  %1655 = vmatpush.msra.mxu3 %v771_v40  ;;  %v999_v7 = vld [vmem:[#allocation4 + $0xd58] sm:$0xff] }
 0x174   : > { %1592 = vmatpush.msra.mxu0 %v591_v41  ;;  %1616 = vmatpush.msra.mxu1 %v639_v43  ;;  %v1063_v8 = vld [vmem:[#allocation4 + $0xf58] sm:$0xff] }
 0x175   : > { %1636 = vmatpush.msra.mxu2 %v703_v42  ;;  %1656 = vmatpush.msra.mxu3 %v767_v44  ;;  %v883_v9 = vld [vmem:[#allocation4 + $0x9b8] sm:$0xff] }
 0x176   : > { %1593 = vmatpush.msra.mxu0 %v587_v45  ;;  %1681 = vmatpush.msrb.mxu1 %v955_v46  ;;  %v931_v10 = vld [vmem:[#allocation4 + $0xb38] sm:$0xff] }
 0x177   : > { %1701 = vmatpush.msrb.mxu2 %v1019_v47  ;;  %1721 = vmatpush.msrb.mxu3 %v1083_v48  ;;  %v995_v11 = vld [vmem:[#allocation4 + $0xd38] sm:$0xff] }
 0x178   : > { %1594 = vmatpush.msra.mxu0 %v583_v49  ;;  %1682 = vmatpush.msrb.mxu1 %v951_v50  ;;  %v1059_v12 = vld [vmem:[#allocation4 + $0xf38] sm:$0xff] }
 0x179   : > { %1702 = vmatpush.msrb.mxu2 %v1015_v51  ;;  %1722 = vmatpush.msrb.mxu3 %v1079_v52  ;;  %v879_v14 = vld [vmem:[#allocation4 + $0x998] sm:$0xff] }
 0x17a   : > { %1595 = vmatpush.msra.mxu0 %v579_v53  ;;  %1683 = vmatpush.msrb.mxu1 %v947_v54  ;;  %v927_v15 = vld [vmem:[#allocation4 + $0xb18] sm:$0xff]  ;;  %v1769_v54 = vld [vmem:[#allocation2 + $0xe0] sm:$0xff] }
 0x17b   : > { %1703 = vmatpush.msrb.mxu2 %v1011_v55  ;;  %1723 = vmatpush.msrb.mxu3 %v1075_v56  ;;  %v991_v16 = vld [vmem:[#allocation4 + $0xd18] sm:$0xff]  ;;  %v1770_v55 = vld [vmem:[#allocation2 + $0xe8] sm:$0xff]  ;;  %v1771_v56 = vld [vmem:[#allocation2 + $0xf0] sm:$0xff] }
 0x17c   : > { %1596 = vmatpush.msra.mxu0 %v575_v58  ;;  %1684 = vmatpush.msrb.mxu1 %v943_v59  ;;  %v1055_v17 = vld [vmem:[#allocation4 + $0xf18] sm:$0xff]  ;;  %v1765_v58 = vld [vmem:[#allocation2 + $0xc0] sm:$0xff]  ;;  %v1766_v59 = vld [vmem:[#allocation2 + $0xc8] sm:$0xff] }
 0x17d   : > { %1704 = vmatpush.msrb.mxu2 %v1007_v60  ;;  %1724 = vmatpush.msrb.mxu3 %v1071_v62  ;;  %v875_v18 = vld [vmem:[#allocation4 + $0x978] sm:$0xff]  ;;  %v1767_v60 = vld [vmem:[#allocation2 + $0xd0] sm:$0xff]  ;;  %v1761_v62 = vld [vmem:[#allocation2 + $0xa0] sm:$0xff] }
 0x17e   : > { %1661 = vmatpush.msrb.mxu0 %v891_v1  ;;  %1685 = vmatpush.msrb.mxu1 %v939_v2  ;;  %v923_v21 = vld [vmem:[#allocation4 + $0xaf8] sm:$0xff]  ;;  %v1763_v1 = vld [vmem:[#allocation2 + $0xb0] sm:$0xff]  ;;  %v1757_v2 = vld [vmem:[#allocation2 + $0x80] sm:$0xff] }
 0x17f   : > { %1705 = vmatpush.msrb.mxu2 %v1003_v3  ;;  %1725 = vmatpush.msrb.mxu3 %v1067_v4  ;;  %v987_v22 = vld [vmem:[#allocation4 + $0xcf8] sm:$0xff]  ;;  %v1758_v3 = vld [vmem:[#allocation2 + $0x88] sm:$0xff]  ;;  %v1759_v4 = vld [vmem:[#allocation2 + $0x90] sm:$0xff] }
 0x180   : > { %1662 = vmatpush.msrb.mxu0 %v887_v5  ;;  %1686 = vmatpush.msrb.mxu1 %v935_v6  ;;  %v1051_v23 = vld [vmem:[#allocation4 + $0xef8] sm:$0xff]  ;;  %v1753_v5 = vld [vmem:[#allocation2 + $0x60] sm:$0xff]  ;;  %v1754_v6 = vld [vmem:[#allocation2 + $0x68] sm:$0xff] }
 0x181   : > { %1706 = vmatpush.msrb.mxu2 %v999_v7  ;;  %1726 = vmatpush.msrb.mxu3 %v1063_v8  ;;  %v871_v24 = vld [vmem:[#allocation4 + $0x958] sm:$0xff]  ;;  %v1755_v7 = vld [vmem:[#allocation2 + $0x70] sm:$0xff]  ;;  %v1749_v8 = vld [vmem:[#allocation2 + $0x40] sm:$0xff] }
 0x182   : > { %1663 = vmatpush.msrb.mxu0 %v883_v9  ;;  %1687 = vmatpush.msrb.mxu1 %v931_v10  ;;  %v919_v26 = vld [vmem:[#allocation4 + $0xad8] sm:$0xff]  ;;  %v1750_v9 = vld [vmem:[#allocation2 + $0x48] sm:$0xff]  ;;  %v1745_v10 = vld [vmem:[#allocation2 + $0x20] sm:$0xff] }
 0x183   : > { %1707 = vmatpush.msrb.mxu2 %v995_v11  ;;  %1727 = vmatpush.msrb.mxu3 %v1059_v12  ;;  %v983_v27 = vld [vmem:[#allocation4 + $0xcd8] sm:$0xff]  ;;  %v1746_v11 = vld [vmem:[#allocation2 + $0x28] sm:$0xff]  ;;  %v1743_v12 = vld [vmem:[#allocation2 + $0x10] sm:$0xff] }
 0x184   : > { %1664 = vmatpush.msrb.mxu0 %v879_v14  ;;  %1688 = vmatpush.msrb.mxu1 %v927_v15  ;;  %v1047_v28 = vld [vmem:[#allocation4 + $0xed8] sm:$0xff]  ;;  %v568_v14 = vld [vmem:[%s3323_s29] sm:$0xff] }
 0x185   : > { %1708 = vmatpush.msrb.mxu2 %v991_v16  ;;  %1728 = vmatpush.msrb.mxu3 %v1055_v17  ;;  %v867_v29 = vld [vmem:[#allocation4 + $0x938] sm:$0xff] }
 0x186   : > { %1665 = vmatpush.msrb.mxu0 %v875_v18  ;;  %1689 = vmatpush.msrb.mxu1 %v923_v21  ;;  %v915_v30 = vld [vmem:[#allocation4 + $0xab8] sm:$0xff]  ;;  %v569_v18 = vld [vmem:[%s3323_s29 + $0x8] sm:$0xff] }
 0x187   : > { %1709 = vmatpush.msrb.mxu2 %v987_v22  ;;  %1729 = vmatpush.msrb.mxu3 %v1051_v23  ;;  %v979_v31 = vld [vmem:[#allocation4 + $0xcb8] sm:$0xff] }
 0x188   : > { %1666 = vmatpush.msrb.mxu0 %v871_v24  ;;  %1690 = vmatpush.msrb.mxu1 %v919_v26  ;;  %v1043_v32 = vld [vmem:[#allocation4 + $0xeb8] sm:$0xff]  ;;  %v570_v24 = vld [vmem:[%s3323_s29 + $0x10] sm:$0xff]  ;;  %s566_s29 = scalar_lea.vmem %s3559_s27, %s2666_s11 }
 0x189   : > { %1710 = vmatpush.msrb.mxu2 %v983_v27  ;;  %1730 = vmatpush.msrb.mxu3 %v1047_v28  ;;  %v863_v33 = vld [vmem:[#allocation4 + $0x918] sm:$0xff] }
 0x18a   : > { %v911_v34 = vld [vmem:[#allocation4 + $0xa98] sm:$0xff]  ;;  %1667 = vmatpush.msrb.mxu0 %v867_v29  ;;  %1691 = vmatpush.msrb.mxu1 %v915_v30  ;;  %v1985_v29 = vld [vmem:[#allocation7 + $0x1e0] sm:$0xff] }
 0x18b   : > { %v975_v35 = vld [vmem:[#allocation4 + $0xc98] sm:$0xff]  ;;  %1711 = vmatpush.msrb.mxu2 %v979_v31  ;;  %1731 = vmatpush.msrb.mxu3 %v1043_v32 }
 0x18c   : > { %v1039_v36 = vld [vmem:[#allocation4 + $0xe98] sm:$0xff]  ;;  %1668 = vmatpush.msrb.mxu0 %v863_v33  ;;  %1692 = vmatpush.msrb.mxu1 %v911_v34  ;;  %v1953_v33 = vld [vmem:[#allocation7 + $0xe0] sm:$0xff] }
 0x18d   : > { %v859_v37 = vld [vmem:[#allocation4 + $0x8f8] sm:$0xff]  ;;  %1712 = vmatpush.msrb.mxu2 %v975_v35  ;;  %1732 = vmatpush.msrb.mxu3 %v1039_v36  ;;  %v2017_v34 = vld [vmem:[#allocation7 + $0x2e0] sm:$0xff] }
 0x18e   : > { %v907_v38 = vld [vmem:[#allocation4 + $0xa78] sm:$0xff]  ;;  %1669 = vmatpush.msrb.mxu0 %v859_v37  ;;  %1637 = vmatmul.f32.vlgmr.msra.gmra.mxu2 %v3262_v57  ;;  %v1981_v37 = vld [vmem:[#allocation7 + $0x1c0] sm:$0xff] }
 0x18f   : > { %v971_v39 = vld [vmem:[#allocation4 + $0xc78] sm:$0xff]  ;;  %1693 = vmatpush.msrb.mxu1 %v907_v38  ;;  %1597 = vmatmul.f32.vlgmr.msra.gmra.mxu0 %v3265_v61  ;;  %v1949_v38 = vld [vmem:[#allocation7 + $0xc0] sm:$0xff] }
 0x190   : > { %v1035_v40 = vld [vmem:[#allocation4 + $0xe78] sm:$0xff]  ;;  %1713 = vmatpush.msrb.mxu2 %v971_v39  ;;  %1617 = vmatmul.f32.vlgmr.msra.gmra.mxu1 %v3268_v63  ;;  %v1762_v63 = vld [vmem:[#allocation2 + $0xa8] sm:$0xff] }
 0x191   : > { %v855_v41 = vld [vmem:[#allocation4 + $0x8d8] sm:$0xff]  ;;  %1733 = vmatpush.msrb.mxu3 %v1035_v40  ;;  %v2013_v39 = vld [vmem:[#allocation7 + $0x2c0] sm:$0xff] }
 0x192   : > { %v903_v42 = vld [vmem:[#allocation4 + $0xa58] sm:$0xff]  ;;  %1670 = vmatpush.msrb.mxu0 %v855_v41  ;;  %1657 = vmatmul.f32.vlgmr.msra.gmra.mxu3 %v3271_v0 }
 0x193   : > { %v967_v43 = vld [vmem:[#allocation4 + $0xc58] sm:$0xff]  ;;  %1694 = vmatpush.msrb.mxu1 %v903_v42 }
 0x194   : > { %v1031_v44 = vld [vmem:[#allocation4 + $0xe58] sm:$0xff]  ;;  %1714 = vmatpush.msrb.mxu2 %v967_v43  ;;  %v1977_v43 = vld [vmem:[#allocation7 + $0x1a0] sm:$0xff] }
 0x195   : > { %v851_v45 = vld [vmem:[#allocation4 + $0x8b8] sm:$0xff]  ;;  %1734 = vmatpush.msrb.mxu3 %v1031_v44 }
 0x196   : > { %v899_v46 = vld [vmem:[#allocation4 + $0xa38] sm:$0xff]  ;;  %1671 = vmatpush.msrb.mxu0 %v851_v45  ;;  %v1973_v45 = vld [vmem:[#allocation7 + $0x180] sm:$0xff] }
 0x197   : > { %v963_v47 = vld [vmem:[#allocation4 + $0xc38] sm:$0xff]  ;;  %1695 = vmatpush.msrb.mxu1 %v899_v46  ;;  %v3340_v46 = vpop.f32.mrf.mxu1 }
 0x198   : > { %v1027_v48 = vld [vmem:[#allocation4 + $0xe38] sm:$0xff]  ;;  %1715 = vmatpush.msrb.mxu2 %v963_v47  ;;  %v3342_v47 = vpop.f32.mrf.mxu3 }
 0x199   : > { %v847_v49 = vld [vmem:[#allocation4 + $0x898] sm:$0xff]  ;;  %1735 = vmatpush.msrb.mxu3 %v1027_v48  ;;  %v3344_v48 = vpop.f32.mrf.mxu2 }
 0x19a   : > { %v895_v50 = vld [vmem:[#allocation4 + $0xa18] sm:$0xff]  ;;  %1672 = vmatpush.msrb.mxu0 %v847_v49 }
 0x19b   : > { %v959_v51 = vld [vmem:[#allocation4 + $0xc18] sm:$0xff]  ;;  %1696 = vmatpush.msrb.mxu1 %v895_v50  ;;  %v3348_v50 = vpop.f32.mrf.mxu0 }
 0x19c   : > { %v1023_v52 = vld [vmem:[#allocation4 + $0xe18] sm:$0xff]  ;;  %1716 = vmatpush.msrb.mxu2 %v959_v51  ;;  %1697 = vmatmul.f32.vlgmr.msrb.gmra.mxu1 %v3288_v25  ;;  %v1742_v25 = vld [vmem:[#allocation2 + $0x8] sm:$0xff] }
 0x19d   : > { %v843_v53 = vld [vmem:[#allocation4 + $0x878] sm:$0xff]  ;;  %1736 = vmatpush.msrb.mxu3 %v1023_v52  ;;  %1821 = vmatpush.msra.mxu1 %v1770_v55 }
 0x19e   : > { %v839_v57 = vld [vmem:[#allocation4 + $0x858] sm:$0xff]  ;;  %1673 = vmatpush.msrb.mxu0 %v843_v53  ;;  %1847 = vmatpush.msra.mxu2 %v1771_v56  ;;  %v2009_v56 = vld [vmem:[#allocation7 + $0x2a0] sm:$0xff] }
 0x19f   : > { %1795 = vmatpush.msra.mxu3 %v1769_v54  ;;  %v835_v61 = vld [vmem:[#allocation4 + $0x838] sm:$0xff]  ;;  %1822 = vmatpush.msra.mxu1 %v1766_v59  ;;  %v3346_v49 = vpop.f32.mrf.mxu1  ;;  %v1945_v54 = vld [vmem:[#allocation7 + $0xa0] sm:$0xff] }
 0x1a0   : > { %1674 = vmatpush.msrb.mxu0 %v839_v57  ;;  %1848 = vmatpush.msra.mxu2 %v1767_v60  ;;  %v831_v0 = vld [vmem:[#allocation4 + $0x818] sm:$0xff]  ;;  %v3350_v51 = vpop.f32.mrf.mxu3 }
 0x1a1   : > { %1796 = vmatpush.msra.mxu3 %v1765_v58  ;;  %1823 = vmatpush.msra.mxu1 %v1762_v63  ;;  %v1772_v15 = vld [vmem:[#allocation2 + $0xf8] sm:$0xff]  ;;  %v3352_v52 = vpop.f32.mrf.mxu2  ;;  %v1969_v58 = vld [vmem:[#allocation7 + $0x160] sm:$0xff] }
 0x1a2   : > { %1675 = vmatpush.msrb.mxu0 %v835_v61  ;;  %1849 = vmatpush.msra.mxu2 %v1763_v1  ;;  %v1768_v16 = vld [vmem:[#allocation2 + $0xd8] sm:$0xff]  ;;  %v2005_v1 = vld [vmem:[#allocation7 + $0x280] sm:$0xff] }
 0x1a3   : > { %1797 = vmatpush.msra.mxu3 %v1761_v62  ;;  %1717 = vmatmul.f32.vlgmr.msrb.gmra.mxu2 %v3278_v13  ;;  %v1751_v13 = vld [vmem:[#allocation2 + $0x50] sm:$0xff]  ;;  %v1764_v17 = vld [vmem:[#allocation2 + $0xb8] sm:$0xff]  ;;  %v3356_v60 = vpop.f32.mrf.mxu0  ;;  %v1941_v62 = vld [vmem:[#allocation7 + $0x80] sm:$0xff] }
 0x1a4   : > { %1676 = vmatpush.msrb.mxu0 %v831_v0  ;;  %1824 = vmatpush.msra.mxu1 %v1758_v3  ;;  %v1760_v21 = vld [vmem:[#allocation2 + $0x98] sm:$0xff] }
 0x1a5   : > { %1798 = vmatpush.msra.mxu3 %v1757_v2  ;;  %1850 = vmatpush.msra.mxu2 %v1759_v4  ;;  %v1756_v22 = vld [vmem:[#allocation2 + $0x78] sm:$0xff]  ;;  %v1965_v4 = vld [vmem:[#allocation7 + $0x140] sm:$0xff] }
 0x1a6   : > { %1677 = vmatmul.f32.vlgmr.msrb.gmra.mxu0 %v3281_v19  ;;  %1737 = vmatmul.f32.vlgmr.msrb.gmra.mxu3 %v3284_v20  ;;  %v1747_v19 = vld [vmem:[#allocation2 + $0x30] sm:$0xff]  ;;  %v1741_v20 = vld [vmem:[#allocation2] sm:$0xff]  ;;  %v1752_v23 = vld [vmem:[#allocation2 + $0x58] sm:$0xff] }
 0x1a7   : > { %1799 = vmatpush.msra.mxu3 %v1753_v5  ;;  %1825 = vmatpush.msra.mxu1 %v1754_v6  ;;  %v1748_v26 = vld [vmem:[#allocation2 + $0x38] sm:$0xff]  ;;  %v3354_v53 = vpop.f32.mrf.mxu1 }
 0x1a8   : > { %1851 = vmatpush.msra.mxu2 %v1755_v7  ;;  %v1744_v27 = vld [vmem:[#allocation2 + $0x18] sm:$0xff]  ;;  %v3358_v61 = vpop.f32.mrf.mxu3  ;;  %v1937_v7 = vld [vmem:[#allocation7 + $0x60] sm:$0xff] }
 0x1a9   : > { %1800 = vmatpush.msra.mxu3 %v1749_v8  ;;  %1826 = vmatpush.msra.mxu1 %v1750_v9  ;;  %v1987_v28 = vld [vmem:[#allocation7 + $0x1f0] sm:$0xff]  ;;  %v3360_v0 = vpop.f32.mrf.mxu2  ;;  %v2001_v9 = vld [vmem:[#allocation7 + $0x260] sm:$0xff] }
 0x1aa   : > { %1852 = vmatpush.msra.mxu2 %v1751_v13  ;;  %v1955_v30 = vld [vmem:[#allocation7 + $0xf0] sm:$0xff] }
 0x1ab   : > { %1801 = vmatpush.msra.mxu3 %v1745_v10  ;;  %1827 = vmatpush.msra.mxu1 %v1746_v11  ;;  %v2019_v31 = vld [vmem:[#allocation7 + $0x2f0] sm:$0xff]  ;;  %v1278_v6 = vpop.f32.mrf.mxu0  ;;  %v1961_v11 = vld [vmem:[#allocation7 + $0x120] sm:$0xff] }
 0x1ac   : > { %1853 = vmatpush.msra.mxu2 %v1747_v19  ;;  %v1983_v32 = vld [vmem:[#allocation7 + $0x1d0] sm:$0xff]  ;;  %2059 = vmatpush.msra.mxu0 %v1955_v30 }
 0x1ad   : > { %1802 = vmatpush.msra.mxu3 %v1741_v20  ;;  %1828 = vmatpush.msra.mxu1 %v1742_v25  ;;  %v1951_v35 = vld [vmem:[#allocation7 + $0xd0] sm:$0xff] }
 0x1ae   : > { %1854 = vmatpush.msra.mxu2 %v1743_v12  ;;  %2652 = vmatmul.msk.f32.vlgmr.msra.gmra.mxu3 %vm1777_vm0, %v568_v14  ;;  %v2015_v36 = vld [vmem:[#allocation7 + $0x2d0] sm:$0xff]  ;;  %v1933_v12 = vld [vmem:[#allocation7 + $0x40] sm:$0xff] }
 0x1af   : > { %2655 = vmatmul.msk.f32.vlgmr.msra.gmra.mxu1 %vm1777_vm0, %v568_v14  ;;  %2658 = vmatmul.msk.f32.vlgmr.msra.gmra.mxu2 %vm1777_vm0, %v568_v14  ;;  %v1979_v40 = vld [vmem:[#allocation7 + $0x1b0] sm:$0xff]  ;;  %v3362_v2 = vpop.f32.mrf.mxu1 }
 0x1b0   : > { %1873 = vmatpush.msrb.mxu3 %v1772_v15  ;;  %2085 = vmatpush.msrb.mxu1 %v1987_v28  ;;  %v1947_v41 = vld [vmem:[#allocation7 + $0xb0] sm:$0xff]  ;;  %v3364_v13 = vpop.f32.mrf.mxu3  ;;  %v1997_v15 = vld [vmem:[#allocation7 + $0x240] sm:$0xff] }
 0x1b1   : > { %2111 = vmatpush.msrb.mxu2 %v2019_v31  ;;  %2060 = vmatpush.msra.mxu0 %v1953_v33  ;;  %v2011_v42 = vld [vmem:[#allocation7 + $0x2b0] sm:$0xff]  ;;  %v3366_v20 = vpop.f32.mrf.mxu2  ;;  %v2049_v28 = vld [vmem:[#allocation7 + $0x3e0] sm:$0xff] }
 0x1b2   : > { %1874 = vmatpush.msrb.mxu3 %v1768_v16  ;;  %2086 = vmatpush.msrb.mxu1 %v1985_v29  ;;  %v1975_v44 = vld [vmem:[#allocation7 + $0x190] sm:$0xff]  ;;  %v1986_v29 = vld [vmem:[#allocation7 + $0x1e8] sm:$0xff] }
 0x1b3   : > { %2112 = vmatpush.msrb.mxu2 %v2017_v34  ;;  %2061 = vmatpush.msra.mxu0 %v1951_v35  ;;  %v1971_v55 = vld [vmem:[#allocation7 + $0x170] sm:$0xff]  ;;  %v1299_v34 = vadd.f32 %v3354_v53, %v1278_v6  ;;  %v1984_v35 = vld [vmem:[#allocation7 + $0x1d8] sm:$0xff] }
 0x1b4   : > { %1875 = vmatpush.msrb.mxu3 %v1764_v17  ;;  %2087 = vmatpush.msrb.mxu1 %v1983_v32  ;;  %v1943_v57 = vld [vmem:[#allocation7 + $0x90] sm:$0xff]  ;;  %v1957_v17 = vld [vmem:[#allocation7 + $0x100] sm:$0xff]  ;;  %v1980_v53 = vld [vmem:[#allocation7 + $0x1b8] sm:$0xff] }
 0x1b5   : > { %2113 = vmatpush.msrb.mxu2 %v2015_v36  ;;  %2062 = vmatpush.msra.mxu0 %v1949_v38  ;;  %v2007_v59 = vld [vmem:[#allocation7 + $0x290] sm:$0xff]  ;;  %v1925_v36 = vld [vmem:[#allocation7] sm:$0xff] }
 0x1b6   : > { %2653 = vmatmul.msk.f32.gmra.mxu3 %vm1777_vm0, %v569_v18  ;;  %2088 = vmatpush.msrb.mxu1 %v1981_v37  ;;  %v1967_v63 = vld [vmem:[#allocation7 + $0x150] sm:$0xff]  ;;  %v1989_v37 = vld [vmem:[#allocation7 + $0x200] sm:$0xff] }
 0x1b7   : > { %2656 = vmatmul.msk.f32.gmra.mxu1 %vm1777_vm0, %v569_v18  ;;  %2659 = vmatmul.msk.f32.gmra.mxu2 %vm1777_vm0, %v569_v18  ;;  %v1939_v3 = vld [vmem:[#allocation7 + $0x70] sm:$0xff]  ;;  %v1458_v25 = vpop.f32.mrf.mxu1  ;;  %v2045_v38 = vld [vmem:[#allocation7 + $0x3c0] sm:$0xff] }
 0x1b8   : > { %1876 = vmatpush.msrb.mxu3 %v1760_v21  ;;  %2114 = vmatpush.msrb.mxu2 %v2013_v39  ;;  %v2003_v5 = vld [vmem:[#allocation7 + $0x270] sm:$0xff] }
 0x1b9   : > { %2089 = vmatpush.msrb.mxu1 %v1979_v40  ;;  %2063 = vmatpush.msra.mxu0 %v1947_v41  ;;  %v1963_v8 = vld [vmem:[#allocation7 + $0x130] sm:$0xff]  ;;  %v1478_v30 = vpop.f32.mrf.mxu2  ;;  %v1956_v40 = vld [vmem:[#allocation7 + $0xf8] sm:$0xff]  ;;  %v1982_v41 = vld [vmem:[#allocation7 + $0x1c8] sm:$0xff] }
 0x1ba   : > { %1877 = vmatpush.msrb.mxu3 %v1756_v22  ;;  %2115 = vmatpush.msrb.mxu2 %v2011_v42  ;;  %v1935_v10 = vld [vmem:[#allocation7 + $0x50] sm:$0xff]  ;;  %v1988_v22 = vld [vmem:[#allocation7 + $0x1f8] sm:$0xff] }
 0x1bb   : > { %2090 = vmatpush.msrb.mxu1 %v1977_v43  ;;  %2064 = vmatpush.msra.mxu0 %v1945_v54  ;;  %v1999_v19 = vld [vmem:[#allocation7 + $0x250] sm:$0xff]  ;;  %v2020_v42 = vld [vmem:[#allocation7 + $0x2f8] sm:$0xff]  ;;  %v2018_v54 = vld [vmem:[#allocation7 + $0x2e8] sm:$0xff] }
 0x1bc   : > { %1878 = vmatpush.msrb.mxu3 %v1752_v23  ;;  %2116 = vmatpush.msrb.mxu2 %v2009_v56  ;;  %v1931_v16 = vld [vmem:[#allocation7 + $0x30] sm:$0xff]  ;;  %v3368_v23 = vpop.f32.mrf.mxu0 }
 0x1bd   : > { %2091 = vmatpush.msrb.mxu1 %v1975_v44  ;;  %2065 = vmatpush.msra.mxu0 %v1943_v57  ;;  %v2051_v21 = vld [vmem:[#allocation7 + $0x3f0] sm:$0xff]  ;;  %v1319_v44 = vadd.f32 %v3360_v0, %v1299_v34  ;;  %v2041_v57 = vld [vmem:[#allocation7 + $0x3a0] sm:$0xff]  ;;  %v1940_v34 = vld [vmem:[#allocation7 + $0x78] sm:$0xff] }
 0x1be   : > { %2654 = vmatmul.msk.f32.gmra.mxu3 %vm1777_vm0, %v570_v24  ;;  %2117 = vmatpush.msrb.mxu2 %v2007_v59  ;;  %v1927_v31 = vld [vmem:[#allocation7 + $0x10] sm:$0xff]  ;;  %v1952_v59 = vld [vmem:[#allocation7 + $0xd8] sm:$0xff] }
 0x1bf   : > { %2657 = vmatmul.msk.f32.gmra.mxu1 %vm1777_vm0, %v570_v24  ;;  %2660 = vmatmul.msk.f32.gmra.mxu2 %vm1777_vm0, %v570_v24  ;;  %v1991_v32 = vld [vmem:[#allocation7 + $0x210] sm:$0xff]  ;;  %v1339_v0 = vadd.f32 %v3358_v61, %v1319_v44  ;;  %v1948_v61 = vld [vmem:[#allocation7 + $0xb8] sm:$0xff] }
 0x1c0   : > { %1879 = vmatpush.msrb.mxu3 %v1748_v26  ;;  %2092 = vmatpush.msrb.mxu1 %v1973_v45  ;;  %v1993_v26 = vld [vmem:[#allocation7 + $0x220] sm:$0xff]  ;;  %v2047_v33 = vld [vmem:[#allocation7 + $0x3d0] sm:$0xff]  ;;  %v1954_v45 = vld [vmem:[#allocation7 + $0xe8] sm:$0xff] }
 0x1c1   : > { %2066 = vmatpush.msra.mxu0 %v1941_v62  ;;  %2118 = vmatpush.msrb.mxu2 %v2005_v1  ;;  %v2043_v43 = vld [vmem:[#allocation7 + $0x3b0] sm:$0xff]  ;;  %v1978_v62 = vld [vmem:[#allocation7 + $0x1a8] sm:$0xff]  ;;  %v1936_v44 = vld [vmem:[#allocation7 + $0x58] sm:$0xff] }
 0x1c2   : > { %1880 = vmatpush.msrb.mxu3 %v1744_v27  ;;  %2093 = vmatpush.msrb.mxu1 %v1971_v55  ;;  %v3370_v27 = vpop.f32.mrf.mxu3  ;;  %v1139_v55 = vadd.f32 %v3340_v46, %v3348_v50  ;;  %v2039_v1 = vld [vmem:[#allocation7 + $0x390] sm:$0xff]  ;;  %v1950_v46 = vld [vmem:[#allocation7 + $0xc8] sm:$0xff]  ;;  %v1976_v50 = vld [vmem:[#allocation7 + $0x198] sm:$0xff] }
 0x1c3   : > { %2067 = vmatpush.msra.mxu0 %v1939_v3  ;;  %2119 = vmatpush.msrb.mxu2 %v2003_v5 }
 0x1c4   : > { %2094 = vmatpush.msrb.mxu1 %v1969_v58  ;;  %2137 = vmatpush.msra.mxu3 %v2051_v21  ;;  %v1438_v56 = vpop.f32.mrf.mxu0  ;;  %v1159_v5 = vadd.f32 %v3344_v48, %v1139_v55  ;;  %v1946_v48 = vld [vmem:[#allocation7 + $0xa8] sm:$0xff] }
 0x1c5   : > { %2068 = vmatpush.msra.mxu0 %v1937_v7  ;;  %2120 = vmatpush.msrb.mxu2 %v2001_v9  ;;  %v1459_v58 = vadd.f32 %v1458_v25, %v1438_v56  ;;  %v2037_v7 = vld [vmem:[#allocation7 + $0x380] sm:$0xff]  ;;  %v1359_v25 = vadd.f32 %v3368_v23, %v1339_v0  ;;  %v1970_v21 = vld [vmem:[#allocation7 + $0x168] sm:$0xff]  ;;  %v2031_v23 = vld [vmem:[#allocation7 + $0x350] sm:$0xff] }
 0x1c6   : > { %2661 = vmatmul.msk.f32.vlgmr.msrb.gmra.mxu3 %vm1777_vm0, %v568_v14  ;;  %2095 = vmatpush.msrb.mxu1 %v1967_v63  ;;  %v1959_v14 = vld [vmem:[#allocation7 + $0x110] sm:$0xff]  ;;  %v2016_v63 = vld [vmem:[#allocation7 + $0x2d8] sm:$0xff]  ;;  %v1934_v55 = vld [vmem:[#allocation7 + $0x48] sm:$0xff] }
 0x1c7   : > { %2069 = vmatpush.msra.mxu0 %v1935_v10  ;;  %2121 = vmatpush.msrb.mxu2 %v1999_v19  ;;  %v1974_v10 = vld [vmem:[#allocation7 + $0x188] sm:$0xff]  ;;  %v2035_v19 = vld [vmem:[#allocation7 + $0x370] sm:$0xff]  ;;  %v1960_v56 = vld [vmem:[#allocation7 + $0x118] sm:$0xff] }
 0x1c8   : > { %2096 = vmatpush.msrb.mxu1 %v1965_v4  ;;  %2138 = vmatpush.msra.mxu3 %v2049_v28  ;;  %v2014_v4 = vld [vmem:[#allocation7 + $0x2c8] sm:$0xff]  ;;  %v1968_v28 = vld [vmem:[#allocation7 + $0x158] sm:$0xff] }
 0x1c9   : > { %2070 = vmatpush.msra.mxu0 %v1933_v12  ;;  %2122 = vmatpush.msrb.mxu2 %v1997_v15  ;;  %v1972_v12 = vld [vmem:[#allocation7 + $0x178] sm:$0xff]  ;;  %v1179_v15 = vadd.f32 %v3342_v47, %v1159_v5  ;;  %v2006_v47 = vld [vmem:[#allocation7 + $0x288] sm:$0xff] }
 0x1ca   : > { %2097 = vmatpush.msrb.mxu1 %v1963_v8  ;;  %2139 = vmatpush.msra.mxu3 %v2047_v33  ;;  %v1479_v8 = vadd.f32 %v1478_v30, %v1459_v58  ;;  %v1958_v0 = vld [vmem:[#allocation7 + $0x108] sm:$0xff] }
 0x1cb   : > { %2071 = vmatpush.msra.mxu0 %v1931_v16  ;;  %v2033_v16 = vld [vmem:[#allocation7 + $0x360] sm:$0xff] }
 0x1cc   : > { %2098 = vmatpush.msrb.mxu1 %v1961_v11  ;;  %2140 = vmatpush.msra.mxu3 %v2045_v38  ;;  %v2012_v11 = vld [vmem:[#allocation7 + $0x2b8] sm:$0xff] }
 0x1ce   : > { %2662 = vmatmul.msk.f32.gmra.mxu3 %vm1777_vm0, %v569_v18  ;;  %2099 = vmatpush.msrb.mxu1 %v1959_v14  ;;  %v1995_v18 = vld [vmem:[#allocation7 + $0x230] sm:$0xff]  ;;  %v2010_v14 = vld [vmem:[#allocation7 + $0x2a8] sm:$0xff] }
 0x1cf   : > { %2123 = vmatpush.msrb.mxu2 %v1995_v18  ;;  %2141 = vmatpush.msra.mxu3 %v2043_v43  ;;  %v1944_v18 = vld [vmem:[#allocation7 + $0x98] sm:$0xff]  ;;  %v2025_v43 = vld [vmem:[#allocation7 + $0x320] sm:$0xff] }
 0x1d0   : > { %2100 = vmatpush.msrb.mxu1 %v1957_v17  ;;  %v3373_v39 = vpop.f32.mrf.mxu1  ;;  %v1499_v17 = vadd.f32 %v3370_v27, %v1479_v8  ;;  %v1199_v27 = vadd.f32 %v3356_v60, %v1179_v15  ;;  %v1938_v60 = vld [vmem:[#allocation7 + $0x68] sm:$0xff] }
 0x1d1   : > { %2124 = vmatpush.msrb.mxu2 %v1993_v26  ;;  %2142 = vmatpush.msra.mxu3 %v2041_v57  ;;  %v1942_v26 = vld [vmem:[#allocation7 + $0x88] sm:$0xff] }
 0x1d2   : > { %2189 = vmatpush.msra.mxu1 %v1988_v22  ;;  %v2008_v22 = vld [vmem:[#allocation7 + $0x298] sm:$0xff]  ;;  %v2050_v8 = vld [vmem:[#allocation7 + $0x3e8] sm:$0xff] }
 0x1d3   : > { %2125 = vmatpush.msrb.mxu2 %v1991_v32  ;;  %2143 = vmatpush.msra.mxu3 %v2039_v1  ;;  %v2029_v32 = vld [vmem:[#allocation7 + $0x340] sm:$0xff]  ;;  %v1932_v1 = vld [vmem:[#allocation7 + $0x38] sm:$0xff]  ;;  %v1926_v15 = vld [vmem:[#allocation7 + $0x8] sm:$0xff] }
 0x1d4   : > { %2190 = vmatpush.msra.mxu1 %v1986_v29  ;;  %v1379_v29 = vadd.f32 %v3362_v2, %v1359_v25  ;;  %v2027_v2 = vld [vmem:[#allocation7 + $0x330] sm:$0xff] }
 0x1d5   : > { %2126 = vmatpush.msrb.mxu2 %v1989_v37  ;;  %2144 = vmatpush.msra.mxu3 %v2037_v7  ;;  %v1994_v7 = vld [vmem:[#allocation7 + $0x228] sm:$0xff] }
 0x1d6   : > { %2663 = vmatmul.msk.f32.gmra.mxu3 %vm1777_vm0, %v570_v24  ;;  %v1929_v24 = vld [vmem:[#allocation7 + $0x20] sm:$0xff]  ;;  %2191 = vmatpush.msra.mxu1 %v1984_v35  ;;  %v1966_v35 = vld [vmem:[#allocation7 + $0x148] sm:$0xff]  ;;  %v1399_v37 = vadd.f32 %v3366_v20, %v1379_v29  ;;  %v2023_v20 = vld [vmem:[#allocation7 + $0x310] sm:$0xff] }
 0x1d7   : > { %2072 = vmatpush.msra.mxu0 %v1929_v24  ;;  %2215 = vmatpush.msra.mxu2 %v2020_v42  ;;  %v1219_v42 = vadd.f32 %v3346_v49, %v1199_v27  ;;  %v1998_v49 = vld [vmem:[#allocation7 + $0x248] sm:$0xff] }
 0x1d8   : > { %2192 = vmatpush.msra.mxu1 %v1982_v41  ;;  %2145 = vmatpush.msra.mxu3 %v2035_v19  ;;  %v2002_v41 = vld [vmem:[#allocation7 + $0x268] sm:$0xff]  ;;  %v1419_v57 = vadd.f32 %v3364_v13, %v1399_v37 }
 0x1d9   : > { %2073 = vmatpush.msra.mxu0 %v1927_v31  ;;  %2216 = vmatpush.msra.mxu2 %v2018_v54  ;;  %v2000_v54 = vld [vmem:[#allocation7 + $0x258] sm:$0xff]  ;;  %v1239_v58 = vadd.f32 %v3352_v52, %v1219_v42  ;;  %v2042_v27 = vld [vmem:[#allocation7 + $0x3a8] sm:$0xff] }
 0x1da   : > { %2193 = vmatpush.msra.mxu1 %v1980_v53  ;;  %2146 = vmatpush.msra.mxu3 %v2033_v16  ;;  %v3409_v52 = vperm.slane %v1419_v57, 0 }
 0x1db   : > { %2074 = vmatpush.msra.mxu0 %v1925_v36  ;;  %2217 = vmatpush.msra.mxu2 %v2016_v63  ;;  %v1518_v24 = vpop.f32.mrf.mxu0  ;;  %v2004_v36 = vld [vmem:[#allocation7 + $0x278] sm:$0xff] }
 0x1dc   : > { %2194 = vmatpush.msra.mxu1 %v1978_v62  ;;  %2147 = vmatpush.msra.mxu3 %v2031_v23  ;;  %v1519_v33 = vadd.f32 %v1518_v24, %v1499_v17 }
 0x1dd   : > { %2163 = vmatpush.msrb.mxu0 %v1956_v40  ;;  %v3382_v6 = vpop.f32.mrf.mxu2  ;;  %2218 = vmatpush.msra.mxu2 %v2014_v4  ;;  %v1964_v40 = vld [vmem:[#allocation7 + $0x138] sm:$0xff] }
 0x1de   : > { %2195 = vmatpush.msra.mxu1 %v1976_v50  ;;  %2148 = vmatpush.msra.mxu3 %v2029_v32  ;;  %v1539_v53 = vadd.f32 %v3373_v39, %v1519_v33  ;;  %v2021_v39 = vld [vmem:[#allocation7 + $0x300] sm:$0xff]  ;;  %v2052_v50 = vld [vmem:[#allocation7 + $0x3f8] sm:$0xff] }
 0x1df   : > { %2164 = vmatpush.msrb.mxu0 %v1954_v45  ;;  %2219 = vmatpush.msra.mxu2 %v2012_v11  ;;  %v1962_v45 = vld [vmem:[#allocation7 + $0x128] sm:$0xff] }
 0x1e0   : > { %v3379_v3 = vpop.f32.mrf.mxu3  ;;  %2196 = vmatpush.msra.mxu1 %v1974_v10  ;;  %2149 = vmatpush.msra.mxu3 %v2027_v2  ;;  %v1559_v62 = vadd.f32 %v3382_v6, %v1539_v53  ;;  %v1930_v6 = vld [vmem:[#allocation7 + $0x28] sm:$0xff]  ;;  %v2040_v2 = vld [vmem:[#allocation7 + $0x398] sm:$0xff] }
 0x1e1   : > { %2165 = vmatpush.msrb.mxu0 %v1952_v59  ;;  %2220 = vmatpush.msra.mxu2 %v2010_v14  ;;  %v3402_v59 = vld [vmem:[#allocation6] sm:$0xf] }
 0x1e2   : > { %2197 = vmatpush.msra.mxu1 %v1972_v12  ;;  %2150 = vmatpush.msra.mxu3 %v2025_v43  ;;  %v3412_v5 = vperm.slane %v3402_v59, 1  ;;  %v1579_v19 = vadd.f32 %v3379_v3, %v1559_v62  ;;  %v1992_v12 = vld [vmem:[#allocation7 + $0x218] sm:$0xff]  ;;  %v3425_v3 = vperm.slane %v3402_v59, 0  ;;  %v3429_v23 = vperm.slane %v3402_v59, 2 }
 0x1e3   : > { %2166 = vmatpush.msrb.mxu0 %v1950_v46  ;;  %2221 = vmatpush.msra.mxu2 %v2008_v22  ;;  %v1996_v46 = vld [vmem:[#allocation7 + $0x238] sm:$0xff] }
 0x1e4   : > { %2198 = vmatpush.msra.mxu1 %v1970_v21  ;;  %2151 = vmatpush.msra.mxu3 %v2023_v20  ;;  %v2048_v14 = vld [vmem:[#allocation7 + $0x3d8] sm:$0xff]  ;;  %v1775_v21 = vperm.slane %v1579_v19, 0  ;;  %v2034_v20 = vld [vmem:[#allocation7 + $0x368] sm:$0xff] }
 0x1e5   : > { %2167 = vmatpush.msrb.mxu0 %v1948_v61  ;;  %2222 = vmatpush.msra.mxu2 %v2006_v47  ;;  %v1259_v61 = vadd.f32 %v3350_v51, %v1239_v58  ;;  %v1990_v51 = vld [vmem:[#allocation7 + $0x208] sm:$0xff] }
 0x1e6   : > { %2199 = vmatpush.msra.mxu1 %v1968_v28  ;;  %2152 = vmatpush.msra.mxu3 %v2021_v39  ;;  %v2032_v39 = vld [vmem:[#allocation7 + $0x358] sm:$0xff] }
 0x1e7   : > { %2168 = vmatpush.msrb.mxu0 %v1946_v48  ;;  %2223 = vmatpush.msra.mxu2 %v2004_v36  ;;  %v1928_v48 = vld [vmem:[#allocation7 + $0x18] sm:$0xff]  ;;  %v3421_v17 = vperm.slane %v1259_v61, 0  ;;  %v2026_v61 = vld [vmem:[#allocation7 + $0x328] sm:$0xff] }
 0x1e8   : > { %2200 = vmatpush.msra.mxu1 %v1966_v35  ;;  %2241 = vmatpush.msrb.mxu3 %v2052_v50 }
 0x1e9   : > { %2169 = vmatpush.msrb.mxu0 %v1944_v18  ;;  %2224 = vmatpush.msra.mxu2 %v2002_v41 }
 0x1ea   : > { %2201 = vmatpush.msra.mxu1 %v1964_v40  ;;  %2242 = vmatpush.msrb.mxu3 %v2050_v8 }
 0x1eb   : > { %2170 = vmatpush.msrb.mxu0 %v1942_v26  ;;  %2225 = vmatpush.msra.mxu2 %v2000_v54  ;;  %v2044_v26 = vld [vmem:[#allocation7 + $0x3b8] sm:$0xff] }
 0x1ec   : > { %2202 = vmatpush.msra.mxu1 %v1962_v45  ;;  %2243 = vmatpush.msrb.mxu3 %v2048_v14  ;;  %v1896_v14 = vperm.slane %v3402_v59, 3 }
 0x1ed   : > { %2171 = vmatpush.msrb.mxu0 %v1940_v34  ;;  %2226 = vmatpush.msra.mxu2 %v1998_v49 }
 0x1ee   : > { %2203 = vmatpush.msra.mxu1 %v1960_v56 }
 0x1ef   : > { %2172 = vmatpush.msrb.mxu0 %v1938_v60  ;;  %2227 = vmatpush.msra.mxu2 %v1996_v46  ;;  %v2030_v46 = vld [vmem:[#allocation7 + $0x348] sm:$0xff] }
 0x1f0   : > { %2204 = vmatpush.msra.mxu1 %v1958_v0 }
 0x1f1   : > { %2173 = vmatpush.msrb.mxu0 %v1936_v44  ;;  %2228 = vmatpush.msra.mxu2 %v1994_v7  ;;  %v2036_v44 = vld [vmem:[#allocation7 + $0x378] sm:$0xff] }
 0x1f3   : > { %2174 = vmatpush.msrb.mxu0 %v1934_v55  ;;  %2229 = vmatpush.msra.mxu2 %v1992_v12 }
 0x1f5   : > { %2175 = vmatpush.msrb.mxu0 %v1932_v1  ;;  %2230 = vmatpush.msra.mxu2 %v1990_v51 }
 0x1f7   : > { %2176 = vmatpush.msrb.mxu0 %v1930_v6  ;;  %v2028_v6 = vld [vmem:[#allocation7 + $0x338] sm:$0xff] }
 0x1f9   : > { %2177 = vmatpush.msrb.mxu0 %v1928_v48  ;;  %v2022_v48 = vld [vmem:[#allocation7 + $0x308] sm:$0xff] }
 0x1fb   : > { %2178 = vmatpush.msrb.mxu0 %v1926_v15 }
 0x20c   : > { %v1598_v4 = vpop.f32.mrf.mxu0 }
 0x20d   : > { %v3384_v9 = vpop.f32.mrf.mxu1 }
 0x20e   : > { %v1619_v10 = vadd.f32 %v3384_v9, %v1598_v4  ;;  %v2046_v9 = vld [vmem:[#allocation7 + $0x3c8] sm:$0xff] }
 0x20f   : > { %2244 = vmatpush.msrb.mxu3 %v2046_v9 }
 0x211   : > { %v3393_v31 = vpop.f32.mrf.mxu2  ;;  %2245 = vmatpush.msrb.mxu3 %v2044_v26  ;;  %v2287_v26 = vld [vmem:[#allocation10 + $0x70] sm:$0xff] }
 0x212   : > { %v1639_v18 = vadd.f32 %v3393_v31, %v1619_v10 }
 0x213   : > { %2246 = vmatpush.msrb.mxu3 %v2042_v27  ;;  %v2283_v27 = vld [vmem:[#allocation10 + $0x50] sm:$0xff] }
 0x215   : > { %v3390_v30 = vpop.f32.mrf.mxu3  ;;  %2247 = vmatpush.msrb.mxu3 %v2040_v2  ;;  %v2276_v2 = vld [vmem:[#allocation10 + $0x18] sm:$0xff] }
 0x216   : > { %v1659_v31 = vadd.f32 %v3390_v30, %v1639_v18  ;;  %v2038_v30 = vld [vmem:[#allocation7 + $0x388] sm:$0xff] }
 0x217   : > { %2248 = vmatpush.msrb.mxu3 %v2038_v30  ;;  %v2274_v30 = vld [vmem:[#allocation10 + $0x8] sm:$0xff] }
 0x219   : > { %v3396_v38 = vpop.f32.mrf.mxu1  ;;  %2249 = vmatpush.msrb.mxu3 %v2036_v44  ;;  %v2300_v44 = vld [vmem:[#allocation10 + $0xd8] sm:$0xff] }
 0x21b   : > { %2250 = vmatpush.msrb.mxu3 %v2034_v20 }
 0x21d   : > { %2251 = vmatpush.msrb.mxu3 %v2032_v39  ;;  %v2294_v39 = vld [vmem:[#allocation10 + $0xa8] sm:$0xff] }
 0x21f   : > { %2252 = vmatpush.msrb.mxu3 %v2030_v46 }
 0x221   : > { %2253 = vmatpush.msrb.mxu3 %v2028_v6 }
 0x223   : > { %v1678_v34 = vpop.f32.mrf.mxu0  ;;  %2254 = vmatpush.msrb.mxu3 %v2026_v61 }
 0x224   : > { %v1679_v41 = vadd.f32 %v1678_v34, %v1659_v31  ;;  %v2282_v31 = vld [vmem:[#allocation10 + $0x48] sm:$0xff]  ;;  %v2279_v34 = vld [vmem:[#allocation10 + $0x30] sm:$0xff] }
 0x226   : > { %v3407_v13 = vpop.f32.mrf.mxu2  ;;  %v1699_v55 = vadd.f32 %v3396_v38, %v1679_v41  ;;  %v2302_v41 = vld [vmem:[#allocation10 + $0xe8] sm:$0xff] }
 0x228   : > { %v1719_v50 = vadd.f32 %v3407_v13, %v1699_v55  ;;  %v2296_v55 = vld [vmem:[#allocation10 + $0xb8] sm:$0xff] }
 0x229   : > { %v3405_v63 = vpop.f32.mrf.mxu3 }
 0x22a   : > { %v1739_v10 = vadd.f32 %v3405_v63, %v1719_v50  ;;  %v2291_v50 = vld [vmem:[#allocation10 + $0x90] sm:$0xff] }
 0x22c   : > { %v1830_v11 = vpop.f32.mrf.mxu1  ;;  %v1776_v12 = vperm.slane %v1739_v10, 0 }
 0x22d   : > { %v1831_v25 = vadd.f32 %v1830_v11, %v3409_v52  ;;  %v2024_v11 = vld [vmem:[#allocation7 + $0x318] sm:$0xff] }
 0x22e   : > { %2255 = vmatpush.msrb.mxu3 %v2024_v11 }
 0x22f   : > { %v3419_v16 = vadd.f32 %v3412_v5, %v1831_v25 }
 0x230   : > { %2256 = vmatpush.msrb.mxu3 %v2022_v48 }
 0x231   : > { %v1914_v22 = vmax.f32 %v3419_v16, 0.0  ;;  %v1804_v24 = vpop.f32.mrf.mxu3 }
 0x232   : > { %v1805_v28 = vadd.f32 %v1804_v24, %v3421_v17  ;;  %v1856_v29 = vpop.f32.mrf.mxu2 }
 0x233   : > { %v1857_v47 = vadd.f32 %v1856_v29, %v1775_v21  ;;  %2101 = vmatmul.f32.vlgmr.msrb.gmra.mxu1 %v1914_v22  ;;  %v2285_v29 = vld [vmem:[#allocation10 + $0x60] sm:$0xff] }
 0x234   : > { %v3436_v32 = vadd.f32 %v3425_v3, %v1805_v28  ;;  %v1833_v33 = vpop.f32.mrf.mxu1  ;;  %v2286_v28 = vld [vmem:[#allocation10 + $0x68] sm:$0xff] }
 0x235   : > { %v3439_v35 = vadd.f32 %v3429_v23, %v1857_v47  ;;  %v1834_v36 = vadd.f32 %v1833_v33, %v3409_v52  ;;  %v2284_v47 = vld [vmem:[#allocation10 + $0x58] sm:$0xff] }
 0x236   : > { %v1913_v37 = vmax.f32 %v3436_v32, 0.0  ;;  %v2281_v32 = vld [vmem:[#allocation10 + $0x40] sm:$0xff]  ;;  %v2280_v33 = vld [vmem:[#allocation10 + $0x38] sm:$0xff] }
 0x237   : > { %v1915_v60 = vmax.f32 %v3439_v35, 0.0  ;;  %v3445_v40 = vadd.f32 %v3412_v5, %v1834_v36  ;;  %v2278_v35 = vld [vmem:[#allocation10 + $0x28] sm:$0xff]  ;;  %v2277_v36 = vld [vmem:[#allocation10 + $0x20] sm:$0xff] }
 0x238   : > { %2075 = vmatmul.f32.vlgmr.msra.gmra.mxu0 %v1913_v37 }
 0x239   : > { %2127 = vmatmul.f32.vlgmr.msrb.gmra.mxu2 %v1915_v60  ;;  %v1807_v42 = vpop.f32.mrf.mxu3  ;;  %v1918_v43 = vmax.f32 %v3445_v40, 0.0  ;;  %v2303_v40 = vld [vmem:[#allocation10 + $0xf0] sm:$0xff] }
 0x23a   : > { %v1808_v45 = vadd.f32 %v1807_v42, %v3421_v17  ;;  %v1859_v53 = vpop.f32.mrf.mxu2  ;;  %v2273_v42 = vld [vmem:[#allocation10] sm:$0xff] }
 0x23b   : > { %v1860_v54 = vadd.f32 %v1859_v53, %v1775_v21  ;;  %2104 = vmatmul.f32.gmra.mxu1 %v1918_v43  ;;  %v2298_v53 = vld [vmem:[#allocation10 + $0xc8] sm:$0xff] }
 0x23c   : > { %v1836_v56 = vpop.f32.mrf.mxu1  ;;  %v1905_v57 = vadd.f32 %v3425_v3, %v1808_v45  ;;  %v2299_v45 = vld [vmem:[#allocation10 + $0xd0] sm:$0xff] }
 0x23d   : > { %v1837_v49 = vadd.f32 %v1836_v56, %v3409_v52  ;;  %v1907_v58 = vadd.f32 %v3429_v23, %v1860_v54  ;;  %v2297_v54 = vld [vmem:[#allocation10 + $0xc0] sm:$0xff]  ;;  %v2295_v56 = vld [vmem:[#allocation10 + $0xb0] sm:$0xff] }
 0x23e   : > { %v1917_v62 = vmax.f32 %v1905_v57, 0.0 }
 0x23f   : > { %v1919_v1 = vmax.f32 %v1907_v58, 0.0  ;;  %v1910_v0 = vadd.f32 %v3412_v5, %v1837_v49  ;;  %v2053_v49 = vld [vmem:[#allocation9] sm:$0x3] }
 0x240   : > { %2078 = vmatmul.f32.gmra.mxu0 %v1917_v62 }
 0x241   : > { %2130 = vmatmul.f32.gmra.mxu2 %v1919_v1  ;;  %v1810_v38 = vpop.f32.mrf.mxu3  ;;  %v1922_v4 = vmax.f32 %v1910_v0, 0.0  ;;  %v2292_v0 = vld [vmem:[#allocation10 + $0x98] sm:$0xff] }
 0x242   : > { %v1811_v7 = vadd.f32 %v1810_v38, %v3421_v17  ;;  %v1862_v52 = vpop.f32.mrf.mxu2 }
 0x243   : > { %v1863_v8 = vadd.f32 %v1862_v52, %v1775_v21  ;;  %2107 = vmatmul.f32.gmra.mxu1 %v1922_v4 }
 0x244   : > { %v1909_v5 = vadd.f32 %v3425_v3, %v1811_v7  ;;  %v2289_v7 = vld [vmem:[#allocation10 + $0x80] sm:$0xff] }
 0x245   : > { %v1911_v13 = vadd.f32 %v3429_v23, %v1863_v8  ;;  %v2288_v23 = vld [vmem:[#allocation10 + $0x78] sm:$0xff] }
 0x246   : > { %v1921_v19 = vmax.f32 %v1909_v5, 0.0  ;;  %2309 = vmatpush.msra.mxu0 %v2288_v23 }
 0x247   : > { %v1923_v25 = vmax.f32 %v1911_v13, 0.0 }
 0x248   : > { %2081 = vmatmul.f32.gmra.mxu0 %v1921_v19 }
 0x249   : > { %2133 = vmatmul.f32.gmra.mxu2 %v1923_v25  ;;  %v1882_v15 = vpop.f32.mrf.mxu3  ;;  %2310 = vmatpush.msra.mxu0 %v2287_v26 }
 0x24a   : > { %v1883_v51 = vadd.f32 %v1882_v15, %v1776_v12 }
 0x24b   : > { %2205 = vmatmul.f32.vlgmr.msra.gmra.mxu1 %v1914_v22  ;;  %2311 = vmatpush.msra.mxu0 %v2286_v28 }
 0x24c   : > { %v1904_v63 = vadd.f32 %v1896_v14, %v1883_v51 }
 0x24d   : > { %2312 = vmatpush.msra.mxu0 %v2285_v29 }
 0x24e   : > { %v1916_v9 = vmax.f32 %v1904_v63, 0.0 }
 0x24f   : > { %2313 = vmatpush.msra.mxu0 %v2284_v47 }
 0x250   : > { %2153 = vmatmul.f32.vlgmr.msra.gmra.mxu3 %v1916_v9  ;;  %2179 = vmatmul.f32.vlgmr.msrb.gmra.mxu0 %v1913_v37  ;;  %v2304_v37 = vld [vmem:[#allocation10 + $0xf8] sm:$0xff] }
 0x251   : > { %2231 = vmatmul.f32.vlgmr.msra.gmra.mxu2 %v1915_v60  ;;  %v1885_v17 = vpop.f32.mrf.mxu3  ;;  %2314 = vmatpush.msra.mxu0 %v2283_v27  ;;  %v2275_v60 = vld [vmem:[#allocation10 + $0x10] sm:$0xff] }
 0x252   : > { %v1886_v18 = vadd.f32 %v1885_v17, %v1776_v12  ;;  %2335 = vmatpush.msrb.mxu1 %v2304_v37 }
 0x253   : > { %2208 = vmatmul.f32.gmra.mxu1 %v1918_v43  ;;  %2315 = vmatpush.msra.mxu0 %v2282_v31  ;;  %v2301_v43 = vld [vmem:[#allocation10 + $0xe0] sm:$0xff] }
 0x254   : > { %v1908_v3 = vadd.f32 %v1896_v14, %v1886_v18  ;;  %2336 = vmatpush.msrb.mxu1 %v2303_v40 }
 0x255   : > { %2316 = vmatpush.msra.mxu0 %v2281_v32 }
 0x256   : > { %v1920_v59 = vmax.f32 %v1908_v3, 0.0  ;;  %2337 = vmatpush.msrb.mxu1 %v2302_v41  ;;  %v2056_v3 = vperm.slane %v2053_v49, 1 }
 0x257   : > { %2317 = vmatpush.msra.mxu0 %v2280_v33 }
 0x258   : > { %2156 = vmatmul.f32.gmra.mxu3 %v1920_v59  ;;  %2182 = vmatmul.f32.gmra.mxu0 %v1917_v62  ;;  %v2293_v62 = vld [vmem:[#allocation10 + $0xa0] sm:$0xff] }
 0x259   : > { %2234 = vmatmul.f32.gmra.mxu2 %v1919_v1  ;;  %v1888_v21 = vpop.f32.mrf.mxu3  ;;  %2318 = vmatpush.msra.mxu0 %v2279_v34  ;;  %v2055_v1 = vperm.slane %v2053_v49, 0  ;;  %v2376_v49 = vld [vmem:[%s3546_s9 + $0x60] sm:$0xff] }
 0x25a   : > { %v1889_v24 = vadd.f32 %v1888_v21, %v1776_v12  ;;  %2338 = vmatpush.msrb.mxu1 %v2301_v43 }
 0x25b   : > { %2211 = vmatmul.f32.gmra.mxu1 %v1922_v4  ;;  %2319 = vmatpush.msra.mxu0 %v2278_v35  ;;  %v2290_v4 = vld [vmem:[#allocation10 + $0x88] sm:$0xff] }
 0x25c   : > { %v1912_v16 = vadd.f32 %v1896_v14, %v1889_v24  ;;  %2339 = vmatpush.msrb.mxu1 %v2300_v44 }
 0x25d   : > { %2320 = vmatpush.msra.mxu0 %v2277_v36 }
 0x25e   : > { %v1924_v22 = vmax.f32 %v1912_v16, 0.0  ;;  %2340 = vmatpush.msrb.mxu1 %v2299_v45 }
 0x25f   : > { %2321 = vmatpush.msra.mxu0 %v2276_v2 }
 0x260   : > { %2159 = vmatmul.f32.gmra.mxu3 %v1924_v22  ;;  %2185 = vmatmul.f32.gmra.mxu0 %v1921_v19 }
 0x261   : > { %2237 = vmatmul.f32.gmra.mxu2 %v1923_v25  ;;  %2322 = vmatpush.msra.mxu0 %v2275_v60 }
 0x262   : > { %2341 = vmatpush.msrb.mxu1 %v2298_v53 }
 0x263   : > { %2323 = vmatpush.msra.mxu0 %v2274_v30 }
 0x264   : > { %2342 = vmatpush.msrb.mxu1 %v2297_v54 }
 0x265   : > { %2324 = vmatpush.msra.mxu0 %v2273_v42 }
 0x266   : > { %2343 = vmatpush.msrb.mxu1 %v2296_v55 }
 0x268   : > { %2257 = vmatmul.f32.vlgmr.msrb.gmra.mxu3 %v1916_v9  ;;  %2344 = vmatpush.msrb.mxu1 %v2295_v56  ;;  %v2378_v56 = vld [vmem:[%s3546_s9 + $0x70] sm:$0xff] }
 0x26a   : > { %2345 = vmatpush.msrb.mxu1 %v2294_v39  ;;  %v2374_v39 = vld [vmem:[%s3546_s9 + $0x50] sm:$0xff] }
 0x26c   : > { %2346 = vmatpush.msrb.mxu1 %v2293_v62  ;;  %v2373_v62 = vld [vmem:[%s3546_s9 + $0x48] sm:$0xff] }
 0x26e   : > { %2347 = vmatpush.msrb.mxu1 %v2292_v0  ;;  %v2371_v0 = vld [vmem:[%s3546_s9 + $0x38] sm:$0xff] }
 0x270   : > { %2260 = vmatmul.f32.gmra.mxu3 %v1920_v59  ;;  %2348 = vmatpush.msrb.mxu1 %v2291_v50  ;;  %v2379_v59 = vld [vmem:[%s3546_s9 + $0x78] sm:$0xff]  ;;  %v2369_v50 = vld [vmem:[%s3546_s9 + $0x28] sm:$0xff] }
 0x271   : > { %2384 = vmatpush.msrb.mxu2 %v2379_v59 }
 0x272   : > { %2349 = vmatpush.msrb.mxu1 %v2290_v4  ;;  %v2367_v4 = vld [vmem:[%s3546_s9 + $0x18] sm:$0xff] }
 0x273   : > { %2385 = vmatpush.msrb.mxu2 %v2378_v56 }
 0x274   : > { %2350 = vmatpush.msrb.mxu1 %v2289_v7  ;;  %v2365_v7 = vld [vmem:[%s3546_s9 + $0x8] sm:$0xff] }
 0x278   : > { %2263 = vmatmul.f32.gmra.mxu3 %v1924_v22 }
 0x2b0   : > { %v2102_v57 = vpop.f32.mrf.mxu1 }
 0x2b5   : > { %v2076_v20 = vpop.f32.mrf.mxu0 }
 0x2b6   : > { %v2077_v38 = vadd.f32 %v2076_v20, %v2055_v1 }
 0x2b8   : > { %v2105_v6 = vpop.f32.mrf.mxu1  ;;  %v2103_v8 = vadd.f32 %v2102_v57, %v2077_v38  ;;  %v2377_v57 = vld [vmem:[%s3546_s9 + $0x68] sm:$0xff]  ;;  %v2368_v38 = vld [vmem:[%s3546_s9 + $0x20] sm:$0xff] }
 0x2b9   : > { %2386 = vmatpush.msrb.mxu2 %v2377_v57 }
 0x2bb   : > { %2387 = vmatpush.msrb.mxu2 %v2376_v49 }
 0x2bc   : > { %v2128_v58 = vpop.f32.mrf.mxu2 }
 0x2bd   : > { %v2079_v46 = vpop.f32.mrf.mxu0  ;;  %v2129_v61 = vadd.f32 %v2128_v58, %v2103_v8  ;;  %v2375_v58 = vld [vmem:[%s3546_s9 + $0x58] sm:$0xff] }
 0x2be   : > { %v2080_v13 = vadd.f32 %v2079_v46, %v2055_v1  ;;  %2388 = vmatpush.msrb.mxu2 %v2375_v58  ;;  %v2370_v46 = vld [vmem:[%s3546_s9 + $0x30] sm:$0xff] }
 0x2c0   : > { %v2108_v25 = vpop.f32.mrf.mxu1  ;;  %v2106_v48 = vadd.f32 %v2105_v6, %v2080_v13  ;;  %2389 = vmatpush.msrb.mxu2 %v2374_v39  ;;  %v2366_v6 = vld [vmem:[%s3546_s9 + $0x10] sm:$0xff] }
 0x2c2   : > { %2390 = vmatpush.msrb.mxu2 %v2373_v62 }
 0x2c4   : > { %v2131_v52 = vpop.f32.mrf.mxu2 }
 0x2c5   : > { %v2082_v10 = vpop.f32.mrf.mxu0  ;;  %v2132_v14 = vadd.f32 %v2131_v52, %v2106_v48  ;;  %v2364_v52 = vld [vmem:[%s3546_s9] sm:$0xff] }
 0x2c6   : > { %v2083_v51 = vadd.f32 %v2082_v10, %v2055_v1  ;;  %v2372_v1 = vld [vmem:[%s3546_s9 + $0x40] sm:$0xff] }
 0x2c7   : > { %2391 = vmatpush.msrb.mxu2 %v2372_v1 }
 0x2c8   : > { %v2109_v18 = vadd.f32 %v2108_v25, %v2083_v51  ;;  %v2206_v21 = vpop.f32.mrf.mxu1 }
 0x2c9   : > { %2392 = vmatpush.msrb.mxu2 %v2371_v0 }
 0x2cb   : > { %2393 = vmatpush.msrb.mxu2 %v2370_v46 }
 0x2cc   : > { %v2134_v12 = vpop.f32.mrf.mxu2 }
 0x2cd   : > { %v2180_v9 = vpop.f32.mrf.mxu0  ;;  %v2135_v24 = vadd.f32 %v2134_v12, %v2109_v18  ;;  %2394 = vmatpush.msrb.mxu2 %v2369_v50  ;;  %v2779_v18 = vld [vmem:[#allocation13] ss:$0 sm:$0xff] }
 0x2ce   : > { %v2181_v23 = vadd.f32 %v2180_v9, %v2056_v3 }
 0x2cf   : > { %2395 = vmatpush.msrb.mxu2 %v2368_v38 }
 0x2d0   : > { %v2207_v47 = vadd.f32 %v2206_v21, %v2181_v23  ;;  %v2209_v34 = vpop.f32.mrf.mxu1 }
 0x2d1   : > { %2396 = vmatpush.msrb.mxu2 %v2367_v4 }
 0x2d3   : > { %v2154_v5 = vpop.f32.mrf.mxu3  ;;  %2397 = vmatpush.msrb.mxu2 %v2366_v6 }
 0x2d4   : > { %v2155_v11 = vadd.f32 %v2154_v5, %v2129_v61  ;;  %v2232_v16 = vpop.f32.mrf.mxu2  ;;  %v2778_v61 = vld [vmem:[#allocation12] ss:$0 sm:$0xff] }
 0x2d5   : > { %v2183_v29 = vpop.f32.mrf.mxu0  ;;  %v2233_v27 = vadd.f32 %v2232_v16, %v2207_v47  ;;  %2398 = vmatpush.msrb.mxu2 %v2365_v7 }
 0x2d6   : > { %v2267_v19 = vmax.f32 %v2155_v11, 0.0  ;;  %v2184_v32 = vadd.f32 %v2183_v29, %v2056_v3 }
 0x2d7   : > { %2399 = vmatpush.msrb.mxu2 %v2364_v52 }
 0x2d8   : > { %2325 = vmatmul.f32.vlgmr.msra.gmra.mxu0 %v2267_v19  ;;  %v2210_v2 = vadd.f32 %v2209_v34, %v2184_v32  ;;  %v2212_v43 = vpop.f32.mrf.mxu1 }
 0x2db   : > { %v2157_v15 = vpop.f32.mrf.mxu3 }
 0x2dc   : > { %v2158_v63 = vadd.f32 %v2157_v15, %v2132_v14  ;;  %v2235_v35 = vpop.f32.mrf.mxu2 }
 0x2dd   : > { %v2186_v37 = vpop.f32.mrf.mxu0  ;;  %v2236_v60 = vadd.f32 %v2235_v35, %v2210_v2 }
 0x2de   : > { %v2269_v17 = vmax.f32 %v2158_v63, 0.0  ;;  %v2187_v30 = vadd.f32 %v2186_v37, %v2056_v3 }
 0x2e0   : > { %2328 = vmatmul.f32.gmra.mxu0 %v2269_v17  ;;  %v2213_v45 = vadd.f32 %v2212_v43, %v2187_v30 }
 0x2e3   : > { %v2160_v22 = vpop.f32.mrf.mxu3 }
 0x2e4   : > { %v2161_v26 = vadd.f32 %v2160_v22, %v2135_v24  ;;  %v2238_v44 = vpop.f32.mrf.mxu2 }
 0x2e5   : > { %v2239_v53 = vadd.f32 %v2238_v44, %v2213_v45 }
 0x2e6   : > { %v2271_v28 = vmax.f32 %v2161_v26, 0.0 }
 0x2e8   : > { %2331 = vmatmul.f32.gmra.mxu0 %v2271_v28 }
 0x2eb   : > { %v2258_v31 = vpop.f32.mrf.mxu3 }
 0x2ec   : > { %v2259_v33 = vadd.f32 %v2258_v31, %v2233_v27 }
 0x2ee   : > { %v2268_v36 = vmax.f32 %v2259_v33, 0.0 }
 0x2f0   : > { %2351 = vmatmul.f32.vlgmr.msrb.gmra.mxu1 %v2268_v36 }
 0x2f3   : > { %v2261_v40 = vpop.f32.mrf.mxu3 }
 0x2f4   : > { %v2262_v41 = vadd.f32 %v2261_v40, %v2236_v60 }
 0x2f6   : > { %v2270_v42 = vmax.f32 %v2262_v41, 0.0 }
 0x2f8   : > { %2354 = vmatmul.f32.gmra.mxu1 %v2270_v42 }
 0x2fb   : > { %v2264_v54 = vpop.f32.mrf.mxu3 }
 0x2fc   : > { %v2265_v20 = vadd.f32 %v2264_v54, %v2239_v53 }
 0x2fe   : > { %v2272_v55 = vmax.f32 %v2265_v20, 0.0 }
 0x300   : > { %2357 = vmatmul.f32.gmra.mxu1 %v2272_v55 }
 0x355   : > { %v2326_v8 = vpop.f32.mrf.mxu0 }
 0x356   : > { %v2327_v10 = vadd.f32 %v2778_v61, %v2326_v8 }
 0x35d   : > { %v2329_v11 = vpop.f32.mrf.mxu0 }
 0x35e   : > { %v2330_v25 = vadd.f32 %v2778_v61, %v2329_v11 }
 0x365   : > { %v2332_v15 = vpop.f32.mrf.mxu0 }
 0x366   : > { %v2333_v51 = vadd.f32 %v2778_v61, %v2332_v15 }
 0x36d   : > { %v2352_v5 = vpop.f32.mrf.mxu1 }
 0x36e   : > { %v2353_v13 = vadd.f32 %v2352_v5, %v2327_v10 }
 0x370   : > { %v2361_v19 = vmax.f32 %v2353_v13, 0.0 }
 0x372   : > { %2400 = vmatmul.f32.vlgmr.msrb.gmra.mxu2 %v2361_v19 }
 0x375   : > { %v2355_v48 = vpop.f32.mrf.mxu1 }
 0x376   : > { %v2356_v12 = vadd.f32 %v2355_v48, %v2330_v25 }
 0x378   : > { %v2362_v14 = vmax.f32 %v2356_v12, 0.0 }
 0x37a   : > { %2403 = vmatmul.f32.gmra.mxu2 %v2362_v14 }
 0x37d   : > { %v2358_v63 = vpop.f32.mrf.mxu1 }
 0x37e   : > { %v2359_v9 = vadd.f32 %v2358_v63, %v2333_v51 }
 0x380   : > { %v2363_v17 = vmax.f32 %v2359_v9, 0.0 }
 0x382   : > { %2406 = vmatmul.f32.gmra.mxu2 %v2363_v17 }
 0x3f5   : > { %v2401_v3 = vpop.f32.mrf.mxu2 }
 0x3f6   : > { %v2402_v59 = vadd.f32 %v2779_v18, %v2401_v3 }
 0x3f8   : > { %v2411_v21 = vsel %vm2410_vm1, %v2402_v59, -inf }
 0x3f9   : > { %2412 = vmax.xlane.f32.xlu0 %v2411_v21 }
 0x3fd   : > { %v2404_v24 = vpop.f32.mrf.mxu2 }
 0x3fe   : > { %v2405_v16 = vadd.f32 %v2779_v18, %v2404_v24 }
 0x400   : > { %v2414_v22 = vsel %vm2410_vm1, %v2405_v16, -inf }
 0x401   : > { %2415 = vmax.xlane.f32.xlu0 %v2414_v22 }
 0x405   : > { %v2407_v23 = vpop.f32.mrf.mxu2 }
 0x406   : > { %v2408_v26 = vadd.f32 %v2779_v18, %v2407_v23 }
 0x408   : > { %v2417_v28 = vsel %vm2410_vm1, %v2408_v26, -inf }
 0x409   : > { %2418 = vmax.xlane.f32.xlu1 %v2417_v28 }
 0x46c   : > { %v2413_v29 = vpop.xlane.xlu0 %2412 }
 0x46d   : > { %v2420_v47 = vsub.f32 %v2402_v59, %v2413_v29 }
 0x46f   : > { %v2423_v27 = vmul.f32 1.442695, %v2420_v47 }
 0x471   : > { %2780 = vpow2.f32 %v2423_v27 }
 0x474   : > { %v2416_v31 = vpop.xlane.xlu0 %2415 }
 0x475   : > { %v2421_v32 = vsub.f32 %v2405_v16, %v2416_v31 }
 0x477   : > { %v2781_v33 = vpop.eup %2780  ;;  %v2425_v34 = vmul.f32 1.442695, %v2421_v32 }
 0x478   : > { %v2429_v35 = vsel %vm2410_vm1, %v2781_v33, 0.0 }
 0x479   : > { %2782 = vpow2.f32 %v2425_v34  ;;  %2430 = vadd.xlane.f32.xlu1 %v2429_v35 }
 0x47c   : > { %v2419_v36 = vpop.xlane.xlu1 %2418 }
 0x47d   : > { %v2422_v2 = vsub.f32 %v2408_v26, %v2419_v36 }
 0x47f   : > { %v2783_v37 = vpop.eup %2782  ;;  %v2427_v60 = vmul.f32 1.442695, %v2422_v2 }
 0x480   : > { %v2432_v40 = vsel %vm2410_vm1, %v2783_v37, 0.0 }
 0x481   : > { %2784 = vpow2.f32 %v2427_v60  ;;  %2433 = vadd.xlane.f32.xlu2 %v2432_v40 }
 0x487   : > { %v2785_v30 = vpop.eup %2784 }
 0x488   : > { %v2435_v41 = vsel %vm2410_vm1, %v2785_v30, 0.0 }
 0x489   : > { %2436 = vadd.xlane.f32.xlu2 %v2435_v41 }
 0x4ec   : > { %v2431_v42 = vpop.xlane.xlu1 %2430 }
 0x4ed   : > { %2786 = vlog2.f32 %v2431_v42 }
 0x4f3   : > { %v2787_v43 = vpop.eup %2786 }
 0x4f4   : > { %v2439_v44 = vmul.f32 0.6931472, %v2787_v43  ;;  %v2434_v45 = vpop.xlane.xlu2 %2433 }
 0x4f5   : > { %2788 = vlog2.f32 %v2434_v45 }
 0x4f6   : > { %v2444_v53 = vsub.f32 %v2420_v47, %v2439_v44 }
 0x4f8   : > { %2447 = vst.msk [vmem:[%s566_s29] sm:$0xff] %vm2410_vm1, %v2444_v53 }
 0x4fb   : > { %v2789_v54 = vpop.eup %2788 }
 0x4fc   : > { %v2441_v20 = vmul.f32 0.6931472, %v2789_v54  ;;  %v2437_v55 = vpop.xlane.xlu2 %2436 }
 0x4fd   : > { %2790 = vlog2.f32 %v2437_v55 }
 0x4fe   : > { %v2445_v56 = vsub.f32 %v2421_v32, %v2441_v20 }
 0x500   : > { %2448 = vst.msk [vmem:[%s566_s29 + $0x8] sm:$0xff] %vm2410_vm1, %v2445_v56 }
 0x503   : > { %v2791_v57 = vpop.eup %2790 }
 0x504   : > { %v2443_v49 = vmul.f32 0.6931472, %v2791_v57 }
 0x506   : > { %v2446_v58 = vsub.f32 %v2422_v2, %v2443_v49 }
 0x508   : > { %2449 = vst.msk [vmem:[%s566_s29 + $0x10] sm:$0xff] %vm2410_vm1, %v2446_v58 }
 0x509 PF: > { %s3560_s17 = sld [smem:[#allocation20_spill]] }
 0x50f   : > { %s26_s13 = sadd.s32 1, %s3560_s17   ;;  %s3561_s17 = smov %s3070_s18 }
 0x510   : > { %p23_p8 = scmp.ge.s32.totalorder %s26_s13, 4   ;;  %s3562_s18 = smov %s3565_s19 }
 0x511   : > { %s3563_s19 = smov %s26_s13 }
 0x512   :  { %25 = sbr.rel (!%p23_p8) target bundleno = 10 (0xa), region = 130 }
 0x517   :  { %2480 = vsyncpa [#allocation3], 1 }
 0x518   :  { %2482 = vsyncpa [#allocation3 + $0x1], 1 }
 0x519   :  { %2483 = vsyncpa [#allocation5], 1 }
 0x51a   :  { %2484 = vsyncpa [#allocation8], 1 }
 0x51b   :  { %2485 = vsyncpa [#allocation11], 1 }
 0x51c   :  { %2486 = vsyncpa [#allocation14], 1 }

// kernel: pointnet_dense_cls.3
= control target key start
LH: loop header
LB: loop body
LE: loop exit
PB: predicated region body
PF: predicated region fallthrough
CT: control target
= control target key end

     0   :  { %s4034_s0 = inlined_call_operand.vmem [shape: f32[2,24,3], index: 0, kind: input, shape index: {}]   ;;  %s4035_s1 = inlined_call_operand.hbm [shape: f32[3,64], index: 1, kind: input, shape index: {}]   ;;  %s4036_s2 = inlined_call_operand.hbm [shape: f32[1,64], index: 2, kind: input, shape index: {}]   ;;  %s4037_s3 = inlined_call_operand.hbm [shape: f32[64,128], index: 3, kind: input, shape index: {}]   ;;  %s4038_s4 = inlined_call_operand.hbm [shape: f32[1,128], index: 4, kind: input, shape index: {}]   ;;  %s4039_s5 = inlined_call_operand.hbm [shape: f32[128,1024], index: 5, kind: input, shape index: {}]   ;;  %s4040_s6 = inlined_call_operand.hbm [shape: f32[1,1024], index: 6, kind: input, shape index: {}]   ;;  %s4041_s7 = inlined_call_operand.hbm [shape: f32[1024,512], index: 7, kind: input, shape index: {}]   ;;  %s4042_s8 = inlined_call_operand.hbm [shape: f32[1,512], index: 8, kind: input, shape index: {}]   ;;  %s4043_s9 = inlined_call_operand.hbm [shape: f32[512,256], index: 9, kind: input, shape index: {}]   ;;  %s4044_s10 = inlined_call_operand.hbm [shape: f32[1,256], index: 10, kind: input, shape index: {}]   ;;  %s4045_s11 = inlined_call_operand.vmem [shape: f32[256,9], index: 11, kind: input, shape index: {}]   ;;  %s4046_s12 = inlined_call_operand.hbm [shape: f32[1,9], index: 12, kind: input, shape index: {}]   ;;  %s4047_s13 = inlined_call_operand.vmem [shape: f32[2,1,9], index: 13, kind: output, shape index: {}]  }
   0x1   :  { %4048 = sst [smem:[#allocation26_spill]] %s4035_s1 }
   0x2   :  { %4049 = sst [smem:[#allocation27_spill]] %s4036_s2 }
   0x3   :  { %4050 = sst [smem:[#allocation28_spill]] %s4037_s3 }
   0x4   :  { %4051 = sst [smem:[#allocation29_spill]] %s4038_s4 }
   0x5   :  { %4052 = sst [smem:[#allocation30_spill]] %s4039_s5 }
   0x6   :  { %4053 = sst [smem:[#allocation31_spill]] %s4040_s6 }
   0x7   :  { %18 = vsyncpa [#allocation4], 0 }
   0x8   :  { %19 = vsyncpa [#allocation6], 0 }
   0x9   :  { %20 = vsyncpa [#allocation9], 0 }
   0xa   :  { %21 = vsyncpa [#allocation12], 0 }
   0xb   :  { %22 = vsyncpa [#allocation15], 0 }
   0xc   :  { %23 = vsyncpa [#allocation18], 0  ;;  %s3634_s25 = smov 0   ;;  %s3636_s26 = smov 0  }
   0xd   :  { %s3638_s27 = smov 0  }
   0xe LB: > { %s4054_s2 = sld [smem:[#allocation27_spill]]  ;;  %s2984_s14 = sadd.s32 4294967295, %s3543_s27   ;;  %s3543_s27 = sphi %s3638_s27, %s29_s27   ;;  %s3539_s26 = sphi %s3636_s26, %s4064_s26   ;;  %s3535_s25 = sphi %s3634_s25, %s4063_s25  }
   0xf   : > { %p2986_p0 = scmp.ge.s32.totalorder %s3543_s27, 1  ;;  %p352_p1 = scmp.lt.s32.totalorder %s3543_s27, 3 }
  0x10   : > { %p3655_p2 = scmp.eq.s32.totalorder %s2984_s14, 0  ;;  %s3545_s17 = smov [#allocation5]  }
  0x11   : > { %p3659_p3 = pnand %p2986_p0, %p352_p1  ;;  %s378_s18 = sshll.u32 %s3545_s17, 4  ;;  %s379_s18 = int_to_ptr.vmem [resolvable:$true] %s378_s18 }
  0x12   : > { %s4057_s4 = sld [smem:[#allocation29_spill]]  ;;  %s3546_s29 = smov [#allocation8]  }
  0x13   : > { %p3066_p4 = pneg %p3659_p3  ;;  %s4058_s6 = sld [smem:[#allocation31_spill]] }
  0x14   : > { %s376_s30 = sshll.u32 %s4054_s2, 4  ;;  %s404_s14 = sshll.u32 %s3546_s29, 4  ;;  %s377_s30 = int_to_ptr.hbm [resolvable:$true] %s376_s30  ;;  %s405_s14 = int_to_ptr.vmem [resolvable:$true] %s404_s14 }
  0x15   : > { %p3673_p5 = pnand %p3655_p2, %p3066_p4  ;;  %s3547_s17 = smov [#allocation11]  }
  0x16   : > { %s430_s19 = sshll.u32 %s3547_s17, 4  ;;  %s454_s23 = sshll.u32 %s4042_s8, 4  ;;  %s431_s19 = int_to_ptr.vmem [resolvable:$true] %s430_s19  ;;  %s455_s23 = int_to_ptr.hbm [resolvable:$true] %s454_s23 }
  0x17   : > { %3072 = dma.hbm_to_vmem [thread:$0]  (!%p3673_p5), %s377_s30, 16, %s379_s18, [#allocation6]  }
  0x18   : > { %s402_s21 = sshll.u32 %s4057_s4, 4  ;;  %s480_s4 = sshll.u32 %s4044_s10, 4  ;;  %s403_s21 = int_to_ptr.hbm [resolvable:$true] %s402_s21  ;;  %s481_s4 = int_to_ptr.hbm [resolvable:$true] %s480_s4 }
  0x19   : > { %s428_s24 = sshll.u32 %s4058_s6, 4  ;;  %s3548_s6 = smov [#allocation14]   ;;  %s429_s24 = int_to_ptr.hbm [resolvable:$true] %s428_s24 }
  0x1a   : > { %3078 = dma.hbm_to_vmem [thread:$0]  (!%p3673_p5), %s403_s21, 16, %s405_s14, [#allocation9]  }
  0x1b   : > { %3084 = dma.hbm_to_vmem [thread:$0]  (!%p3673_p5), %s429_s24, 128, %s431_s19, [#allocation12]  }
  0x1c   : > { %s456_s30 = sshll.u32 %s3548_s6, 4  ;;  %s3549_s18 = smov [#allocation17]   ;;  %s457_s30 = int_to_ptr.vmem [resolvable:$true] %s456_s30 }
  0x1d   : > { %3090 = dma.hbm_to_vmem [thread:$0]  (!%p3673_p5), %s455_s23, 64, %s457_s30, [#allocation15]  }
  0x1e   : > { %s482_s21 = sshll.u32 %s3549_s18, 4  ;;  %s41_s14 = sadd.s32 1, %s3539_s26  ;;  %s483_s21 = int_to_ptr.vmem [resolvable:$true] %s482_s21 }
  0x1f   : > { %3096 = dma.hbm_to_vmem [thread:$0]  (!%p3673_p5), %s481_s4, 32, %s483_s21, [#allocation18]  }
  0x20   : > { %s4060_s1 = sld [smem:[#allocation26_spill]]  ;;  %p43_p6 = scmp.ge.s32.totalorder %s41_s14, 2 }
  0x21   : > { %s4061_s3 = sld [smem:[#allocation28_spill]]  ;;  %s3550_s22 = smov [#allocation3]  }
  0x22   : > { %s4066_s14 = smov (%p43_p6, %s41_s14), 0  ;;  %s366_s23 = sshll.u32 %s3550_s22, 4  ;;  %s367_s23 = int_to_ptr.vmem [resolvable:$true] %s366_s23 }
  0x23   : > { %s3551_s4 = smov [#allocation7]   ;;  %s3552_s30 = smov 128  }
  0x24   : > { %s389_s29 = sshll.u32 %s3551_s4, 4  ;;  %s3553_s18 = smov 8   ;;  %s390_s29 = int_to_ptr.vmem [resolvable:$true] %s389_s29 }
  0x25   : > { %s4062_s5 = sld [smem:[#allocation30_spill]]  ;;  %s3554_s2 = smov [#allocation10]  }
  0x26   : > { %s364_s24 = sshll.u32 %s4060_s1, 4  ;;  %s415_s6 = sshll.u32 %s3554_s2, 4  ;;  %s365_s24 = int_to_ptr.hbm [resolvable:$true] %s364_s24  ;;  %s416_s6 = int_to_ptr.vmem [resolvable:$true] %s415_s6 }
  0x27   : > { %s387_s19 = sshll.u32 %s4061_s3, 4  ;;  %s3556_s4 = smov 64   ;;  %s388_s19 = int_to_ptr.hbm [resolvable:$true] %s387_s19 }
  0x28   : > { %3069 = dma.hbm_to_vmem [thread:$0]  (!%p3673_p5), %s365_s24, 64, %s367_s23, [#allocation4]  }
  0x29   : > { %3075 = dma.hbm_to_vmem [thread:$0]  (!%p3673_p5), %s388_s19, 1024, %s390_s29, [#allocation6], %s3552_s30, %s3552_s30, %s3553_s18  }
  0x2a   : > { %s439_s24 = sshll.u32 %s4041_s7, 4  ;;  %s3555_s23 = smov 1024   ;;  %s440_s24 = int_to_ptr.hbm [resolvable:$true] %s439_s24 }
  0x2b   : > { %s413_s20 = sshll.u32 %s4062_s5, 4  ;;  %s3557_s19 = smov [#allocation13]   ;;  %s414_s20 = int_to_ptr.hbm [resolvable:$true] %s413_s20 }
  0x2c   : > { %3081 = dma.hbm_to_vmem [thread:$0]  (!%p3673_p5), %s414_s20, 16384, %s416_s6, [#allocation9], %s3555_s23, %s3555_s23, %s3556_s4  }
  0x2d   : > { %s441_s29 = sshll.u32 %s3557_s19, 4  ;;  %s3558_s30 = smov 512   ;;  %s442_s29 = int_to_ptr.vmem [resolvable:$true] %s441_s29 }
  0x2e   : > { %s3559_s18 = smov 32   ;;  %s465_s2 = sshll.u32 %s4043_s9, 4  ;;  %s466_s2 = int_to_ptr.hbm [resolvable:$true] %s465_s2 }
  0x2f   : > { %3087 = dma.hbm_to_vmem [thread:$0]  (!%p3673_p5), %s440_s24, 65536, %s442_s29, [#allocation12], %s3558_s30, %s3558_s30, %s3559_s18  }
  0x30   : > { %s3560_s1 = smov [#allocation16]   ;;  %s495_s6 = sshll.u32 %s4046_s12, 4  ;;  %s496_s6 = int_to_ptr.hbm [resolvable:$true] %s495_s6 }
  0x31   : > { %s467_s22 = sshll.u32 %s3560_s1, 4  ;;  %s3561_s23 = smov 256   ;;  %s468_s22 = int_to_ptr.vmem [resolvable:$true] %s467_s22 }
  0x32   : > { %s3562_s4 = smov 16   ;;  %s3563_s19 = smov [#allocation19]  }
  0x33   : > { %3093 = dma.hbm_to_vmem [thread:$0]  (!%p3673_p5), %s466_s2, 16384, %s468_s22, [#allocation15], %s3561_s23, %s3561_s23, %s3562_s4  }
  0x34   : > { %s497_s5 = sshll.u32 %s3563_s19, 4  ;;  %523 = sbr.rel (%p3659_p3) target bundleno = 1207 (0x4b7), region = 72  ;;  %s498_s5 = int_to_ptr.vmem [resolvable:$true] %s497_s5 }
  0x35   : > { %3099 = dma.hbm_to_vmem [thread:$0]  (!%p3673_p5), %s496_s6, 16, %s498_s5, [#allocation18]  }
  0x39   : > { %3510 = dma.done.wait (%p3655_p2), [#allocation4], 64  }
  0x3a   : > { %3512 = vsyncadd (%p3655_p2), [#allocation4], 4294967232 }
  0x3b   : > { %3514 = dma.done.wait (%p3655_p2), [#allocation6], 1040  }
  0x3c   : > { %3516 = vsyncadd (%p3655_p2), [#allocation6], 4294966256 }
  0x3d   : > { %3518 = dma.done.wait (%p3655_p2), [#allocation9], 16400  }
  0x3e   : > { %3520 = vsyncadd (%p3655_p2), [#allocation9], 4294950896 }
  0x3f   : > { %3522 = dma.done.wait (%p3655_p2), [#allocation12], 65664  }
  0x40   : > { %3524 = vsyncadd (%p3655_p2), [#allocation12], 4294901632 }
  0x41   : > { %3526 = dma.done.wait (%p3655_p2), [#allocation15], 16448  }
  0x42   : > { %3528 = vsyncadd (%p3655_p2), [#allocation15], 4294950848 }
  0x43   : > { %3530 = dma.done.wait (%p3655_p2), [#allocation18], 48  }
  0x44   : > { %3532 = vsyncadd (%p3655_p2), [#allocation18], 4294967248  ;;  %p621_p7 = scmp.lt.s32.totalorder %s3535_s25, 1  ;;  %vm656_vm0 = vcmask 1042432   ;;  %vm646_vm1 = vcmask 23552   ;;  %v696_v2 = vld [vmem:[#allocation7 + $0x38] sm:$0xff] }
  0x45   : > { %v641_v0 = vld [vmem:[#allocation3] sm:$0x7]  ;;  %v695_v3 = vld [vmem:[#allocation7 + $0x30] sm:$0xff]  ;;  %719 = vmatpush.msra.mxu1 %v696_v2  ;;  %v694_v4 = vld [vmem:[#allocation7 + $0x28] sm:$0xff]  ;;  %vm701_vm2 = vcmask 523264   ;;  %vm1240_vm4 = vcmask 1040384  }
  0x46   : > { %s4068_s25 = smov (!%p621_p7, %s3535_s25), 1  ;;  %3012 = vmatpush.msk.msra.mxu0 %vm656_vm0, %v641_v0  ;;  %v693_v5 = vld [vmem:[#allocation7 + $0x20] sm:$0xff]  ;;  %v692_v7 = vld [vmem:[#allocation7 + $0x18] sm:$0xff]  ;;  %v691_v9 = vld [vmem:[#allocation7 + $0x10] sm:$0xff]  ;;  %vm1242_vm5 = vcmask 1042434   ;;  %vm1244_vm6 = vcmask 1041408  }
  0x47   : > { %s3021_s3 = smul.u32 24, %s4068_s25  ;;  %720 = vmatpush.msra.mxu1 %v695_v3  ;;  %v690_v10 = vld [vmem:[#allocation7 + $0x8] sm:$0xff]  ;;  %v689_v11 = vld [vmem:[#allocation7] sm:$0xff]  ;;  %v862_v14 = vld [vmem:[#allocation10 + $0x3d0] sm:$0xff]  ;;  %vm1248_vm7 = vcmask 1046534   ;;  %vm1246_vm8 = vcmask 1044484   ;;  %s632_s22 = scalar_lea.vmem %s4047_s13, %s4068_s25 }
  0x48   : > { %v860_v12 = vld [vmem:[#allocation10 + $0x3c0] sm:$0xff]  ;;  %v861_v13 = vld [vmem:[#allocation10 + $0x3c8] sm:$0xff]  ;;  %v863_v15 = vld [vmem:[#allocation10 + $0x3d8] sm:$0xff]  ;;  %938 = vmatpush.msrb.mxu0 %v862_v14  ;;  %vm1250_vm9 = vcmask 1045508   ;;  %vm1252_vm10 = vcmask 1043456   ;;  %vm2813_vm11 = vcmask 65536  }
  0x49   : > { %s628_s28 = scalar_lea.vmem %s4034_s0, %s3021_s3  ;;  %721 = vmatpush.msra.mxu1 %v694_v4  ;;  %886 = vmatpush.msra.mxu2 %v860_v12  ;;  %v852_v16 = vld [vmem:[#allocation10 + $0x380] sm:$0xff]  ;;  %v853_v17 = vld [vmem:[#allocation10 + $0x388] sm:$0xff]  ;;  %v854_v18 = vld [vmem:[#allocation10 + $0x390] sm:$0xff] }
  0x4a   : > { %v638_v1 = vld [vmem:[%s628_s28] sm:$0xff]  ;;  %v639_v6 = vld [vmem:[%s628_s28 + $0x8] sm:$0xff]  ;;  %v640_v8 = vld [vmem:[%s628_s28 + $0x10] sm:$0xff]  ;;  %912 = vmatpush.msra.mxu3 %v861_v13  ;;  %939 = vmatpush.msrb.mxu0 %v854_v18 }
  0x4b   : > { %3013 = vmatmul.msk.f32.vlgmr.msra.gmra.mxu0 %vm646_vm1, %v638_v1  ;;  %722 = vmatpush.msra.mxu1 %v693_v5  ;;  %v855_v19 = vld [vmem:[#allocation10 + $0x398] sm:$0xff]  ;;  %v844_v20 = vld [vmem:[#allocation10 + $0x340] sm:$0xff]  ;;  %v845_v21 = vld [vmem:[#allocation10 + $0x348] sm:$0xff] }
  0x4c   : > { %887 = vmatpush.msra.mxu2 %v852_v16  ;;  %913 = vmatpush.msra.mxu3 %v853_v17  ;;  %v846_v22 = vld [vmem:[#allocation10 + $0x350] sm:$0xff]  ;;  %v847_v23 = vld [vmem:[#allocation10 + $0x358] sm:$0xff]  ;;  %v836_v24 = vld [vmem:[#allocation10 + $0x300] sm:$0xff] }
  0x4d   : > { %723 = vmatpush.msra.mxu1 %v692_v7  ;;  %v837_v25 = vld [vmem:[#allocation10 + $0x308] sm:$0xff]  ;;  %v838_v26 = vld [vmem:[#allocation10 + $0x310] sm:$0xff]  ;;  %v839_v27 = vld [vmem:[#allocation10 + $0x318] sm:$0xff]  ;;  %940 = vmatpush.msrb.mxu0 %v846_v22 }
  0x4e   : > { %888 = vmatpush.msra.mxu2 %v844_v20  ;;  %914 = vmatpush.msra.mxu3 %v845_v21  ;;  %v828_v28 = vld [vmem:[#allocation10 + $0x2c0] sm:$0xff]  ;;  %v829_v29 = vld [vmem:[#allocation10 + $0x2c8] sm:$0xff]  ;;  %v830_v30 = vld [vmem:[#allocation10 + $0x2d0] sm:$0xff] }
  0x4f   : > { %724 = vmatpush.msra.mxu1 %v691_v9  ;;  %v831_v31 = vld [vmem:[#allocation10 + $0x2d8] sm:$0xff]  ;;  %941 = vmatpush.msrb.mxu0 %v838_v26  ;;  %v820_v33 = vld [vmem:[#allocation10 + $0x280] sm:$0xff]  ;;  %v821_v34 = vld [vmem:[#allocation10 + $0x288] sm:$0xff] }
  0x50   : > { %889 = vmatpush.msra.mxu2 %v836_v24  ;;  %915 = vmatpush.msra.mxu3 %v837_v25  ;;  %v3763_v32 = vld [vmem:[#allocation5] ss:$0 sm:$0xff]  ;;  %v822_v35 = vld [vmem:[#allocation10 + $0x290] sm:$0xff]  ;;  %v812_v37 = vld [vmem:[#allocation10 + $0x240] sm:$0xff] }
  0x51   : > { %725 = vmatpush.msra.mxu1 %v690_v10  ;;  %v823_v36 = vld [vmem:[#allocation10 + $0x298] sm:$0xff]  ;;  %942 = vmatpush.msrb.mxu0 %v830_v30  ;;  %v813_v38 = vld [vmem:[#allocation10 + $0x248] sm:$0xff]  ;;  %v814_v40 = vld [vmem:[#allocation10 + $0x250] sm:$0xff] }
  0x52   : > { %890 = vmatpush.msra.mxu2 %v828_v28  ;;  %916 = vmatpush.msra.mxu3 %v829_v29  ;;  %v815_v41 = vld [vmem:[#allocation10 + $0x258] sm:$0xff]  ;;  %v804_v43 = vld [vmem:[#allocation10 + $0x200] sm:$0xff]  ;;  %v805_v44 = vld [vmem:[#allocation10 + $0x208] sm:$0xff] }
  0x53   : > { %3014 = vmatmul.msk.f32.gmra.mxu0 %vm646_vm1, %v639_v6  ;;  %726 = vmatpush.msra.mxu1 %v689_v11  ;;  %v806_v45 = vld [vmem:[#allocation10 + $0x210] sm:$0xff]  ;;  %v807_v47 = vld [vmem:[#allocation10 + $0x218] sm:$0xff]  ;;  %v796_v48 = vld [vmem:[#allocation10 + $0x1c0] sm:$0xff] }
  0x54   : > { %891 = vmatpush.msra.mxu2 %v820_v33  ;;  %917 = vmatpush.msra.mxu3 %v821_v34  ;;  %v797_v49 = vld [vmem:[#allocation10 + $0x1c8] sm:$0xff]  ;;  %v798_v50 = vld [vmem:[#allocation10 + $0x1d0] sm:$0xff]  ;;  %v799_v51 = vld [vmem:[#allocation10 + $0x1d8] sm:$0xff] }
  0x55   : > { %964 = vmatpush.msrb.mxu1 %v863_v15  ;;  %943 = vmatpush.msrb.mxu0 %v822_v35  ;;  %v788_v52 = vld [vmem:[#allocation10 + $0x180] sm:$0xff]  ;;  %v789_v53 = vld [vmem:[#allocation10 + $0x188] sm:$0xff]  ;;  %v790_v54 = vld [vmem:[#allocation10 + $0x190] sm:$0xff] }
  0x56   : > { %892 = vmatpush.msra.mxu2 %v812_v37  ;;  %918 = vmatpush.msra.mxu3 %v813_v38  ;;  %v791_v55 = vld [vmem:[#allocation10 + $0x198] sm:$0xff]  ;;  %v780_v56 = vld [vmem:[#allocation10 + $0x140] sm:$0xff]  ;;  %v781_v58 = vld [vmem:[#allocation10 + $0x148] sm:$0xff] }
  0x57   : > { %965 = vmatpush.msrb.mxu1 %v855_v19  ;;  %944 = vmatpush.msrb.mxu0 %v814_v40  ;;  %v782_v59 = vld [vmem:[#allocation10 + $0x150] sm:$0xff]  ;;  %v783_v61 = vld [vmem:[#allocation10 + $0x158] sm:$0xff]  ;;  %v772_v62 = vld [vmem:[#allocation10 + $0x100] sm:$0xff] }
  0x58   : > { %893 = vmatpush.msra.mxu2 %v804_v43  ;;  %919 = vmatpush.msra.mxu3 %v805_v44  ;;  %v773_v63 = vld [vmem:[#allocation10 + $0x108] sm:$0xff]  ;;  %v774_v1 = vld [vmem:[#allocation10 + $0x110] sm:$0xff]  ;;  %v775_v2 = vld [vmem:[#allocation10 + $0x118] sm:$0xff] }
  0x59   : > { %966 = vmatpush.msrb.mxu1 %v847_v23  ;;  %945 = vmatpush.msrb.mxu0 %v806_v45  ;;  %v764_v3 = vld [vmem:[#allocation10 + $0xc0] sm:$0xff]  ;;  %v765_v4 = vld [vmem:[#allocation10 + $0xc8] sm:$0xff]  ;;  %v766_v5 = vld [vmem:[#allocation10 + $0xd0] sm:$0xff] }
  0x5a   : > { %894 = vmatpush.msra.mxu2 %v796_v48  ;;  %920 = vmatpush.msra.mxu3 %v797_v49  ;;  %v767_v6 = vld [vmem:[#allocation10 + $0xd8] sm:$0xff]  ;;  %v756_v7 = vld [vmem:[#allocation10 + $0x80] sm:$0xff]  ;;  %v758_v9 = vld [vmem:[#allocation10 + $0x90] sm:$0xff] }
  0x5b   : > { %3015 = vmatmul.msk.f32.gmra.mxu0 %vm646_vm1, %v640_v8  ;;  %967 = vmatpush.msrb.mxu1 %v839_v27  ;;  %v757_v8 = vld [vmem:[#allocation10 + $0x88] sm:$0xff]  ;;  %v759_v10 = vld [vmem:[#allocation10 + $0x98] sm:$0xff]  ;;  %v748_v12 = vld [vmem:[#allocation10 + $0x40] sm:$0xff] }
  0x5c   : > { %946 = vmatpush.msrb.mxu0 %v798_v50  ;;  %895 = vmatpush.msra.mxu2 %v788_v52  ;;  %v749_v13 = vld [vmem:[#allocation10 + $0x48] sm:$0xff]  ;;  %v750_v15 = vld [vmem:[#allocation10 + $0x50] sm:$0xff]  ;;  %v751_v16 = vld [vmem:[#allocation10 + $0x58] sm:$0xff] }
  0x5d   : > { %968 = vmatpush.msrb.mxu1 %v831_v31  ;;  %921 = vmatpush.msra.mxu3 %v789_v53  ;;  %v740_v17 = vld [vmem:[#allocation10] sm:$0xff]  ;;  %v741_v19 = vld [vmem:[#allocation10 + $0x8] sm:$0xff]  ;;  %v742_v20 = vld [vmem:[#allocation10 + $0x10] sm:$0xff] }
  0x5e   : > { %947 = vmatpush.msrb.mxu0 %v790_v54  ;;  %896 = vmatpush.msra.mxu2 %v780_v56  ;;  %v743_v21 = vld [vmem:[#allocation10 + $0x18] sm:$0xff]  ;;  %v864_v22 = vld [vmem:[#allocation10 + $0x3e0] sm:$0xff]  ;;  %v865_v23 = vld [vmem:[#allocation10 + $0x3e8] sm:$0xff] }
  0x5f   : > { %969 = vmatpush.msrb.mxu1 %v823_v36  ;;  %922 = vmatpush.msra.mxu3 %v781_v58  ;;  %v866_v24 = vld [vmem:[#allocation10 + $0x3f0] sm:$0xff]  ;;  %v867_v25 = vld [vmem:[#allocation10 + $0x3f8] sm:$0xff]  ;;  %v856_v26 = vld [vmem:[#allocation10 + $0x3a0] sm:$0xff] }
  0x60   : > { %948 = vmatpush.msrb.mxu0 %v782_v59  ;;  %897 = vmatpush.msra.mxu2 %v772_v62  ;;  %v857_v27 = vld [vmem:[#allocation10 + $0x3a8] sm:$0xff]  ;;  %v858_v28 = vld [vmem:[#allocation10 + $0x3b0] sm:$0xff]  ;;  %v859_v29 = vld [vmem:[#allocation10 + $0x3b8] sm:$0xff] }
  0x61   : > { %970 = vmatpush.msrb.mxu1 %v815_v41  ;;  %923 = vmatpush.msra.mxu3 %v773_v63  ;;  %v848_v30 = vld [vmem:[#allocation10 + $0x360] sm:$0xff]  ;;  %v849_v31 = vld [vmem:[#allocation10 + $0x368] sm:$0xff]  ;;  %v851_v33 = vld [vmem:[#allocation10 + $0x378] sm:$0xff] }
  0x62   : > { %949 = vmatpush.msrb.mxu0 %v774_v1  ;;  %898 = vmatpush.msra.mxu2 %v764_v3  ;;  %v840_v34 = vld [vmem:[#allocation10 + $0x320] sm:$0xff]  ;;  %v841_v35 = vld [vmem:[#allocation10 + $0x328] sm:$0xff]  ;;  %v842_v36 = vld [vmem:[#allocation10 + $0x330] sm:$0xff] }
  0x63   : > { %971 = vmatpush.msrb.mxu1 %v807_v47  ;;  %924 = vmatpush.msra.mxu3 %v765_v4  ;;  %v843_v37 = vld [vmem:[#allocation10 + $0x338] sm:$0xff]  ;;  %v832_v38 = vld [vmem:[#allocation10 + $0x2e0] sm:$0xff]  ;;  %v834_v40 = vld [vmem:[#allocation10 + $0x2f0] sm:$0xff] }
  0x64   : > { %950 = vmatpush.msrb.mxu0 %v766_v5  ;;  %899 = vmatpush.msra.mxu2 %v756_v7  ;;  %v835_v41 = vld [vmem:[#allocation10 + $0x2f8] sm:$0xff]  ;;  %v825_v43 = vld [vmem:[#allocation10 + $0x2a8] sm:$0xff]  ;;  %v826_v44 = vld [vmem:[#allocation10 + $0x2b0] sm:$0xff] }
  0x65   : > { %972 = vmatpush.msrb.mxu1 %v799_v51  ;;  %925 = vmatpush.msra.mxu3 %v757_v8  ;;  %v827_v45 = vld [vmem:[#allocation10 + $0x2b8] sm:$0xff]  ;;  %v817_v47 = vld [vmem:[#allocation10 + $0x268] sm:$0xff]  ;;  %v818_v48 = vld [vmem:[#allocation10 + $0x270] sm:$0xff] }
  0x66   : > { %951 = vmatpush.msrb.mxu0 %v758_v9  ;;  %900 = vmatpush.msra.mxu2 %v748_v12  ;;  %v819_v49 = vld [vmem:[#allocation10 + $0x278] sm:$0xff]  ;;  %v808_v50 = vld [vmem:[#allocation10 + $0x220] sm:$0xff]  ;;  %v809_v51 = vld [vmem:[#allocation10 + $0x228] sm:$0xff] }
  0x67   : > { %973 = vmatpush.msrb.mxu1 %v791_v55  ;;  %926 = vmatpush.msra.mxu3 %v749_v13  ;;  %v810_v52 = vld [vmem:[#allocation10 + $0x230] sm:$0xff]  ;;  %v811_v53 = vld [vmem:[#allocation10 + $0x238] sm:$0xff]  ;;  %v800_v54 = vld [vmem:[#allocation10 + $0x1e0] sm:$0xff] }
  0x68   : > { %952 = vmatpush.msrb.mxu0 %v750_v15  ;;  %901 = vmatpush.msra.mxu2 %v740_v17  ;;  %v801_v55 = vld [vmem:[#allocation10 + $0x1e8] sm:$0xff]  ;;  %v802_v56 = vld [vmem:[#allocation10 + $0x1f0] sm:$0xff]  ;;  %v792_v58 = vld [vmem:[#allocation10 + $0x1a0] sm:$0xff] }
  0x69   : > { %974 = vmatpush.msrb.mxu1 %v783_v61  ;;  %927 = vmatpush.msra.mxu3 %v741_v19  ;;  %v793_v59 = vld [vmem:[#allocation10 + $0x1a8] sm:$0xff]  ;;  %v795_v61 = vld [vmem:[#allocation10 + $0x1b8] sm:$0xff]  ;;  %v784_v62 = vld [vmem:[#allocation10 + $0x160] sm:$0xff] }
  0x6a   : > { %953 = vmatpush.msrb.mxu0 %v742_v20  ;;  %990 = vmatpush.msrb.mxu2 %v864_v22  ;;  %v785_v63 = vld [vmem:[#allocation10 + $0x168] sm:$0xff]  ;;  %v787_v1 = vld [vmem:[#allocation10 + $0x178] sm:$0xff]  ;;  %v778_v4 = vld [vmem:[#allocation10 + $0x130] sm:$0xff] }
  0x6b   : > { %975 = vmatpush.msrb.mxu1 %v775_v2  ;;  %1016 = vmatpush.msrb.mxu3 %v865_v23  ;;  %v776_v2 = vld [vmem:[#allocation10 + $0x120] sm:$0xff]  ;;  %v777_v3 = vld [vmem:[#allocation10 + $0x128] sm:$0xff]  ;;  %v779_v5 = vld [vmem:[#allocation10 + $0x138] sm:$0xff] }
  0x6c   : > { %1042 = vmatpush.msra.mxu0 %v866_v24  ;;  %991 = vmatpush.msrb.mxu2 %v856_v26  ;;  %v769_v7 = vld [vmem:[#allocation10 + $0xe8] sm:$0xff]  ;;  %v770_v8 = vld [vmem:[#allocation10 + $0xf0] sm:$0xff]  ;;  %v771_v9 = vld [vmem:[#allocation10 + $0xf8] sm:$0xff] }
  0x6d   : > { %976 = vmatpush.msrb.mxu1 %v767_v6  ;;  %1017 = vmatpush.msrb.mxu3 %v857_v27  ;;  %v768_v6 = vld [vmem:[#allocation10 + $0xe0] sm:$0xff]  ;;  %v762_v12 = vld [vmem:[#allocation10 + $0xb0] sm:$0xff]  ;;  %v763_v13 = vld [vmem:[#allocation10 + $0xb8] sm:$0xff] }
  0x6e   : > { %1043 = vmatpush.msra.mxu0 %v858_v28  ;;  %992 = vmatpush.msrb.mxu2 %v848_v30  ;;  %v753_v15 = vld [vmem:[#allocation10 + $0x68] sm:$0xff]  ;;  %v755_v17 = vld [vmem:[#allocation10 + $0x78] sm:$0xff]  ;;  %v746_v20 = vld [vmem:[#allocation10 + $0x30] sm:$0xff] }
  0x6f   : > { %977 = vmatpush.msrb.mxu1 %v759_v10  ;;  %1018 = vmatpush.msrb.mxu3 %v849_v31  ;;  %v760_v10 = vld [vmem:[#allocation10 + $0xa0] sm:$0xff]  ;;  %v745_v19 = vld [vmem:[#allocation10 + $0x28] sm:$0xff]  ;;  %v3166_v22 = vld [vmem:[#allocation8] ss:$0 sm:$0xff] }
  0x70   : > { %993 = vmatpush.msrb.mxu2 %v840_v34  ;;  %v1449_v34 = vld [vmem:[#allocation13 + $0x5e0] sm:$0xff] }
  0x71   : > { %978 = vmatpush.msrb.mxu1 %v751_v16  ;;  %1019 = vmatpush.msrb.mxu3 %v841_v35  ;;  %v754_v16 = vld [vmem:[#allocation10 + $0x70] sm:$0xff]  ;;  %v1513_v35 = vld [vmem:[#allocation13 + $0x7e0] sm:$0xff] }
  0x72   : > { %994 = vmatpush.msrb.mxu2 %v832_v38  ;;  %v1445_v38 = vld [vmem:[#allocation13 + $0x5c0] sm:$0xff] }
  0x73   : > { %979 = vmatpush.msrb.mxu1 %v743_v21  ;;  %v747_v21 = vld [vmem:[#allocation10 + $0x38] sm:$0xff] }
  0xc8   : > { %v677_v39 = vpop.f32.mrf.mxu0 }
  0xc9   : > { %v678_v42 = vadd.f32 %v3763_v32, %v677_v39  ;;  %v833_v39 = vld [vmem:[#allocation10 + $0x2e8] sm:$0xff] }
  0xca   : > { %1020 = vmatpush.msrb.mxu3 %v833_v39  ;;  %v1509_v39 = vld [vmem:[#allocation13 + $0x7c0] sm:$0xff] }
  0xcb   : > { %v686_v46 = vmax.f32 %v678_v42, 0.0  ;;  %v824_v42 = vld [vmem:[#allocation10 + $0x2a0] sm:$0xff] }
  0xcc   : > { %995 = vmatpush.msrb.mxu2 %v824_v42  ;;  %1021 = vmatpush.msrb.mxu3 %v825_v43  ;;  %v1441_v42 = vld [vmem:[#allocation13 + $0x5a0] sm:$0xff] }
  0xcd   : > { %3016 = vmatmul.msk.f32.vlgmr.msra.gmra.mxu1 %vm701_vm2, %v686_v46  ;;  %v816_v46 = vld [vmem:[#allocation10 + $0x260] sm:$0xff]  ;;  %v1505_v43 = vld [vmem:[#allocation13 + $0x7a0] sm:$0xff] }
  0xce   : > { %1068 = vmatpush.msra.mxu1 %v867_v25  ;;  %996 = vmatpush.msrb.mxu2 %v816_v46  ;;  %v1437_v46 = vld [vmem:[#allocation13 + $0x580] sm:$0xff] }
  0xcf   : > { %1022 = vmatpush.msrb.mxu3 %v817_v47  ;;  %v1501_v47 = vld [vmem:[#allocation13 + $0x780] sm:$0xff] }
  0xd0   : > { %v680_v57 = vpop.f32.mrf.mxu0  ;;  %1069 = vmatpush.msra.mxu1 %v859_v29  ;;  %997 = vmatpush.msrb.mxu2 %v808_v50  ;;  %v1433_v50 = vld [vmem:[#allocation13 + $0x560] sm:$0xff] }
  0xd1   : > { %v681_v60 = vadd.f32 %v3763_v32, %v680_v57  ;;  %1023 = vmatpush.msrb.mxu3 %v809_v51  ;;  %v803_v57 = vld [vmem:[#allocation10 + $0x1f8] sm:$0xff]  ;;  %v1497_v51 = vld [vmem:[#allocation13 + $0x760] sm:$0xff] }
  0xd2   : > { %1070 = vmatpush.msra.mxu1 %v851_v33  ;;  %998 = vmatpush.msrb.mxu2 %v800_v54  ;;  %v1385_v33 = vld [vmem:[#allocation13 + $0x3e0] sm:$0xff] }
  0xd3   : > { %v687_v0 = vmax.f32 %v681_v60, 0.0  ;;  %1024 = vmatpush.msrb.mxu3 %v801_v55  ;;  %v794_v60 = vld [vmem:[#allocation10 + $0x1b0] sm:$0xff]  ;;  %v1429_v54 = vld [vmem:[#allocation13 + $0x540] sm:$0xff] }
  0xd4   : > { %1071 = vmatpush.msra.mxu1 %v843_v37  ;;  %999 = vmatpush.msrb.mxu2 %v792_v58  ;;  %v1381_v37 = vld [vmem:[#allocation13 + $0x3c0] sm:$0xff] }
  0xd5   : > { %3017 = vmatmul.msk.f32.gmra.mxu1 %vm701_vm2, %v687_v0  ;;  %1025 = vmatpush.msrb.mxu3 %v793_v59  ;;  %v786_v0 = vld [vmem:[#allocation10 + $0x170] sm:$0xff]  ;;  %v1493_v55 = vld [vmem:[#allocation13 + $0x740] sm:$0xff] }
  0xd6   : > { %1072 = vmatpush.msra.mxu1 %v835_v41  ;;  %1000 = vmatpush.msrb.mxu2 %v784_v62  ;;  %v1377_v41 = vld [vmem:[#allocation13 + $0x3a0] sm:$0xff] }
  0xd7   : > { %1026 = vmatpush.msrb.mxu3 %v785_v63  ;;  %v1425_v58 = vld [vmem:[#allocation13 + $0x520] sm:$0xff] }
  0xd8   : > { %v683_v11 = vpop.f32.mrf.mxu0  ;;  %1073 = vmatpush.msra.mxu1 %v827_v45  ;;  %1001 = vmatpush.msrb.mxu2 %v776_v2  ;;  %v1373_v45 = vld [vmem:[#allocation13 + $0x380] sm:$0xff] }
  0xd9   : > { %v684_v14 = vadd.f32 %v3763_v32, %v683_v11  ;;  %v850_v32 = vld [vmem:[#allocation10 + $0x370] sm:$0xff]  ;;  %1027 = vmatpush.msrb.mxu3 %v777_v3  ;;  %v761_v11 = vld [vmem:[#allocation10 + $0xa8] sm:$0xff] }
  0xda   : > { %1044 = vmatpush.msra.mxu0 %v850_v32  ;;  %1074 = vmatpush.msra.mxu1 %v819_v49  ;;  %v1321_v32 = vld [vmem:[#allocation13 + $0x1e0] sm:$0xff] }
  0xdb   : > { %v688_v18 = vmax.f32 %v684_v14, 0.0  ;;  %1002 = vmatpush.msrb.mxu2 %v768_v6  ;;  %1028 = vmatpush.msrb.mxu3 %v769_v7  ;;  %v752_v14 = vld [vmem:[#allocation10 + $0x60] sm:$0xff]  ;;  %v1369_v49 = vld [vmem:[#allocation13 + $0x360] sm:$0xff] }
  0xdc   : > { %1045 = vmatpush.msra.mxu0 %v842_v36  ;;  %1075 = vmatpush.msra.mxu1 %v811_v53  ;;  %v1317_v36 = vld [vmem:[#allocation13 + $0x1c0] sm:$0xff] }
  0xdd   : > { %3018 = vmatmul.msk.f32.gmra.mxu1 %vm701_vm2, %v688_v18  ;;  %1003 = vmatpush.msrb.mxu2 %v760_v10  ;;  %v744_v18 = vld [vmem:[#allocation10 + $0x20] sm:$0xff]  ;;  %v1365_v53 = vld [vmem:[#allocation13 + $0x340] sm:$0xff] }
  0xde   : > { %1046 = vmatpush.msra.mxu0 %v834_v40  ;;  %1076 = vmatpush.msra.mxu1 %v803_v57  ;;  %v1313_v40 = vld [vmem:[#allocation13 + $0x1a0] sm:$0xff] }
  0xdf   : > { %1029 = vmatpush.msrb.mxu3 %v761_v11  ;;  %1004 = vmatpush.msrb.mxu2 %v752_v14  ;;  %v1361_v57 = vld [vmem:[#allocation13 + $0x320] sm:$0xff] }
  0xe0   : > { %1047 = vmatpush.msra.mxu0 %v826_v44  ;;  %1077 = vmatpush.msra.mxu1 %v795_v61  ;;  %v1309_v44 = vld [vmem:[#allocation13 + $0x180] sm:$0xff] }
  0xe1   : > { %1030 = vmatpush.msrb.mxu3 %v753_v15  ;;  %1005 = vmatpush.msrb.mxu2 %v744_v18  ;;  %v1489_v59 = vld [vmem:[#allocation13 + $0x720] sm:$0xff] }
  0xe2   : > { %1048 = vmatpush.msra.mxu0 %v818_v48  ;;  %1078 = vmatpush.msra.mxu1 %v787_v1  ;;  %v1305_v48 = vld [vmem:[#allocation13 + $0x160] sm:$0xff] }
  0xe3   : > { %1031 = vmatpush.msrb.mxu3 %v745_v19  ;;  %v1357_v61 = vld [vmem:[#allocation13 + $0x300] sm:$0xff] }
  0xe4   : > { %1049 = vmatpush.msra.mxu0 %v810_v52  ;;  %1079 = vmatpush.msra.mxu1 %v779_v5  ;;  %v1301_v52 = vld [vmem:[#allocation13 + $0x140] sm:$0xff] }
  0xe5   : > { %v1421_v62 = vld [vmem:[#allocation13 + $0x500] sm:$0xff] }
  0xe6   : > { %1050 = vmatpush.msra.mxu0 %v802_v56  ;;  %1080 = vmatpush.msra.mxu1 %v771_v9  ;;  %v1297_v56 = vld [vmem:[#allocation13 + $0x120] sm:$0xff] }
  0xe7   : > { %v1485_v63 = vld [vmem:[#allocation13 + $0x700] sm:$0xff] }
  0xe8   : > { %1051 = vmatpush.msra.mxu0 %v794_v60  ;;  %1081 = vmatpush.msra.mxu1 %v763_v13  ;;  %v1293_v60 = vld [vmem:[#allocation13 + $0x100] sm:$0xff] }
  0xe9   : > { %v1353_v1 = vld [vmem:[#allocation13 + $0x2e0] sm:$0xff] }
  0xea   : > { %1052 = vmatpush.msra.mxu0 %v786_v0  ;;  %1082 = vmatpush.msra.mxu1 %v755_v17  ;;  %v1289_v0 = vld [vmem:[#allocation13 + $0xe0] sm:$0xff] }
  0xeb   : > { %v1417_v2 = vld [vmem:[#allocation13 + $0x4e0] sm:$0xff] }
  0xec   : > { %1053 = vmatpush.msra.mxu0 %v778_v4  ;;  %1083 = vmatpush.msra.mxu1 %v747_v21  ;;  %v1481_v3 = vld [vmem:[#allocation13 + $0x6e0] sm:$0xff] }
  0xed   : > { %v1285_v4 = vld [vmem:[#allocation13 + $0xc0] sm:$0xff] }
  0xee   : > { %1054 = vmatpush.msra.mxu0 %v770_v8  ;;  %v1349_v5 = vld [vmem:[#allocation13 + $0x2c0] sm:$0xff] }
  0xef   : > { %v1413_v6 = vld [vmem:[#allocation13 + $0x4c0] sm:$0xff] }
  0xf0   : > { %1055 = vmatpush.msra.mxu0 %v762_v12  ;;  %v1477_v7 = vld [vmem:[#allocation13 + $0x6c0] sm:$0xff] }
  0xf1   : > { %v1281_v8 = vld [vmem:[#allocation13 + $0xa0] sm:$0xff] }
  0xf2   : > { %1056 = vmatpush.msra.mxu0 %v754_v16  ;;  %v1345_v9 = vld [vmem:[#allocation13 + $0x2a0] sm:$0xff] }
  0xf3   : > { %v1409_v10 = vld [vmem:[#allocation13 + $0x4a0] sm:$0xff] }
  0xf4   : > { %1057 = vmatpush.msra.mxu0 %v746_v20  ;;  %v1473_v11 = vld [vmem:[#allocation13 + $0x6a0] sm:$0xff] }
  0xf5   : > { %v1277_v14 = vld [vmem:[#allocation13 + $0x80] sm:$0xff] }
  0xf6   : > { %v1341_v15 = vld [vmem:[#allocation13 + $0x280] sm:$0xff] }
  0xf7   : > { %v1405_v16 = vld [vmem:[#allocation13 + $0x480] sm:$0xff] }
  0xf8   : > { %v1469_v17 = vld [vmem:[#allocation13 + $0x680] sm:$0xff] }
  0xf9   : > { %v1273_v18 = vld [vmem:[#allocation13 + $0x60] sm:$0xff] }
  0xfa   : > { %v1337_v19 = vld [vmem:[#allocation13 + $0x260] sm:$0xff] }
  0xfb   : > { %v1401_v20 = vld [vmem:[#allocation13 + $0x460] sm:$0xff] }
  0xfc   : > { %v1465_v21 = vld [vmem:[#allocation13 + $0x660] sm:$0xff] }
 0x14a   : > { %v728_v23 = vpop.f32.mrf.mxu1 }
 0x14b   : > { %v729_v24 = vadd.f32 %v3166_v22, %v728_v23  ;;  %v1333_v23 = vld [vmem:[#allocation13 + $0x240] sm:$0xff] }
 0x14d   : > { %v737_v25 = vmax.f32 %v729_v24, 0.0  ;;  %v1397_v24 = vld [vmem:[#allocation13 + $0x440] sm:$0xff] }
 0x14f   : > { %902 = vmatmul.f32.vlgmr.msra.gmra.mxu2 %v737_v25  ;;  %928 = vmatmul.f32.vlgmr.msra.gmra.mxu3 %v737_v25 }
 0x150   : > { %954 = vmatmul.f32.vlgmr.msrb.gmra.mxu0 %v737_v25  ;;  %980 = vmatmul.f32.vlgmr.msrb.gmra.mxu1 %v737_v25 }
 0x151   : > { %1800 = vmatpush.msra.mxu2 %v1321_v32  ;;  %1820 = vmatpush.msra.mxu3 %v1385_v33 }
 0x152   : > { %v731_v26 = vpop.f32.mrf.mxu1  ;;  %1840 = vmatpush.msrb.mxu0 %v1449_v34  ;;  %1860 = vmatpush.msrb.mxu1 %v1513_v35  ;;  %v1261_v34 = vld [vmem:[#allocation13] sm:$0xff] }
 0x153   : > { %v732_v27 = vadd.f32 %v3166_v22, %v731_v26  ;;  %1801 = vmatpush.msra.mxu2 %v1317_v36  ;;  %1821 = vmatpush.msra.mxu3 %v1381_v37  ;;  %v1325_v35 = vld [vmem:[#allocation13 + $0x200] sm:$0xff] }
 0x154   : > { %1841 = vmatpush.msrb.mxu0 %v1445_v38  ;;  %1861 = vmatpush.msrb.mxu1 %v1509_v39  ;;  %v1389_v36 = vld [vmem:[#allocation13 + $0x400] sm:$0xff] }
 0x155   : > { %v738_v28 = vmax.f32 %v732_v27, 0.0  ;;  %1802 = vmatpush.msra.mxu2 %v1313_v40  ;;  %1822 = vmatpush.msra.mxu3 %v1377_v41  ;;  %v1461_v27 = vld [vmem:[#allocation13 + $0x640] sm:$0xff] }
 0x156   : > { %1842 = vmatpush.msrb.mxu0 %v1441_v42  ;;  %1862 = vmatpush.msrb.mxu1 %v1505_v43  ;;  %v1453_v37 = vld [vmem:[#allocation13 + $0x600] sm:$0xff]  ;;  %v1119_v42 = vlaneseq }
 0x157   : > { %905 = vmatmul.f32.gmra.mxu2 %v738_v28  ;;  %931 = vmatmul.f32.gmra.mxu3 %v738_v28  ;;  %v1577_v38 = vld [vmem:[#allocation13 + $0x9e0] sm:$0xff] }
 0x158   : > { %957 = vmatmul.f32.gmra.mxu0 %v738_v28  ;;  %983 = vmatmul.f32.gmra.mxu1 %v738_v28  ;;  %v1641_v39 = vld [vmem:[#allocation13 + $0xbe0] sm:$0xff] }
 0x159   : > { %1803 = vmatpush.msra.mxu2 %v1309_v44  ;;  %1823 = vmatpush.msra.mxu3 %v1373_v45  ;;  %v1705_v40 = vld [vmem:[#allocation13 + $0xde0] sm:$0xff] }
 0x15a   : > { %v734_v29 = vpop.f32.mrf.mxu1  ;;  %1843 = vmatpush.msrb.mxu0 %v1437_v46  ;;  %1863 = vmatpush.msrb.mxu1 %v1501_v47  ;;  %v1769_v41 = vld [vmem:[#allocation13 + $0xfe0] sm:$0xff] }
 0x15b   : > { %v735_v30 = vadd.f32 %v3166_v22, %v734_v29  ;;  %1804 = vmatpush.msra.mxu2 %v1305_v48  ;;  %1824 = vmatpush.msra.mxu3 %v1369_v49  ;;  %v1269_v22 = vld [vmem:[#allocation13 + $0x40] sm:$0xff] }
 0x15c   : > { %1844 = vmatpush.msrb.mxu0 %v1433_v50  ;;  %1864 = vmatpush.msrb.mxu1 %v1497_v51  ;;  %v1329_v29 = vld [vmem:[#allocation13 + $0x220] sm:$0xff] }
 0x15d   : > { %v739_v31 = vmax.f32 %v735_v30, 0.0  ;;  %1805 = vmatpush.msra.mxu2 %v1301_v52  ;;  %1825 = vmatpush.msra.mxu3 %v1365_v53  ;;  %v1393_v30 = vld [vmem:[#allocation13 + $0x420] sm:$0xff]  ;;  %v3785_v52 = vld [vmem:[#allocation11] sm:$0xff] }
 0x15e   : > { %1845 = vmatpush.msrb.mxu0 %v1429_v54  ;;  %1865 = vmatpush.msrb.mxu1 %v1493_v55  ;;  %v1573_v43 = vld [vmem:[#allocation13 + $0x9c0] sm:$0xff]  ;;  %v1120_v54 = vshrl.u32 %v1119_v42, 7 }
 0x15f   : > { %908 = vmatmul.f32.gmra.mxu2 %v739_v31  ;;  %934 = vmatmul.f32.gmra.mxu3 %v739_v31  ;;  %v1637_v44 = vld [vmem:[#allocation13 + $0xbc0] sm:$0xff] }
 0x160   : > { %960 = vmatmul.f32.gmra.mxu0 %v739_v31  ;;  %986 = vmatmul.f32.gmra.mxu1 %v739_v31  ;;  %v1701_v45 = vld [vmem:[#allocation13 + $0xdc0] sm:$0xff] }
 0x161   : > { %1806 = vmatpush.msra.mxu2 %v1297_v56  ;;  %1826 = vmatpush.msra.mxu3 %v1361_v57  ;;  %v1765_v46 = vld [vmem:[#allocation13 + $0xfc0] sm:$0xff] }
 0x162   : > { %1846 = vmatpush.msrb.mxu0 %v1425_v58  ;;  %1866 = vmatpush.msrb.mxu1 %v1489_v59  ;;  %v1569_v49 = vld [vmem:[#allocation13 + $0x9a0] sm:$0xff] }
 0x163   : > { %1807 = vmatpush.msra.mxu2 %v1293_v60  ;;  %1827 = vmatpush.msra.mxu3 %v1357_v61  ;;  %v1633_v50 = vld [vmem:[#allocation13 + $0xba0] sm:$0xff]  ;;  %v872_v61 = vperm.slane %v3785_v52, 2 }
 0x164   : > { %1847 = vmatpush.msrb.mxu0 %v1421_v62  ;;  %1867 = vmatpush.msrb.mxu1 %v1485_v63  ;;  %v1697_v51 = vld [vmem:[#allocation13 + $0xda0] sm:$0xff]  ;;  %v873_v62 = vperm.slane %v3785_v52, 3 }
 0x165   : > { %1808 = vmatpush.msra.mxu2 %v1289_v0  ;;  %1828 = vmatpush.msra.mxu3 %v1353_v1  ;;  %v1761_v53 = vld [vmem:[#allocation13 + $0xfa0] sm:$0xff] }
 0x166   : > { %1848 = vmatpush.msrb.mxu0 %v1417_v2  ;;  %1868 = vmatpush.msrb.mxu1 %v1481_v3  ;;  %v1565_v55 = vld [vmem:[#allocation13 + $0x980] sm:$0xff] }
 0x167   : > { %1006 = vmatmul.f32.vlgmr.msrb.gmra.mxu2 %v737_v25  ;;  %1032 = vmatmul.f32.vlgmr.msrb.gmra.mxu3 %v737_v25  ;;  %v1629_v56 = vld [vmem:[#allocation13 + $0xb80] sm:$0xff] }
 0x168   : > { %1058 = vmatmul.f32.vlgmr.msra.gmra.mxu0 %v737_v25  ;;  %1084 = vmatmul.f32.vlgmr.msra.gmra.mxu1 %v737_v25  ;;  %v1693_v57 = vld [vmem:[#allocation13 + $0xd80] sm:$0xff] }
 0x169   : > { %1809 = vmatpush.msra.mxu2 %v1285_v4  ;;  %1829 = vmatpush.msra.mxu3 %v1349_v5  ;;  %v1757_v60 = vld [vmem:[#allocation13 + $0xf80] sm:$0xff]  ;;  %v3789_v4 = vadd.s32 16, %v1120_v54 }
 0x16a   : > { %1849 = vmatpush.msrb.mxu0 %v1413_v6  ;;  %1869 = vmatpush.msrb.mxu1 %v1477_v7  ;;  %v1561_v63 = vld [vmem:[#allocation13 + $0x960] sm:$0xff] }
 0x16b   : > { %1810 = vmatpush.msra.mxu2 %v1281_v8  ;;  %1830 = vmatpush.msra.mxu3 %v1345_v9  ;;  %v1625_v0 = vld [vmem:[#allocation13 + $0xb60] sm:$0xff]  ;;  %v871_v9 = vperm.slane %v3785_v52, 1  ;;  %vm1129_vm3 = vcmp.lt.s32.totalorder %v3789_v4, 20 }
 0x16c   : > { %1850 = vmatpush.msrb.mxu0 %v1409_v10  ;;  %1870 = vmatpush.msrb.mxu1 %v1473_v11  ;;  %v1689_v1 = vld [vmem:[#allocation13 + $0xd60] sm:$0xff] }
 0x16d   : > { %1811 = vmatpush.msra.mxu2 %v1277_v14  ;;  %1831 = vmatpush.msra.mxu3 %v1341_v15  ;;  %v1753_v2 = vld [vmem:[#allocation13 + $0xf60] sm:$0xff]  ;;  %v870_v15 = vperm.slane %v3785_v52, 0 }
 0x16e   : > { %1851 = vmatpush.msrb.mxu0 %v1405_v16  ;;  %1871 = vmatpush.msrb.mxu1 %v1469_v17  ;;  %v1557_v6 = vld [vmem:[#allocation13 + $0x940] sm:$0xff] }
 0x16f   : > { %1009 = vmatmul.f32.gmra.mxu2 %v738_v28  ;;  %1035 = vmatmul.f32.gmra.mxu3 %v738_v28  ;;  %v1621_v7 = vld [vmem:[#allocation13 + $0xb40] sm:$0xff] }
 0x170   : > { %1061 = vmatmul.f32.gmra.mxu0 %v738_v28  ;;  %1087 = vmatmul.f32.gmra.mxu1 %v738_v28  ;;  %v1265_v28 = vld [vmem:[#allocation13 + $0x20] sm:$0xff] }
 0x171   : > { %1812 = vmatpush.msra.mxu2 %v1273_v18  ;;  %1832 = vmatpush.msra.mxu3 %v1337_v19  ;;  %v1685_v8 = vld [vmem:[#allocation13 + $0xd40] sm:$0xff] }
 0x172   : > { %1852 = vmatpush.msrb.mxu0 %v1401_v20  ;;  %1872 = vmatpush.msrb.mxu1 %v1465_v21  ;;  %v1749_v14 = vld [vmem:[#allocation13 + $0xf40] sm:$0xff] }
 0x173   : > { %1813 = vmatpush.msra.mxu2 %v1269_v22  ;;  %1833 = vmatpush.msra.mxu3 %v1333_v23  ;;  %v1553_v18 = vld [vmem:[#allocation13 + $0x920] sm:$0xff] }
 0x174   : > { %1853 = vmatpush.msrb.mxu0 %v1397_v24  ;;  %1873 = vmatpush.msrb.mxu1 %v1461_v27  ;;  %v1617_v19 = vld [vmem:[#allocation13 + $0xb20] sm:$0xff] }
 0x175   : > { %1814 = vmatpush.msra.mxu2 %v1265_v28  ;;  %1834 = vmatpush.msra.mxu3 %v1329_v29  ;;  %v1681_v20 = vld [vmem:[#allocation13 + $0xd20] sm:$0xff] }
 0x176   : > { %1854 = vmatpush.msrb.mxu0 %v1393_v30  ;;  %v1745_v27 = vld [vmem:[#allocation13 + $0xf20] sm:$0xff] }
 0x177   : > { %1012 = vmatmul.f32.gmra.mxu2 %v739_v31  ;;  %1038 = vmatmul.f32.gmra.mxu3 %v739_v31  ;;  %v1549_v30 = vld [vmem:[#allocation13 + $0x900] sm:$0xff] }
 0x178   : > { %1064 = vmatmul.f32.gmra.mxu0 %v739_v31  ;;  %1090 = vmatmul.f32.gmra.mxu1 %v739_v31  ;;  %v1457_v31 = vld [vmem:[#allocation13 + $0x620] sm:$0xff] }
 0x179   : > { %1874 = vmatpush.msrb.mxu1 %v1457_v31  ;;  %1815 = vmatpush.msra.mxu2 %v1261_v34  ;;  %v1613_v31 = vld [vmem:[#allocation13 + $0xb00] sm:$0xff] }
 0x17a   : > { %1835 = vmatpush.msra.mxu3 %v1325_v35  ;;  %1855 = vmatpush.msrb.mxu0 %v1389_v36  ;;  %v1673_v42 = vld [vmem:[#allocation13 + $0xce0] sm:$0xff] }
 0x17b   : > { %1875 = vmatpush.msrb.mxu1 %v1453_v37  ;;  %1880 = vmatpush.msrb.mxu2 %v1577_v38  ;;  %v1741_v37 = vld [vmem:[#allocation13 + $0xf00] sm:$0xff] }
 0x17c   : > { %1900 = vmatpush.msrb.mxu3 %v1641_v39  ;;  %1920 = vmatpush.msra.mxu0 %v1705_v40  ;;  %v1545_v40 = vld [vmem:[#allocation13 + $0x8e0] sm:$0xff] }
 0x17d   : > { %1940 = vmatpush.msra.mxu1 %v1769_v41  ;;  %1881 = vmatpush.msrb.mxu2 %v1573_v43  ;;  %v1609_v41 = vld [vmem:[#allocation13 + $0xae0] sm:$0xff] }
 0x17e   : > { %1901 = vmatpush.msrb.mxu3 %v1637_v44  ;;  %1921 = vmatpush.msra.mxu0 %v1701_v45  ;;  %v1737_v45 = vld [vmem:[#allocation13 + $0xee0] sm:$0xff] }
 0x17f   : > { %1941 = vmatpush.msra.mxu1 %v1765_v46  ;;  %1882 = vmatpush.msrb.mxu2 %v1569_v49  ;;  %v1541_v49 = vld [vmem:[#allocation13 + $0x8c0] sm:$0xff] }
 0x180   : > { %1902 = vmatpush.msrb.mxu3 %v1633_v50  ;;  %1922 = vmatpush.msra.mxu0 %v1697_v51  ;;  %v1605_v50 = vld [vmem:[#allocation13 + $0xac0] sm:$0xff] }
 0x181   : > { %1942 = vmatpush.msra.mxu1 %v1761_v53  ;;  %1883 = vmatpush.msrb.mxu2 %v1565_v55 }
 0x182   : > { %1903 = vmatpush.msrb.mxu3 %v1629_v56  ;;  %1923 = vmatpush.msra.mxu0 %v1693_v57  ;;  %v1669_v56 = vld [vmem:[#allocation13 + $0xcc0] sm:$0xff] }
 0x183   : > { %1943 = vmatpush.msra.mxu1 %v1757_v60  ;;  %1884 = vmatpush.msrb.mxu2 %v1561_v63  ;;  %v1733_v57 = vld [vmem:[#allocation13 + $0xec0] sm:$0xff] }
 0x184   : > { %1904 = vmatpush.msrb.mxu3 %v1625_v0  ;;  %1924 = vmatpush.msra.mxu0 %v1689_v1 }
 0x185   : > { %1944 = vmatpush.msra.mxu1 %v1753_v2  ;;  %1885 = vmatpush.msrb.mxu2 %v1557_v6  ;;  %v1665_v2 = vld [vmem:[#allocation13 + $0xca0] sm:$0xff] }
 0x186   : > { %1905 = vmatpush.msrb.mxu3 %v1621_v7  ;;  %1925 = vmatpush.msra.mxu0 %v1685_v8  ;;  %v1533_v6 = vld [vmem:[#allocation13 + $0x880] sm:$0xff] }
 0x187   : > { %1945 = vmatpush.msra.mxu1 %v1749_v14  ;;  %1886 = vmatpush.msrb.mxu2 %v1553_v18  ;;  %v1597_v7 = vld [vmem:[#allocation13 + $0xa80] sm:$0xff] }
 0x188   : > { %1906 = vmatpush.msrb.mxu3 %v1617_v19  ;;  %1926 = vmatpush.msra.mxu0 %v1681_v20  ;;  %v1661_v14 = vld [vmem:[#allocation13 + $0xc80] sm:$0xff] }
 0x189   : > { %1946 = vmatpush.msra.mxu1 %v1745_v27  ;;  %1887 = vmatpush.msrb.mxu2 %v1549_v30  ;;  %v1529_v18 = vld [vmem:[#allocation13 + $0x860] sm:$0xff] }
 0x18a   : > { %1907 = vmatpush.msrb.mxu3 %v1613_v31  ;;  %v1593_v19 = vld [vmem:[#allocation13 + $0xa60] sm:$0xff] }
 0x18b   : > { %1947 = vmatpush.msra.mxu1 %v1741_v37  ;;  %1888 = vmatpush.msrb.mxu2 %v1545_v40 }
 0x18c   : > { %1908 = vmatpush.msrb.mxu3 %v1609_v41 }
 0x18d   : > { %1948 = vmatpush.msra.mxu1 %v1737_v45  ;;  %1889 = vmatpush.msrb.mxu2 %v1541_v49 }
 0x18e   : > { %1909 = vmatpush.msrb.mxu3 %v1605_v50 }
 0x18f   : > { %1949 = vmatpush.msra.mxu1 %v1733_v57 }
 0x1cd   : > { %v3771_v12 = vpop.f32.mrf.mxu0  ;;  %v3773_v13 = vpop.f32.mrf.mxu1 }
 0x1ce   : > { %v956_v21 = vadd.f32 %v3771_v12, %v872_v61  ;;  %v982_v22 = vadd.f32 %v3773_v13, %v873_v62 }
 0x1d0   : > { %v1096_v43 = vmax.f32 %v956_v21, 0.0 }
 0x1d2   : > { %v3775_v25 = vpop.f32.mrf.mxu2  ;;  %v3777_v26 = vpop.f32.mrf.mxu3 }
 0x1d3   : > { %v904_v46 = vadd.f32 %v3775_v25, %v870_v15 }
 0x1d5   : > { %v3779_v32 = vpop.f32.mrf.mxu0  ;;  %v3781_v33 = vpop.f32.mrf.mxu1 }
 0x1d6   : > { %v959_v10 = vadd.f32 %v3779_v32, %v872_v61  ;;  %v985_v11 = vadd.f32 %v3781_v33, %v873_v62  ;;  %v1677_v32 = vld [vmem:[#allocation13 + $0xd00] sm:$0xff]  ;;  %v930_v33 = vadd.f32 %v3777_v26, %v871_v9  ;;  %v1097_v26 = vmax.f32 %v982_v22, 0.0 }
 0x1d7   : > { %1927 = vmatpush.msra.mxu0 %v1677_v32  ;;  %v877_v22 = vperm.slane %v3785_v52, 7 }
 0x1d8   : > { %v1104_v34 = vmax.f32 %v959_v10, 0.0  ;;  %v1105_v35 = vmax.f32 %v985_v11, 0.0  ;;  %v1095_v51 = vmax.f32 %v930_v33, 0.0  ;;  %v1653_v33 = vld [vmem:[#allocation13 + $0xc40] sm:$0xff] }
 0x1d9   : > { %1928 = vmatpush.msra.mxu0 %v1673_v42 }
 0x1da   : > { %v3783_v47 = vpop.f32.mrf.mxu2  ;;  %v932_v48 = vpop.f32.mrf.mxu3  ;;  %v1177_v53 = vmax.f32 %v1096_v43, %v1104_v34  ;;  %v1185_v54 = vmax.f32 %v1097_v26, %v1105_v35  ;;  %v1717_v34 = vld [vmem:[#allocation13 + $0xe40] sm:$0xff]  ;;  %v874_v43 = vperm.slane %v3785_v52, 4 }
 0x1db   : > { %v933_v23 = vadd.f32 %v932_v48, %v871_v9  ;;  %v907_v38 = vadd.f32 %v3783_v47, %v870_v15  ;;  %1929 = vmatpush.msra.mxu0 %v1669_v56  ;;  %v1649_v26 = vld [vmem:[#allocation13 + $0xc20] sm:$0xff] }
 0x1dd   : > { %v961_v58 = vpop.f32.mrf.mxu0  ;;  %v987_v59 = vpop.f32.mrf.mxu1  ;;  %v1103_v44 = vmax.f32 %v933_v23, 0.0  ;;  %1930 = vmatpush.msra.mxu0 %v1665_v2  ;;  %v1657_v23 = vld [vmem:[#allocation13 + $0xc60] sm:$0xff] }
 0x1de   : > { %v962_v3 = vadd.f32 %v961_v58, %v872_v61  ;;  %v988_v5 = vadd.f32 %v987_v59, %v873_v62  ;;  %v1102_v58 = vmax.f32 %v907_v38, 0.0  ;;  %v1537_v61 = vld [vmem:[#allocation13 + $0x8a0] sm:$0xff] }
 0x1df   : > { %v1601_v62 = vld [vmem:[#allocation13 + $0xaa0] sm:$0xff]  ;;  %v1169_v63 = vmax.f32 %v1095_v51, %v1103_v44  ;;  %1890 = vmatpush.msrb.mxu2 %v1537_v61  ;;  %1931 = vmatpush.msra.mxu0 %v1661_v14 }
 0x1e0   : > { %v1112_v28 = vmax.f32 %v962_v3, 0.0  ;;  %v1113_v29 = vmax.f32 %v988_v5, 0.0  ;;  %v1729_v3 = vld [vmem:[#allocation13 + $0xea0] sm:$0xff]  ;;  %v1094_v5 = vmax.f32 %v904_v46, 0.0  ;;  %1910 = vmatpush.msrb.mxu3 %v1601_v62  ;;  %v875_v46 = vperm.slane %v3785_v52, 5 }
 0x1e1   : > { %1950 = vmatpush.msra.mxu1 %v1729_v3  ;;  %1891 = vmatpush.msrb.mxu2 %v1533_v6  ;;  %v1521_v38 = vld [vmem:[#allocation13 + $0x820] sm:$0xff] }
 0x1e2   : > { %v909_v16 = vpop.f32.mrf.mxu2  ;;  %v935_v17 = vpop.f32.mrf.mxu3  ;;  %v1154_v48 = vsel %vm1129_vm3, %v1112_v28, -inf  ;;  %v1155_v47 = vsel %vm1129_vm3, %v1113_v29, -inf  ;;  %1911 = vmatpush.msrb.mxu3 %v1597_v7  ;;  %v1525_v28 = vld [vmem:[#allocation13 + $0x840] sm:$0xff]  ;;  %1932 = vmatpush.msra.mxu0 %v1657_v23 }
 0x1e3   : > { %v936_v24 = vadd.f32 %v935_v17, %v871_v9  ;;  %v910_v12 = vadd.f32 %v909_v16, %v870_v15  ;;  %v1178_v0 = vmax.f32 %v1177_v53, %v1154_v48  ;;  %v1186_v1 = vmax.f32 %v1185_v54, %v1155_v47  ;;  %v1725_v15 = vld [vmem:[#allocation13 + $0xe80] sm:$0xff]  ;;  %1892 = vmatpush.msrb.mxu2 %v1529_v18 }
 0x1e4   : > { %v1161_v16 = vmax.f32 %v1094_v5, %v1102_v58  ;;  %v876_v17 = vperm.slane %v3785_v52, 6  ;;  %1951 = vmatpush.msra.mxu1 %v1725_v15  ;;  %v1589_v29 = vld [vmem:[#allocation13 + $0xa40] sm:$0xff]  ;;  %1912 = vmatpush.msrb.mxu3 %v1593_v19 }
 0x1e5   : > { %v3799_v36 = vpop.f32.mrf.mxu0  ;;  %v3801_v13 = vpop.f32.mrf.mxu1  ;;  %v1111_v39 = vmax.f32 %v936_v24, 0.0  ;;  %v1110_v55 = vmax.f32 %v910_v12, 0.0  ;;  %v1179_v20 = vrot.slane %v1178_v0, 4  ;;  %v1187_v21 = vrot.slane %v1186_v1, 4  ;;  %v1721_v24 = vld [vmem:[#allocation13 + $0xe60] sm:$0xff]  ;;  %1893 = vmatpush.msrb.mxu2 %v1525_v28  ;;  %1933 = vmatpush.msra.mxu0 %v1653_v33 }
 0x1e6   : > { %v1060_v35 = vadd.f32 %v3799_v36, %v876_v17  ;;  %1952 = vmatpush.msra.mxu1 %v1721_v24  ;;  %v1086_v42 = vadd.f32 %v3801_v13, %v877_v22  ;;  %1913 = vmatpush.msrb.mxu3 %v1589_v29  ;;  %v1713_v44 = vld [vmem:[#allocation13 + $0xe20] sm:$0xff] }
 0x1e7   : > { %v1153_v25 = vsel %vm1129_vm3, %v1111_v39, -inf  ;;  %v1152_v8 = vsel %vm1129_vm3, %v1110_v55, -inf  ;;  %v1585_v39 = vld [vmem:[#allocation13 + $0xa20] sm:$0xff]  ;;  %v1180_v40 = vmax.f32 %v1178_v0, %v1179_v20  ;;  %v1188_v41 = vmax.f32 %v1186_v1, %v1187_v21  ;;  %1894 = vmatpush.msrb.mxu2 %v1521_v38  ;;  %1934 = vmatpush.msra.mxu0 %v1649_v26 }
 0x1e8   : > { %v1170_v9 = vmax.f32 %v1169_v63, %v1153_v25  ;;  %v1162_v27 = vmax.f32 %v1161_v16, %v1152_v8  ;;  %1953 = vmatpush.msra.mxu1 %v1717_v34  ;;  %v1517_v36 = vld [vmem:[#allocation13 + $0x800] sm:$0xff]  ;;  %1914 = vmatpush.msrb.mxu3 %v1585_v39  ;;  %v1100_v61 = vmax.f32 %v1060_v35, 0.0  ;;  %v1101_v62 = vmax.f32 %v1086_v42, 0.0 }
 0x1e9   : > { %v1581_v48 = vld [vmem:[#allocation13 + $0xa00] sm:$0xff]  ;;  %v1181_v52 = vrot.slane %v1180_v40, 2  ;;  %v1189_v25 = vrot.slane %v1188_v41, 2  ;;  %1895 = vmatpush.msrb.mxu2 %v1517_v36 }
 0x1ea   : > { %v3811_v59 = vpop.f32.mrf.mxu2  ;;  %v3813_v60 = vpop.f32.mrf.mxu3  ;;  %v1171_v30 = vrot.slane %v1170_v9, 4  ;;  %v1163_v45 = vrot.slane %v1162_v27, 4  ;;  %v1645_v13 = vld [vmem:[#allocation13 + $0xc00] sm:$0xff]  ;;  %1954 = vmatpush.msra.mxu1 %v1713_v44  ;;  %1915 = vmatpush.msrb.mxu3 %v1581_v48 }
 0x1eb   : > { %v1709_v55 = vld [vmem:[#allocation13 + $0xe00] sm:$0xff]  ;;  %v1008_v63 = vadd.f32 %v3811_v59, %v874_v43  ;;  %v1034_v0 = vadd.f32 %v3813_v60, %v875_v46  ;;  %1935 = vmatpush.msra.mxu0 %v1645_v13  ;;  %v1182_v18 = vmax.f32 %v1180_v40, %v1181_v52  ;;  %v1190_v19 = vmax.f32 %v1188_v41, %v1189_v25 }
 0x1ec   : > { %v1172_v47 = vmax.f32 %v1170_v9, %v1171_v30  ;;  %1955 = vmatpush.msra.mxu1 %v1709_v55  ;;  %v1164_v3 = vmax.f32 %v1162_v27, %v1163_v45 }
 0x1ed   : > { %v1062_v10 = vpop.f32.mrf.mxu0  ;;  %v1088_v11 = vpop.f32.mrf.mxu1  ;;  %v1098_v20 = vmax.f32 %v1008_v63, 0.0  ;;  %v1099_v21 = vmax.f32 %v1034_v0, 0.0  ;;  %v1183_v40 = vrot.slane %v1182_v18, 1  ;;  %v1191_v26 = vrot.slane %v1190_v19, 1 }
 0x1ee   : > { %v1063_v31 = vadd.f32 %v1062_v10, %v876_v17  ;;  %v1089_v32 = vadd.f32 %v1088_v11, %v877_v22  ;;  %v1173_v5 = vrot.slane %v1172_v47, 2  ;;  %v1165_v28 = vrot.slane %v1164_v3, 2 }
 0x1f0   : > { %v1108_v49 = vmax.f32 %v1063_v31, 0.0  ;;  %v1109_v50 = vmax.f32 %v1089_v32, 0.0  ;;  %v1174_v29 = vmax.f32 %v1172_v47, %v1173_v5  ;;  %v1166_v44 = vmax.f32 %v1164_v3, %v1165_v28  ;;  %v1510_v28 = vld [vmem:[#allocation13 + $0x7c8] sm:$0xff] }
 0x1f2   : > { %v1010_v12 = vpop.f32.mrf.mxu2  ;;  %v1036_v37 = vpop.f32.mrf.mxu3  ;;  %v1209_v6 = vmax.f32 %v1100_v61, %v1108_v49  ;;  %v1217_v7 = vmax.f32 %v1101_v62, %v1109_v50  ;;  %v1175_v41 = vrot.slane %v1174_v29, 1  ;;  %v1167_v13 = vrot.slane %v1166_v44, 1 }
 0x1f3   : > { %v1011_v51 = vadd.f32 %v1010_v12, %v874_v43  ;;  %v1037_v56 = vadd.f32 %v1036_v37, %v875_v46 }
 0x1f4   : > { %v1176_v50 = vmax.f32 %v1174_v29, %v1175_v41  ;;  %v1168_v0 = vmax.f32 %v1166_v44, %v1167_v13  ;;  %v1314_v29 = vld [vmem:[#allocation13 + $0x1a8] sm:$0xff] }
 0x1f5   : > { %v1065_v53 = vpop.f32.mrf.mxu0  ;;  %v1091_v54 = vpop.f32.mrf.mxu1  ;;  %v1106_v8 = vmax.f32 %v1011_v51, 0.0  ;;  %v1107_v9 = vmax.f32 %v1037_v56, 0.0  ;;  %v1306_v41 = vld [vmem:[#allocation13 + $0x168] sm:$0xff] }
 0x1f6   : > { %v1066_v57 = vadd.f32 %v1065_v53, %v876_v17  ;;  %v1092_v58 = vadd.f32 %v1091_v54, %v877_v22  ;;  %v1184_v53 = vmax.f32 %v1182_v18, %v1183_v40  ;;  %v1192_v54 = vmax.f32 %v1190_v19, %v1191_v26  ;;  %v1322_v19 = vld [vmem:[#allocation13 + $0x1e8] sm:$0xff] }
 0x1f7   : > { %v1193_v30 = vmax.f32 %v1098_v20, %v1106_v8  ;;  %v1201_v31 = vmax.f32 %v1099_v21, %v1107_v9  ;;  %v1233_v52 = vrot.slane %v1176_v50, 7  ;;  %v1386_v20 = vld [vmem:[#allocation13 + $0x3e8] sm:$0xff] }
 0x1f8   : > { %v1116_v1 = vmax.f32 %v1066_v57, 0.0  ;;  %v1117_v2 = vmax.f32 %v1092_v58, 0.0  ;;  %v1234_v62 = vrot.slane %v1184_v53, 6  ;;  %v1235_v63 = vrot.slane %v1192_v54, 5  ;;  %v1450_v21 = vld [vmem:[#allocation13 + $0x5e8] sm:$0xff] }
 0x1f9   : > { %v1498_v26 = vld [vmem:[#allocation13 + $0x768] sm:$0xff] }
 0x1fa   : > { %v1158_v10 = vsel %vm1129_vm3, %v1116_v1, -inf  ;;  %v1159_v11 = vsel %vm1129_vm3, %v1117_v2, -inf  ;;  %v1013_v14 = vpop.f32.mrf.mxu2  ;;  %v1039_v59 = vpop.f32.mrf.mxu3  ;;  %v1243_v9 = vsel %vm1242_vm5, %v1234_v62, %v1235_v63  ;;  %v1302_v44 = vld [vmem:[#allocation13 + $0x148] sm:$0xff] }
 0x1fb   : > { %v1210_v15 = vmax.f32 %v1209_v6, %v1158_v10  ;;  %v1218_v60 = vmax.f32 %v1217_v7, %v1159_v11  ;;  %v1014_v16 = vadd.f32 %v1013_v14, %v874_v43  ;;  %v1040_v17 = vadd.f32 %v1039_v59, %v875_v46  ;;  %v1490_v50 = vld [vmem:[#allocation13 + $0x728] sm:$0xff] }
 0x1fc   : > { %v1241_v6 = vsel %vm1240_vm4, %v1168_v0, %v1233_v52  ;;  %v1422_v53 = vld [vmem:[#allocation13 + $0x508] sm:$0xff] }
 0x1fd   : > { %v1211_v22 = vrot.slane %v1210_v15, 4  ;;  %v1219_v23 = vrot.slane %v1218_v60, 4  ;;  %v1114_v24 = vmax.f32 %v1014_v16, 0.0  ;;  %v1115_v27 = vmax.f32 %v1040_v17, 0.0  ;;  %v1486_v54 = vld [vmem:[#allocation13 + $0x708] sm:$0xff] }
 0x1fe   : > { %v1245_v14 = vsel %vm1244_vm6, %v1241_v6, %v1243_v9  ;;  %v1290_v13 = vld [vmem:[#allocation13 + $0xe8] sm:$0xff] }
 0x1ff   : > { %v1212_v32 = vmax.f32 %v1210_v15, %v1211_v22  ;;  %v1220_v33 = vmax.f32 %v1218_v60, %v1219_v23  ;;  %v1156_v34 = vsel %vm1129_vm3, %v1114_v24, -inf  ;;  %v1157_v35 = vsel %vm1129_vm3, %v1115_v27, -inf  ;;  %v1514_v22 = vld [vmem:[#allocation13 + $0x7e8] sm:$0xff] }
 0x200   : > { %v1194_v12 = vmax.f32 %v1193_v30, %v1156_v34  ;;  %v1202_v37 = vmax.f32 %v1201_v31, %v1157_v35  ;;  %v1318_v23 = vld [vmem:[#allocation13 + $0x1c8] sm:$0xff] }
 0x201   : > { %v1213_v38 = vrot.slane %v1212_v32, 2  ;;  %v1221_v39 = vrot.slane %v1220_v33, 2  ;;  %v1382_v24 = vld [vmem:[#allocation13 + $0x3c8] sm:$0xff] }
 0x202   : > { %v1195_v42 = vrot.slane %v1194_v12, 4  ;;  %v1203_v43 = vrot.slane %v1202_v37, 4  ;;  %v1446_v27 = vld [vmem:[#allocation13 + $0x5c8] sm:$0xff] }
 0x203   : > { %v1214_v45 = vmax.f32 %v1212_v32, %v1213_v38  ;;  %v1222_v46 = vmax.f32 %v1220_v33, %v1221_v39  ;;  %v1378_v30 = vld [vmem:[#allocation13 + $0x3a8] sm:$0xff] }
 0x204   : > { %v1196_v36 = vmax.f32 %v1194_v12, %v1195_v42  ;;  %v1204_v48 = vmax.f32 %v1202_v37, %v1203_v43  ;;  %v1442_v31 = vld [vmem:[#allocation13 + $0x5a8] sm:$0xff] }
 0x205   : > { %v1215_v47 = vrot.slane %v1214_v45, 1  ;;  %v1223_v49 = vrot.slane %v1222_v46, 1  ;;  %v1506_v32 = vld [vmem:[#allocation13 + $0x7a8] sm:$0xff] }
 0x206   : > { %v1197_v51 = vrot.slane %v1196_v36, 2  ;;  %v1205_v4 = vrot.slane %v1204_v48, 2  ;;  %v1310_v33 = vld [vmem:[#allocation13 + $0x188] sm:$0xff] }
 0x207   : > { %v1216_v55 = vmax.f32 %v1214_v45, %v1215_v47  ;;  %v1224_v56 = vmax.f32 %v1222_v46, %v1223_v49  ;;  %v1374_v34 = vld [vmem:[#allocation13 + $0x388] sm:$0xff] }
 0x208   : > { %v1198_v57 = vmax.f32 %v1196_v36, %v1197_v51  ;;  %v1206_v58 = vmax.f32 %v1204_v48, %v1205_v4  ;;  %v1438_v35 = vld [vmem:[#allocation13 + $0x588] sm:$0xff] }
 0x209   : > { %v1238_v1 = vrot.slane %v1216_v55, 2  ;;  %v1239_v2 = vrot.slane %v1224_v56, 1  ;;  %v1502_v12 = vld [vmem:[#allocation13 + $0x788] sm:$0xff] }
 0x20a   : > { %v1199_v25 = vrot.slane %v1198_v57, 1  ;;  %v1207_v61 = vrot.slane %v1206_v58, 1  ;;  %v1370_v42 = vld [vmem:[#allocation13 + $0x368] sm:$0xff] }
 0x20b   : > { %v1249_v10 = vsel %vm1248_vm7, %v1238_v1, %v1239_v2  ;;  %v1434_v43 = vld [vmem:[#allocation13 + $0x568] sm:$0xff] }
 0x20c   : > { %v1200_v3 = vmax.f32 %v1198_v57, %v1199_v25  ;;  %v1208_v5 = vmax.f32 %v1206_v58, %v1207_v61  ;;  %v1366_v45 = vld [vmem:[#allocation13 + $0x348] sm:$0xff] }
 0x20d   : > { %v1430_v46 = vld [vmem:[#allocation13 + $0x548] sm:$0xff] }
 0x20e   : > { %v1236_v7 = vrot.slane %v1200_v3, 4  ;;  %v1237_v8 = vrot.slane %v1208_v5, 3  ;;  %v1494_v36 = vld [vmem:[#allocation13 + $0x748] sm:$0xff] }
 0x20f   : > { %v1298_v48 = vld [vmem:[#allocation13 + $0x128] sm:$0xff] }
 0x210   : > { %v1247_v11 = vsel %vm1246_vm8, %v1236_v7, %v1237_v8  ;;  %v1362_v47 = vld [vmem:[#allocation13 + $0x328] sm:$0xff] }
 0x211   : > { %v1251_v59 = vsel %vm1250_vm9, %v1247_v11, %v1249_v10  ;;  %v1426_v49 = vld [vmem:[#allocation13 + $0x528] sm:$0xff] }
 0x212   : > { %v1253_v15 = vsel %vm1252_vm10, %v1245_v14, %v1251_v59  ;;  %v1294_v51 = vld [vmem:[#allocation13 + $0x108] sm:$0xff] }
 0x213   : > { %v3833_v60 = vperm.slane %v1253_v15, 0  ;;  %v3835_v16 = vperm.slane %v1253_v15, 1  ;;  %v3837_v17 = vperm.slane %v1253_v15, 2  ;;  %v3839_v18 = vperm.slane %v1253_v15, 3  ;;  %v1358_v4 = vld [vmem:[#allocation13 + $0x308] sm:$0xff] }
 0x214   : > { %v3845_v37 = vperm.slane %v1253_v15, 4  ;;  %v3847_v38 = vperm.slane %v1253_v15, 5  ;;  %v3849_v39 = vperm.slane %v1253_v15, 6  ;;  %v3851_v40 = vperm.slane %v1253_v15, 7  ;;  %v1354_v55 = vld [vmem:[#allocation13 + $0x2e8] sm:$0xff] }
 0x215   : > { %1816 = vmatmul.f32.vlgmr.msra.gmra.mxu2 %v3833_v60  ;;  %1836 = vmatmul.f32.vlgmr.msra.gmra.mxu3 %v3835_v16  ;;  %v1418_v56 = vld [vmem:[#allocation13 + $0x4e8] sm:$0xff] }
 0x216   : > { %1856 = vmatmul.f32.vlgmr.msrb.gmra.mxu0 %v3837_v17  ;;  %1876 = vmatmul.f32.vlgmr.msrb.gmra.mxu1 %v3839_v18  ;;  %v1482_v57 = vld [vmem:[#allocation13 + $0x6e8] sm:$0xff] }
 0x217   : > { %1960 = vmatpush.msra.mxu2 %v1322_v19  ;;  %1980 = vmatpush.msra.mxu3 %v1386_v20  ;;  %v1286_v58 = vld [vmem:[#allocation13 + $0xc8] sm:$0xff] }
 0x218   : > { %2000 = vmatpush.msrb.mxu0 %v1450_v21  ;;  %2020 = vmatpush.msrb.mxu1 %v1514_v22  ;;  %v1350_v52 = vld [vmem:[#allocation13 + $0x2c8] sm:$0xff] }
 0x219   : > { %1961 = vmatpush.msra.mxu2 %v1318_v23  ;;  %1981 = vmatpush.msra.mxu3 %v1382_v24  ;;  %v1414_v25 = vld [vmem:[#allocation13 + $0x4c8] sm:$0xff] }
 0x21a   : > { %2001 = vmatpush.msrb.mxu0 %v1446_v27  ;;  %2021 = vmatpush.msrb.mxu1 %v1510_v28  ;;  %v1478_v61 = vld [vmem:[#allocation13 + $0x6c8] sm:$0xff] }
 0x21b   : > { %1962 = vmatpush.msra.mxu2 %v1314_v29  ;;  %1982 = vmatpush.msra.mxu3 %v1378_v30  ;;  %v1282_v62 = vld [vmem:[#allocation13 + $0xa8] sm:$0xff] }
 0x21c   : > { %2002 = vmatpush.msrb.mxu0 %v1442_v31  ;;  %2022 = vmatpush.msrb.mxu1 %v1506_v32  ;;  %v1346_v63 = vld [vmem:[#allocation13 + $0x2a8] sm:$0xff] }
 0x21d   : > { %1963 = vmatpush.msra.mxu2 %v1310_v33  ;;  %1983 = vmatpush.msra.mxu3 %v1374_v34  ;;  %v1410_v0 = vld [vmem:[#allocation13 + $0x4a8] sm:$0xff] }
 0x21e   : > { %2003 = vmatpush.msrb.mxu0 %v1438_v35  ;;  %2023 = vmatpush.msrb.mxu1 %v1502_v12  ;;  %v1474_v1 = vld [vmem:[#allocation13 + $0x6a8] sm:$0xff] }
 0x21f   : > { %1896 = vmatmul.f32.vlgmr.msrb.gmra.mxu2 %v3845_v37  ;;  %1916 = vmatmul.f32.vlgmr.msrb.gmra.mxu3 %v3847_v38  ;;  %v1278_v2 = vld [vmem:[#allocation13 + $0x88] sm:$0xff] }
 0x220   : > { %1936 = vmatmul.f32.vlgmr.msra.gmra.mxu0 %v3849_v39  ;;  %1956 = vmatmul.f32.vlgmr.msra.gmra.mxu1 %v3851_v40  ;;  %v1342_v3 = vld [vmem:[#allocation13 + $0x288] sm:$0xff] }
 0x221   : > { %1964 = vmatpush.msra.mxu2 %v1306_v41  ;;  %1984 = vmatpush.msra.mxu3 %v1370_v42  ;;  %v1406_v5 = vld [vmem:[#allocation13 + $0x488] sm:$0xff] }
 0x222   : > { %2004 = vmatpush.msrb.mxu0 %v1434_v43  ;;  %2024 = vmatpush.msrb.mxu1 %v1498_v26  ;;  %v1470_v6 = vld [vmem:[#allocation13 + $0x688] sm:$0xff] }
 0x223   : > { %1965 = vmatpush.msra.mxu2 %v1302_v44  ;;  %1985 = vmatpush.msra.mxu3 %v1366_v45  ;;  %v1274_v7 = vld [vmem:[#allocation13 + $0x68] sm:$0xff] }
 0x224   : > { %2005 = vmatpush.msrb.mxu0 %v1430_v46  ;;  %2025 = vmatpush.msrb.mxu1 %v1494_v36  ;;  %v1338_v8 = vld [vmem:[#allocation13 + $0x268] sm:$0xff] }
 0x225   : > { %1966 = vmatpush.msra.mxu2 %v1298_v48  ;;  %1986 = vmatpush.msra.mxu3 %v1362_v47  ;;  %v1402_v9 = vld [vmem:[#allocation13 + $0x468] sm:$0xff] }
 0x226   : > { %2006 = vmatpush.msrb.mxu0 %v1426_v49  ;;  %2026 = vmatpush.msrb.mxu1 %v1490_v50  ;;  %v1466_v10 = vld [vmem:[#allocation13 + $0x668] sm:$0xff] }
 0x227   : > { %1967 = vmatpush.msra.mxu2 %v1294_v51  ;;  %1987 = vmatpush.msra.mxu3 %v1358_v4  ;;  %v1270_v11 = vld [vmem:[#allocation13 + $0x48] sm:$0xff] }
 0x228   : > { %2007 = vmatpush.msrb.mxu0 %v1422_v53  ;;  %2027 = vmatpush.msrb.mxu1 %v1486_v54  ;;  %v1334_v14 = vld [vmem:[#allocation13 + $0x248] sm:$0xff] }
 0x229   : > { %1968 = vmatpush.msra.mxu2 %v1290_v13  ;;  %1988 = vmatpush.msra.mxu3 %v1354_v55  ;;  %v1398_v59 = vld [vmem:[#allocation13 + $0x448] sm:$0xff] }
 0x22a   : > { %2008 = vmatpush.msrb.mxu0 %v1418_v56  ;;  %2028 = vmatpush.msrb.mxu1 %v1482_v57  ;;  %v1462_v15 = vld [vmem:[#allocation13 + $0x648] sm:$0xff] }
 0x22b   : > { %1969 = vmatpush.msra.mxu2 %v1286_v58  ;;  %1989 = vmatpush.msra.mxu3 %v1350_v52  ;;  %v1266_v19 = vld [vmem:[#allocation13 + $0x28] sm:$0xff] }
 0x22c   : > { %2009 = vmatpush.msrb.mxu0 %v1414_v25  ;;  %2029 = vmatpush.msrb.mxu1 %v1478_v61  ;;  %v1330_v20 = vld [vmem:[#allocation13 + $0x228] sm:$0xff] }
 0x22d   : > { %1970 = vmatpush.msra.mxu2 %v1282_v62  ;;  %1990 = vmatpush.msra.mxu3 %v1346_v63  ;;  %v1394_v21 = vld [vmem:[#allocation13 + $0x428] sm:$0xff] }
 0x22e   : > { %2010 = vmatpush.msrb.mxu0 %v1410_v0  ;;  %2030 = vmatpush.msrb.mxu1 %v1474_v1  ;;  %v1458_v22 = vld [vmem:[#allocation13 + $0x628] sm:$0xff] }
 0x22f   : > { %1971 = vmatpush.msra.mxu2 %v1278_v2  ;;  %1991 = vmatpush.msra.mxu3 %v1342_v3  ;;  %v1262_v23 = vld [vmem:[#allocation13 + $0x8] sm:$0xff] }
 0x230   : > { %2011 = vmatpush.msrb.mxu0 %v1406_v5  ;;  %2031 = vmatpush.msrb.mxu1 %v1470_v6  ;;  %v1326_v24 = vld [vmem:[#allocation13 + $0x208] sm:$0xff] }
 0x231   : > { %1972 = vmatpush.msra.mxu2 %v1274_v7  ;;  %1992 = vmatpush.msra.mxu3 %v1338_v8  ;;  %v1390_v27 = vld [vmem:[#allocation13 + $0x408] sm:$0xff] }
 0x232   : > { %2012 = vmatpush.msrb.mxu0 %v1402_v9  ;;  %2032 = vmatpush.msrb.mxu1 %v1466_v10  ;;  %v1454_v28 = vld [vmem:[#allocation13 + $0x608] sm:$0xff] }
 0x233   : > { %1973 = vmatpush.msra.mxu2 %v1270_v11  ;;  %1993 = vmatpush.msra.mxu3 %v1334_v14  ;;  %v1578_v29 = vld [vmem:[#allocation13 + $0x9e8] sm:$0xff] }
 0x234   : > { %2013 = vmatpush.msrb.mxu0 %v1398_v59  ;;  %2033 = vmatpush.msrb.mxu1 %v1462_v15  ;;  %v1642_v30 = vld [vmem:[#allocation13 + $0xbe8] sm:$0xff] }
 0x235   : > { %1974 = vmatpush.msra.mxu2 %v1266_v19  ;;  %1994 = vmatpush.msra.mxu3 %v1330_v20  ;;  %v1706_v31 = vld [vmem:[#allocation13 + $0xde8] sm:$0xff] }
 0x236   : > { %2014 = vmatpush.msrb.mxu0 %v1394_v21  ;;  %2034 = vmatpush.msrb.mxu1 %v1458_v22  ;;  %v1770_v32 = vld [vmem:[#allocation13 + $0xfe8] sm:$0xff] }
 0x237   : > { %1975 = vmatpush.msra.mxu2 %v1262_v23  ;;  %1995 = vmatpush.msra.mxu3 %v1326_v24  ;;  %v1574_v33 = vld [vmem:[#allocation13 + $0x9c8] sm:$0xff] }
 0x238   : > { %2015 = vmatpush.msrb.mxu0 %v1390_v27  ;;  %2035 = vmatpush.msrb.mxu1 %v1454_v28  ;;  %v1638_v34 = vld [vmem:[#allocation13 + $0xbc8] sm:$0xff] }
 0x239   : > { %1976 = vmatmul.f32.vlgmr.msra.gmra.mxu2 %v3833_v60  ;;  %1996 = vmatmul.f32.vlgmr.msra.gmra.mxu3 %v3835_v16  ;;  %v1702_v35 = vld [vmem:[#allocation13 + $0xdc8] sm:$0xff] }
 0x23a   : > { %2016 = vmatmul.f32.vlgmr.msrb.gmra.mxu0 %v3837_v17  ;;  %2036 = vmatmul.f32.vlgmr.msrb.gmra.mxu1 %v3839_v18  ;;  %v1766_v12 = vld [vmem:[#allocation13 + $0xfc8] sm:$0xff] }
 0x23b   : > { %2040 = vmatpush.msrb.mxu2 %v1578_v29  ;;  %2060 = vmatpush.msrb.mxu3 %v1642_v30  ;;  %v1570_v41 = vld [vmem:[#allocation13 + $0x9a8] sm:$0xff] }
 0x23c   : > { %2080 = vmatpush.msra.mxu0 %v1706_v31  ;;  %2100 = vmatpush.msra.mxu1 %v1770_v32  ;;  %v1634_v42 = vld [vmem:[#allocation13 + $0xba8] sm:$0xff] }
 0x23d   : > { %2041 = vmatpush.msrb.mxu2 %v1574_v33  ;;  %2061 = vmatpush.msrb.mxu3 %v1638_v34  ;;  %v1698_v43 = vld [vmem:[#allocation13 + $0xda8] sm:$0xff] }
 0x23e   : > { %v1762_v26 = vld [vmem:[#allocation13 + $0xfa8] sm:$0xff]  ;;  %2081 = vmatpush.msra.mxu0 %v1702_v35  ;;  %2101 = vmatpush.msra.mxu1 %v1766_v12 }
 0x23f   : > { %v1566_v44 = vld [vmem:[#allocation13 + $0x988] sm:$0xff]  ;;  %2042 = vmatpush.msrb.mxu2 %v1570_v41  ;;  %2062 = vmatpush.msrb.mxu3 %v1634_v42  ;;  %v1323_v41 = vld [vmem:[#allocation13 + $0x1f0] sm:$0xff] }
 0x240   : > { %v1630_v45 = vld [vmem:[#allocation13 + $0xb88] sm:$0xff]  ;;  %2082 = vmatpush.msra.mxu0 %v1698_v43  ;;  %2102 = vmatpush.msra.mxu1 %v1762_v26  ;;  %v1387_v42 = vld [vmem:[#allocation13 + $0x3f0] sm:$0xff] }
 0x241   : > { %v1694_v46 = vld [vmem:[#allocation13 + $0xd88] sm:$0xff]  ;;  %2043 = vmatpush.msrb.mxu2 %v1566_v44  ;;  %2063 = vmatpush.msrb.mxu3 %v1630_v45  ;;  %v1451_v43 = vld [vmem:[#allocation13 + $0x5f0] sm:$0xff] }
 0x242   : > { %v1758_v36 = vld [vmem:[#allocation13 + $0xf88] sm:$0xff]  ;;  %2083 = vmatpush.msra.mxu0 %v1694_v46  ;;  %v1515_v26 = vld [vmem:[#allocation13 + $0x7f0] sm:$0xff] }
 0x243   : > { %v1562_v48 = vld [vmem:[#allocation13 + $0x968] sm:$0xff]  ;;  %2103 = vmatpush.msra.mxu1 %v1758_v36  ;;  %v1319_v44 = vld [vmem:[#allocation13 + $0x1d0] sm:$0xff] }
 0x244   : > { %v1626_v47 = vld [vmem:[#allocation13 + $0xb68] sm:$0xff]  ;;  %2044 = vmatpush.msrb.mxu2 %v1562_v48  ;;  %v1383_v45 = vld [vmem:[#allocation13 + $0x3d0] sm:$0xff] }
 0x245   : > { %v1690_v49 = vld [vmem:[#allocation13 + $0xd68] sm:$0xff]  ;;  %2064 = vmatpush.msrb.mxu3 %v1626_v47  ;;  %v1447_v46 = vld [vmem:[#allocation13 + $0x5d0] sm:$0xff] }
 0x246   : > { %v1754_v50 = vld [vmem:[#allocation13 + $0xf68] sm:$0xff]  ;;  %2084 = vmatpush.msra.mxu0 %v1690_v49  ;;  %v1511_v36 = vld [vmem:[#allocation13 + $0x7d0] sm:$0xff] }
 0x247   : > { %v1558_v51 = vld [vmem:[#allocation13 + $0x948] sm:$0xff]  ;;  %2104 = vmatpush.msra.mxu1 %v1754_v50  ;;  %v1315_v48 = vld [vmem:[#allocation13 + $0x1b0] sm:$0xff] }
 0x248   : > { %v1622_v4 = vld [vmem:[#allocation13 + $0xb48] sm:$0xff]  ;;  %2045 = vmatpush.msrb.mxu2 %v1558_v51  ;;  %v1379_v47 = vld [vmem:[#allocation13 + $0x3b0] sm:$0xff] }
 0x249   : > { %v1686_v53 = vld [vmem:[#allocation13 + $0xd48] sm:$0xff]  ;;  %2065 = vmatpush.msrb.mxu3 %v1622_v4  ;;  %v1443_v49 = vld [vmem:[#allocation13 + $0x5b0] sm:$0xff] }
 0x24a   : > { %v1750_v54 = vld [vmem:[#allocation13 + $0xf48] sm:$0xff]  ;;  %2085 = vmatpush.msra.mxu0 %v1686_v53  ;;  %v1507_v50 = vld [vmem:[#allocation13 + $0x7b0] sm:$0xff] }
 0x24b   : > { %v1554_v13 = vld [vmem:[#allocation13 + $0x928] sm:$0xff]  ;;  %2105 = vmatpush.msra.mxu1 %v1750_v54  ;;  %v1311_v51 = vld [vmem:[#allocation13 + $0x190] sm:$0xff] }
 0x24c   : > { %v1618_v55 = vld [vmem:[#allocation13 + $0xb28] sm:$0xff]  ;;  %2046 = vmatpush.msrb.mxu2 %v1554_v13  ;;  %v1375_v4 = vld [vmem:[#allocation13 + $0x390] sm:$0xff] }
 0x24d   : > { %v1682_v56 = vld [vmem:[#allocation13 + $0xd28] sm:$0xff]  ;;  %2066 = vmatpush.msrb.mxu3 %v1618_v55  ;;  %v1439_v53 = vld [vmem:[#allocation13 + $0x590] sm:$0xff] }
 0x24e   : > { %v1746_v57 = vld [vmem:[#allocation13 + $0xf28] sm:$0xff]  ;;  %2086 = vmatpush.msra.mxu0 %v1682_v56  ;;  %v1503_v54 = vld [vmem:[#allocation13 + $0x790] sm:$0xff] }
 0x24f   : > { %v1550_v58 = vld [vmem:[#allocation13 + $0x908] sm:$0xff]  ;;  %2106 = vmatpush.msra.mxu1 %v1746_v57  ;;  %v1307_v13 = vld [vmem:[#allocation13 + $0x170] sm:$0xff] }
 0x250   : > { %v1614_v52 = vld [vmem:[#allocation13 + $0xb08] sm:$0xff]  ;;  %2047 = vmatpush.msrb.mxu2 %v1550_v58  ;;  %v1371_v55 = vld [vmem:[#allocation13 + $0x370] sm:$0xff] }
 0x251   : > { %v1678_v25 = vld [vmem:[#allocation13 + $0xd08] sm:$0xff]  ;;  %2067 = vmatpush.msrb.mxu3 %v1614_v52  ;;  %v1435_v56 = vld [vmem:[#allocation13 + $0x570] sm:$0xff] }
 0x252   : > { %v1742_v61 = vld [vmem:[#allocation13 + $0xf08] sm:$0xff]  ;;  %2087 = vmatpush.msra.mxu0 %v1678_v25  ;;  %v1499_v57 = vld [vmem:[#allocation13 + $0x770] sm:$0xff] }
 0x253   : > { %v1546_v62 = vld [vmem:[#allocation13 + $0x8e8] sm:$0xff]  ;;  %2107 = vmatpush.msra.mxu1 %v1742_v61  ;;  %v1303_v58 = vld [vmem:[#allocation13 + $0x150] sm:$0xff] }
 0x254   : > { %v1610_v63 = vld [vmem:[#allocation13 + $0xae8] sm:$0xff]  ;;  %2048 = vmatpush.msrb.mxu2 %v1546_v62  ;;  %v1367_v52 = vld [vmem:[#allocation13 + $0x350] sm:$0xff] }
 0x255   : > { %v1674_v0 = vld [vmem:[#allocation13 + $0xce8] sm:$0xff]  ;;  %2068 = vmatpush.msrb.mxu3 %v1610_v63  ;;  %v1431_v25 = vld [vmem:[#allocation13 + $0x550] sm:$0xff] }
 0x256   : > { %v1738_v1 = vld [vmem:[#allocation13 + $0xee8] sm:$0xff]  ;;  %2088 = vmatpush.msra.mxu0 %v1674_v0  ;;  %v1495_v61 = vld [vmem:[#allocation13 + $0x750] sm:$0xff] }
 0x257   : > { %v1542_v2 = vld [vmem:[#allocation13 + $0x8c8] sm:$0xff]  ;;  %2108 = vmatpush.msra.mxu1 %v1738_v1  ;;  %v1299_v62 = vld [vmem:[#allocation13 + $0x130] sm:$0xff] }
 0x258   : > { %v1606_v3 = vld [vmem:[#allocation13 + $0xac8] sm:$0xff]  ;;  %2049 = vmatpush.msrb.mxu2 %v1542_v2  ;;  %v1363_v63 = vld [vmem:[#allocation13 + $0x330] sm:$0xff] }
 0x259   : > { %v1670_v5 = vld [vmem:[#allocation13 + $0xcc8] sm:$0xff]  ;;  %2069 = vmatpush.msrb.mxu3 %v1606_v3  ;;  %v1427_v0 = vld [vmem:[#allocation13 + $0x530] sm:$0xff] }
 0x25a   : > { %v1734_v6 = vld [vmem:[#allocation13 + $0xec8] sm:$0xff]  ;;  %2089 = vmatpush.msra.mxu0 %v1670_v5  ;;  %v1491_v1 = vld [vmem:[#allocation13 + $0x730] sm:$0xff] }
 0x25b   : > { %v1538_v7 = vld [vmem:[#allocation13 + $0x8a8] sm:$0xff]  ;;  %2109 = vmatpush.msra.mxu1 %v1734_v6  ;;  %v1295_v2 = vld [vmem:[#allocation13 + $0x110] sm:$0xff] }
 0x25c   : > { %v1602_v8 = vld [vmem:[#allocation13 + $0xaa8] sm:$0xff]  ;;  %2050 = vmatpush.msrb.mxu2 %v1538_v7  ;;  %v1359_v3 = vld [vmem:[#allocation13 + $0x310] sm:$0xff] }
 0x25d   : > { %v1666_v9 = vld [vmem:[#allocation13 + $0xca8] sm:$0xff]  ;;  %2070 = vmatpush.msrb.mxu3 %v1602_v8  ;;  %v1423_v5 = vld [vmem:[#allocation13 + $0x510] sm:$0xff] }
 0x25e   : > { %v1730_v10 = vld [vmem:[#allocation13 + $0xea8] sm:$0xff]  ;;  %2090 = vmatpush.msra.mxu0 %v1666_v9  ;;  %v1487_v6 = vld [vmem:[#allocation13 + $0x710] sm:$0xff] }
 0x25f   : > { %v1534_v11 = vld [vmem:[#allocation13 + $0x888] sm:$0xff]  ;;  %2110 = vmatpush.msra.mxu1 %v1730_v10  ;;  %v1291_v7 = vld [vmem:[#allocation13 + $0xf0] sm:$0xff] }
 0x260   : > { %v1598_v14 = vld [vmem:[#allocation13 + $0xa88] sm:$0xff]  ;;  %2051 = vmatpush.msrb.mxu2 %v1534_v11  ;;  %v1355_v8 = vld [vmem:[#allocation13 + $0x2f0] sm:$0xff] }
 0x261   : > { %v1662_v59 = vld [vmem:[#allocation13 + $0xc88] sm:$0xff]  ;;  %2071 = vmatpush.msrb.mxu3 %v1598_v14  ;;  %v1419_v9 = vld [vmem:[#allocation13 + $0x4f0] sm:$0xff] }
 0x262   : > { %v1726_v15 = vld [vmem:[#allocation13 + $0xe88] sm:$0xff]  ;;  %2091 = vmatpush.msra.mxu0 %v1662_v59  ;;  %v1483_v10 = vld [vmem:[#allocation13 + $0x6f0] sm:$0xff] }
 0x263   : > { %v1530_v19 = vld [vmem:[#allocation13 + $0x868] sm:$0xff]  ;;  %2111 = vmatpush.msra.mxu1 %v1726_v15  ;;  %v1287_v11 = vld [vmem:[#allocation13 + $0xd0] sm:$0xff] }
 0x264   : > { %v1594_v20 = vld [vmem:[#allocation13 + $0xa68] sm:$0xff]  ;;  %2052 = vmatpush.msrb.mxu2 %v1530_v19  ;;  %v1351_v14 = vld [vmem:[#allocation13 + $0x2d0] sm:$0xff] }
 0x265   : > { %v1658_v21 = vld [vmem:[#allocation13 + $0xc68] sm:$0xff]  ;;  %2072 = vmatpush.msrb.mxu3 %v1594_v20  ;;  %v1415_v59 = vld [vmem:[#allocation13 + $0x4d0] sm:$0xff] }
 0x266   : > { %v1722_v22 = vld [vmem:[#allocation13 + $0xe68] sm:$0xff]  ;;  %2092 = vmatpush.msra.mxu0 %v1658_v21  ;;  %v1479_v15 = vld [vmem:[#allocation13 + $0x6d0] sm:$0xff] }
 0x267   : > { %v1526_v23 = vld [vmem:[#allocation13 + $0x848] sm:$0xff]  ;;  %2112 = vmatpush.msra.mxu1 %v1722_v22  ;;  %v1283_v19 = vld [vmem:[#allocation13 + $0xb0] sm:$0xff] }
 0x268   : > { %v1590_v24 = vld [vmem:[#allocation13 + $0xa48] sm:$0xff]  ;;  %2053 = vmatpush.msrb.mxu2 %v1526_v23  ;;  %v1347_v20 = vld [vmem:[#allocation13 + $0x2b0] sm:$0xff] }
 0x269   : > { %v1654_v27 = vld [vmem:[#allocation13 + $0xc48] sm:$0xff]  ;;  %2073 = vmatpush.msrb.mxu3 %v1590_v24  ;;  %v1411_v21 = vld [vmem:[#allocation13 + $0x4b0] sm:$0xff] }
 0x26a   : > { %v1718_v28 = vld [vmem:[#allocation13 + $0xe48] sm:$0xff]  ;;  %2093 = vmatpush.msra.mxu0 %v1654_v27  ;;  %v1475_v22 = vld [vmem:[#allocation13 + $0x6b0] sm:$0xff] }
 0x26b   : > { %v1522_v29 = vld [vmem:[#allocation13 + $0x828] sm:$0xff]  ;;  %2113 = vmatpush.msra.mxu1 %v1718_v28  ;;  %v1279_v23 = vld [vmem:[#allocation13 + $0x90] sm:$0xff] }
 0x26c   : > { %v1586_v30 = vld [vmem:[#allocation13 + $0xa28] sm:$0xff]  ;;  %2054 = vmatpush.msrb.mxu2 %v1522_v29  ;;  %v1343_v24 = vld [vmem:[#allocation13 + $0x290] sm:$0xff] }
 0x26d   : > { %v1650_v31 = vld [vmem:[#allocation13 + $0xc28] sm:$0xff]  ;;  %2074 = vmatpush.msrb.mxu3 %v1586_v30  ;;  %v1407_v27 = vld [vmem:[#allocation13 + $0x490] sm:$0xff] }
 0x26e   : > { %v1714_v32 = vld [vmem:[#allocation13 + $0xe28] sm:$0xff]  ;;  %2094 = vmatpush.msra.mxu0 %v1650_v31  ;;  %v1471_v28 = vld [vmem:[#allocation13 + $0x690] sm:$0xff] }
 0x26f   : > { %v1518_v33 = vld [vmem:[#allocation13 + $0x808] sm:$0xff]  ;;  %2114 = vmatpush.msra.mxu1 %v1714_v32  ;;  %v1275_v29 = vld [vmem:[#allocation13 + $0x70] sm:$0xff] }
 0x270   : > { %v1582_v34 = vld [vmem:[#allocation13 + $0xa08] sm:$0xff]  ;;  %2055 = vmatpush.msrb.mxu2 %v1518_v33  ;;  %v1339_v30 = vld [vmem:[#allocation13 + $0x270] sm:$0xff] }
 0x271   : > { %v1646_v35 = vld [vmem:[#allocation13 + $0xc08] sm:$0xff]  ;;  %2075 = vmatpush.msrb.mxu3 %v1582_v34  ;;  %2056 = vmatmul.f32.vlgmr.msrb.gmra.mxu2 %v3845_v37  ;;  %v1403_v31 = vld [vmem:[#allocation13 + $0x470] sm:$0xff] }
 0x272   : > { %v1710_v12 = vld [vmem:[#allocation13 + $0xe08] sm:$0xff]  ;;  %2095 = vmatpush.msra.mxu0 %v1646_v35  ;;  %2076 = vmatmul.f32.vlgmr.msrb.gmra.mxu3 %v3847_v38  ;;  %v1467_v32 = vld [vmem:[#allocation13 + $0x670] sm:$0xff] }
 0x273   : > { %2115 = vmatpush.msra.mxu1 %v1710_v12  ;;  %2096 = vmatmul.f32.vlgmr.msra.gmra.mxu0 %v3849_v39  ;;  %v1271_v33 = vld [vmem:[#allocation13 + $0x50] sm:$0xff] }
 0x274   : > { %2116 = vmatmul.f32.vlgmr.msra.gmra.mxu1 %v3851_v40  ;;  %2120 = vmatpush.msra.mxu2 %v1323_v41  ;;  %v1335_v34 = vld [vmem:[#allocation13 + $0x250] sm:$0xff] }
 0x275   : > { %2140 = vmatpush.msra.mxu3 %v1387_v42  ;;  %2160 = vmatpush.msrb.mxu0 %v1451_v43  ;;  %v1399_v35 = vld [vmem:[#allocation13 + $0x450] sm:$0xff] }
 0x276   : > { %2180 = vmatpush.msrb.mxu1 %v1515_v26  ;;  %2121 = vmatpush.msra.mxu2 %v1319_v44  ;;  %v1463_v12 = vld [vmem:[#allocation13 + $0x650] sm:$0xff] }
 0x277   : > { %2141 = vmatpush.msra.mxu3 %v1383_v45  ;;  %2161 = vmatpush.msrb.mxu0 %v1447_v46  ;;  %v1267_v41 = vld [vmem:[#allocation13 + $0x30] sm:$0xff] }
 0x278   : > { %2181 = vmatpush.msrb.mxu1 %v1511_v36  ;;  %2122 = vmatpush.msra.mxu2 %v1315_v48  ;;  %v1331_v42 = vld [vmem:[#allocation13 + $0x230] sm:$0xff] }
 0x279   : > { %2142 = vmatpush.msra.mxu3 %v1379_v47  ;;  %2162 = vmatpush.msrb.mxu0 %v1443_v49  ;;  %v1395_v43 = vld [vmem:[#allocation13 + $0x430] sm:$0xff] }
 0x27a   : > { %2182 = vmatpush.msrb.mxu1 %v1507_v50  ;;  %2123 = vmatpush.msra.mxu2 %v1311_v51  ;;  %v1459_v26 = vld [vmem:[#allocation13 + $0x630] sm:$0xff] }
 0x27b   : > { %2143 = vmatpush.msra.mxu3 %v1375_v4  ;;  %2163 = vmatpush.msrb.mxu0 %v1439_v53  ;;  %v1263_v44 = vld [vmem:[#allocation13 + $0x10] sm:$0xff] }
 0x27c   : > { %2183 = vmatpush.msrb.mxu1 %v1503_v54  ;;  %2124 = vmatpush.msra.mxu2 %v1307_v13  ;;  %v1327_v45 = vld [vmem:[#allocation13 + $0x210] sm:$0xff] }
 0x27d   : > { %2144 = vmatpush.msra.mxu3 %v1371_v55  ;;  %2164 = vmatpush.msrb.mxu0 %v1435_v56  ;;  %v1391_v46 = vld [vmem:[#allocation13 + $0x410] sm:$0xff] }
 0x27e   : > { %2184 = vmatpush.msrb.mxu1 %v1499_v57  ;;  %2125 = vmatpush.msra.mxu2 %v1303_v58  ;;  %v1455_v36 = vld [vmem:[#allocation13 + $0x610] sm:$0xff] }
 0x27f   : > { %2145 = vmatpush.msra.mxu3 %v1367_v52  ;;  %2165 = vmatpush.msrb.mxu0 %v1431_v25  ;;  %v1579_v48 = vld [vmem:[#allocation13 + $0x9f0] sm:$0xff] }
 0x280   : > { %2185 = vmatpush.msrb.mxu1 %v1495_v61  ;;  %2126 = vmatpush.msra.mxu2 %v1299_v62  ;;  %v1643_v47 = vld [vmem:[#allocation13 + $0xbf0] sm:$0xff] }
 0x281   : > { %2146 = vmatpush.msra.mxu3 %v1363_v63  ;;  %2166 = vmatpush.msrb.mxu0 %v1427_v0  ;;  %v1707_v49 = vld [vmem:[#allocation13 + $0xdf0] sm:$0xff] }
 0x282   : > { %2186 = vmatpush.msrb.mxu1 %v1491_v1  ;;  %2127 = vmatpush.msra.mxu2 %v1295_v2  ;;  %v1771_v50 = vld [vmem:[#allocation13 + $0xff0] sm:$0xff] }
 0x283   : > { %2147 = vmatpush.msra.mxu3 %v1359_v3  ;;  %2167 = vmatpush.msrb.mxu0 %v1423_v5  ;;  %v1575_v51 = vld [vmem:[#allocation13 + $0x9d0] sm:$0xff] }
 0x284   : > { %2187 = vmatpush.msrb.mxu1 %v1487_v6  ;;  %2128 = vmatpush.msra.mxu2 %v1291_v7  ;;  %v1639_v4 = vld [vmem:[#allocation13 + $0xbd0] sm:$0xff] }
 0x285   : > { %2148 = vmatpush.msra.mxu3 %v1355_v8  ;;  %2168 = vmatpush.msrb.mxu0 %v1419_v9  ;;  %v1703_v53 = vld [vmem:[#allocation13 + $0xdd0] sm:$0xff] }
 0x286   : > { %2188 = vmatpush.msrb.mxu1 %v1483_v10  ;;  %2129 = vmatpush.msra.mxu2 %v1287_v11  ;;  %v1767_v54 = vld [vmem:[#allocation13 + $0xfd0] sm:$0xff] }
 0x287   : > { %2149 = vmatpush.msra.mxu3 %v1351_v14  ;;  %2169 = vmatpush.msrb.mxu0 %v1415_v59  ;;  %v1571_v13 = vld [vmem:[#allocation13 + $0x9b0] sm:$0xff] }
 0x288   : > { %2189 = vmatpush.msrb.mxu1 %v1479_v15  ;;  %2130 = vmatpush.msra.mxu2 %v1283_v19  ;;  %v1635_v55 = vld [vmem:[#allocation13 + $0xbb0] sm:$0xff] }
 0x289   : > { %2150 = vmatpush.msra.mxu3 %v1347_v20  ;;  %2170 = vmatpush.msrb.mxu0 %v1411_v21  ;;  %v1699_v56 = vld [vmem:[#allocation13 + $0xdb0] sm:$0xff] }
 0x28a   : > { %2190 = vmatpush.msrb.mxu1 %v1475_v22  ;;  %2131 = vmatpush.msra.mxu2 %v1279_v23  ;;  %v1763_v57 = vld [vmem:[#allocation13 + $0xfb0] sm:$0xff] }
 0x28b   : > { %2151 = vmatpush.msra.mxu3 %v1343_v24  ;;  %2171 = vmatpush.msrb.mxu0 %v1407_v27  ;;  %v1567_v58 = vld [vmem:[#allocation13 + $0x990] sm:$0xff] }
 0x28c   : > { %2191 = vmatpush.msrb.mxu1 %v1471_v28  ;;  %2132 = vmatpush.msra.mxu2 %v1275_v29  ;;  %v1631_v52 = vld [vmem:[#allocation13 + $0xb90] sm:$0xff] }
 0x28d   : > { %2152 = vmatpush.msra.mxu3 %v1339_v30  ;;  %2172 = vmatpush.msrb.mxu0 %v1403_v31  ;;  %v1695_v25 = vld [vmem:[#allocation13 + $0xd90] sm:$0xff] }
 0x28e   : > { %2192 = vmatpush.msrb.mxu1 %v1467_v32  ;;  %2133 = vmatpush.msra.mxu2 %v1271_v33  ;;  %v1759_v61 = vld [vmem:[#allocation13 + $0xf90] sm:$0xff] }
 0x28f   : > { %2153 = vmatpush.msra.mxu3 %v1335_v34  ;;  %2173 = vmatpush.msrb.mxu0 %v1399_v35  ;;  %v1563_v62 = vld [vmem:[#allocation13 + $0x970] sm:$0xff] }
 0x290   : > { %2193 = vmatpush.msrb.mxu1 %v1463_v12  ;;  %2134 = vmatpush.msra.mxu2 %v1267_v41  ;;  %v1627_v63 = vld [vmem:[#allocation13 + $0xb70] sm:$0xff] }
 0x291   : > { %2154 = vmatpush.msra.mxu3 %v1331_v42  ;;  %2174 = vmatpush.msrb.mxu0 %v1395_v43  ;;  %v1691_v0 = vld [vmem:[#allocation13 + $0xd70] sm:$0xff] }
 0x292   : > { %2194 = vmatpush.msrb.mxu1 %v1459_v26  ;;  %2135 = vmatpush.msra.mxu2 %v1263_v44  ;;  %v1755_v1 = vld [vmem:[#allocation13 + $0xf70] sm:$0xff] }
 0x293   : > { %2155 = vmatpush.msra.mxu3 %v1327_v45  ;;  %2175 = vmatpush.msrb.mxu0 %v1391_v46  ;;  %v1559_v2 = vld [vmem:[#allocation13 + $0x950] sm:$0xff] }
 0x294   : > { %2195 = vmatpush.msrb.mxu1 %v1455_v36  ;;  %2136 = vmatmul.f32.vlgmr.msra.gmra.mxu2 %v3833_v60  ;;  %v1623_v3 = vld [vmem:[#allocation13 + $0xb50] sm:$0xff] }
 0x295   : > { %2156 = vmatmul.f32.vlgmr.msra.gmra.mxu3 %v3835_v16  ;;  %2176 = vmatmul.f32.vlgmr.msrb.gmra.mxu0 %v3837_v17  ;;  %v1687_v5 = vld [vmem:[#allocation13 + $0xd50] sm:$0xff] }
 0x296   : > { %2196 = vmatmul.f32.vlgmr.msrb.gmra.mxu1 %v3839_v18  ;;  %2200 = vmatpush.msrb.mxu2 %v1579_v48  ;;  %v1751_v6 = vld [vmem:[#allocation13 + $0xf50] sm:$0xff] }
 0x297   : > { %2220 = vmatpush.msrb.mxu3 %v1643_v47  ;;  %2240 = vmatpush.msra.mxu0 %v1707_v49  ;;  %v1555_v7 = vld [vmem:[#allocation13 + $0x930] sm:$0xff] }
 0x298   : > { %2260 = vmatpush.msra.mxu1 %v1771_v50  ;;  %2201 = vmatpush.msrb.mxu2 %v1575_v51  ;;  %v1619_v8 = vld [vmem:[#allocation13 + $0xb30] sm:$0xff] }
 0x299   : > { %2221 = vmatpush.msrb.mxu3 %v1639_v4  ;;  %2241 = vmatpush.msra.mxu0 %v1703_v53  ;;  %v1683_v9 = vld [vmem:[#allocation13 + $0xd30] sm:$0xff] }
 0x29a   : > { %2261 = vmatpush.msra.mxu1 %v1767_v54  ;;  %2202 = vmatpush.msrb.mxu2 %v1571_v13  ;;  %v1747_v10 = vld [vmem:[#allocation13 + $0xf30] sm:$0xff]  ;;  %v1324_v13 = vld [vmem:[#allocation13 + $0x1f8] sm:$0xff] }
 0x29b   : > { %2222 = vmatpush.msrb.mxu3 %v1635_v55  ;;  %2242 = vmatpush.msra.mxu0 %v1699_v56  ;;  %v1551_v11 = vld [vmem:[#allocation13 + $0x910] sm:$0xff]  ;;  %v1388_v55 = vld [vmem:[#allocation13 + $0x3f8] sm:$0xff] }
 0x29c   : > { %2262 = vmatpush.msra.mxu1 %v1763_v57  ;;  %2203 = vmatpush.msrb.mxu2 %v1567_v58  ;;  %v1615_v14 = vld [vmem:[#allocation13 + $0xb10] sm:$0xff]  ;;  %v1452_v56 = vld [vmem:[#allocation13 + $0x5f8] sm:$0xff] }
 0x29d   : > { %2223 = vmatpush.msrb.mxu3 %v1631_v52  ;;  %2243 = vmatpush.msra.mxu0 %v1695_v25  ;;  %v1679_v59 = vld [vmem:[#allocation13 + $0xd10] sm:$0xff]  ;;  %v1516_v57 = vld [vmem:[#allocation13 + $0x7f8] sm:$0xff] }
 0x29e   : > { %2263 = vmatpush.msra.mxu1 %v1759_v61  ;;  %2204 = vmatpush.msrb.mxu2 %v1563_v62  ;;  %v1743_v15 = vld [vmem:[#allocation13 + $0xf10] sm:$0xff]  ;;  %v1320_v58 = vld [vmem:[#allocation13 + $0x1d8] sm:$0xff] }
 0x29f   : > { %2224 = vmatpush.msrb.mxu3 %v1627_v63  ;;  %2244 = vmatpush.msra.mxu0 %v1691_v0  ;;  %v1547_v19 = vld [vmem:[#allocation13 + $0x8f0] sm:$0xff]  ;;  %v1384_v52 = vld [vmem:[#allocation13 + $0x3d8] sm:$0xff] }
 0x2a0   : > { %2264 = vmatpush.msra.mxu1 %v1755_v1  ;;  %2205 = vmatpush.msrb.mxu2 %v1559_v2  ;;  %v1611_v20 = vld [vmem:[#allocation13 + $0xaf0] sm:$0xff]  ;;  %v1448_v25 = vld [vmem:[#allocation13 + $0x5d8] sm:$0xff] }
 0x2a1   : > { %2225 = vmatpush.msrb.mxu3 %v1623_v3  ;;  %2245 = vmatpush.msra.mxu0 %v1687_v5  ;;  %v1675_v21 = vld [vmem:[#allocation13 + $0xcf0] sm:$0xff]  ;;  %v1512_v61 = vld [vmem:[#allocation13 + $0x7d8] sm:$0xff] }
 0x2a2   : > { %2265 = vmatpush.msra.mxu1 %v1751_v6  ;;  %2206 = vmatpush.msrb.mxu2 %v1555_v7  ;;  %v1739_v22 = vld [vmem:[#allocation13 + $0xef0] sm:$0xff]  ;;  %v1316_v62 = vld [vmem:[#allocation13 + $0x1b8] sm:$0xff] }
 0x2a3   : > { %2226 = vmatpush.msrb.mxu3 %v1619_v8  ;;  %2246 = vmatpush.msra.mxu0 %v1683_v9  ;;  %v1543_v23 = vld [vmem:[#allocation13 + $0x8d0] sm:$0xff]  ;;  %v1380_v63 = vld [vmem:[#allocation13 + $0x3b8] sm:$0xff] }
 0x2a4   : > { %2266 = vmatpush.msra.mxu1 %v1747_v10  ;;  %2207 = vmatpush.msrb.mxu2 %v1551_v11  ;;  %v1607_v24 = vld [vmem:[#allocation13 + $0xad0] sm:$0xff]  ;;  %v1444_v0 = vld [vmem:[#allocation13 + $0x5b8] sm:$0xff] }
 0x2a5   : > { %2227 = vmatpush.msrb.mxu3 %v1615_v14  ;;  %2247 = vmatpush.msra.mxu0 %v1679_v59  ;;  %v1671_v27 = vld [vmem:[#allocation13 + $0xcd0] sm:$0xff]  ;;  %v1508_v1 = vld [vmem:[#allocation13 + $0x7b8] sm:$0xff] }
 0x2a6   : > { %2267 = vmatpush.msra.mxu1 %v1743_v15  ;;  %2208 = vmatpush.msrb.mxu2 %v1547_v19  ;;  %v1735_v28 = vld [vmem:[#allocation13 + $0xed0] sm:$0xff]  ;;  %v1312_v2 = vld [vmem:[#allocation13 + $0x198] sm:$0xff] }
 0x2a7   : > { %2228 = vmatpush.msrb.mxu3 %v1611_v20  ;;  %2248 = vmatpush.msra.mxu0 %v1675_v21  ;;  %v1539_v29 = vld [vmem:[#allocation13 + $0x8b0] sm:$0xff]  ;;  %v1376_v3 = vld [vmem:[#allocation13 + $0x398] sm:$0xff] }
 0x2a8   : > { %2268 = vmatpush.msra.mxu1 %v1739_v22  ;;  %v1603_v30 = vld [vmem:[#allocation13 + $0xab0] sm:$0xff]  ;;  %2209 = vmatpush.msrb.mxu2 %v1543_v23  ;;  %v1440_v5 = vld [vmem:[#allocation13 + $0x598] sm:$0xff] }
 0x2a9   : > { %2229 = vmatpush.msrb.mxu3 %v1607_v24  ;;  %v1667_v31 = vld [vmem:[#allocation13 + $0xcb0] sm:$0xff]  ;;  %2249 = vmatpush.msra.mxu0 %v1671_v27  ;;  %v1504_v6 = vld [vmem:[#allocation13 + $0x798] sm:$0xff] }
 0x2aa   : > { %v1731_v32 = vld [vmem:[#allocation13 + $0xeb0] sm:$0xff]  ;;  %2269 = vmatpush.msra.mxu1 %v1735_v28  ;;  %2210 = vmatpush.msrb.mxu2 %v1539_v29  ;;  %v1308_v7 = vld [vmem:[#allocation13 + $0x178] sm:$0xff] }
 0x2ab   : > { %v1535_v33 = vld [vmem:[#allocation13 + $0x890] sm:$0xff]  ;;  %2230 = vmatpush.msrb.mxu3 %v1603_v30  ;;  %2250 = vmatpush.msra.mxu0 %v1667_v31  ;;  %v1372_v8 = vld [vmem:[#allocation13 + $0x378] sm:$0xff] }
 0x2ac   : > { %v1599_v34 = vld [vmem:[#allocation13 + $0xa90] sm:$0xff]  ;;  %2270 = vmatpush.msra.mxu1 %v1731_v32  ;;  %2211 = vmatpush.msrb.mxu2 %v1535_v33  ;;  %v1436_v9 = vld [vmem:[#allocation13 + $0x578] sm:$0xff] }
 0x2ad   : > { %v1663_v35 = vld [vmem:[#allocation13 + $0xc90] sm:$0xff]  ;;  %2231 = vmatpush.msrb.mxu3 %v1599_v34  ;;  %v1500_v10 = vld [vmem:[#allocation13 + $0x778] sm:$0xff] }
 0x2ae   : > { %v1727_v12 = vld [vmem:[#allocation13 + $0xe90] sm:$0xff]  ;;  %2251 = vmatpush.msra.mxu0 %v1663_v35  ;;  %v1304_v11 = vld [vmem:[#allocation13 + $0x158] sm:$0xff] }
 0x2af   : > { %v1531_v41 = vld [vmem:[#allocation13 + $0x870] sm:$0xff]  ;;  %2271 = vmatpush.msra.mxu1 %v1727_v12  ;;  %v1368_v14 = vld [vmem:[#allocation13 + $0x358] sm:$0xff] }
 0x2b0   : > { %v1595_v42 = vld [vmem:[#allocation13 + $0xa70] sm:$0xff]  ;;  %2212 = vmatpush.msrb.mxu2 %v1531_v41  ;;  %v1432_v59 = vld [vmem:[#allocation13 + $0x558] sm:$0xff] }
 0x2b1   : > { %v1659_v43 = vld [vmem:[#allocation13 + $0xc70] sm:$0xff]  ;;  %2232 = vmatpush.msrb.mxu3 %v1595_v42  ;;  %v1496_v15 = vld [vmem:[#allocation13 + $0x758] sm:$0xff] }
 0x2b2   : > { %v1723_v26 = vld [vmem:[#allocation13 + $0xe70] sm:$0xff]  ;;  %2252 = vmatpush.msra.mxu0 %v1659_v43  ;;  %v1300_v19 = vld [vmem:[#allocation13 + $0x138] sm:$0xff] }
 0x2b3   : > { %v1527_v44 = vld [vmem:[#allocation13 + $0x850] sm:$0xff]  ;;  %2272 = vmatpush.msra.mxu1 %v1723_v26  ;;  %v1364_v20 = vld [vmem:[#allocation13 + $0x338] sm:$0xff] }
 0x2b4   : > { %v1591_v45 = vld [vmem:[#allocation13 + $0xa50] sm:$0xff]  ;;  %2213 = vmatpush.msrb.mxu2 %v1527_v44  ;;  %v1428_v21 = vld [vmem:[#allocation13 + $0x538] sm:$0xff] }
 0x2b5   : > { %v1655_v46 = vld [vmem:[#allocation13 + $0xc50] sm:$0xff]  ;;  %2233 = vmatpush.msrb.mxu3 %v1591_v45  ;;  %v1492_v22 = vld [vmem:[#allocation13 + $0x738] sm:$0xff] }
 0x2b6   : > { %v1719_v36 = vld [vmem:[#allocation13 + $0xe50] sm:$0xff]  ;;  %2253 = vmatpush.msra.mxu0 %v1655_v46  ;;  %v1296_v23 = vld [vmem:[#allocation13 + $0x118] sm:$0xff] }
 0x2b7   : > { %v1523_v48 = vld [vmem:[#allocation13 + $0x830] sm:$0xff]  ;;  %2273 = vmatpush.msra.mxu1 %v1719_v36  ;;  %v1360_v24 = vld [vmem:[#allocation13 + $0x318] sm:$0xff] }
 0x2b8   : > { %v1587_v47 = vld [vmem:[#allocation13 + $0xa30] sm:$0xff]  ;;  %2214 = vmatpush.msrb.mxu2 %v1523_v48  ;;  %v1424_v27 = vld [vmem:[#allocation13 + $0x518] sm:$0xff] }
 0x2b9   : > { %v1651_v49 = vld [vmem:[#allocation13 + $0xc30] sm:$0xff]  ;;  %2234 = vmatpush.msrb.mxu3 %v1587_v47  ;;  %v1488_v28 = vld [vmem:[#allocation13 + $0x718] sm:$0xff] }
 0x2ba   : > { %v1715_v50 = vld [vmem:[#allocation13 + $0xe30] sm:$0xff]  ;;  %2254 = vmatpush.msra.mxu0 %v1651_v49  ;;  %v1292_v29 = vld [vmem:[#allocation13 + $0xf8] sm:$0xff] }
 0x2bb   : > { %v1519_v51 = vld [vmem:[#allocation13 + $0x810] sm:$0xff]  ;;  %2274 = vmatpush.msra.mxu1 %v1715_v50  ;;  %v1356_v30 = vld [vmem:[#allocation13 + $0x2f8] sm:$0xff] }
 0x2bc   : > { %v1583_v4 = vld [vmem:[#allocation13 + $0xa10] sm:$0xff]  ;;  %2215 = vmatpush.msrb.mxu2 %v1519_v51  ;;  %v1420_v31 = vld [vmem:[#allocation13 + $0x4f8] sm:$0xff] }
 0x2bd   : > { %v1647_v53 = vld [vmem:[#allocation13 + $0xc10] sm:$0xff]  ;;  %2235 = vmatpush.msrb.mxu3 %v1583_v4  ;;  %2216 = vmatmul.f32.vlgmr.msrb.gmra.mxu2 %v3845_v37  ;;  %v1484_v32 = vld [vmem:[#allocation13 + $0x6f8] sm:$0xff] }
 0x2be   : > { %v1711_v54 = vld [vmem:[#allocation13 + $0xe10] sm:$0xff]  ;;  %2255 = vmatpush.msra.mxu0 %v1647_v53  ;;  %2236 = vmatmul.f32.vlgmr.msrb.gmra.mxu3 %v3847_v38  ;;  %v1288_v33 = vld [vmem:[#allocation13 + $0xd8] sm:$0xff] }
 0x2bf   : > { %2275 = vmatpush.msra.mxu1 %v1711_v54  ;;  %2256 = vmatmul.f32.vlgmr.msra.gmra.mxu0 %v3849_v39  ;;  %v1352_v34 = vld [vmem:[#allocation13 + $0x2d8] sm:$0xff] }
 0x2c0   : > { %2276 = vmatmul.f32.vlgmr.msra.gmra.mxu1 %v3851_v40  ;;  %2280 = vmatpush.msra.mxu2 %v1324_v13  ;;  %v1416_v35 = vld [vmem:[#allocation13 + $0x4d8] sm:$0xff] }
 0x2c1   : > { %2300 = vmatpush.msra.mxu3 %v1388_v55  ;;  %2320 = vmatpush.msrb.mxu0 %v1452_v56  ;;  %v1480_v12 = vld [vmem:[#allocation13 + $0x6d8] sm:$0xff] }
 0x2c2   : > { %2340 = vmatpush.msrb.mxu1 %v1516_v57  ;;  %2281 = vmatpush.msra.mxu2 %v1320_v58  ;;  %v1284_v41 = vld [vmem:[#allocation13 + $0xb8] sm:$0xff] }
 0x2c3   : > { %2301 = vmatpush.msra.mxu3 %v1384_v52  ;;  %2321 = vmatpush.msrb.mxu0 %v1448_v25  ;;  %v1348_v42 = vld [vmem:[#allocation13 + $0x2b8] sm:$0xff] }
 0x2c4   : > { %2341 = vmatpush.msrb.mxu1 %v1512_v61  ;;  %2282 = vmatpush.msra.mxu2 %v1316_v62  ;;  %v1412_v43 = vld [vmem:[#allocation13 + $0x4b8] sm:$0xff] }
 0x2c5   : > { %2302 = vmatpush.msra.mxu3 %v1380_v63  ;;  %2322 = vmatpush.msrb.mxu0 %v1444_v0  ;;  %v1476_v26 = vld [vmem:[#allocation13 + $0x6b8] sm:$0xff] }
 0x2c6   : > { %2342 = vmatpush.msrb.mxu1 %v1508_v1  ;;  %2283 = vmatpush.msra.mxu2 %v1312_v2  ;;  %v1280_v44 = vld [vmem:[#allocation13 + $0x98] sm:$0xff] }
 0x2c7   : > { %2303 = vmatpush.msra.mxu3 %v1376_v3  ;;  %2323 = vmatpush.msrb.mxu0 %v1440_v5  ;;  %v1344_v45 = vld [vmem:[#allocation13 + $0x298] sm:$0xff] }
 0x2c8   : > { %2343 = vmatpush.msrb.mxu1 %v1504_v6  ;;  %2284 = vmatpush.msra.mxu2 %v1308_v7  ;;  %v1408_v46 = vld [vmem:[#allocation13 + $0x498] sm:$0xff] }
 0x2c9   : > { %2304 = vmatpush.msra.mxu3 %v1372_v8  ;;  %2324 = vmatpush.msrb.mxu0 %v1436_v9  ;;  %v1472_v36 = vld [vmem:[#allocation13 + $0x698] sm:$0xff] }
 0x2ca   : > { %2344 = vmatpush.msrb.mxu1 %v1500_v10  ;;  %2285 = vmatpush.msra.mxu2 %v1304_v11  ;;  %v1276_v48 = vld [vmem:[#allocation13 + $0x78] sm:$0xff] }
 0x2cb   : > { %2305 = vmatpush.msra.mxu3 %v1368_v14  ;;  %2325 = vmatpush.msrb.mxu0 %v1432_v59  ;;  %v1340_v47 = vld [vmem:[#allocation13 + $0x278] sm:$0xff] }
 0x2cc   : > { %2345 = vmatpush.msrb.mxu1 %v1496_v15  ;;  %2286 = vmatpush.msra.mxu2 %v1300_v19  ;;  %v1404_v49 = vld [vmem:[#allocation13 + $0x478] sm:$0xff] }
 0x2cd   : > { %2306 = vmatpush.msra.mxu3 %v1364_v20  ;;  %2326 = vmatpush.msrb.mxu0 %v1428_v21  ;;  %v1468_v50 = vld [vmem:[#allocation13 + $0x678] sm:$0xff] }
 0x2ce   : > { %2346 = vmatpush.msrb.mxu1 %v1492_v22  ;;  %2287 = vmatpush.msra.mxu2 %v1296_v23  ;;  %v1272_v51 = vld [vmem:[#allocation13 + $0x58] sm:$0xff] }
 0x2cf   : > { %2307 = vmatpush.msra.mxu3 %v1360_v24  ;;  %2327 = vmatpush.msrb.mxu0 %v1424_v27  ;;  %v1336_v4 = vld [vmem:[#allocation13 + $0x258] sm:$0xff] }
 0x2d0   : > { %2347 = vmatpush.msrb.mxu1 %v1488_v28  ;;  %2288 = vmatpush.msra.mxu2 %v1292_v29  ;;  %v1400_v53 = vld [vmem:[#allocation13 + $0x458] sm:$0xff] }
 0x2d1   : > { %2308 = vmatpush.msra.mxu3 %v1356_v30  ;;  %2328 = vmatpush.msrb.mxu0 %v1420_v31  ;;  %v1464_v54 = vld [vmem:[#allocation13 + $0x658] sm:$0xff]  ;;  %v3877_v31 = vpop.f32.mrf.mxu2 }
 0x2d2   : > { %2348 = vmatpush.msrb.mxu1 %v1484_v32  ;;  %2289 = vmatpush.msra.mxu2 %v1288_v33  ;;  %v1268_v13 = vld [vmem:[#allocation13 + $0x38] sm:$0xff] }
 0x2d3   : > { %2309 = vmatpush.msra.mxu3 %v1352_v34  ;;  %2329 = vmatpush.msrb.mxu0 %v1416_v35  ;;  %v1332_v55 = vld [vmem:[#allocation13 + $0x238] sm:$0xff] }
 0x2d4   : > { %2349 = vmatpush.msrb.mxu1 %v1480_v12  ;;  %2290 = vmatpush.msra.mxu2 %v1284_v41  ;;  %v1396_v56 = vld [vmem:[#allocation13 + $0x438] sm:$0xff] }
 0x2d5   : > { %2310 = vmatpush.msra.mxu3 %v1348_v42  ;;  %2330 = vmatpush.msrb.mxu0 %v1412_v43  ;;  %v1460_v57 = vld [vmem:[#allocation13 + $0x638] sm:$0xff] }
 0x2d6   : > { %2350 = vmatpush.msrb.mxu1 %v1476_v26  ;;  %2291 = vmatpush.msra.mxu2 %v1280_v44  ;;  %v1264_v58 = vld [vmem:[#allocation13 + $0x18] sm:$0xff] }
 0x2d7   : > { %2311 = vmatpush.msra.mxu3 %v1344_v45  ;;  %2331 = vmatpush.msrb.mxu0 %v1408_v46  ;;  %v1328_v52 = vld [vmem:[#allocation13 + $0x218] sm:$0xff] }
 0x2d8   : > { %2351 = vmatpush.msrb.mxu1 %v1472_v36  ;;  %2292 = vmatpush.msra.mxu2 %v1276_v48  ;;  %v1392_v25 = vld [vmem:[#allocation13 + $0x418] sm:$0xff]  ;;  %v3879_v36 = vpop.f32.mrf.mxu3 }
 0x2d9   : > { %2312 = vmatpush.msra.mxu3 %v1340_v47  ;;  %2332 = vmatpush.msrb.mxu0 %v1404_v49  ;;  %v1456_v61 = vld [vmem:[#allocation13 + $0x618] sm:$0xff] }
 0x2da   : > { %2352 = vmatpush.msrb.mxu1 %v1468_v50  ;;  %2293 = vmatpush.msra.mxu2 %v1272_v51  ;;  %v1580_v62 = vld [vmem:[#allocation13 + $0x9f8] sm:$0xff] }
 0x2db   : > { %2313 = vmatpush.msra.mxu3 %v1336_v4  ;;  %2333 = vmatpush.msrb.mxu0 %v1400_v53  ;;  %v1644_v63 = vld [vmem:[#allocation13 + $0xbf8] sm:$0xff] }
 0x2dc   : > { %2353 = vmatpush.msrb.mxu1 %v1464_v54  ;;  %2294 = vmatpush.msra.mxu2 %v1268_v13  ;;  %v1708_v0 = vld [vmem:[#allocation13 + $0xdf8] sm:$0xff]  ;;  %v3881_v13 = vpop.f32.mrf.mxu0 }
 0x2dd   : > { %2314 = vmatpush.msra.mxu3 %v1332_v55  ;;  %2334 = vmatpush.msrb.mxu0 %v1396_v56  ;;  %v1772_v1 = vld [vmem:[#allocation13 + $0xff8] sm:$0xff]  ;;  %v3883_v55 = vpop.f32.mrf.mxu2 }
 0x2de   : > { %2354 = vmatpush.msrb.mxu1 %v1460_v57  ;;  %2295 = vmatpush.msra.mxu2 %v1264_v58  ;;  %v1576_v2 = vld [vmem:[#allocation13 + $0x9d8] sm:$0xff] }
 0x2df   : > { %2315 = vmatpush.msra.mxu3 %v1328_v52  ;;  %2335 = vmatpush.msrb.mxu0 %v1392_v25  ;;  %v1640_v3 = vld [vmem:[#allocation13 + $0xbd8] sm:$0xff]  ;;  %v3885_v25 = vld [vmem:[#allocation14] sm:$0xf] }
 0x2e0   : > { %2355 = vmatpush.msrb.mxu1 %v1456_v61  ;;  %2296 = vmatmul.f32.vlgmr.msra.gmra.mxu2 %v3833_v60  ;;  %v1704_v5 = vld [vmem:[#allocation13 + $0xdd8] sm:$0xff] }
 0x2e1   : > { %2316 = vmatmul.f32.vlgmr.msra.gmra.mxu3 %v3835_v16  ;;  %2336 = vmatmul.f32.vlgmr.msrb.gmra.mxu0 %v3837_v17  ;;  %v1768_v6 = vld [vmem:[#allocation13 + $0xfd8] sm:$0xff] }
 0x2e2   : > { %2356 = vmatmul.f32.vlgmr.msrb.gmra.mxu1 %v3839_v18  ;;  %2360 = vmatpush.msrb.mxu2 %v1580_v62  ;;  %v1572_v7 = vld [vmem:[#allocation13 + $0x9b8] sm:$0xff] }
 0x2e3   : > { %2380 = vmatpush.msrb.mxu3 %v1644_v63  ;;  %2400 = vmatpush.msra.mxu0 %v1708_v0  ;;  %v1636_v8 = vld [vmem:[#allocation13 + $0xbb8] sm:$0xff] }
 0x2e4   : > { %2420 = vmatpush.msra.mxu1 %v1772_v1  ;;  %2361 = vmatpush.msrb.mxu2 %v1576_v2  ;;  %v1700_v60 = vld [vmem:[#allocation13 + $0xdb8] sm:$0xff]  ;;  %v3887_v1 = vpop.f32.mrf.mxu1 }
 0x2e5   : > { %2381 = vmatpush.msrb.mxu3 %v1640_v3  ;;  %v1764_v16 = vld [vmem:[#allocation13 + $0xfb8] sm:$0xff]  ;;  %2401 = vmatpush.msra.mxu0 %v1704_v5  ;;  %v1792_v5 = vperm.slane %v3885_v25, 0 }
 0x2e6   : > { %2421 = vmatpush.msra.mxu1 %v1768_v6  ;;  %v1568_v9 = vld [vmem:[#allocation13 + $0x998] sm:$0xff]  ;;  %2362 = vmatpush.msrb.mxu2 %v1572_v7 }
 0x2e7   : > { %v1632_v17 = vld [vmem:[#allocation13 + $0xb98] sm:$0xff]  ;;  %2382 = vmatpush.msrb.mxu3 %v1636_v8  ;;  %2402 = vmatpush.msra.mxu0 %v1700_v60  ;;  %v3890_v8 = vpop.f32.mrf.mxu3 }
 0x2e8   : > { %v1696_v18 = vld [vmem:[#allocation13 + $0xd98] sm:$0xff]  ;;  %2422 = vmatpush.msra.mxu1 %v1764_v16  ;;  %2363 = vmatpush.msrb.mxu2 %v1568_v9  ;;  %v1793_v9 = vperm.slane %v3885_v25, 1 }
 0x2e9   : > { %v1760_v10 = vld [vmem:[#allocation13 + $0xf98] sm:$0xff]  ;;  %2383 = vmatpush.msrb.mxu3 %v1632_v17  ;;  %2403 = vmatpush.msra.mxu0 %v1696_v18  ;;  %v1977_v17 = vpop.f32.mrf.mxu2  ;;  %v1818_v18 = vadd.f32 %v3877_v31, %v1792_v5  ;;  %v2516_v5 = vld [vmem:[#allocation16 + $0x240] sm:$0xff] }
 0x2ea   : > { %v1564_v11 = vld [vmem:[#allocation13 + $0x978] sm:$0xff]  ;;  %2423 = vmatpush.msra.mxu1 %v1760_v10 }
 0x2eb   : > { %v1628_v14 = vld [vmem:[#allocation13 + $0xb78] sm:$0xff]  ;;  %2364 = vmatpush.msrb.mxu2 %v1564_v11 }
 0x2ec   : > { %v1692_v59 = vld [vmem:[#allocation13 + $0xd78] sm:$0xff]  ;;  %2384 = vmatpush.msrb.mxu3 %v1628_v14  ;;  %v3894_v14 = vpop.f32.mrf.mxu0 }
 0x2ed   : > { %v1756_v15 = vld [vmem:[#allocation13 + $0xf78] sm:$0xff]  ;;  %2404 = vmatpush.msra.mxu0 %v1692_v59 }
 0x2ee   : > { %v1560_v19 = vld [vmem:[#allocation13 + $0x958] sm:$0xff]  ;;  %2424 = vmatpush.msra.mxu1 %v1756_v15  ;;  %v1978_v15 = vadd.f32 %v1977_v17, %v1793_v9  ;;  %v2448_v9 = vld [vmem:[#allocation16 + $0x20] sm:$0xff] }
 0x2ef   : > { %v1624_v20 = vld [vmem:[#allocation13 + $0xb58] sm:$0xff]  ;;  %2365 = vmatpush.msrb.mxu2 %v1560_v19  ;;  %v2472_v19 = vld [vmem:[#allocation16 + $0xe0] sm:$0xff] }
 0x2f0   : > { %v1688_v21 = vld [vmem:[#allocation13 + $0xd58] sm:$0xff]  ;;  %2385 = vmatpush.msrb.mxu3 %v1624_v20  ;;  %v2504_v20 = vld [vmem:[#allocation16 + $0x1e0] sm:$0xff] }
 0x2f1   : > { %v1752_v22 = vld [vmem:[#allocation13 + $0xf58] sm:$0xff]  ;;  %2405 = vmatpush.msra.mxu0 %v1688_v21  ;;  %v2536_v21 = vld [vmem:[#allocation16 + $0x2e0] sm:$0xff] }
 0x2f2   : > { %v1556_v23 = vld [vmem:[#allocation13 + $0x938] sm:$0xff]  ;;  %2425 = vmatpush.msra.mxu1 %v1752_v22  ;;  %v1838_v22 = vadd.f32 %v3879_v36, %v1818_v18  ;;  %v2480_v17 = vld [vmem:[#allocation16 + $0x120] sm:$0xff] }
 0x2f3   : > { %v1620_v24 = vld [vmem:[#allocation13 + $0xb38] sm:$0xff]  ;;  %2366 = vmatpush.msrb.mxu2 %v1556_v23 }
 0x2f4   : > { %v1684_v27 = vld [vmem:[#allocation13 + $0xd38] sm:$0xff]  ;;  %2386 = vmatpush.msrb.mxu3 %v1620_v24 }
 0x2f5   : > { %v1748_v28 = vld [vmem:[#allocation13 + $0xf38] sm:$0xff]  ;;  %2406 = vmatpush.msra.mxu0 %v1684_v27  ;;  %v3901_v27 = vpop.f32.mrf.mxu1 }
 0x2f6   : > { %v1552_v29 = vld [vmem:[#allocation13 + $0x918] sm:$0xff]  ;;  %2426 = vmatpush.msra.mxu1 %v1748_v28 }
 0x2f7   : > { %v1616_v30 = vld [vmem:[#allocation13 + $0xb18] sm:$0xff]  ;;  %2367 = vmatpush.msrb.mxu2 %v1552_v29  ;;  %v2500_v29 = vld [vmem:[#allocation16 + $0x1c0] sm:$0xff] }
 0x2f8   : > { %v1680_v32 = vld [vmem:[#allocation13 + $0xd18] sm:$0xff]  ;;  %2387 = vmatpush.msrb.mxu3 %v1616_v30  ;;  %v1858_v30 = vadd.f32 %v3881_v13, %v1838_v22 }
 0x2f9   : > { %v1744_v33 = vld [vmem:[#allocation13 + $0xf18] sm:$0xff]  ;;  %2407 = vmatpush.msra.mxu0 %v1680_v32 }
 0x2fa   : > { %v1548_v34 = vld [vmem:[#allocation13 + $0x8f8] sm:$0xff]  ;;  %2427 = vmatpush.msra.mxu1 %v1744_v33  ;;  %v2017_v33 = vpop.f32.mrf.mxu0 }
 0x2fb   : > { %v1612_v35 = vld [vmem:[#allocation13 + $0xaf8] sm:$0xff]  ;;  %2368 = vmatpush.msrb.mxu2 %v1548_v34 }
 0x2fc   : > { %v1676_v12 = vld [vmem:[#allocation13 + $0xcf8] sm:$0xff]  ;;  %2388 = vmatpush.msrb.mxu3 %v1612_v35 }
 0x2fd   : > { %v1740_v41 = vld [vmem:[#allocation13 + $0xef8] sm:$0xff]  ;;  %2408 = vmatpush.msra.mxu0 %v1676_v12  ;;  %v2464_v12 = vld [vmem:[#allocation16 + $0xa0] sm:$0xff] }
 0x2fe   : > { %v1544_v42 = vld [vmem:[#allocation13 + $0x8d8] sm:$0xff]  ;;  %2428 = vmatpush.msra.mxu1 %v1740_v41  ;;  %v2496_v41 = vld [vmem:[#allocation16 + $0x1a0] sm:$0xff] }
 0x2ff   : > { %v1608_v43 = vld [vmem:[#allocation13 + $0xad8] sm:$0xff]  ;;  %2369 = vmatpush.msrb.mxu2 %v1544_v42  ;;  %v2528_v42 = vld [vmem:[#allocation16 + $0x2a0] sm:$0xff] }
 0x300   : > { %v1672_v26 = vld [vmem:[#allocation13 + $0xcd8] sm:$0xff]  ;;  %2389 = vmatpush.msrb.mxu3 %v1608_v43  ;;  %v1878_v43 = vadd.f32 %v3887_v1, %v1858_v30  ;;  %v2452_v1 = vld [vmem:[#allocation16 + $0x40] sm:$0xff]  ;;  %v2537_v30 = vld [vmem:[#allocation16 + $0x2e8] sm:$0xff] }
 0x301   : > { %v1736_v44 = vld [vmem:[#allocation13 + $0xed8] sm:$0xff]  ;;  %2409 = vmatpush.msra.mxu0 %v1672_v26 }
 0x302   : > { %v1540_v45 = vld [vmem:[#allocation13 + $0x8b8] sm:$0xff]  ;;  %2429 = vmatpush.msra.mxu1 %v1736_v44 }
 0x303   : > { %v1604_v46 = vld [vmem:[#allocation13 + $0xab8] sm:$0xff]  ;;  %2370 = vmatpush.msrb.mxu2 %v1540_v45  ;;  %v2037_v45 = vpop.f32.mrf.mxu1 }
 0x304   : > { %v1668_v48 = vld [vmem:[#allocation13 + $0xcb8] sm:$0xff]  ;;  %2390 = vmatpush.msrb.mxu3 %v1604_v46  ;;  %v2057_v46 = vpop.f32.mrf.mxu2 }
 0x305   : > { %v1732_v47 = vld [vmem:[#allocation13 + $0xeb8] sm:$0xff]  ;;  %2410 = vmatpush.msra.mxu0 %v1668_v48 }
 0x306   : > { %v1536_v49 = vld [vmem:[#allocation13 + $0x898] sm:$0xff]  ;;  %2430 = vmatpush.msra.mxu1 %v1732_v47  ;;  %v2460_v47 = vld [vmem:[#allocation16 + $0x80] sm:$0xff] }
 0x307   : > { %v1600_v50 = vld [vmem:[#allocation13 + $0xa98] sm:$0xff]  ;;  %2371 = vmatpush.msrb.mxu2 %v1536_v49  ;;  %v2492_v49 = vld [vmem:[#allocation16 + $0x180] sm:$0xff] }
 0x308   : > { %v1664_v51 = vld [vmem:[#allocation13 + $0xc98] sm:$0xff]  ;;  %2391 = vmatpush.msrb.mxu3 %v1600_v50  ;;  %v2524_v50 = vld [vmem:[#allocation16 + $0x280] sm:$0xff] }
 0x309   : > { %v1728_v4 = vld [vmem:[#allocation13 + $0xe98] sm:$0xff]  ;;  %2411 = vmatpush.msra.mxu0 %v1664_v51  ;;  %v1898_v51 = vadd.f32 %v3883_v55, %v1878_v43 }
 0x30a   : > { %v1532_v53 = vld [vmem:[#allocation13 + $0x878] sm:$0xff]  ;;  %2431 = vmatpush.msra.mxu1 %v1728_v4 }
 0x30b   : > { %v1596_v54 = vld [vmem:[#allocation13 + $0xa78] sm:$0xff]  ;;  %2372 = vmatpush.msrb.mxu2 %v1532_v53  ;;  %v2117_v18 = vpop.f32.mrf.mxu1 }
 0x30c   : > { %v1660_v56 = vld [vmem:[#allocation13 + $0xc78] sm:$0xff]  ;;  %2392 = vmatpush.msrb.mxu3 %v1596_v54 }
 0x30d   : > { %v1724_v57 = vld [vmem:[#allocation13 + $0xe78] sm:$0xff]  ;;  %2412 = vmatpush.msra.mxu0 %v1660_v56  ;;  %v2456_v56 = vld [vmem:[#allocation16 + $0x60] sm:$0xff] }
 0x30e   : > { %v1528_v58 = vld [vmem:[#allocation13 + $0x858] sm:$0xff]  ;;  %2432 = vmatpush.msra.mxu1 %v1724_v57  ;;  %v2488_v57 = vld [vmem:[#allocation16 + $0x160] sm:$0xff] }
 0x30f   : > { %v1592_v52 = vld [vmem:[#allocation13 + $0xa58] sm:$0xff]  ;;  %2373 = vmatpush.msrb.mxu2 %v1528_v58 }
 0x310   : > { %v1656_v61 = vld [vmem:[#allocation13 + $0xc58] sm:$0xff]  ;;  %2393 = vmatpush.msrb.mxu3 %v1592_v52  ;;  %v2520_v52 = vld [vmem:[#allocation16 + $0x260] sm:$0xff] }
 0x311   : > { %v1720_v62 = vld [vmem:[#allocation13 + $0xe58] sm:$0xff]  ;;  %2413 = vmatpush.msra.mxu0 %v1656_v61  ;;  %v1918_v61 = vadd.f32 %v3890_v8, %v1898_v51 }
 0x312   : > { %v1524_v63 = vld [vmem:[#allocation13 + $0x838] sm:$0xff]  ;;  %2433 = vmatpush.msra.mxu1 %v1720_v62 }
 0x313   : > { %v1588_v0 = vld [vmem:[#allocation13 + $0xa38] sm:$0xff]  ;;  %2374 = vmatpush.msrb.mxu2 %v1524_v63 }
 0x314   : > { %v1652_v2 = vld [vmem:[#allocation13 + $0xc38] sm:$0xff]  ;;  %2394 = vmatpush.msrb.mxu3 %v1588_v0 }
 0x315   : > { %v1716_v3 = vld [vmem:[#allocation13 + $0xe38] sm:$0xff]  ;;  %2414 = vmatpush.msra.mxu0 %v1652_v2  ;;  %v2484_v2 = vld [vmem:[#allocation16 + $0x140] sm:$0xff] }
 0x316   : > { %v1520_v6 = vld [vmem:[#allocation13 + $0x818] sm:$0xff]  ;;  %2434 = vmatpush.msra.mxu1 %v1716_v3  ;;  %v2097_v3 = vpop.f32.mrf.mxu0 }
 0x317   : > { %v1584_v7 = vld [vmem:[#allocation13 + $0xa18] sm:$0xff]  ;;  %2375 = vmatpush.msrb.mxu2 %v1520_v6  ;;  %v1938_v6 = vadd.f32 %v3894_v14, %v1918_v61 }
 0x318   : > { %v1648_v60 = vld [vmem:[#allocation13 + $0xc18] sm:$0xff]  ;;  %2395 = vmatpush.msrb.mxu3 %v1584_v7  ;;  %2376 = vmatmul.f32.vlgmr.msrb.gmra.mxu2 %v3845_v37  ;;  %v1997_v37 = vpop.f32.mrf.mxu3 }
 0x319   : > { %v1712_v16 = vld [vmem:[#allocation13 + $0xe18] sm:$0xff]  ;;  %2415 = vmatpush.msra.mxu0 %v1648_v60  ;;  %2396 = vmatmul.f32.vlgmr.msrb.gmra.mxu3 %v3847_v38  ;;  %v1998_v28 = vadd.f32 %v1997_v37, %v1978_v15  ;;  %v2508_v37 = vld [vmem:[#allocation16 + $0x200] sm:$0xff] }
 0x31a   : > { %2435 = vmatpush.msra.mxu1 %v1712_v16  ;;  %v2474_v10 = vld [vmem:[#allocation16 + $0xf0] sm:$0xff]  ;;  %2416 = vmatmul.f32.vlgmr.msra.gmra.mxu0 %v3849_v39  ;;  %v2468_v39 = vld [vmem:[#allocation16 + $0xc0] sm:$0xff]  ;;  %v2531_v43 = vld [vmem:[#allocation16 + $0x2b8] sm:$0xff] }
 0x31b   : > { %v2506_v11 = vld [vmem:[#allocation16 + $0x1f0] sm:$0xff]  ;;  %2436 = vmatmul.f32.vlgmr.msra.gmra.mxu1 %v3851_v40  ;;  %2578 = vmatpush.msra.mxu2 %v2474_v10  ;;  %v2532_v40 = vld [vmem:[#allocation16 + $0x2c0] sm:$0xff]  ;;  %v2018_v35 = vadd.f32 %v2017_v33, %v1998_v28  ;;  %v2505_v28 = vld [vmem:[#allocation16 + $0x1e8] sm:$0xff] }
 0x31c   : > { %v2538_v59 = vld [vmem:[#allocation16 + $0x2f0] sm:$0xff]  ;;  %2598 = vmatpush.msra.mxu3 %v2506_v11  ;;  %v2512_v10 = vld [vmem:[#allocation16 + $0x220] sm:$0xff]  ;;  %v3909_v11 = vadd.f32 %v3901_v27, %v1938_v6  ;;  %v2507_v27 = vld [vmem:[#allocation16 + $0x1f8] sm:$0xff] }
 0x31d   : > { %v2470_v23 = vld [vmem:[#allocation16 + $0xd0] sm:$0xff]  ;;  %2618 = vmatpush.msrb.mxu0 %v2538_v59  ;;  %2579 = vmatpush.msra.mxu2 %v2472_v19  ;;  %v2038_v48 = vadd.f32 %v2037_v45, %v2018_v35  ;;  %v2535_v33 = vld [vmem:[#allocation16 + $0x2d8] sm:$0xff] }
 0x31e   : > { %v2502_v24 = vld [vmem:[#allocation16 + $0x1d0] sm:$0xff]  ;;  %2599 = vmatpush.msra.mxu3 %v2504_v20  ;;  %v2444_v20 = vld [vmem:[#allocation16] sm:$0xff]  ;;  %v2440_v22 = vmax.f32 %v3909_v11, 0.0  ;;  %v2499_v35 = vld [vmem:[#allocation16 + $0x1b8] sm:$0xff] }
 0x31f   : > { %v2534_v38 = vld [vmem:[#allocation16 + $0x2d0] sm:$0xff]  ;;  %2619 = vmatpush.msrb.mxu0 %v2536_v21  ;;  %2580 = vmatpush.msra.mxu2 %v2470_v23  ;;  %v2058_v4 = vadd.f32 %v2057_v46, %v2038_v48  ;;  %v2476_v21 = vld [vmem:[#allocation16 + $0x100] sm:$0xff]  ;;  %v2529_v46 = vld [vmem:[#allocation16 + $0x2a8] sm:$0xff] }
 0x320   : > { %2600 = vmatpush.msra.mxu3 %v2502_v24  ;;  %v2466_v31 = vld [vmem:[#allocation16 + $0xb0] sm:$0xff]  ;;  %v2077_v58 = vpop.f32.mrf.mxu3  ;;  %v2475_v24 = vld [vmem:[#allocation16 + $0xf8] sm:$0xff]  ;;  %v2493_v48 = vld [vmem:[#allocation16 + $0x188] sm:$0xff] }
 0x321   : > { %v2498_v32 = vld [vmem:[#allocation16 + $0x1b0] sm:$0xff]  ;;  %2620 = vmatpush.msrb.mxu0 %v2534_v38  ;;  %2581 = vmatpush.msra.mxu2 %v2468_v39  ;;  %v2078_v62 = vadd.f32 %v2077_v58, %v2058_v4  ;;  %v2473_v38 = vld [vmem:[#allocation16 + $0xe8] sm:$0xff]  ;;  %v2539_v39 = vld [vmem:[#allocation16 + $0x2f8] sm:$0xff] }
 0x322   : > { %2601 = vmatpush.msra.mxu3 %v2500_v29  ;;  %v2530_v34 = vld [vmem:[#allocation16 + $0x2b0] sm:$0xff]  ;;  %v2471_v29 = vld [vmem:[#allocation16 + $0xd8] sm:$0xff]  ;;  %v2568_v58 = vld [vmem:[#allocation16 + $0x3e0] sm:$0xff] }
 0x323   : > { %2621 = vmatpush.msrb.mxu0 %v2532_v40  ;;  %2582 = vmatpush.msra.mxu2 %v2466_v31  ;;  %v2462_v26 = vld [vmem:[#allocation16 + $0x90] sm:$0xff]  ;;  %v2098_v7 = vadd.f32 %v2097_v3, %v2078_v62  ;;  %v2503_v40 = vld [vmem:[#allocation16 + $0x1d8] sm:$0xff]  ;;  %v2469_v31 = vld [vmem:[#allocation16 + $0xc8] sm:$0xff] }
 0x324   : > { %2602 = vmatpush.msra.mxu3 %v2498_v32  ;;  %v2494_v44 = vld [vmem:[#allocation16 + $0x190] sm:$0xff]  ;;  %v2501_v32 = vld [vmem:[#allocation16 + $0x1c8] sm:$0xff]  ;;  %v2459_v51 = vld [vmem:[#allocation16 + $0x78] sm:$0xff] }
 0x325   : > { %2622 = vmatpush.msrb.mxu0 %v2530_v34  ;;  %2583 = vmatpush.msra.mxu2 %v2464_v12  ;;  %v2526_v36 = vld [vmem:[#allocation16 + $0x290] sm:$0xff]  ;;  %v3911_v59 = vadd.f32 %v2117_v18, %v2098_v7  ;;  %v2467_v34 = vld [vmem:[#allocation16 + $0xb8] sm:$0xff]  ;;  %v2533_v12 = vld [vmem:[#allocation16 + $0x2c8] sm:$0xff] }
 0x326   : > { %2603 = vmatpush.msra.mxu3 %v2496_v41  ;;  %v2458_v53 = vld [vmem:[#allocation16 + $0x70] sm:$0xff]  ;;  %v2465_v41 = vld [vmem:[#allocation16 + $0xa8] sm:$0xff]  ;;  %v2491_v4 = vld [vmem:[#allocation16 + $0x178] sm:$0xff] }
 0x327   : > { %2623 = vmatpush.msrb.mxu0 %v2528_v42  ;;  %2584 = vmatpush.msra.mxu2 %v2462_v26  ;;  %v2490_v54 = vld [vmem:[#allocation16 + $0x170] sm:$0xff]  ;;  %v2441_v23 = vmax.f32 %v3911_v59, 0.0  ;;  %v2497_v42 = vld [vmem:[#allocation16 + $0x1a8] sm:$0xff]  ;;  %v2463_v26 = vld [vmem:[#allocation16 + $0x98] sm:$0xff] }
 0x328   : > { %2604 = vmatpush.msra.mxu3 %v2494_v44  ;;  %v2522_v13 = vld [vmem:[#allocation16 + $0x270] sm:$0xff]  ;;  %v2495_v44 = vld [vmem:[#allocation16 + $0x198] sm:$0xff]  ;;  %v2517_v7 = vld [vmem:[#allocation16 + $0x248] sm:$0xff] }
 0x329   : > { %2624 = vmatpush.msrb.mxu0 %v2526_v36  ;;  %2585 = vmatpush.msra.mxu2 %v2460_v47  ;;  %v2454_v63 = vld [vmem:[#allocation16 + $0x50] sm:$0xff]  ;;  %v2461_v36 = vld [vmem:[#allocation16 + $0x88] sm:$0xff]  ;;  %v1794_v47 = vperm.slane %v3885_v25, 2  ;;  %v2455_v61 = vld [vmem:[#allocation16 + $0x58] sm:$0xff] }
 0x32a   : > { %2605 = vmatpush.msra.mxu3 %v2492_v49  ;;  %v2486_v0 = vld [vmem:[#allocation16 + $0x150] sm:$0xff]  ;;  %v2527_v49 = vld [vmem:[#allocation16 + $0x298] sm:$0xff]  ;;  %v2552_v11 = vld [vmem:[#allocation16 + $0x360] sm:$0xff] }
 0x32b   : > { %2625 = vmatpush.msrb.mxu0 %v2524_v50  ;;  %2586 = vmatpush.msra.mxu2 %v2458_v53  ;;  %v2518_v55 = vld [vmem:[#allocation16 + $0x250] sm:$0xff]  ;;  %v2137_v50 = vpop.f32.mrf.mxu2  ;;  %v2525_v53 = vld [vmem:[#allocation16 + $0x288] sm:$0xff]  ;;  %v2487_v62 = vld [vmem:[#allocation16 + $0x158] sm:$0xff] }
 0x32c   : > { %2606 = vmatpush.msra.mxu3 %v2490_v54  ;;  %v2450_v60 = vld [vmem:[#allocation16 + $0x30] sm:$0xff]  ;;  %v2457_v54 = vld [vmem:[#allocation16 + $0x68] sm:$0xff]  ;;  %v2519_v3 = vld [vmem:[#allocation16 + $0x258] sm:$0xff] }
 0x32d   : > { %2626 = vmatpush.msrb.mxu0 %v2522_v13  ;;  %2587 = vmatpush.msra.mxu2 %v2456_v56  ;;  %v2482_v16 = vld [vmem:[#allocation16 + $0x130] sm:$0xff]  ;;  %v2489_v13 = vld [vmem:[#allocation16 + $0x168] sm:$0xff]  ;;  %v2138_v56 = vadd.f32 %v2137_v50, %v1794_v47  ;;  %v2483_v6 = vld [vmem:[#allocation16 + $0x138] sm:$0xff] }
 0x32e   : > { %2607 = vmatpush.msra.mxu3 %v2488_v57  ;;  %v2514_v8 = vld [vmem:[#allocation16 + $0x230] sm:$0xff]  ;;  %v2523_v57 = vld [vmem:[#allocation16 + $0x278] sm:$0xff] }
 0x32f   : > { %2627 = vmatpush.msrb.mxu0 %v2520_v52  ;;  %2588 = vmatpush.msra.mxu2 %v2454_v63  ;;  %v2446_v14 = vld [vmem:[#allocation16 + $0x10] sm:$0xff]  ;;  %v2521_v63 = vld [vmem:[#allocation16 + $0x268] sm:$0xff]  ;;  %v2447_v18 = vld [vmem:[#allocation16 + $0x18] sm:$0xff] }
 0x330   : > { %2608 = vmatpush.msra.mxu3 %v2486_v0  ;;  %v2478_v15 = vld [vmem:[#allocation16 + $0x110] sm:$0xff]  ;;  %v2157_v0 = vpop.f32.mrf.mxu3  ;;  %v2563_v47 = vld [vmem:[#allocation16 + $0x3b8] sm:$0xff] }
 0x331   : > { %2628 = vmatpush.msrb.mxu0 %v2518_v55  ;;  %2589 = vmatpush.msra.mxu2 %v2452_v1  ;;  %v2510_v19 = vld [vmem:[#allocation16 + $0x210] sm:$0xff]  ;;  %v2453_v55 = vld [vmem:[#allocation16 + $0x48] sm:$0xff]  ;;  %v2559_v50 = vld [vmem:[#allocation16 + $0x398] sm:$0xff] }
 0x332   : > { %2609 = vmatpush.msra.mxu3 %v2484_v2  ;;  %v2570_v45 = vld [vmem:[#allocation16 + $0x3f0] sm:$0xff]  ;;  %v2485_v1 = vld [vmem:[#allocation16 + $0x148] sm:$0xff]  ;;  %v2158_v2 = vadd.f32 %v2157_v0, %v2138_v56  ;;  %v2547_v56 = vld [vmem:[#allocation16 + $0x338] sm:$0xff] }
 0x333   : > { %2629 = vmatpush.msrb.mxu0 %v2516_v5  ;;  %2590 = vmatpush.msra.mxu2 %v2450_v60  ;;  %v2566_v52 = vld [vmem:[#allocation16 + $0x3d0] sm:$0xff]  ;;  %v2451_v5 = vld [vmem:[#allocation16 + $0x38] sm:$0xff]  ;;  %v2177_v60 = vpop.f32.mrf.mxu0 }
 0x334   : > { %2610 = vmatpush.msra.mxu3 %v2482_v16  ;;  %2638 = vmatpush.msrb.mxu1 %v2570_v45  ;;  %v2449_v16 = vld [vmem:[#allocation16 + $0x28] sm:$0xff]  ;;  %v2550_v59 = vld [vmem:[#allocation16 + $0x350] sm:$0xff]  ;;  %v2571_v45 = vld [vmem:[#allocation16 + $0x3f8] sm:$0xff] }
 0x335   : > { %2630 = vmatpush.msrb.mxu0 %v2514_v8  ;;  %2591 = vmatpush.msra.mxu2 %v2448_v9  ;;  %v2481_v8 = vld [vmem:[#allocation16 + $0x128] sm:$0xff]  ;;  %v2178_v9 = vadd.f32 %v2177_v60, %v2158_v2 }
 0x336   : > { %2611 = vmatpush.msra.mxu3 %v2480_v17  ;;  %2639 = vmatpush.msrb.mxu1 %v2568_v58  ;;  %v2515_v17 = vld [vmem:[#allocation16 + $0x238] sm:$0xff]  ;;  %v1795_v58 = vperm.slane %v3885_v25, 3 }
 0x337   : > { %2631 = vmatpush.msrb.mxu0 %v2512_v10  ;;  %2592 = vmatpush.msra.mxu2 %v2446_v14  ;;  %v2479_v10 = vld [vmem:[#allocation16 + $0x118] sm:$0xff]  ;;  %v2513_v14 = vld [vmem:[#allocation16 + $0x228] sm:$0xff] }
 0x338   : > { %2612 = vmatpush.msra.mxu3 %v2478_v15  ;;  %2640 = vmatpush.msrb.mxu1 %v2566_v52  ;;  %v2564_v15 = vld [vmem:[#allocation16 + $0x3c0] sm:$0xff] }
 0x339   : > { %2632 = vmatpush.msrb.mxu0 %v2510_v19  ;;  %2593 = vmatpush.msra.mxu2 %v2444_v20  ;;  %v2562_v19 = vld [vmem:[#allocation16 + $0x3b0] sm:$0xff]  ;;  %v2197_v20 = vpop.f32.mrf.mxu1 }
 0x33a   : > { %2613 = vmatpush.msra.mxu3 %v2476_v21  ;;  %2594 = vmatmul.f32.vlgmr.msra.gmra.mxu2 %v2440_v22  ;;  %v2445_v21 = vld [vmem:[#allocation16 + $0x8] sm:$0xff] }
 0x33b   : > { %2614 = vmatmul.f32.vlgmr.msra.gmra.mxu3 %v2441_v23  ;;  %2658 = vmatpush.msrb.mxu2 %v2475_v24  ;;  %v2477_v24 = vld [vmem:[#allocation16 + $0x108] sm:$0xff] }
 0x33c   : > { %2678 = vmatpush.msrb.mxu3 %v2507_v27  ;;  %2633 = vmatpush.msrb.mxu0 %v2508_v37  ;;  %v2198_v27 = vadd.f32 %v2197_v20, %v2178_v9  ;;  %v2770_v20 = vld [vmem:[%s4045_s11 + $0xf0] sm:$0xff] }
 0x33d   : > { %2659 = vmatpush.msrb.mxu2 %v2473_v38  ;;  %2641 = vmatpush.msrb.mxu1 %v2564_v15  ;;  %v2511_v38 = vld [vmem:[#allocation16 + $0x218] sm:$0xff]  ;;  %v2771_v15 = vld [vmem:[%s4045_s11 + $0xf8] sm:$0xff] }
 0x33e   : > { %2679 = vmatpush.msrb.mxu3 %v2505_v28  ;;  %2698 = vmatpush.msra.mxu0 %v2539_v39  ;;  %v2560_v28 = vld [vmem:[#allocation16 + $0x3a0] sm:$0xff] }
 0x33f   : > { %2660 = vmatpush.msrb.mxu2 %v2471_v29  ;;  %2642 = vmatpush.msrb.mxu1 %v2562_v19  ;;  %v2753_v19 = vld [vmem:[%s4045_s11 + $0x68] sm:$0xff] }
 0x340   : > { %2680 = vmatpush.msrb.mxu3 %v2503_v40  ;;  %2699 = vmatpush.msra.mxu0 %v2537_v30  ;;  %v2217_v37 = vpop.f32.mrf.mxu2  ;;  %v2509_v40 = vld [vmem:[#allocation16 + $0x208] sm:$0xff] }
 0x341   : > { %2661 = vmatpush.msrb.mxu2 %v2469_v31  ;;  %v2218_v39 = vadd.f32 %v2217_v37, %v2198_v27  ;;  %v2237_v29 = vpop.f32.mrf.mxu3  ;;  %2643 = vmatpush.msrb.mxu1 %v2560_v28  ;;  %v2257_v31 = vpop.f32.mrf.mxu0  ;;  %v2768_v27 = vld [vmem:[%s4045_s11 + $0xe0] sm:$0xff]  ;;  %v2751_v37 = vld [vmem:[%s4045_s11 + $0x58] sm:$0xff]  ;;  %v2750_v28 = vld [vmem:[%s4045_s11 + $0x50] sm:$0xff] }
 0x342   : > { %2681 = vmatpush.msrb.mxu3 %v2501_v32  ;;  %2700 = vmatpush.msra.mxu0 %v2535_v33  ;;  %v2277_v33 = vpop.f32.mrf.mxu1 }
 0x343   : > { %2662 = vmatpush.msrb.mxu2 %v2467_v34  ;;  %v2238_v30 = vadd.f32 %v2237_v29, %v2218_v39  ;;  %v2766_v39 = vld [vmem:[%s4045_s11 + $0xd0] sm:$0xff]  ;;  %v2749_v29 = vld [vmem:[%s4045_s11 + $0x48] sm:$0xff] }
 0x344   : > { %2682 = vmatpush.msrb.mxu3 %v2499_v35  ;;  %2701 = vmatpush.msra.mxu0 %v2533_v12  ;;  %v2558_v35 = vld [vmem:[#allocation16 + $0x390] sm:$0xff]  ;;  %v2556_v12 = vld [vmem:[#allocation16 + $0x380] sm:$0xff] }
 0x345   : > { %2663 = vmatpush.msrb.mxu2 %v2465_v41  ;;  %v2258_v32 = vadd.f32 %v2257_v31, %v2238_v30  ;;  %2644 = vmatpush.msrb.mxu1 %v2558_v35  ;;  %v2748_v30 = vld [vmem:[%s4045_s11 + $0x40] sm:$0xff]  ;;  %v2745_v35 = vld [vmem:[%s4045_s11 + $0x28] sm:$0xff] }
 0x346   : > { %2683 = vmatpush.msrb.mxu3 %v2497_v42  ;;  %2702 = vmatpush.msra.mxu0 %v2531_v43  ;;  %v2554_v42 = vld [vmem:[#allocation16 + $0x370] sm:$0xff]  ;;  %v2544_v43 = vld [vmem:[#allocation16 + $0x320] sm:$0xff] }
 0x347   : > { %2664 = vmatpush.msrb.mxu2 %v2463_v26  ;;  %v2278_v34 = vadd.f32 %v2277_v33, %v2258_v32  ;;  %2645 = vmatpush.msrb.mxu1 %v2556_v12  ;;  %v2542_v26 = vld [vmem:[#allocation16 + $0x310] sm:$0xff]  ;;  %v2747_v32 = vld [vmem:[%s4045_s11 + $0x38] sm:$0xff] }
 0x348   : > { %2684 = vmatpush.msrb.mxu3 %v2495_v44  ;;  %2703 = vmatpush.msra.mxu0 %v2529_v46  ;;  %v2540_v44 = vld [vmem:[#allocation16 + $0x300] sm:$0xff]  ;;  %v2569_v46 = vld [vmem:[#allocation16 + $0x3e8] sm:$0xff] }
 0x349   : > { %2665 = vmatpush.msrb.mxu2 %v2461_v36  ;;  %v2442_v41 = vmax.f32 %v2278_v34, 0.0  ;;  %2646 = vmatpush.msrb.mxu1 %v2554_v42  ;;  %v2567_v36 = vld [vmem:[#allocation16 + $0x3d8] sm:$0xff]  ;;  %v2764_v31 = vld [vmem:[%s4045_s11 + $0xc0] sm:$0xff]  ;;  %v2763_v33 = vld [vmem:[%s4045_s11 + $0xb8] sm:$0xff] }
 0x34a   : > { %2685 = vmatpush.msrb.mxu3 %v2493_v48  ;;  %2704 = vmatpush.msra.mxu0 %v2527_v49  ;;  %v2565_v48 = vld [vmem:[#allocation16 + $0x3c8] sm:$0xff]  ;;  %v2746_v34 = vld [vmem:[%s4045_s11 + $0x30] sm:$0xff] }
 0x34b   : > { %2666 = vmatpush.msrb.mxu2 %v2459_v51  ;;  %2634 = vmatmul.f32.vlgmr.msrb.gmra.mxu0 %v2442_v41  ;;  %v2561_v49 = vld [vmem:[#allocation16 + $0x3a8] sm:$0xff]  ;;  %v2742_v42 = vld [vmem:[%s4045_s11 + $0x10] sm:$0xff] }
 0x34c   : > { %2686 = vmatpush.msrb.mxu3 %v2491_v4  ;;  %2705 = vmatpush.msra.mxu0 %v2525_v53  ;;  %v2557_v51 = vld [vmem:[#allocation16 + $0x388] sm:$0xff]  ;;  %v2555_v4 = vld [vmem:[#allocation16 + $0x378] sm:$0xff] }
 0x34d   : > { %2667 = vmatpush.msrb.mxu2 %v2457_v54  ;;  %2647 = vmatpush.msrb.mxu1 %v2552_v11  ;;  %v2553_v53 = vld [vmem:[#allocation16 + $0x368] sm:$0xff]  ;;  %v2551_v54 = vld [vmem:[#allocation16 + $0x358] sm:$0xff] }
 0x34e   : > { %2687 = vmatpush.msrb.mxu3 %v2489_v13  ;;  %2706 = vmatpush.msra.mxu0 %v2523_v57  ;;  %v2549_v13 = vld [vmem:[#allocation16 + $0x348] sm:$0xff]  ;;  %v2762_v11 = vld [vmem:[%s4045_s11 + $0xb0] sm:$0xff] }
 0x34f   : > { %2668 = vmatpush.msrb.mxu2 %v2455_v61  ;;  %2648 = vmatpush.msrb.mxu1 %v2550_v59  ;;  %v2545_v57 = vld [vmem:[#allocation16 + $0x328] sm:$0xff]  ;;  %v2543_v61 = vld [vmem:[#allocation16 + $0x318] sm:$0xff] }
 0x350   : > { %2688 = vmatpush.msrb.mxu3 %v2487_v62  ;;  %2707 = vmatpush.msra.mxu0 %v2521_v63  ;;  %v2541_v62 = vld [vmem:[#allocation16 + $0x308] sm:$0xff]  ;;  %v2741_v59 = vld [vmem:[%s4045_s11 + $0x8] sm:$0xff] }
 0x351   : > { %2669 = vmatpush.msrb.mxu2 %v2453_v55  ;;  %v2744_v12 = vld [vmem:[%s4045_s11 + $0x20] sm:$0xff] }
 0x352   : > { %2689 = vmatpush.msrb.mxu3 %v2485_v1  ;;  %2708 = vmatpush.msra.mxu0 %v2519_v3 }
 0x353   : > { %2670 = vmatpush.msrb.mxu2 %v2451_v5 }
 0x354   : > { %2690 = vmatpush.msrb.mxu3 %v2483_v6  ;;  %2709 = vmatpush.msra.mxu0 %v2517_v7 }
 0x355   : > { %2671 = vmatpush.msrb.mxu2 %v2449_v16 }
 0x356   : > { %2691 = vmatpush.msrb.mxu3 %v2481_v8  ;;  %2710 = vmatpush.msra.mxu0 %v2515_v17 }
 0x357   : > { %2672 = vmatpush.msrb.mxu2 %v2447_v18 }
 0x358   : > { %2692 = vmatpush.msrb.mxu3 %v2479_v10  ;;  %2711 = vmatpush.msra.mxu0 %v2513_v14  ;;  %v2755_v10 = vld [vmem:[%s4045_s11 + $0x78] sm:$0xff]  ;;  %v2754_v14 = vld [vmem:[%s4045_s11 + $0x70] sm:$0xff] }
 0x359   : > { %2673 = vmatpush.msrb.mxu2 %v2445_v21  ;;  %v2769_v21 = vld [vmem:[%s4045_s11 + $0xe8] sm:$0xff] }
 0x35a   : > { %2693 = vmatpush.msrb.mxu3 %v2477_v24  ;;  %2674 = vmatmul.f32.vlgmr.msrb.gmra.mxu2 %v2440_v22  ;;  %v2548_v22 = vld [vmem:[#allocation16 + $0x340] sm:$0xff]  ;;  %v2752_v24 = vld [vmem:[%s4045_s11 + $0x60] sm:$0xff] }
 0x35b   : > { %2694 = vmatmul.f32.vlgmr.msrb.gmra.mxu3 %v2441_v23  ;;  %2712 = vmatpush.msra.mxu0 %v2511_v38  ;;  %v2546_v23 = vld [vmem:[#allocation16 + $0x330] sm:$0xff]  ;;  %v2767_v38 = vld [vmem:[%s4045_s11 + $0xd8] sm:$0xff] }
 0x35c   : > { %2649 = vmatpush.msrb.mxu1 %v2548_v22  ;;  %2773 = vmatpush.msra.mxu2 %v2755_v10  ;;  %v2761_v22 = vld [vmem:[%s4045_s11 + $0xa8] sm:$0xff] }
 0x35d   : > { %2713 = vmatpush.msra.mxu0 %v2509_v40  ;;  %2793 = vmatpush.msra.mxu3 %v2771_v15  ;;  %v2765_v40 = vld [vmem:[%s4045_s11 + $0xc8] sm:$0xff] }
 0x35e   : > { %2714 = vmatmul.f32.vlgmr.msra.gmra.mxu0 %v2442_v41  ;;  %2650 = vmatpush.msrb.mxu1 %v2546_v23  ;;  %v2337_v1 = vpop.f32.mrf.mxu0  ;;  %v2743_v41 = vld [vmem:[%s4045_s11 + $0x18] sm:$0xff]  ;;  %v2740_v23 = vld [vmem:[%s4045_s11] sm:$0xff] }
 0x35f   : > { %v2357_v3 = vpop.f32.mrf.mxu1  ;;  %2774 = vmatpush.msra.mxu2 %v2754_v14  ;;  %2794 = vmatpush.msra.mxu3 %v2770_v20 }
 0x360   : > { %2651 = vmatpush.msrb.mxu1 %v2544_v43  ;;  %v2760_v43 = vld [vmem:[%s4045_s11 + $0xa0] sm:$0xff] }
 0x361   : > { %2775 = vmatpush.msra.mxu2 %v2753_v19  ;;  %2795 = vmatpush.msra.mxu3 %v2769_v21 }
 0x362   : > { %2652 = vmatpush.msrb.mxu1 %v2542_v26  ;;  %v2759_v26 = vld [vmem:[%s4045_s11 + $0x98] sm:$0xff] }
 0x363   : > { %v2297_v52 = vpop.f32.mrf.mxu2  ;;  %2776 = vmatpush.msra.mxu2 %v2752_v24  ;;  %2796 = vmatpush.msra.mxu3 %v2768_v27 }
 0x364   : > { %2653 = vmatpush.msrb.mxu1 %v2540_v44  ;;  %v2298_v63 = vadd.f32 %v2297_v52, %v1795_v58  ;;  %v2317_v0 = vpop.f32.mrf.mxu3  ;;  %v2758_v44 = vld [vmem:[%s4045_s11 + $0x90] sm:$0xff] }
 0x365   : > { %2777 = vmatpush.msra.mxu2 %v2751_v37  ;;  %2797 = vmatpush.msra.mxu3 %v2767_v38 }
 0x366   : > { %2718 = vmatpush.msra.mxu1 %v2571_v45  ;;  %v2318_v55 = vadd.f32 %v2317_v0, %v2298_v63  ;;  %v2757_v45 = vld [vmem:[%s4045_s11 + $0x88] sm:$0xff] }
 0x367   : > { %2778 = vmatpush.msra.mxu2 %v2750_v28  ;;  %2798 = vmatpush.msra.mxu3 %v2766_v39 }
 0x368   : > { %2719 = vmatpush.msra.mxu1 %v2569_v46  ;;  %v2338_v2 = vadd.f32 %v2337_v1, %v2318_v55  ;;  %v2756_v46 = vld [vmem:[%s4045_s11 + $0x80] sm:$0xff] }
 0x369   : > { %2779 = vmatpush.msra.mxu2 %v2749_v29  ;;  %2799 = vmatpush.msra.mxu3 %v2765_v40 }
 0x36a   : > { %2720 = vmatpush.msra.mxu1 %v2567_v36  ;;  %v2358_v5 = vadd.f32 %v2357_v3, %v2338_v2  ;;  %v2572_v36 = vld [vmem:[#allocation17] sm:$0x3]  ;;  %v2772_v3 = vld [vmem:[#allocation19] sm:$0x1] }
 0x36b   : > { %2780 = vmatpush.msra.mxu2 %v2748_v30  ;;  %2800 = vmatpush.msra.mxu3 %v2764_v31 }
 0x36c   : > { %2721 = vmatpush.msra.mxu1 %v2565_v48  ;;  %v2574_v48 = vperm.slane %v2572_v36, 0 }
 0x36d   : > { %2781 = vmatpush.msra.mxu2 %v2747_v32  ;;  %2801 = vmatpush.msra.mxu3 %v2763_v33 }
 0x36e   : > { %2722 = vmatpush.msra.mxu1 %v2563_v47 }
 0x36f   : > { %2782 = vmatpush.msra.mxu2 %v2746_v34  ;;  %2802 = vmatpush.msra.mxu3 %v2762_v11 }
 0x370   : > { %2723 = vmatpush.msra.mxu1 %v2561_v49 }
 0x371   : > { %2783 = vmatpush.msra.mxu2 %v2745_v35  ;;  %2803 = vmatpush.msra.mxu3 %v2761_v22 }
 0x372   : > { %2724 = vmatpush.msra.mxu1 %v2559_v50 }
 0x373   : > { %2784 = vmatpush.msra.mxu2 %v2744_v12  ;;  %2804 = vmatpush.msra.mxu3 %v2760_v43 }
 0x374   : > { %2725 = vmatpush.msra.mxu1 %v2557_v51 }
 0x375   : > { %2785 = vmatpush.msra.mxu2 %v2743_v41  ;;  %2805 = vmatpush.msra.mxu3 %v2759_v26 }
 0x376   : > { %2726 = vmatpush.msra.mxu1 %v2555_v4 }
 0x377   : > { %2786 = vmatpush.msra.mxu2 %v2742_v42  ;;  %2806 = vmatpush.msra.mxu3 %v2758_v44 }
 0x378   : > { %2727 = vmatpush.msra.mxu1 %v2553_v53  ;;  %v2575_v53 = vperm.slane %v2572_v36, 1 }
 0x379   : > { %2787 = vmatpush.msra.mxu2 %v2741_v59  ;;  %2807 = vmatpush.msra.mxu3 %v2757_v45 }
 0x37a   : > { %2728 = vmatpush.msra.mxu1 %v2551_v54 }
 0x37b   : > { %2788 = vmatpush.msra.mxu2 %v2740_v23  ;;  %2808 = vmatpush.msra.mxu3 %v2756_v46 }
 0x37c   : > { %2729 = vmatpush.msra.mxu1 %v2549_v13 }
 0x37e   : > { %2730 = vmatpush.msra.mxu1 %v2547_v56 }
 0x380   : > { %2731 = vmatpush.msra.mxu1 %v2545_v57 }
 0x382   : > { %2732 = vmatpush.msra.mxu1 %v2543_v61 }
 0x384   : > { %2733 = vmatpush.msra.mxu1 %v2541_v62 }
 0x397   : > { %v2417_v8 = vpop.f32.mrf.mxu0 }
 0x398   : > { %v2437_v9 = vpop.f32.mrf.mxu1 }
 0x39b   : > { %v2377_v6 = vpop.f32.mrf.mxu2 }
 0x39c   : > { %v2378_v7 = vadd.f32 %v2377_v6, %v2358_v5  ;;  %v2397_v60 = vpop.f32.mrf.mxu3 }
 0x39e   : > { %v2398_v16 = vadd.f32 %v2397_v60, %v2378_v7 }
 0x3a0   : > { %v2418_v25 = vadd.f32 %v2417_v8, %v2398_v16 }
 0x3a2   : > { %v2438_v17 = vadd.f32 %v2437_v9, %v2418_v25 }
 0x3a4   : > { %v2443_v18 = vmax.f32 %v2438_v17, 0.0 }
 0x3a6   : > { %2654 = vmatmul.f32.vlgmr.msrb.gmra.mxu1 %v2443_v18 }
 0x3ae   : > { %2734 = vmatmul.f32.vlgmr.msra.gmra.mxu1 %v2443_v18 }
 0x3bd   : > { %v2595_v47 = vpop.f32.mrf.mxu2 }
 0x3be   : > { %v2596_v49 = vadd.f32 %v2595_v47, %v2574_v48  ;;  %v2615_v51 = vpop.f32.mrf.mxu3 }
 0x3c0   : > { %v2616_v4 = vadd.f32 %v2615_v51, %v2596_v49 }
 0x3c8   : > { %v2635_v50 = vpop.f32.mrf.mxu0 }
 0x3c9   : > { %v2636_v13 = vadd.f32 %v2635_v50, %v2616_v4 }
 0x3db   : > { %v2715_v62 = vpop.f32.mrf.mxu0 }
 0x3dd   : > { %v2675_v54 = vpop.f32.mrf.mxu2 }
 0x3de   : > { %v2676_v57 = vadd.f32 %v2675_v54, %v2575_v53  ;;  %v2695_v61 = vpop.f32.mrf.mxu3 }
 0x3e0   : > { %v2696_v63 = vadd.f32 %v2695_v61, %v2676_v57 }
 0x3e2   : > { %v2716_v0 = vadd.f32 %v2715_v62, %v2696_v63 }
 0x423   : > { %v2655_v56 = vpop.f32.mrf.mxu1 }
 0x424   : > { %v2656_v58 = vadd.f32 %v2655_v56, %v2636_v13 }
 0x426   : > { %v2738_v52 = vmax.f32 %v2656_v58, 0.0 }
 0x428   : > { %2789 = vmatmul.f32.vlgmr.msra.gmra.mxu2 %v2738_v52 }
 0x42b   : > { %v2735_v55 = vpop.f32.mrf.mxu1 }
 0x42c   : > { %v2736_v1 = vadd.f32 %v2735_v55, %v2716_v0 }
 0x42e   : > { %v2739_v2 = vmax.f32 %v2736_v1, 0.0 }
 0x430   : > { %2809 = vmatmul.f32.vlgmr.msra.gmra.mxu3 %v2739_v2 }
 0x4ab   : > { %v2790_v5 = vpop.f32.mrf.mxu2 }
 0x4ac   : > { %v2791_v6 = vadd.f32 %v2790_v5, %v2772_v3 }
 0x4b3   : > { %v2810_v7 = vpop.f32.mrf.mxu3 }
 0x4b4   : > { %v2811_v60 = vadd.f32 %v2810_v7, %v2791_v6 }
 0x4b6   : > { %2814 = vst.msk [vmem:[%s632_s22] sm:$0x1] %vm2813_vm11, %v2811_v60 }
 0x4b7 PF: > { %s29_s27 = sadd.s32 1, %s3543_s27   ;;  %s4063_s25 = smov %s3539_s26 }
 0x4b8   : > { %p26_p8 = scmp.ge.s32.totalorder %s29_s27, 4   ;;  %s4064_s26 = smov %s4066_s14 }
 0x4ba   :  { %28 = sbr.rel (!%p26_p8) target bundleno = 14 (0xe), region = 155 }
 0x4bf   :  { %2832 = vsyncpa [#allocation4], 1 }
 0x4c0   :  { %2834 = vsyncpa [#allocation4 + $0x1], 1 }
 0x4c1   :  { %2835 = vsyncpa [#allocation6], 1 }
 0x4c2   :  { %2836 = vsyncpa [#allocation9], 1 }
 0x4c3   :  { %2837 = vsyncpa [#allocation12], 1 }
 0x4c4   :  { %2838 = vsyncpa [#allocation15], 1 }
 0x4c5   :  { %2839 = vsyncpa [#allocation18], 1 }

</bundles_post_ra>
